<compile_context>
chip_gen: v5e
topology: v5e:2x2
jax: 0.10.0
libtpu: 0.0.40
codegen_flags: <defaults>
</compile_context>

<pallas_src>
import functools

import jax
import jax.numpy as jnp
from jax.experimental import pallas as pl
from jax.experimental.pallas import tpu as pltpu


C1, C2, C3 = 64, 128, 1024      # conv output widths (fixed by the module)
CHUNK = 256                     # conv3 output-channel chunk size


def _pointnetfeat_kernel(x_ref,
                         w1_ref, s1_ref, t1_ref,
                         w2_ref, s2_ref, t2_ref,
                         w3_ref,
                         out_ref, acc_ref):
    """Grid = (B, n_split, tiles_per_split); everything is channel-major (C, TN).

    x_ref block : (1, 3, TN) f32   (cast to bf16 in-kernel; x is tiny)
    w*_ref      : bf16 weights, resident (constant index maps); w3 sign-folded
    s*/t*_ref   : (C, 1) f32 folded-BN scale/shift, resident
    out_ref     : (1, 1, 1024, 1) f32 -- written once, on the last point tile
    acc_ref     : (1024, 128) f32 scratch, running point-max across tiles
    """
    j = pl.program_id(2)

    x = x_ref[0].astype(jnp.bfloat16)                              # (3, TN)

    # conv1 (1x1) + folded bn1 + relu  (K=3 MXU pass; negligible vs conv3)
    h = jnp.dot(w1_ref[...], x, preferred_element_type=jnp.float32)      # (64, TN)
    h = jnp.maximum(h * s1_ref[...] + t1_ref[...], 0.0)

    # conv2 (1x1) + folded bn2 + relu
    h = jnp.dot(w2_ref[...], h.astype(jnp.bfloat16),
                preferred_element_type=jnp.float32)                      # (128, TN)
    h = jnp.maximum(h * s2_ref[...] + t2_ref[...], 0.0)
    h = h.astype(jnp.bfloat16)

    @pl.when(j == 0)
    def _():
        acc_ref[...] = jnp.full(acc_ref.shape, -jnp.inf, jnp.float32)

    # conv3 (1x1) with sign-folded weights, in output-channel chunks.  The bn3
    # affine (|s3|, t3) is applied outside the kernel (max commutes with it).
    for ci in range(C3 // CHUNK):
        c0 = ci * CHUNK
        z = jnp.dot(w3_ref[c0:c0 + CHUNK, :], h,
                    preferred_element_type=jnp.float32)            # (CHUNK, TN)
        # Pairwise lane fold TN -> 128: slice offsets are multiples of 128, so
        # this is vreg-aligned pure-VPU work (no XLU in the hot loop).
        r = z.shape[1]
        while r > 128:
            half = r // 2
            z = jnp.maximum(z[:, :half], z[:, half:])
            r = half
        acc_ref[c0:c0 + CHUNK, :] = jnp.maximum(acc_ref[c0:c0 + CHUNK, :], z)

    # Only on the last point tile: one XLU 128->1 lane reduce + column store.
    @pl.when(j == pl.num_programs(2) - 1)
    def _():
        out_ref[...] = jnp.max(acc_ref[...], axis=1,
                               keepdims=True).reshape(1, 1, C3, 1)


def _fold_bn(conv_b, gamma, beta, mean, var, eps=1e-5):
    """Fold conv bias + eval-mode BatchNorm into per-channel (scale, shift)."""
    scale = gamma / jnp.sqrt(var + eps)
    shift = scale * (conv_b - mean) + beta
    return scale.astype(jnp.float32), shift.astype(jnp.float32)


@functools.partial(jax.jit, static_argnames=("tile_n",))
def pointnetfeat_forward(x, params, tile_n=2048):
    """x: (B, 3, N) float32 (PyTorch NCW layout). Returns (B, 1024) float32."""
    B, C_in, N = x.shape
    assert C_in == 3
    # tile_n must be a power-of-two multiple of 128 (lane fold); shrink it for
    # small N and to keep the replicated-point padding modest for ragged N.
    assert tile_n >= 128 and tile_n % 128 == 0 and (tile_n & (tile_n - 1)) == 0
    tile_n = min(tile_n, 1 << max(7, (N - 1).bit_length()))
    while tile_n > 128 and N % tile_n != 0 and (tile_n - N % tile_n) > tile_n // 4:
        tile_n //= 2
    pad = (-N) % tile_n
    if pad:
        # Replicate the last point: duplicates can never corrupt a channel max.
        x = jnp.concatenate(
            [x, jnp.broadcast_to(x[:, :, -1:], (B, C_in, pad))], axis=2)
    n_pad = N + pad
    num_tiles = n_pad // tile_n

    # Split the point axis only when batch=1 would leave the second v7x
    # TensorCore idle; on v5e/v6e (1 TC) and for B>=2 the batch axis suffices.
    n_split = 2 if (B == 1 and num_tiles % 2 == 0) else 1
    tiles_per_split = num_tiles // n_split

    # PyTorch Conv1d weights are (C_out, C_in, 1), squeezed to (C_out, C_in) --
    # exactly the channel-major matmul layout used by the kernel (no .T needed).
    s1, t1 = _fold_bn(params["conv1_b"], *params["bn1"])
    s2, t2 = _fold_bn(params["conv2_b"], *params["bn2"])
    s3, t3 = _fold_bn(params["conv3_b"], *params["bn3"])

    w1 = params["conv1_w"].astype(jnp.bfloat16)                    # (64, 3)
    w2 = params["conv2_w"].astype(jnp.bfloat16)                    # (128, 64)
    sgn3 = jnp.sign(s3)                                            # exact fold
    w3 = (params["conv3_w"] * sgn3[:, None]).astype(jnp.bfloat16)  # (1024, 128)

    const = lambda shape: pl.BlockSpec(shape, lambda b, p, j: (0, 0))

    grid_spec = pltpu.PrefetchScalarGridSpec(
        num_scalar_prefetch=0,
        grid=(B, n_split, tiles_per_split),
        in_specs=[
            pl.BlockSpec((1, 3, tile_n),
                         lambda b, p, j: (b, 0, p * tiles_per_split + j)),
            const((C1, 3)), const((C1, 1)), const((C1, 1)),
            const((C2, C1)), const((C2, 1)), const((C2, 1)),
            const((C3, C2)),
        ],
        out_specs=pl.BlockSpec((1, 1, C3, 1), lambda b, p, j: (b, p, 0, 0)),
        scratch_shapes=[pltpu.VMEM((C3, 128), jnp.float32)],
    )

    partial_max = pl.pallas_call(
        _pointnetfeat_kernel,
        out_shape=jax.ShapeDtypeStruct((B, n_split, C3, 1), jnp.float32),
        grid_spec=grid_spec,
        compiler_params=pltpu.CompilerParams(
            dimension_semantics=("parallel", "parallel", "arbitrary"),
            vmem_limit_bytes=32 * 1024 * 1024),
    )(x,
      w1, s1.reshape(C1, 1), t1.reshape(C1, 1),
      w2, s2.reshape(C2, 1), t2.reshape(C2, 1),
      w3)

    # Tiny epilogue on (B, 1024): combine the split partials and apply the
    # layer-3 affine hoisted out of the hot loop (exact because |s3| >= 0).
    feat = jnp.max(partial_max[:, :, :, 0], axis=1)                # (B, 1024)
    return feat * jnp.abs(s3)[None, :] + t3[None, :]


def _make_params(key):
    ks = jax.random.split(key, 9)

    def bn(k, c):
        k1, k2, k3, k4 = jax.random.split(k, 4)
        gamma = 1.0 + 0.1 * jax.random.normal(k1, (c,), jnp.float32)
        beta = 0.1 * jax.random.normal(k2, (c,), jnp.float32)
        mean = 0.1 * jax.random.normal(k3, (c,), jnp.float32)
        var = jnp.abs(1.0 + 0.1 * jax.random.normal(k4, (c,), jnp.float32))
        return (gamma, beta, mean, var)

    return {
        # PyTorch Conv1d weight layout (C_out, C_in), kernel-size-1 squeezed.
        "conv1_w": 0.5 * jax.random.normal(ks[0], (64, 3), jnp.float32),
        "conv1_b": 0.1 * jax.random.normal(ks[1], (64,), jnp.float32),
        "conv2_w": 0.1 * jax.random.normal(ks[2], (128, 64), jnp.float32),
        "conv2_b": 0.1 * jax.random.normal(ks[3], (128,), jnp.float32),
        "conv3_w": 0.05 * jax.random.normal(ks[4], (1024, 128), jnp.float32),
        "conv3_b": 0.1 * jax.random.normal(ks[5], (1024,), jnp.float32),
        "bn1": bn(ks[6], 64),
        "bn2": bn(ks[7], 128),
        "bn3": bn(ks[8], 1024),
    }


def _reference(x, params):
    """Pure-JAX f32 reference matching the PyTorch forward (eval-mode BN)."""
    def conv_bn(h, w, b, bn, relu):
        h = jnp.einsum("bcn,dc->bdn", h, w) + b[None, :, None]
        g, bb, m, v = bn
        h = (h - m[None, :, None]) / jnp.sqrt(v[None, :, None] + 1e-5) \
            * g[None, :, None] + bb[None, :, None]
        return jnp.maximum(h, 0.0) if relu else h

    h = conv_bn(x, params["conv1_w"], params["conv1_b"], params["bn1"], True)
    h = conv_bn(h, params["conv2_w"], params["conv2_b"], params["bn2"], True)
    h = conv_bn(h, params["conv3_w"], params["conv3_b"], params["bn3"], False)
    return jnp.max(h, axis=2)


if __name__ == "__main__":
    key = jax.random.PRNGKey(0)
    kx, kp = jax.random.split(key)

    B, N = 2, 1024              # small point count for the example
    x = jax.random.normal(kx, (B, 3, N), jnp.float32)   # PyTorch (B, 3, N) layout
    params = _make_params(kp)

    out = pointnetfeat_forward(x, params)
    out = jax.block_until_ready(out)

    ref = _reference(x, params)
    assert out.shape == (B, 1024)
    err = float(jnp.max(jnp.abs(out - ref)))
    # bf16 matmul operands (f32 accumulation) -> tolerance loosened vs f32 ref.
    assert jnp.allclose(out, ref, atol=3e-2, rtol=3e-2), \
        f"mismatch vs reference, max|err|={err}"

    print("KERNEL_OK")
</pallas_src>

<mosaic_0001>
module attributes {stable_mosaic.version = 11 : i64} {
  func.func @_pointnetfeat_kernel(%arg0: i32, %arg1: i32, %arg2: i32, %arg3: memref<1x3x1024xf32, #tpu.memory_space<vmem>>, %arg4: memref<64x3xbf16, #tpu.memory_space<vmem>>, %arg5: memref<64x1xf32, #tpu.memory_space<vmem>>, %arg6: memref<64x1xf32, #tpu.memory_space<vmem>>, %arg7: memref<128x64xbf16, #tpu.memory_space<vmem>>, %arg8: memref<128x1xf32, #tpu.memory_space<vmem>>, %arg9: memref<128x1xf32, #tpu.memory_space<vmem>>, %arg10: memref<1024x128xbf16, #tpu.memory_space<vmem>>, %arg11: memref<1x1x1024x1xf32, #tpu.memory_space<vmem>>, %arg12: memref<1024x128xf32, #tpu.memory_space<vmem>>) attributes {dimension_semantics = [#tpu.dimension_semantics<parallel>, #tpu.dimension_semantics<parallel>, #tpu.dimension_semantics<arbitrary>], iteration_bounds = array<i64: 2, 1, 1>, scalar_prefetch = 0 : i64, scratch_operands = 1 : i64, tpu.core_type = #tpu.core_type<tc>, window_params = [{transform_indices = @transform_0, window_bounds = array<i64: 1, 3, 1024>}, {pipeline_mode = #tpu.pipeline_mode<synchronous>, transform_indices = @transform_1, window_bounds = array<i64: 64, 3>}, {pipeline_mode = #tpu.pipeline_mode<synchronous>, transform_indices = @transform_2, window_bounds = array<i64: 64, 1>}, {pipeline_mode = #tpu.pipeline_mode<synchronous>, transform_indices = @transform_3, window_bounds = array<i64: 64, 1>}, {pipeline_mode = #tpu.pipeline_mode<synchronous>, transform_indices = @transform_4, window_bounds = array<i64: 128, 64>}, {pipeline_mode = #tpu.pipeline_mode<synchronous>, transform_indices = @transform_5, window_bounds = array<i64: 128, 1>}, {pipeline_mode = #tpu.pipeline_mode<synchronous>, transform_indices = @transform_6, window_bounds = array<i64: 128, 1>}, {pipeline_mode = #tpu.pipeline_mode<synchronous>, transform_indices = @transform_7, window_bounds = array<i64: 1024, 128>}, {transform_indices = @transform_8, window_bounds = array<i64: 1, 1, 1024, 1>}]} {
    %c0 = arith.constant 0 : index
    %c0_0 = arith.constant 0 : index
    %c0_1 = arith.constant 0 : index
    %0 = vector.load %arg3[%c0, %c0_0, %c0_1] : memref<1x3x1024xf32, #tpu.memory_space<vmem>>, vector<1x3x1024xf32>
    %1 = vector.shape_cast %0 : vector<1x3x1024xf32> to vector<3x1024xf32>
    %2 = arith.truncf %1 : vector<3x1024xf32> to vector<3x1024xbf16>
    %c0_2 = arith.constant 0 : index
    %c0_3 = arith.constant 0 : index
    %3 = vector.load %arg4[%c0_2, %c0_3] : memref<64x3xbf16, #tpu.memory_space<vmem>>, vector<64x3xbf16>
    %cst = arith.constant dense<0.000000e+00> : vector<64x1024xf32>
    %4 = tpu.matmul %3, %2, %cst {dimension_numbers = #tpu.dot_dimension_numbers<[1], [0], [0], [1], [0, 0, 1, 1], [], []>} : vector<64x3xbf16>, vector<3x1024xbf16>, vector<64x1024xf32> -> vector<64x1024xf32>
    %c0_4 = arith.constant 0 : index
    %c0_5 = arith.constant 0 : index
    %5 = vector.load %arg5[%c0_4, %c0_5] : memref<64x1xf32, #tpu.memory_space<vmem>>, vector<64x1xf32>
    %6 = vector.broadcast %5 : vector<64x1xf32> to vector<64x1024xf32>
    %7 = arith.mulf %4, %6 : vector<64x1024xf32>
    %c0_6 = arith.constant 0 : index
    %c0_7 = arith.constant 0 : index
    %8 = vector.load %arg6[%c0_6, %c0_7] : memref<64x1xf32, #tpu.memory_space<vmem>>, vector<64x1xf32>
    %9 = vector.broadcast %8 : vector<64x1xf32> to vector<64x1024xf32>
    %10 = arith.addf %7, %9 : vector<64x1024xf32>
    %cst_8 = arith.constant 0.000000e+00 : f32
    %11 = vector.broadcast %cst_8 : f32 to vector<64x1024xf32>
    %12 = arith.maximumf %10, %11 : vector<64x1024xf32>
    %c0_9 = arith.constant 0 : index
    %c0_10 = arith.constant 0 : index
    %13 = vector.load %arg7[%c0_9, %c0_10] : memref<128x64xbf16, #tpu.memory_space<vmem>>, vector<128x64xbf16>
    %14 = arith.truncf %12 : vector<64x1024xf32> to vector<64x1024xbf16>
    %cst_11 = arith.constant dense<0.000000e+00> : vector<128x1024xf32>
    %15 = tpu.matmul %13, %14, %cst_11 {dimension_numbers = #tpu.dot_dimension_numbers<[1], [0], [0], [1], [0, 0, 1, 1], [], []>} : vector<128x64xbf16>, vector<64x1024xbf16>, vector<128x1024xf32> -> vector<128x1024xf32>
    %c0_12 = arith.constant 0 : index
    %c0_13 = arith.constant 0 : index
    %16 = vector.load %arg8[%c0_12, %c0_13] : memref<128x1xf32, #tpu.memory_space<vmem>>, vector<128x1xf32>
    %17 = vector.broadcast %16 : vector<128x1xf32> to vector<128x1024xf32>
    %18 = arith.mulf %15, %17 : vector<128x1024xf32>
    %c0_14 = arith.constant 0 : index
    %c0_15 = arith.constant 0 : index
    %19 = vector.load %arg9[%c0_14, %c0_15] : memref<128x1xf32, #tpu.memory_space<vmem>>, vector<128x1xf32>
    %20 = vector.broadcast %19 : vector<128x1xf32> to vector<128x1024xf32>
    %21 = arith.addf %18, %20 : vector<128x1024xf32>
    %cst_16 = arith.constant 0.000000e+00 : f32
    %22 = vector.broadcast %cst_16 : f32 to vector<128x1024xf32>
    %23 = arith.maximumf %21, %22 : vector<128x1024xf32>
    %24 = arith.truncf %23 : vector<128x1024xf32> to vector<128x1024xbf16>
    %c0_i32 = arith.constant 0 : i32
    %25 = arith.cmpi eq, %arg2, %c0_i32 : i32
    %26 = arith.extui %25 : i1 to i32
    %c0_i32_17 = arith.constant 0 : i32
    %27 = arith.cmpi ne, %26, %c0_i32_17 : i32
    scf.if %27 {
      %cst_45 = arith.constant 0xFF800000 : f32
      %87 = vector.broadcast %cst_45 : f32 to vector<1024x128xf32>
      %c0_46 = arith.constant 0 : index
      %c0_47 = arith.constant 0 : index
      %88 = vector.load %arg12[%c0_46, %c0_47] : memref<1024x128xf32, #tpu.memory_space<vmem>>, vector<1024x128xf32>
      tpu.vector_store %arg12[%c0_46, %c0_47], %87 {strides = array<i32>} : memref<1024x128xf32, #tpu.memory_space<vmem>>, vector<1024x128xf32>,
    } else {
    }
    %c0_18 = arith.constant 0 : index
    %c0_19 = arith.constant 0 : index
    %28 = vector.load %arg10[%c0_18, %c0_19] : memref<1024x128xbf16, #tpu.memory_space<vmem>>, vector<256x128xbf16>
    %cst_20 = arith.constant dense<0.000000e+00> : vector<256x1024xf32>
    %29 = tpu.matmul %28, %24, %cst_20 {dimension_numbers = #tpu.dot_dimension_numbers<[1], [0], [0], [1], [0, 0, 1, 1], [], []>} : vector<256x128xbf16>, vector<128x1024xbf16>, vector<256x1024xf32> -> vector<256x1024xf32>
    %30 = vector.extract_strided_slice %29 {offsets = [0, 0], sizes = [256, 512], strides = [1, 1]} : vector<256x1024xf32> to vector<256x512xf32>
    %31 = vector.extract_strided_slice %29 {offsets = [0, 512], sizes = [256, 512], strides = [1, 1]} : vector<256x1024xf32> to vector<256x512xf32>
    %32 = arith.maximumf %30, %31 : vector<256x512xf32>
    %33 = vector.extract_strided_slice %32 {offsets = [0, 0], sizes = [256, 256], strides = [1, 1]} : vector<256x512xf32> to vector<256x256xf32>
    %34 = vector.extract_strided_slice %32 {offsets = [0, 256], sizes = [256, 256], strides = [1, 1]} : vector<256x512xf32> to vector<256x256xf32>
    %35 = arith.maximumf %33, %34 : vector<256x256xf32>
    %36 = vector.extract_strided_slice %35 {offsets = [0, 0], sizes = [256, 128], strides = [1, 1]} : vector<256x256xf32> to vector<256x128xf32>
    %37 = vector.extract_strided_slice %35 {offsets = [0, 128], sizes = [256, 128], strides = [1, 1]} : vector<256x256xf32> to vector<256x128xf32>
    %38 = arith.maximumf %36, %37 : vector<256x128xf32>
    %c0_21 = arith.constant 0 : index
    %c0_22 = arith.constant 0 : index
    %39 = vector.load %arg12[%c0_21, %c0_22] : memref<1024x128xf32, #tpu.memory_space<vmem>>, vector<256x128xf32>
    %40 = arith.maximumf %39, %38 : vector<256x128xf32>
    %c0_23 = arith.constant 0 : index
    %c0_24 = arith.constant 0 : index
    %41 = vector.load %arg12[%c0_23, %c0_24] : memref<1024x128xf32, #tpu.memory_space<vmem>>, vector<256x128xf32>
    tpu.vector_store %arg12[%c0_23, %c0_24], %40 {strides = array<i32>} : memref<1024x128xf32, #tpu.memory_space<vmem>>, vector<256x128xf32>,
    %c256 = arith.constant 256 : index
    %c0_25 = arith.constant 0 : index
    %42 = vector.load %arg10[%c256, %c0_25] : memref<1024x128xbf16, #tpu.memory_space<vmem>>, vector<256x128xbf16>
    %cst_26 = arith.constant dense<0.000000e+00> : vector<256x1024xf32>
    %43 = tpu.matmul %42, %24, %cst_26 {dimension_numbers = #tpu.dot_dimension_numbers<[1], [0], [0], [1], [0, 0, 1, 1], [], []>} : vector<256x128xbf16>, vector<128x1024xbf16>, vector<256x1024xf32> -> vector<256x1024xf32>
    %44 = vector.extract_strided_slice %43 {offsets = [0, 0], sizes = [256, 512], strides = [1, 1]} : vector<256x1024xf32> to vector<256x512xf32>
    %45 = vector.extract_strided_slice %43 {offsets = [0, 512], sizes = [256, 512], strides = [1, 1]} : vector<256x1024xf32> to vector<256x512xf32>
    %46 = arith.maximumf %44, %45 : vector<256x512xf32>
    %47 = vector.extract_strided_slice %46 {offsets = [0, 0], sizes = [256, 256], strides = [1, 1]} : vector<256x512xf32> to vector<256x256xf32>
    %48 = vector.extract_strided_slice %46 {offsets = [0, 256], sizes = [256, 256], strides = [1, 1]} : vector<256x512xf32> to vector<256x256xf32>
    %49 = arith.maximumf %47, %48 : vector<256x256xf32>
    %50 = vector.extract_strided_slice %49 {offsets = [0, 0], sizes = [256, 128], strides = [1, 1]} : vector<256x256xf32> to vector<256x128xf32>
    %51 = vector.extract_strided_slice %49 {offsets = [0, 128], sizes = [256, 128], strides = [1, 1]} : vector<256x256xf32> to vector<256x128xf32>
    %52 = arith.maximumf %50, %51 : vector<256x128xf32>
    %c256_27 = arith.constant 256 : index
    %c0_28 = arith.constant 0 : index
    %53 = vector.load %arg12[%c256_27, %c0_28] : memref<1024x128xf32, #tpu.memory_space<vmem>>, vector<256x128xf32>
    %54 = arith.maximumf %53, %52 : vector<256x128xf32>
    %c256_29 = arith.constant 256 : index
    %c0_30 = arith.constant 0 : index
    %55 = vector.load %arg12[%c256_29, %c0_30] : memref<1024x128xf32, #tpu.memory_space<vmem>>, vector<256x128xf32>
    tpu.vector_store %arg12[%c256_29, %c0_30], %54 {strides = array<i32>} : memref<1024x128xf32, #tpu.memory_space<vmem>>, vector<256x128xf32>,
    %c512 = arith.constant 512 : index
    %c0_31 = arith.constant 0 : index
    %56 = vector.load %arg10[%c512, %c0_31] : memref<1024x128xbf16, #tpu.memory_space<vmem>>, vector<256x128xbf16>
    %cst_32 = arith.constant dense<0.000000e+00> : vector<256x1024xf32>
    %57 = tpu.matmul %56, %24, %cst_32 {dimension_numbers = #tpu.dot_dimension_numbers<[1], [0], [0], [1], [0, 0, 1, 1], [], []>} : vector<256x128xbf16>, vector<128x1024xbf16>, vector<256x1024xf32> -> vector<256x1024xf32>
    %58 = vector.extract_strided_slice %57 {offsets = [0, 0], sizes = [256, 512], strides = [1, 1]} : vector<256x1024xf32> to vector<256x512xf32>
    %59 = vector.extract_strided_slice %57 {offsets = [0, 512], sizes = [256, 512], strides = [1, 1]} : vector<256x1024xf32> to vector<256x512xf32>
    %60 = arith.maximumf %58, %59 : vector<256x512xf32>
    %61 = vector.extract_strided_slice %60 {offsets = [0, 0], sizes = [256, 256], strides = [1, 1]} : vector<256x512xf32> to vector<256x256xf32>
    %62 = vector.extract_strided_slice %60 {offsets = [0, 256], sizes = [256, 256], strides = [1, 1]} : vector<256x512xf32> to vector<256x256xf32>
    %63 = arith.maximumf %61, %62 : vector<256x256xf32>
    %64 = vector.extract_strided_slice %63 {offsets = [0, 0], sizes = [256, 128], strides = [1, 1]} : vector<256x256xf32> to vector<256x128xf32>
    %65 = vector.extract_strided_slice %63 {offsets = [0, 128], sizes = [256, 128], strides = [1, 1]} : vector<256x256xf32> to vector<256x128xf32>
    %66 = arith.maximumf %64, %65 : vector<256x128xf32>
    %c512_33 = arith.constant 512 : index
    %c0_34 = arith.constant 0 : index
    %67 = vector.load %arg12[%c512_33, %c0_34] : memref<1024x128xf32, #tpu.memory_space<vmem>>, vector<256x128xf32>
    %68 = arith.maximumf %67, %66 : vector<256x128xf32>
    %c512_35 = arith.constant 512 : index
    %c0_36 = arith.constant 0 : index
    %69 = vector.load %arg12[%c512_35, %c0_36] : memref<1024x128xf32, #tpu.memory_space<vmem>>, vector<256x128xf32>
    tpu.vector_store %arg12[%c512_35, %c0_36], %68 {strides = array<i32>} : memref<1024x128xf32, #tpu.memory_space<vmem>>, vector<256x128xf32>,
    %c768 = arith.constant 768 : index
    %c0_37 = arith.constant 0 : index
    %70 = vector.load %arg10[%c768, %c0_37] : memref<1024x128xbf16, #tpu.memory_space<vmem>>, vector<256x128xbf16>
    %cst_38 = arith.constant dense<0.000000e+00> : vector<256x1024xf32>
    %71 = tpu.matmul %70, %24, %cst_38 {dimension_numbers = #tpu.dot_dimension_numbers<[1], [0], [0], [1], [0, 0, 1, 1], [], []>} : vector<256x128xbf16>, vector<128x1024xbf16>, vector<256x1024xf32> -> vector<256x1024xf32>
    %72 = vector.extract_strided_slice %71 {offsets = [0, 0], sizes = [256, 512], strides = [1, 1]} : vector<256x1024xf32> to vector<256x512xf32>
    %73 = vector.extract_strided_slice %71 {offsets = [0, 512], sizes = [256, 512], strides = [1, 1]} : vector<256x1024xf32> to vector<256x512xf32>
    %74 = arith.maximumf %72, %73 : vector<256x512xf32>
    %75 = vector.extract_strided_slice %74 {offsets = [0, 0], sizes = [256, 256], strides = [1, 1]} : vector<256x512xf32> to vector<256x256xf32>
    %76 = vector.extract_strided_slice %74 {offsets = [0, 256], sizes = [256, 256], strides = [1, 1]} : vector<256x512xf32> to vector<256x256xf32>
    %77 = arith.maximumf %75, %76 : vector<256x256xf32>
    %78 = vector.extract_strided_slice %77 {offsets = [0, 0], sizes = [256, 128], strides = [1, 1]} : vector<256x256xf32> to vector<256x128xf32>
    %79 = vector.extract_strided_slice %77 {offsets = [0, 128], sizes = [256, 128], strides = [1, 1]} : vector<256x256xf32> to vector<256x128xf32>
    %80 = arith.maximumf %78, %79 : vector<256x128xf32>
    %c768_39 = arith.constant 768 : index
    %c0_40 = arith.constant 0 : index
    %81 = vector.load %arg12[%c768_39, %c0_40] : memref<1024x128xf32, #tpu.memory_space<vmem>>, vector<256x128xf32>
    %82 = arith.maximumf %81, %80 : vector<256x128xf32>
    %c768_41 = arith.constant 768 : index
    %c0_42 = arith.constant 0 : index
    %83 = vector.load %arg12[%c768_41, %c0_42] : memref<1024x128xf32, #tpu.memory_space<vmem>>, vector<256x128xf32>
    tpu.vector_store %arg12[%c768_41, %c0_42], %82 {strides = array<i32>} : memref<1024x128xf32, #tpu.memory_space<vmem>>, vector<256x128xf32>,
    %c0_i32_43 = arith.constant 0 : i32
    %84 = arith.cmpi eq, %arg2, %c0_i32_43 : i32
    %85 = arith.extui %84 : i1 to i32
    %c0_i32_44 = arith.constant 0 : i32
    %86 = arith.cmpi ne, %85, %c0_i32_44 : i32
    scf.if %86 {
      %c0_45 = arith.constant 0 : index
      %c0_46 = arith.constant 0 : index
      %87 = vector.load %arg12[%c0_45, %c0_46] : memref<1024x128xf32, #tpu.memory_space<vmem>>, vector<1024x128xf32>
      %cst_47 = arith.constant dense<0xFF800000> : vector<1024xf32>
      %88 = vector.multi_reduction <maximumf>, %87, %cst_47 [1] : vector<1024x128xf32> to vector<1024xf32>
      %89 = vector.shape_cast %88 : vector<1024xf32> to vector<1024x1xf32>
      %90 = vector.shape_cast %89 : vector<1024x1xf32> to vector<1x1x1024x1xf32>
      %c0_48 = arith.constant 0 : index
      %c0_49 = arith.constant 0 : index
      %c0_50 = arith.constant 0 : index
      %c0_51 = arith.constant 0 : index
      %91 = vector.load %arg11[%c0_48, %c0_49, %c0_50, %c0_51] : memref<1x1x1024x1xf32, #tpu.memory_space<vmem>>, vector<1x1x1024x1xf32>
      tpu.vector_store %arg11[%c0_48, %c0_49, %c0_50, %c0_51], %90 {strides = array<i32>} : memref<1x1x1024x1xf32, #tpu.memory_space<vmem>>, vector<1x1x1024x1xf32>,
    } else {
    }
    return
  }
  func.func @transform_0(%arg0: i32, %arg1: i32, %arg2: i32) -> (i32, i32, i32) {
    %c1_i32 = arith.constant 1 : i32
    %0 = arith.muli %arg1, %c1_i32 : i32
    %1 = arith.addi %0, %arg2 : i32
    %c0_i32 = arith.constant 0 : i32
    %c0_i32_0 = arith.constant 0 : i32
    return %arg0, %c0_i32, %1 : i32, i32, i32
  }
  func.func @transform_1(%arg0: i32, %arg1: i32, %arg2: i32) -> (i32, i32) {
    %c0_i32 = arith.constant 0 : i32
    %c0_i32_0 = arith.constant 0 : i32
    %c0_i32_1 = arith.constant 0 : i32
    return %c0_i32, %c0_i32_0 : i32, i32
  }
  func.func @transform_2(%arg0: i32, %arg1: i32, %arg2: i32) -> (i32, i32) {
    %c0_i32 = arith.constant 0 : i32
    %c0_i32_0 = arith.constant 0 : i32
    %c0_i32_1 = arith.constant 0 : i32
    return %c0_i32, %c0_i32_0 : i32, i32
  }
  func.func @transform_3(%arg0: i32, %arg1: i32, %arg2: i32) -> (i32, i32) {
    %c0_i32 = arith.constant 0 : i32
    %c0_i32_0 = arith.constant 0 : i32
    %c0_i32_1 = arith.constant 0 : i32
    return %c0_i32, %c0_i32_0 : i32, i32
  }
  func.func @transform_4(%arg0: i32, %arg1: i32, %arg2: i32) -> (i32, i32) {
    %c0_i32 = arith.constant 0 : i32
    %c0_i32_0 = arith.constant 0 : i32
    %c0_i32_1 = arith.constant 0 : i32
    return %c0_i32, %c0_i32_0 : i32, i32
  }
  func.func @transform_5(%arg0: i32, %arg1: i32, %arg2: i32) -> (i32, i32) {
    %c0_i32 = arith.constant 0 : i32
    %c0_i32_0 = arith.constant 0 : i32
    %c0_i32_1 = arith.constant 0 : i32
    return %c0_i32, %c0_i32_0 : i32, i32
  }
  func.func @transform_6(%arg0: i32, %arg1: i32, %arg2: i32) -> (i32, i32) {
    %c0_i32 = arith.constant 0 : i32
    %c0_i32_0 = arith.constant 0 : i32
    %c0_i32_1 = arith.constant 0 : i32
    return %c0_i32, %c0_i32_0 : i32, i32
  }
  func.func @transform_7(%arg0: i32, %arg1: i32, %arg2: i32) -> (i32, i32) {
    %c0_i32 = arith.constant 0 : i32
    %c0_i32_0 = arith.constant 0 : i32
    %c0_i32_1 = arith.constant 0 : i32
    return %c0_i32, %c0_i32_0 : i32, i32
  }
  func.func @transform_8(%arg0: i32, %arg1: i32, %arg2: i32) -> (i32, i32, i32, i32) {
    %c0_i32 = arith.constant 0 : i32
    %c0_i32_0 = arith.constant 0 : i32
    %c0_i32_1 = arith.constant 0 : i32
    return %arg0, %arg1, %c0_i32, %c0_i32_0 : i32, i32, i32, i32
  }
}

</mosaic_0001>

<bundles_post_ra>
// kernel: pointnetfeat_forward.1
= control target key start
LH: loop header
LB: loop body
LE: loop exit
PB: predicated region body
PF: predicated region fallthrough
CT: control target
= control target key end

     0   :  { %s8105_s27 = smov 0   ;;  %s8107_s28 = smov 0   ;;  %s12398_s0 = inlined_call_operand.vmem [shape: f32[2,3,1024], index: 0, kind: input, shape index: {}]   ;;  %s12399_s1 = inlined_call_operand.vmem [shape: bf16[64,3], index: 1, kind: input, shape index: {}]   ;;  %s12400_s2 = inlined_call_operand.vmem [shape: f32[64,1], index: 2, kind: input, shape index: {}]   ;;  %s12401_s3 = inlined_call_operand.vmem [shape: f32[64,1], index: 3, kind: input, shape index: {}]   ;;  %s12402_s4 = inlined_call_operand.vmem [shape: bf16[128,64], index: 4, kind: input, shape index: {}]   ;;  %s12403_s5 = inlined_call_operand.vmem [shape: f32[128,1], index: 5, kind: input, shape index: {}]   ;;  %s12404_s6 = inlined_call_operand.vmem [shape: f32[128,1], index: 6, kind: input, shape index: {}]   ;;  %s12405_s7 = inlined_call_operand.vmem [shape: bf16[1024,128], index: 7, kind: input, shape index: {}]   ;;  %s12406_s8 = inlined_call_operand.vmem [shape: f32[2,1,1024,1], index: 8, kind: output, shape index: {}]  }
   0x1   :  { %s8109_s29 = smov 0  }
   0x2 LB: > { %s37_s30 = sadd.s32 1, %s8052_s28  ;;  %p7516_p0 = scmp.ge.s32.totalorder %s8056_s29, 1  ;;  %s8056_s29 = sphi %s8109_s29, %s18_s29   ;;  %s8052_s28 = sphi %s8107_s28, %s13659_s28   ;;  %s8048_s27 = sphi %s8105_s27, %s13658_s27  }
   0x3   : > { %p39_p1 = scmp.ge.s32.totalorder %s37_s30, 2  ;;  %p294_p2 = scmp.lt.s32.totalorder %s8056_s29, 3 }
   0x5   : > { %s13661_s30 = smov (%p39_p1, %s37_s30), 0  ;;  %p295_p3 = pnand %p7516_p0, %p294_p2 }
   0x7   : > { %298 = sbr.rel (%p295_p3) target bundleno = 2833 (0xb11), region = 52 }
   0xc   : > { %v817_v0 = vld [vmem:[%s12401_s3 + $0x30] sm:$0xff]  ;;  %v703_v2 = vld [vmem:[%s12400_s2 + $0x20] sm:$0xff]  ;;  %p339_p4 = scmp.lt.s32.totalorder %s8048_s27, 1  ;;  %v8058_v3 = vmov 0   ;;  %v818_v6 = vld [vmem:[%s12401_s3 + $0x38] sm:$0xff]  ;;  %vm439_vm0 = vcmask 1040384  }
   0xd   : > { %v705_v1 = vld [vmem:[%s12400_s2 + $0x30] sm:$0xff]  ;;  %8029 = vset.pattern.permute.xlu2 %v8058_v3  ;;  %8028 = vset.pattern.permute.xlu1 %v8058_v3  ;;  %v706_v7 = vld [vmem:[%s12400_s2 + $0x38] sm:$0xff]  ;;  %v704_v8 = vld [vmem:[%s12400_s2 + $0x28] sm:$0xff]  ;;  %vm440_vm1 = vcmask 1041408   ;;  %v8059_v9 = vmov 65535   ;;  %vm426_vm2 = vcmask 23552  }
   0xe   : > { %8027 = vset.pattern.permute.xlu0 %v8058_v3  ;;  %851 = vperm.xlu1 %8028, %v817_v0   ;;  %s13663_s27 = smov (!%p339_p4, %s8048_s27), 1  ;;  %v441_v10 = vsel %vm439_vm0, 4294967295, %v8059_v9  ;;  %v816_v11 = vld [vmem:[%s12401_s3 + $0x28] sm:$0xff]  ;;  %v815_v19 = vld [vmem:[%s12401_s3 + $0x20] sm:$0xff]  ;;  %v701_v20 = vld [vmem:[%s12400_s2 + $0x10] sm:$0xff]  ;;  %vm1075_vm3 = vcmask 523264  }
   0xf   : > { %739 = vperm.xlu0 %8027, %v705_v1   ;;  %729 = vperm.xlu2 %8029, %v703_v2   ;;  %s7923_s15 = sshll.u32 %s13663_s27, 5  ;;  %v8154_v12 = vsel %vm440_vm1, %v441_v10, 0  ;;  %v8169_v27 = vld [vmem:[%s12399_s1] sm:$0xff]  ;;  %v813_v28 = vld [vmem:[%s12401_s3 + $0x10] sm:$0xff]  ;;  %v702_v29 = vld [vmem:[%s12400_s2 + $0x18] sm:$0xff]  ;;  %s7924_s14 = sshll.u32 %s13663_s27, 10 }
  0x10   : > { %s8138_s18 = scalar_lea.vmem %s12398_s0, %s7923_s15  ;;  %v814_v30 = vld [vmem:[%s12401_s3 + $0x18] sm:$0xff]  ;;  %v700_v31 = vld [vmem:[%s12400_s2 + $0x8] sm:$0xff]  ;;  %v811_v32 = vld [vmem:[%s12401_s3] sm:$0xff]  ;;  %s10150_s17 = scalar_lea.vmem %s12406_s8, %s7924_s14  ;;  %vm7291_vm4 = vcmask 7168  }
  0x11   : > { %v359_v4 = vld [vmem:[%s8138_s18] sm:$0x77]  ;;  %v360_v5 = vld [vmem:[%s8138_s18 + $0x8] sm:$0x77]  ;;  %v1507_v35 = vld [vmem:[%s12403_s5 + $0x78] sm:$0xff] }
  0x12   : > { %367 = vst [vmem:[#allocation1] ss:$2 sm:$0xff] %v359_v4  ;;  %v699_v33 = vld [vmem:[%s12400_s2] sm:$0xff]  ;;  %v8200_v34 = vld [vmem:[%s12399_s1 + $0x8] sm:$0xff]  ;;  %v1506_v36 = vld [vmem:[%s12403_s5 + $0x70] sm:$0xff] }
  0x13   : > { %369 = vst [vmem:[#allocation1 + $0x10] ss:$2 sm:$0xff] %v360_v5  ;;  %v812_v37 = vld [vmem:[%s12401_s3 + $0x8] sm:$0xff]  ;;  %v361_v38 = vld [vmem:[%s8138_s18 + $0x10] sm:$0x77]  ;;  %v1504_v40 = vld [vmem:[%s12403_s5 + $0x60] sm:$0xff] }
  0x14   : > { %v362_v39 = vld [vmem:[%s8138_s18 + $0x18] sm:$0x77]  ;;  %371 = vst [vmem:[#allocation1 + $0x20] ss:$2 sm:$0xff] %v361_v38  ;;  %v1730_v42 = vld [vmem:[%s12404_s6 + $0x70] sm:$0xff]  ;;  %v1728_v56 = vld [vmem:[%s12404_s6 + $0x60] sm:$0xff] }
  0x15   : > { %373 = vst [vmem:[#allocation1 + $0x30] ss:$2 sm:$0xff] %v362_v39  ;;  %v1731_v41 = vld [vmem:[%s12404_s6 + $0x78] sm:$0xff]  ;;  %v8233_v51 = vld [vmem:[%s12399_s1 + $0x10] sm:$0xff]  ;;  %v1729_v57 = vld [vmem:[%s12404_s6 + $0x68] sm:$0xff] }
  0x16   : > { %856 = vperm.xlu1 %8028, %v818_v6   ;;  %v1505_v58 = vld [vmem:[%s12403_s5 + $0x68] sm:$0xff]  ;;  %v1503_v59 = vld [vmem:[%s12403_s5 + $0x58] sm:$0xff]  ;;  %v1726_v60 = vld [vmem:[%s12404_s6 + $0x50] sm:$0xff] }
  0x17   : > { %744 = vperm.xlu0 %8027, %v706_v7   ;;  %734 = vperm.xlu2 %8029, %v704_v8   ;;  %v1502_v61 = vld [vmem:[%s12403_s5 + $0x50] sm:$0xff]  ;;  %v7928_v62 = vld [vmem:[%s12399_s1 + $0x18] sm:$0xff]  ;;  %v1500_v63 = vld [vmem:[%s12403_s5 + $0x40] sm:$0xff] }
  0x18   : > { %v1501_v0 = vld [vmem:[%s12403_s5 + $0x48] sm:$0xff]  ;;  %v1727_v1 = vld [vmem:[%s12404_s6 + $0x58] sm:$0xff]  ;;  %v1498_v3 = vld [vmem:[%s12403_s5 + $0x30] sm:$0xff] }
  0x19   : > { %v374_v13 = vld.sshfl [vmem:[#allocation1] sm:$0xff pattern:$0x75316420]  ;;  %v375_v14 = vld.sshfl [vmem:[#allocation1 + $0x8] sm:$0xff pattern:$0x75316420] }
  0x1a   : > { %v390_v15 = vpack.c.bf16 %v374_v13, %v374_v13  ;;  %v391_v16 = vpack.c.bf16 %v375_v14, %v375_v14  ;;  %v376_v17 = vld.sshfl [vmem:[#allocation1 + $0x10] sm:$0xff pattern:$0x75316420]  ;;  %v377_v18 = vld.sshfl [vmem:[#allocation1 + $0x18] sm:$0xff pattern:$0x75316420] }
  0x1b   : > { %v392_v21 = vpack.c.bf16 %v376_v17, %v376_v17  ;;  %v393_v22 = vpack.c.bf16 %v377_v18, %v377_v18  ;;  %v378_v43 = vld.sshfl [vmem:[#allocation1 + $0x20] sm:$0xff pattern:$0x75316420]  ;;  %v379_v44 = vld.sshfl [vmem:[#allocation1 + $0x28] sm:$0xff pattern:$0x75316420] }
  0x1c   : > { %v444_v23 = vand.u32 %v8154_v12, %v390_v15  ;;  %v447_v24 = vand.u32 %v8154_v12, %v391_v16  ;;  %v394_v45 = vpack.c.bf16 %v378_v43, %v378_v43  ;;  %v395_v46 = vpack.c.bf16 %v379_v44, %v379_v44  ;;  %v380_v47 = vld.sshfl [vmem:[#allocation1 + $0x30] sm:$0xff pattern:$0x75316420]  ;;  %v381_v48 = vld.sshfl [vmem:[#allocation1 + $0x38] sm:$0xff pattern:$0x75316420] }
  0x1d   : > { %v450_v25 = vand.u32 %v8154_v12, %v392_v21  ;;  %v453_v26 = vand.u32 %v8154_v12, %v393_v22  ;;  %v396_v49 = vpack.c.bf16 %v380_v47, %v380_v47  ;;  %v397_v50 = vpack.c.bf16 %v381_v48, %v381_v48  ;;  %v1725_v2 = vld [vmem:[%s12404_s6 + $0x48] sm:$0xff]  ;;  %v1724_v4 = vld [vmem:[%s12404_s6 + $0x40] sm:$0xff]  ;;  %v1722_v5 = vld [vmem:[%s12404_s6 + $0x30] sm:$0xff] }
  0x1e   : > { %846 = vperm.xlu1 %8028, %v816_v11   ;;  %474 = vmatpush.bf16.msra.mxu0 %v444_v23  ;;  %v456_v52 = vand.u32 %v8154_v12, %v394_v45  ;;  %v459_v53 = vand.u32 %v8154_v12, %v395_v46  ;;  %v1723_v6 = vld [vmem:[%s12404_s6 + $0x38] sm:$0xff]  ;;  %v1497_v8 = vld [vmem:[%s12403_s5 + $0x28] sm:$0xff]  ;;  %v1720_v9 = vld [vmem:[%s12404_s6 + $0x20] sm:$0xff] }
  0x1f   : > { %841 = vperm.xlu0 %8027, %v815_v19   ;;  %719 = vperm.xlu2 %8029, %v701_v20   ;;  %v462_v54 = vand.u32 %v8154_v12, %v396_v49  ;;  %v465_v55 = vand.u32 %v8154_v12, %v397_v50  ;;  %v1499_v7 = vld [vmem:[%s12403_s5 + $0x38] sm:$0xff]  ;;  %v1496_v10 = vld [vmem:[%s12403_s5 + $0x20] sm:$0xff]  ;;  %v1494_v11 = vld [vmem:[%s12403_s5 + $0x10] sm:$0xff] }
  0x20   : > { %503 = vmatpush.bf16.msra.mxu1 %v447_v24  ;;  %532 = vmatpush.bf16.msra.mxu2 %v450_v25  ;;  %v1495_v12 = vld [vmem:[%s12403_s5 + $0x18] sm:$0xff]  ;;  %v1721_v13 = vld [vmem:[%s12404_s6 + $0x28] sm:$0xff]  ;;  %v1492_v15 = vld [vmem:[%s12403_s5] sm:$0xff] }
  0x21   : > { %561 = vmatpush.bf16.msra.mxu3 %v453_v26  ;;  %7537 = vmatmul.msk.bf16.vlgmr.msra.gmra.mxu0 %vm426_vm2, %v8169_v27  ;;  %v1719_v14 = vld [vmem:[%s12404_s6 + $0x18] sm:$0xff]  ;;  %v1718_v16 = vld [vmem:[%s12404_s6 + $0x10] sm:$0xff]  ;;  %v1716_v17 = vld [vmem:[%s12404_s6] sm:$0xff] }
  0x22   : > { %590 = vmatpush.bf16.msrb.mxu0 %v456_v52  ;;  %v1717_v18 = vld [vmem:[%s12404_s6 + $0x8] sm:$0xff] }
  0x23   : > { %7541 = vmatmul.msk.bf16.vlgmr.msra.gmra.mxu1 %vm426_vm2, %v8169_v27  ;;  %7545 = vmatmul.msk.bf16.vlgmr.msra.gmra.mxu2 %vm426_vm2, %v8169_v27  ;;  %v1493_v19 = vld [vmem:[%s12403_s5 + $0x8] sm:$0xff] }
  0x24   : > { %7549 = vmatmul.msk.bf16.vlgmr.msra.gmra.mxu3 %vm426_vm2, %v8169_v27  ;;  %619 = vmatpush.bf16.msrb.mxu1 %v459_v53 }
  0x25   : > { %648 = vmatpush.bf16.msrb.mxu2 %v462_v54  ;;  %677 = vmatpush.bf16.msrb.mxu3 %v465_v55 }
  0x26   : > { %831 = vperm.xlu1 %8028, %v813_v28  }
  0x27   : > { %724 = vperm.xlu0 %8027, %v702_v29   ;;  %836 = vperm.xlu2 %8029, %v814_v30  }
  0x2e   : > { %714 = vperm.xlu1 %8028, %v700_v31  }
  0x2f   : > { %821 = vperm.xlu2 %8029, %v811_v32   ;;  %709 = vperm.xlu0 %8027, %v699_v33  }
  0x31   : > { %7538 = vmatmul.msk.bf16.gmra.mxu0 %vm426_vm2, %v8200_v34 }
  0x33   : > { %7542 = vmatmul.msk.bf16.gmra.mxu1 %vm426_vm2, %v8200_v34  ;;  %7546 = vmatmul.msk.bf16.gmra.mxu2 %vm426_vm2, %v8200_v34 }
  0x34   : > { %7550 = vmatmul.msk.bf16.gmra.mxu3 %vm426_vm2, %v8200_v34 }
  0x36   : > { %1580 = vperm.xlu1 %8028, %v1506_v36  }
  0x37   : > { %1585 = vperm.xlu2 %8029, %v1507_v35   ;;  %826 = vperm.xlu0 %8027, %v812_v37  }
  0x3e   : > { %1809 = vperm.xlu1 %8028, %v1731_v41  }
  0x3f   : > { %1570 = vperm.xlu2 %8029, %v1504_v40   ;;  %1804 = vperm.xlu0 %8027, %v1730_v42  }
  0x41   : > { %7539 = vmatmul.msk.bf16.gmra.mxu0 %vm426_vm2, %v8233_v51 }
  0x43   : > { %7543 = vmatmul.msk.bf16.gmra.mxu1 %vm426_vm2, %v8233_v51  ;;  %7547 = vmatmul.msk.bf16.gmra.mxu2 %vm426_vm2, %v8233_v51 }
  0x44   : > { %7551 = vmatmul.msk.bf16.gmra.mxu3 %vm426_vm2, %v8233_v51 }
  0x46   : > { %1794 = vperm.xlu1 %8028, %v1728_v56  }
  0x47   : > { %1799 = vperm.xlu2 %8029, %v1729_v57   ;;  %1575 = vperm.xlu0 %8027, %v1505_v58  }
  0x4e   : > { %1565 = vperm.xlu1 %8028, %v1503_v59  }
  0x4f   : > { %1784 = vperm.xlu2 %8029, %v1726_v60   ;;  %1560 = vperm.xlu0 %8027, %v1502_v61  }
  0x51   : > { %7540 = vmatmul.msk.bf16.gmra.mxu0 %vm426_vm2, %v7928_v62 }
  0x53   : > { %7544 = vmatmul.msk.bf16.gmra.mxu1 %vm426_vm2, %v7928_v62  ;;  %7548 = vmatmul.msk.bf16.gmra.mxu2 %vm426_vm2, %v7928_v62 }
  0x54   : > { %7552 = vmatmul.msk.bf16.gmra.mxu3 %vm426_vm2, %v7928_v62 }
  0x56   : > { %1550 = vperm.xlu1 %8028, %v1500_v63  }
  0x57   : > { %1555 = vperm.xlu2 %8029, %v1501_v0   ;;  %1789 = vperm.xlu0 %8027, %v1727_v1  }
  0x5e   : > { %1779 = vperm.xlu1 %8028, %v1725_v2  }
  0x5f   : > { %1540 = vperm.xlu2 %8029, %v1498_v3   ;;  %1774 = vperm.xlu0 %8027, %v1724_v4  }
  0x61   : > { %7553 = vmatmul.msk.bf16.vlgmr.msrb.gmra.mxu0 %vm426_vm2, %v8169_v27 }
  0x63   : > { %7557 = vmatmul.msk.bf16.vlgmr.msrb.gmra.mxu1 %vm426_vm2, %v8169_v27  ;;  %7561 = vmatmul.msk.bf16.vlgmr.msrb.gmra.mxu2 %vm426_vm2, %v8169_v27 }
  0x64   : > { %7565 = vmatmul.msk.bf16.vlgmr.msrb.gmra.mxu3 %vm426_vm2, %v8169_v27 }
  0x66   : > { %1764 = vperm.xlu1 %8028, %v1722_v5  }
  0x67   : > { %1769 = vperm.xlu2 %8029, %v1723_v6   ;;  %1545 = vperm.xlu0 %8027, %v1499_v7  }
  0x69   : > { %v8365_v23 = vpop.permute.xlu2 %729 }
  0x6e   : > { %1535 = vperm.xlu1 %8028, %v1497_v8  }
  0x6f   : > { %1754 = vperm.xlu2 %8029, %v1720_v9   ;;  %1530 = vperm.xlu0 %8027, %v1496_v10  }
  0x71   : > { %7554 = vmatmul.msk.bf16.gmra.mxu0 %vm426_vm2, %v8200_v34  ;;  %v8371_v30 = vpop.permute.xlu2 %734 }
  0x73   : > { %7558 = vmatmul.msk.bf16.gmra.mxu1 %vm426_vm2, %v8200_v34  ;;  %7562 = vmatmul.msk.bf16.gmra.mxu2 %vm426_vm2, %v8200_v34 }
  0x74   : > { %7566 = vmatmul.msk.bf16.gmra.mxu3 %vm426_vm2, %v8200_v34 }
  0x76   : > { %1520 = vperm.xlu1 %8028, %v1494_v11  }
  0x77   : > { %1525 = vperm.xlu2 %8029, %v1495_v12   ;;  %1759 = vperm.xlu0 %8027, %v1721_v13  }
  0x79   : > { %v8379_v41 = vpop.permute.xlu2 %719 }
  0x7e   : > { %1749 = vperm.xlu1 %8028, %v1719_v14  }
  0x7f   : > { %1510 = vperm.xlu2 %8029, %v1492_v15   ;;  %1744 = vperm.xlu0 %8027, %v1718_v16  }
  0x80   : > { %v8367_v24 = vpop.permute.xlu1 %851 }
  0x81   : > { %7555 = vmatmul.msk.bf16.gmra.mxu0 %vm426_vm2, %v8233_v51  ;;  %v8363_v22 = vpop.permute.xlu0 %739  ;;  %v8389_v48 = vpop.permute.xlu2 %836 }
  0x83   : > { %7559 = vmatmul.msk.bf16.gmra.mxu1 %vm426_vm2, %v8233_v51  ;;  %7563 = vmatmul.msk.bf16.gmra.mxu2 %vm426_vm2, %v8233_v51 }
  0x84   : > { %7567 = vmatmul.msk.bf16.gmra.mxu3 %vm426_vm2, %v8233_v51 }
  0x86   : > { %1734 = vperm.xlu1 %8028, %v1716_v17  }
  0x87   : > { %1739 = vperm.xlu2 %8029, %v1717_v18   ;;  %1515 = vperm.xlu0 %8027, %v1493_v19  }
  0x88   : > { %v8375_v35 = vpop.permute.xlu1 %856 }
  0x89   : > { %v8369_v29 = vpop.permute.xlu0 %744  ;;  %v8400_v56 = vpop.permute.xlu2 %821 }
  0x90   : > { %v8381_v42 = vpop.permute.xlu1 %846 }
  0x91   : > { %7556 = vmatmul.msk.bf16.gmra.mxu0 %vm426_vm2, %v7928_v62  ;;  %v8377_v36 = vpop.permute.xlu0 %841 }
  0x93   : > { %7560 = vmatmul.msk.bf16.gmra.mxu1 %vm426_vm2, %v7928_v62  ;;  %7564 = vmatmul.msk.bf16.gmra.mxu2 %vm426_vm2, %v7928_v62 }
  0x94   : > { %7568 = vmatmul.msk.bf16.gmra.mxu3 %vm426_vm2, %v7928_v62 }
  0x98   : > { %v8391_v49 = vpop.permute.xlu1 %831 }
  0x99   : > { %v8387_v47 = vpop.permute.xlu0 %724 }
  0x9e   : > { %v476_v20 = vpop.f32.mrf.mxu0 }
  0xa0   : > { %v505_v21 = vpop.f32.mrf.mxu1  ;;  %v8405_v0 = vpop.permute.xlu1 %714 }
  0xa1   : > { %v8397_v54 = vpop.permute.xlu0 %709 }
  0xa2   : > { %v747_v55 = vmul.f32 %v8397_v54, %v476_v20  ;;  %v748_v63 = vmul.f32 %v8397_v54, %v505_v21 }
  0xa4   : > { %v8408_v1 = vadd.f32 %v8400_v56, %v747_v55  ;;  %v8421_v8 = vadd.f32 %v8400_v56, %v748_v63 }
  0xa6   : > { %v534_v25 = vpop.f32.mrf.mxu2  ;;  %v478_v27 = vpop.f32.mrf.mxu0  ;;  %v923_v13 = vmax.f32 %v8408_v1, 0.0 }
  0xa7   : > { %v563_v26 = vpop.f32.mrf.mxu3  ;;  %v755_v2 = vmul.f32 %v8405_v0, %v478_v27  ;;  %v8424_v9 = vmul.f32 %v8397_v54, %v534_v25 }
  0xa8   : > { %v507_v28 = vpop.f32.mrf.mxu1  ;;  %v8432_v14 = vmul.f32 %v8397_v54, %v563_v26 }
  0xa9   : > { %v756_v5 = vmul.f32 %v8405_v0, %v507_v28  ;;  %v8426_v10 = vpop.permute.xlu0 %826 }
  0xaa   : > { %v8441_v17 = vadd.f32 %v8426_v10, %v755_v2 }
  0xab   : > { %v8449_v26 = vadd.f32 %v8426_v10, %v756_v5 }
  0xae   : > { %v536_v31 = vpop.f32.mrf.mxu2  ;;  %v481_v33 = vpop.f32.mrf.mxu0 }
  0xaf   : > { %v8373_v32 = vpop.f32.mrf.mxu3  ;;  %v763_v59 = vmul.f32 %v8379_v41, %v481_v33  ;;  %v8444_v18 = vmul.f32 %v8405_v0, %v536_v31 }
  0xb0   : > { %v510_v34 = vpop.f32.mrf.mxu1 }
  0xb1   : > { %v764_v60 = vmul.f32 %v8379_v41, %v510_v34  ;;  %v8415_v6 = vadd.f32 %v8391_v49, %v763_v59 }
  0xb3   : > { %v8418_v7 = vadd.f32 %v8391_v49, %v764_v60  ;;  %v939_v27 = vmax.f32 %v8415_v6, 0.0 }
  0xb5   : > { %v940_v28 = vmax.f32 %v8418_v7, 0.0  ;;  %v869_v7 = vadd.f32 %v8426_v10, %v8444_v18 }
  0xb6   : > { %v539_v37 = vpop.f32.mrf.mxu2  ;;  %v483_v39 = vpop.f32.mrf.mxu0 }
  0xb7   : > { %v568_v38 = vpop.f32.mrf.mxu3  ;;  %v771_v3 = vmul.f32 %v8387_v47, %v483_v39  ;;  %v8460_v59 = vmul.f32 %v8379_v41, %v539_v37 }
  0xb8   : > { %v512_v40 = vpop.f32.mrf.mxu1  ;;  %v8463_v60 = vmul.f32 %v8379_v41, %v568_v38 }
  0xb9   : > { %v772_v4 = vmul.f32 %v8387_v47, %v512_v40  ;;  %v8435_v15 = vadd.f32 %v8389_v48, %v771_v3 }
  0xbb   : > { %v8438_v16 = vadd.f32 %v8389_v48, %v772_v4 }
  0xbe   : > { %v8383_v43 = vpop.f32.mrf.mxu2  ;;  %v486_v45 = vpop.f32.mrf.mxu0 }
  0xbf   : > { %v8385_v44 = vpop.f32.mrf.mxu3  ;;  %v779_v33 = vmul.f32 %v8365_v23, %v486_v45  ;;  %v947_v45 = vmax.f32 %v8435_v15, 0.0 }
  0xc0   : > { %v515_v46 = vpop.f32.mrf.mxu1 }
  0xc1   : > { %v780_v34 = vmul.f32 %v8365_v23, %v515_v46  ;;  %v948_v46 = vmax.f32 %v8438_v16, 0.0  ;;  %v891_v3 = vadd.f32 %v8377_v36, %v779_v33 }
  0xc3   : > { %v892_v37 = vadd.f32 %v8377_v36, %v780_v34 }
  0xc6   : > { %v8393_v50 = vpop.f32.mrf.mxu2  ;;  %v488_v52 = vpop.f32.mrf.mxu0 }
  0xc7   : > { %v8395_v51 = vpop.f32.mrf.mxu3  ;;  %v787_v19 = vmul.f32 %v8371_v30, %v488_v52  ;;  %v781_v16 = vmul.f32 %v8365_v23, %v8393_v50 }
  0xc8   : > { %v517_v53 = vpop.f32.mrf.mxu1 }
  0xc9   : > { %v788_v20 = vmul.f32 %v8371_v30, %v517_v53 }
  0xce   : > { %v546_v57 = vpop.f32.mrf.mxu2  ;;  %v491_v61 = vpop.f32.mrf.mxu0 }
  0xcf   : > { %v575_v58 = vpop.f32.mrf.mxu3  ;;  %v795_v11 = vmul.f32 %v8363_v22, %v491_v61  ;;  %v899_v61 = vadd.f32 %v8381_v42, %v787_v19  ;;  %v782_v19 = vmul.f32 %v8365_v23, %v8395_v51 }
  0xd0   : > { %v520_v62 = vpop.f32.mrf.mxu1  ;;  %v790_v33 = vmul.f32 %v8371_v30, %v575_v58  ;;  %v774_v58 = vmul.f32 %v8387_v47, %v8385_v44 }
  0xd1   : > { %v796_v12 = vmul.f32 %v8363_v22, %v520_v62  ;;  %v907_v40 = vadd.f32 %v8367_v24, %v795_v11  ;;  %v900_v62 = vadd.f32 %v8381_v42, %v788_v20  ;;  %v789_v20 = vmul.f32 %v8371_v30, %v546_v57 }
  0xd2   : > { %v773_v57 = vmul.f32 %v8387_v47, %v8383_v43 }
  0xd3   : > { %v908_v52 = vadd.f32 %v8367_v24, %v796_v12  ;;  %v971_v5 = vmax.f32 %v907_v40, 0.0  ;;  %v964_v34 = vmax.f32 %v900_v62, 0.0  ;;  %v956_v62 = vmax.f32 %v892_v37, 0.0 }
  0xd5   : > { %v972_v11 = vmax.f32 %v908_v52, 0.0 }
  0xd6   : > { %v549_v21 = vpop.f32.mrf.mxu2  ;;  %v493_v39 = vpop.f32.mrf.mxu0 }
  0xd7   : > { %v578_v25 = vpop.f32.mrf.mxu3  ;;  %v803_v53 = vmul.f32 %v8369_v29, %v493_v39  ;;  %v797_v4 = vmul.f32 %v8363_v22, %v549_v21  ;;  %v963_v39 = vmax.f32 %v899_v61, 0.0  ;;  %v955_v61 = vmax.f32 %v891_v3, 0.0 }
  0xd8   : > { %v522_v31 = vpop.f32.mrf.mxu1  ;;  %v798_v38 = vmul.f32 %v8363_v22, %v578_v25 }
  0xd9   : > { %v804_v55 = vmul.f32 %v8369_v29, %v522_v31  ;;  %v915_v63 = vadd.f32 %v8375_v35, %v803_v53  ;;  %v909_v40 = vadd.f32 %v8367_v24, %v797_v4  ;;  %v902_v4 = vadd.f32 %v8381_v42, %v790_v33 }
  0xda   : > { %v910_v52 = vadd.f32 %v8367_v24, %v798_v38  ;;  %v1019_v43 = vpack.c.bf16 %v963_v39, %v955_v61  ;;  %v886_v33 = vadd.f32 %v8389_v48, %v774_v58 }
  0xdb   : > { %v916_v2 = vadd.f32 %v8375_v35, %v804_v55  ;;  %v979_v12 = vmax.f32 %v915_v63, 0.0 }
  0xdc   : > { %v974_v44 = vmax.f32 %v910_v52, 0.0  ;;  %v1011_v52 = vpack.c.bf16 %v947_v45, %v939_v27  ;;  %v950_v27 = vmax.f32 %v886_v33, 0.0 }
  0xdd   : > { %v980_v15 = vmax.f32 %v916_v2, 0.0  ;;  %v1027_v31 = vpack.c.bf16 %v979_v12, %v971_v5  ;;  %v901_v2 = vadd.f32 %v8381_v42, %v789_v20  ;;  %v894_v12 = vadd.f32 %v8377_v36, %v782_v19 }
  0xde   : > { %v551_v53 = vpop.f32.mrf.mxu2  ;;  %v8485_v63 = vpop.f32.mrf.mxu0  ;;  %v885_v20 = vadd.f32 %v8389_v48, %v773_v57  ;;  %v878_v57 = vadd.f32 %v8391_v49, %v8463_v60 }
  0xdf   : > { %v1028_v21 = vpack.c.bf16 %v980_v15, %v972_v11  ;;  %v580_v25 = vpop.f32.mrf.mxu3  ;;  %v805_v55 = vmul.f32 %v8369_v29, %v551_v53  ;;  %1104 = vmatpush.bf16.msra.mxu0 %v1027_v31  ;;  %v893_v11 = vadd.f32 %v8377_v36, %v781_v16  ;;  %v1020_v15 = vpack.c.bf16 %v964_v34, %v956_v62 }
  0xe0   : > { %v806_v50 = vmul.f32 %v8369_v29, %v580_v25  ;;  %v8487_v51 = vpop.f32.mrf.mxu1  ;;  %v973_v53 = vmax.f32 %v909_v40, 0.0  ;;  %v758_v31 = vmul.f32 %v8405_v0, %v8373_v32  ;;  %v965_v16 = vmax.f32 %v901_v2, 0.0 }
  0xe1   : > { %1153 = vmatpush.bf16.msra.mxu1 %v1028_v21  ;;  %v917_v38 = vadd.f32 %v8375_v35, %v805_v55  ;;  %v924_v21 = vmax.f32 %v8421_v8, 0.0  ;;  %v966_v25 = vmax.f32 %v902_v4, 0.0  ;;  %v1012_v32 = vpack.c.bf16 %v948_v46, %v940_v28 }
  0xe2   : > { %v918_v5 = vadd.f32 %v8375_v35, %v806_v50  ;;  %v931_v55 = vmax.f32 %v8441_v17, 0.0  ;;  %v932_v50 = vmax.f32 %v8449_v26, 0.0  ;;  %v877_v8 = vadd.f32 %v8391_v49, %v8460_v59 }
  0xe3   : > { %v981_v3 = vmax.f32 %v917_v38, 0.0  ;;  %1105 = vmatpush.bf16.msra.mxu0 %v1019_v43  ;;  %v957_v58 = vmax.f32 %v893_v11, 0.0  ;;  %v958_v61 = vmax.f32 %v894_v12, 0.0  ;;  %v870_v17 = vadd.f32 %v8426_v10, %v758_v31 }
  0xe4   : > { %v982_v37 = vmax.f32 %v918_v5, 0.0  ;;  %v949_v26 = vmax.f32 %v885_v20, 0.0  ;;  %v1003_v60 = vpack.c.bf16 %v931_v55, %v923_v13  ;;  %v1004_v45 = vpack.c.bf16 %v932_v50, %v924_v21  ;;  %v8534_v5 = vld [vmem:[%s12402_s4] sm:$0xff]  ;;  %v8549_v21 = vld [vmem:[%s12402_s4 + $0x8] sm:$0xff] }
  0xe5   : > { %1154 = vmatpush.bf16.msra.mxu1 %v1020_v15  ;;  %v1029_v19 = vpack.c.bf16 %v981_v3, %v973_v53  ;;  %v1021_v28 = vpack.c.bf16 %v965_v16, %v957_v58  ;;  %v1022_v59 = vpack.c.bf16 %v966_v25, %v958_v61  ;;  %v861_v46 = vadd.f32 %v8400_v56, %v8424_v9 }
  0xe6   : > { %v1030_v39 = vpack.c.bf16 %v982_v37, %v974_v44  ;;  %v8504_v34 = vpop.f32.mrf.mxu2  ;;  %v8518_v62 = vpop.f32.mrf.mxu0  ;;  %v862_v2 = vadd.f32 %v8400_v56, %v8432_v14  ;;  %v941_v4 = vmax.f32 %v877_v8, 0.0  ;;  %v942_v18 = vmax.f32 %v878_v57, 0.0  ;;  %v8570_v8 = vld [vmem:[%s12402_s4 + $0x10] sm:$0xff] }
  0xe7   : > { %v8506_v40 = vpop.f32.mrf.mxu3  ;;  %1202 = vmatpush.bf16.msra.mxu2 %v1029_v19  ;;  %1106 = vmatpush.bf16.msra.mxu0 %v1011_v52  ;;  %v933_v38 = vmax.f32 %v869_v7, 0.0  ;;  %v934_v1 = vmax.f32 %v870_v17, 0.0  ;;  %v925_v43 = vmax.f32 %v861_v46, 0.0  ;;  %v751_v57 = vmul.f32 %v8397_v54, %v8485_v63 }
  0xe8   : > { %1251 = vmatpush.bf16.msra.mxu3 %v1030_v39  ;;  %v8520_v6 = vpop.f32.mrf.mxu1  ;;  %v1013_v13 = vpack.c.bf16 %v949_v26, %v941_v4  ;;  %v1014_v11 = vpack.c.bf16 %v950_v27, %v942_v18  ;;  %v926_v14 = vmax.f32 %v862_v2, 0.0  ;;  %v752_v58 = vmul.f32 %v8397_v54, %v8487_v51  ;;  %v8578_v27 = vpop.permute.xlu1 %1580 }
  0xe9   : > { %1155 = vmatpush.bf16.msra.mxu1 %v1012_v32  ;;  %v1005_v44 = vpack.c.bf16 %v933_v38, %v925_v43  ;;  %v8589_v51 = vpop.permute.xlu2 %1585 }
  0xea   : > { %v1006_v3 = vpack.c.bf16 %v934_v1, %v926_v14 }
  0xeb   : > { %1203 = vmatpush.bf16.msra.mxu2 %v1021_v28  ;;  %1107 = vmatpush.bf16.msra.mxu0 %v1003_v60  ;;  %v759_v28 = vmul.f32 %v8405_v0, %v8518_v62  ;;  %v8592_v60 = vadd.f32 %v8400_v56, %v751_v57  ;;  %v8599_v62 = vmul.f32 %v8397_v54, %v8504_v34 }
  0xec   : > { %1252 = vmatpush.bf16.msra.mxu3 %v1022_v59  ;;  %v760_v59 = vmul.f32 %v8405_v0, %v8520_v6  ;;  %v8603_v6 = vmul.f32 %v8397_v54, %v8506_v40 }
  0xed   : > { %1156 = vmatpush.bf16.msra.mxu1 %v1004_v45  ;;  %v8595_v45 = vadd.f32 %v8400_v56, %v752_v58  ;;  %v8608_v4 = vadd.f32 %v8426_v10, %v759_v28 }
  0xee   : > { %v652_v9 = vpop.f32.mrf.mxu2  ;;  %v597_v15 = vpop.f32.mrf.mxu0  ;;  %7601 = vmatmul.msk.bf16.vlgmr.msra.gmra.mxu0 %vm1075_vm3, %v8534_v5  ;;  %v8611_v18 = vadd.f32 %v8426_v10, %v760_v59 }
  0xef   : > { %v681_v12 = vpop.f32.mrf.mxu3  ;;  %1204 = vmatpush.bf16.msra.mxu2 %v1013_v13  ;;  %v767_v46 = vmul.f32 %v8379_v41, %v597_v15  ;;  %v8616_v34 = vmul.f32 %v8405_v0, %v652_v9 }
  0xf0   : > { %1253 = vmatpush.bf16.msra.mxu3 %v1014_v11  ;;  %v626_v53 = vpop.f32.mrf.mxu1  ;;  %7609 = vmatmul.msk.bf16.vlgmr.msra.gmra.mxu1 %vm1075_vm3, %v8534_v5  ;;  %v8624_v11 = vmul.f32 %v8405_v0, %v681_v12 }
  0xf1   : > { %v768_v2 = vmul.f32 %v8379_v41, %v626_v53  ;;  %v8633_v9 = vadd.f32 %v8391_v49, %v767_v46 }
  0xf3   : > { %1205 = vmatpush.bf16.msra.mxu2 %v1005_v44  ;;  %v8636_v44 = vadd.f32 %v8391_v49, %v768_v2 }
  0xf4   : > { %1254 = vmatpush.bf16.msra.mxu3 %v1006_v3 }
  0xf6   : > { %v655_v37 = vpop.f32.mrf.mxu2  ;;  %7617 = vmatmul.msk.bf16.vlgmr.msra.gmra.mxu2 %vm1075_vm3, %v8534_v5  ;;  %v599_v20 = vpop.f32.mrf.mxu0 }
  0xf7   : > { %v8540_v31 = vpop.f32.mrf.mxu3  ;;  %7625 = vmatmul.msk.bf16.vlgmr.msra.gmra.mxu3 %vm1075_vm3, %v8534_v5  ;;  %v775_v63 = vmul.f32 %v8387_v47, %v599_v20  ;;  %v8639_v0 = vmul.f32 %v8379_v41, %v655_v37 }
  0xf8   : > { %v628_v33 = vpop.f32.mrf.mxu1  ;;  %v8648_v57 = vmul.f32 %v8379_v41, %v8540_v31 }
  0xf9   : > { %v8619_v54 = vadd.f32 %v8389_v48, %v775_v63  ;;  %v776_v40 = vmul.f32 %v8387_v47, %v628_v33 }
  0xfb   : > { %v8652_v37 = vadd.f32 %v8389_v48, %v776_v40 }
  0xfe   : > { %v8551_v16 = vpop.f32.mrf.mxu2  ;;  %v602_v19 = vpop.f32.mrf.mxu0  ;;  %7602 = vmatmul.msk.bf16.gmra.mxu0 %vm1075_vm3, %v8549_v21 }
  0xff   : > { %v8553_v25 = vpop.f32.mrf.mxu3  ;;  %v783_v13 = vmul.f32 %v8365_v23, %v602_v19 }
 0x100   : > { %v631_v39 = vpop.f32.mrf.mxu1  ;;  %7610 = vmatmul.msk.bf16.gmra.mxu1 %vm1075_vm3, %v8549_v21 }
 0x101   : > { %v784_v12 = vmul.f32 %v8365_v23, %v631_v39  ;;  %v895_v39 = vadd.f32 %v8377_v36, %v783_v13 }
 0x103   : > { %v896_v31 = vadd.f32 %v8377_v36, %v784_v12  ;;  %v777_v12 = vmul.f32 %v8387_v47, %v8551_v16 }
 0x105   : > { %v960_v58 = vmax.f32 %v896_v31, 0.0 }
 0x106   : > { %v8559_v52 = vpop.f32.mrf.mxu2  ;;  %7618 = vmatmul.msk.bf16.gmra.mxu2 %vm1075_vm3, %v8549_v21  ;;  %v604_v55 = vpop.f32.mrf.mxu0 }
 0x107   : > { %v8561_v32 = vpop.f32.mrf.mxu3  ;;  %7626 = vmatmul.msk.bf16.gmra.mxu3 %vm1075_vm3, %v8549_v21  ;;  %v791_v43 = vmul.f32 %v8371_v30, %v604_v55 }
 0x108   : > { %v633_v50 = vpop.f32.mrf.mxu1 }
 0x109   : > { %v792_v14 = vmul.f32 %v8371_v30, %v633_v50  ;;  %v903_v28 = vadd.f32 %v8381_v42, %v791_v43 }
 0x10b   : > { %v904_v59 = vadd.f32 %v8381_v42, %v792_v14  ;;  %v8672_v14 = vld [vmem:[%s12402_s4 + $0x18] sm:$0xff] }
 0x10e   : > { %v662_v61 = vpop.f32.mrf.mxu2  ;;  %v607_v17 = vpop.f32.mrf.mxu0  ;;  %7603 = vmatmul.msk.bf16.gmra.mxu0 %vm1075_vm3, %v8570_v8 }
 0x10f   : > { %v8576_v7 = vpop.f32.mrf.mxu3  ;;  %v799_v38 = vmul.f32 %v8363_v22, %v607_v17  ;;  %v8655_v17 = vpop.permute.xlu1 %1809  ;;  %v793_v46 = vmul.f32 %v8371_v30, %v662_v61  ;;  %v785_v61 = vmul.f32 %v8365_v23, %v8559_v52 }
 0x110   : > { %v636_v26 = vpop.f32.mrf.mxu1  ;;  %7611 = vmatmul.msk.bf16.gmra.mxu1 %vm1075_vm3, %v8570_v8 }
 0x111   : > { %v800_v1 = vmul.f32 %v8363_v22, %v636_v26  ;;  %v911_v33 = vadd.f32 %v8367_v24, %v799_v38  ;;  %v8657_v26 = vpop.permute.xlu0 %1804 }
 0x113   : > { %v912_v19 = vadd.f32 %v8367_v24, %v800_v1  ;;  %v8667_v1 = vpop.permute.xlu2 %1570  ;;  %v975_v40 = vmax.f32 %v911_v33, 0.0 }
 0x115   : > { %v976_v13 = vmax.f32 %v912_v19, 0.0 }
 0x116   : > { %v665_v15 = vpop.f32.mrf.mxu2  ;;  %7619 = vmatmul.msk.bf16.gmra.mxu2 %vm1075_vm3, %v8570_v8  ;;  %v609_v3 = vpop.f32.mrf.mxu0 }
 0x117   : > { %v694_v53 = vpop.f32.mrf.mxu3  ;;  %7627 = vmatmul.msk.bf16.gmra.mxu3 %vm1075_vm3, %v8570_v8  ;;  %v807_v55 = vmul.f32 %v8369_v29, %v609_v3  ;;  %v801_v2 = vmul.f32 %v8363_v22, %v665_v15  ;;  %v794_v15 = vmul.f32 %v8371_v30, %v8576_v7  ;;  %v905_v30 = vadd.f32 %v8381_v42, %v793_v46 }
 0x118   : > { %v638_v20 = vpop.f32.mrf.mxu1  ;;  %v802_v38 = vmul.f32 %v8363_v22, %v694_v53  ;;  %v786_v22 = vmul.f32 %v8365_v23, %v8561_v32  ;;  %v967_v53 = vmax.f32 %v903_v28, 0.0  ;;  %v778_v23 = vmul.f32 %v8387_v47, %v8553_v25 }
 0x119   : > { %v808_v50 = vmul.f32 %v8369_v29, %v638_v20  ;;  %v919_v63 = vadd.f32 %v8375_v35, %v807_v55  ;;  %v968_v20 = vmax.f32 %v904_v59, 0.0  ;;  %v959_v32 = vmax.f32 %v895_v39, 0.0 }
 0x11a   : > { %v952_v7 = vmax.f32 %v8652_v37, 0.0  ;;  %v897_v47 = vadd.f32 %v8377_v36, %v785_v61  ;;  %v898_v25 = vadd.f32 %v8377_v36, %v786_v22  ;;  %v8701_v37 = vpop.permute.xlu0 %1575 }
 0x11b   : > { %v920_v41 = vadd.f32 %v8375_v35, %v808_v50  ;;  %v983_v3 = vmax.f32 %v919_v63, 0.0  ;;  %v913_v63 = vadd.f32 %v8367_v24, %v801_v2  ;;  %v1023_v39 = vpack.c.bf16 %v967_v53, %v959_v32  ;;  %v8707_v22 = vpop.permute.xlu2 %1799 }
 0x11c   : > { %v1024_v59 = vpack.c.bf16 %v968_v20, %v960_v58  ;;  %v936_v53 = vmax.f32 %v8611_v18, 0.0 }
 0x11d   : > { %v984_v43 = vmax.f32 %v920_v41, 0.0  ;;  %v1031_v33 = vpack.c.bf16 %v983_v3, %v975_v40  ;;  %v914_v41 = vadd.f32 %v8367_v24, %v802_v38  ;;  %v906_v24 = vadd.f32 %v8381_v42, %v794_v15  ;;  %v8699_v40 = vpop.permute.xlu1 %1794 }
 0x11e   : > { %v667_v55 = vpop.f32.mrf.mxu2  ;;  %7604 = vmatmul.msk.bf16.gmra.mxu0 %vm1075_vm3, %v8672_v14  ;;  %v977_v31 = vmax.f32 %v913_v63, 0.0  ;;  %v943_v42 = vmax.f32 %v8633_v9, 0.0  ;;  %v890_v3 = vadd.f32 %v8389_v48, %v778_v23  ;;  %v935_v15 = vmax.f32 %v8608_v4, 0.0 }
 0x11f   : > { %v1032_v19 = vpack.c.bf16 %v984_v43, %v976_v13  ;;  %v696_v50 = vpop.f32.mrf.mxu3  ;;  %v809_v16 = vmul.f32 %v8369_v29, %v667_v55  ;;  %1300 = vmatpush.bf16.msrb.mxu0 %v1031_v33  ;;  %v978_v46 = vmax.f32 %v914_v41, 0.0  ;;  %v889_v13 = vadd.f32 %v8389_v48, %v777_v12 }
 0x120   : > { %v810_v52 = vmul.f32 %v8369_v29, %v696_v50  ;;  %7612 = vmatmul.msk.bf16.gmra.mxu1 %vm1075_vm3, %v8672_v14  ;;  %v969_v43 = vmax.f32 %v905_v30, 0.0  ;;  %v970_v36 = vmax.f32 %v906_v24, 0.0  ;;  %v881_v9 = vadd.f32 %v8391_v49, %v8639_v0 }
 0x121   : > { %v921_v28 = vadd.f32 %v8375_v35, %v809_v16  ;;  %1349 = vmatpush.bf16.msrb.mxu1 %v1032_v19  ;;  %v961_v48 = vmax.f32 %v897_v47, 0.0  ;;  %v962_v12 = vmax.f32 %v898_v25, 0.0  ;;  %v12599_v4 = vmax.f32 %v8619_v54, 0.0 }
 0x122   : > { %v922_v29 = vadd.f32 %v8375_v35, %v810_v52  ;;  %v944_v35 = vmax.f32 %v8636_v44, 0.0  ;;  %v882_v44 = vadd.f32 %v8391_v49, %v8648_v57  ;;  %v927_v33 = vmax.f32 %v8592_v60, 0.0 }
 0x123   : > { %v985_v2 = vmax.f32 %v921_v28, 0.0  ;;  %1301 = vmatpush.bf16.msrb.mxu0 %v1023_v39  ;;  %v1015_v20 = vpack.c.bf16 %v12599_v4, %v943_v42  ;;  %v928_v0 = vmax.f32 %v8595_v45, 0.0  ;;  %v873_v49 = vadd.f32 %v8426_v10, %v8616_v34  ;;  %v8759_v39 = vld [vmem:[%s12402_s4 + $0x28] sm:$0xff]  ;;  %v8782_v42 = vld [vmem:[%s12402_s4 + $0x30] sm:$0xff] }
 0x124   : > { %v986_v38 = vmax.f32 %v922_v29, 0.0  ;;  %v1016_v18 = vpack.c.bf16 %v952_v7, %v944_v35  ;;  %v874_v57 = vadd.f32 %v8426_v10, %v8624_v11  ;;  %v953_v19 = vmax.f32 %v889_v13, 0.0  ;;  %v8734_v10 = vld [vmem:[%s12402_s4 + $0x20] sm:$0xff]  ;;  %v8740_v7 = vpop.permute.xlu2 %1784 }
 0x125   : > { %v1033_v61 = vpack.c.bf16 %v985_v2, %v977_v31  ;;  %1350 = vmatpush.bf16.msrb.mxu1 %v1024_v59  ;;  %v954_v55 = vmax.f32 %v890_v3, 0.0  ;;  %v1025_v50 = vpack.c.bf16 %v969_v43, %v961_v48  ;;  %v1026_v63 = vpack.c.bf16 %v970_v36, %v962_v12  ;;  %v8736_v32 = vpop.permute.xlu1 %1565  ;;  %12600 = vst [vmem:[#allocation3_spill] sm:$0xff] %v8740_v7  ;;  %v8803_v36 = vld [vmem:[%s12402_s4 + $0x38] sm:$0xff] }
 0x126   : > { %v1034_v58 = vpack.c.bf16 %v986_v38, %v978_v46  ;;  %7620 = vmatmul.msk.bf16.gmra.mxu2 %vm1075_vm3, %v8672_v14  ;;  %v865_v54 = vadd.f32 %v8400_v56, %v8599_v62  ;;  %v866_v60 = vadd.f32 %v8400_v56, %v8603_v6  ;;  %v945_v41 = vmax.f32 %v881_v9, 0.0  ;;  %v8738_v56 = vpop.permute.xlu0 %1560 }
 0x127   : > { %7628 = vmatmul.msk.bf16.gmra.mxu3 %vm1075_vm3, %v8672_v14  ;;  %1398 = vmatpush.bf16.msrb.mxu2 %v1033_v61  ;;  %v946_v45 = vmax.f32 %v882_v44, 0.0  ;;  %v1007_v34 = vpack.c.bf16 %v935_v15, %v927_v33  ;;  %v1008_v16 = vpack.c.bf16 %v936_v53, %v928_v0  ;;  %v937_v11 = vmax.f32 %v873_v49, 0.0 }
 0x128   : > { %1447 = vmatpush.bf16.msrb.mxu3 %v1034_v58  ;;  %1302 = vmatpush.bf16.msrb.mxu0 %v1015_v20  ;;  %v938_v52 = vmax.f32 %v874_v57, 0.0  ;;  %v1017_v23 = vpack.c.bf16 %v953_v19, %v945_v41  ;;  %v929_v6 = vmax.f32 %v865_v54, 0.0  ;;  %v930_v30 = vmax.f32 %v866_v60, 0.0 }
 0x129   : > { %1351 = vmatpush.bf16.msrb.mxu1 %v1016_v18  ;;  %v1018_v62 = vpack.c.bf16 %v954_v55, %v946_v45 }
 0x12a   : > { %v1009_v24 = vpack.c.bf16 %v937_v11, %v929_v6  ;;  %v1010_v28 = vpack.c.bf16 %v938_v52, %v930_v30 }
 0x12b   : > { %1399 = vmatpush.bf16.msrb.mxu2 %v1025_v50 }
 0x12c   : > { %1448 = vmatpush.bf16.msrb.mxu3 %v1026_v63  ;;  %1303 = vmatpush.bf16.msrb.mxu0 %v1007_v34  ;;  %v8754_v25 = vpop.permute.xlu2 %1555 }
 0x12d   : > { %1352 = vmatpush.bf16.msrb.mxu1 %v1008_v16  ;;  %v8750_v29 = vpop.permute.xlu1 %1550 }
 0x12e   : > { %7605 = vmatmul.msk.bf16.gmra.mxu0 %vm1075_vm3, %v8734_v10  ;;  %v8752_v47 = vpop.permute.xlu0 %1789 }
 0x12f   : > { %1400 = vmatpush.bf16.msrb.mxu2 %v1017_v23  ;;  %12601 = vst [vmem:[#allocation4_spill] sm:$0xff] %v8752_v47 }
 0x130   : > { %1449 = vmatpush.bf16.msrb.mxu3 %v1018_v62  ;;  %7613 = vmatmul.msk.bf16.gmra.mxu1 %vm1075_vm3, %v8734_v10 }
 0x133   : > { %1401 = vmatpush.bf16.msrb.mxu2 %v1009_v24 }
 0x134   : > { %1450 = vmatpush.bf16.msrb.mxu3 %v1010_v28  ;;  %v8769_v46 = vpop.permute.xlu2 %1540 }
 0x135   : > { %v8765_v59 = vpop.permute.xlu1 %1779  ;;  %12604 = vst [vmem:[#allocation7_spill] sm:$0xff] %v8769_v46 }
 0x136   : > { %7621 = vmatmul.msk.bf16.gmra.mxu2 %vm1075_vm3, %v8734_v10  ;;  %12602 = vst [vmem:[#allocation5_spill] sm:$0xff] %v8765_v59  ;;  %v8767_v31 = vpop.permute.xlu0 %1774 }
 0x137   : > { %7629 = vmatmul.msk.bf16.gmra.mxu3 %vm1075_vm3, %v8734_v10  ;;  %12603 = vst [vmem:[#allocation6_spill] sm:$0xff] %v8767_v31 }
 0x13c   : > { %v8784_v35 = vpop.permute.xlu2 %1769 }
 0x13d   : > { %v8775_v2 = vpop.permute.xlu1 %1764  ;;  %12607 = vst [vmem:[#allocation10_spill] sm:$0xff] %v8784_v35 }
 0x13e   : > { %7606 = vmatmul.msk.bf16.gmra.mxu0 %vm1075_vm3, %v8759_v39  ;;  %12605 = vst [vmem:[#allocation8_spill] sm:$0xff] %v8775_v2  ;;  %v8777_v38 = vpop.permute.xlu0 %1545 }
 0x13f   : > { %12606 = vst [vmem:[#allocation9_spill] sm:$0xff] %v8777_v38 }
 0x140   : > { %7614 = vmatmul.msk.bf16.gmra.mxu1 %vm1075_vm3, %v8759_v39 }
 0x144   : > { %v8798_v43 = vpop.permute.xlu2 %1754 }
 0x145   : > { %v8790_v13 = vpop.permute.xlu1 %1535  ;;  %12610 = vst [vmem:[#allocation13_spill] sm:$0xff] %v8798_v43 }
 0x146   : > { %7622 = vmatmul.msk.bf16.gmra.mxu2 %vm1075_vm3, %v8759_v39  ;;  %12608 = vst [vmem:[#allocation11_spill] sm:$0xff] %v8790_v13  ;;  %v8792_v3 = vpop.permute.xlu0 %1530 }
 0x147   : > { %7630 = vmatmul.msk.bf16.gmra.mxu3 %vm1075_vm3, %v8759_v39  ;;  %12609 = vst [vmem:[#allocation12_spill] sm:$0xff] %v8792_v3 }
 0x14c   : > { %v8813_v15 = vpop.permute.xlu2 %1525 }
 0x14d   : > { %v8805_v61 = vpop.permute.xlu1 %1520  ;;  %12613 = vst [vmem:[#allocation16_spill] sm:$0xff] %v8813_v15 }
 0x14e   : > { %7607 = vmatmul.msk.bf16.gmra.mxu0 %vm1075_vm3, %v8782_v42  ;;  %12611 = vst [vmem:[#allocation14_spill] sm:$0xff] %v8805_v61  ;;  %v8807_v58 = vpop.permute.xlu0 %1759 }
 0x14f   : > { %12612 = vst [vmem:[#allocation15_spill] sm:$0xff] %v8807_v58 }
 0x150   : > { %7615 = vmatmul.msk.bf16.gmra.mxu1 %vm1075_vm3, %v8782_v42 }
 0x154   : > { %v8823_v44 = vpop.permute.xlu2 %1510 }
 0x155   : > { %v8819_v53 = vpop.permute.xlu1 %1749  ;;  %12616 = vst [vmem:[#allocation19_spill] sm:$0xff] %v8823_v44 }
 0x156   : > { %7623 = vmatmul.msk.bf16.gmra.mxu2 %vm1075_vm3, %v8782_v42  ;;  %12614 = vst [vmem:[#allocation17_spill] sm:$0xff] %v8819_v53  ;;  %v8821_v9 = vpop.permute.xlu0 %1744 }
 0x157   : > { %7631 = vmatmul.msk.bf16.gmra.mxu3 %vm1075_vm3, %v8782_v42  ;;  %12615 = vst [vmem:[#allocation18_spill] sm:$0xff] %v8821_v9 }
 0x15c   : > { %v8843_v63 = vpop.permute.xlu2 %1739 }
 0x15d   : > { %v8831_v18 = vpop.permute.xlu1 %1734  ;;  %12619 = vst [vmem:[#allocation22_spill] sm:$0xff] %v8843_v63 }
 0x15e   : > { %7608 = vmatmul.msk.bf16.gmra.mxu0 %vm1075_vm3, %v8803_v36  ;;  %12617 = vst [vmem:[#allocation20_spill] sm:$0xff] %v8831_v18  ;;  %v8833_v33 = vpop.permute.xlu0 %1515 }
 0x15f   : > { %12618 = vst [vmem:[#allocation21_spill] sm:$0xff] %v8833_v33 }
 0x160   : > { %7616 = vmatmul.msk.bf16.gmra.mxu1 %vm1075_vm3, %v8803_v36 }
 0x166   : > { %7624 = vmatmul.msk.bf16.gmra.mxu2 %vm1075_vm3, %v8803_v36 }
 0x167   : > { %7632 = vmatmul.msk.bf16.gmra.mxu3 %vm1075_vm3, %v8803_v36 }
 0x16b   : > { %v1109_v48 = vpop.f32.mrf.mxu0 }
 0x16c   : > { %v1588_v4 = vmul.f32 %v8823_v44, %v1109_v48 }
 0x16d   : > { %v1158_v12 = vpop.f32.mrf.mxu1 }
 0x16e   : > { %7633 = vmatmul.msk.bf16.vlgmr.msrb.gmra.mxu0 %vm1075_vm3, %v8534_v5  ;;  %v1589_v20 = vmul.f32 %v8823_v44, %v1158_v12  ;;  %v1812_v0 = vadd.f32 %v8831_v18, %v1588_v4 }
 0x170   : > { %7641 = vmatmul.msk.bf16.vlgmr.msrb.gmra.mxu1 %vm1075_vm3, %v8534_v5  ;;  %v1813_v19 = vadd.f32 %v8831_v18, %v1589_v20  ;;  %v1940_v34 = vmax.f32 %v1812_v0, 0.0 }
 0x172   : > { %v1941_v16 = vmax.f32 %v1813_v19, 0.0 }
 0x173   : > { %v1111_v49 = vpop.f32.mrf.mxu0 }
 0x174   : > { %v1596_v55 = vmul.f32 %v8833_v33, %v1111_v49 }
 0x175   : > { %v1160_v57 = vpop.f32.mrf.mxu1 }
 0x176   : > { %v1597_v50 = vmul.f32 %v8833_v33, %v1160_v57  ;;  %7649 = vmatmul.msk.bf16.vlgmr.msrb.gmra.mxu2 %vm1075_vm3, %v8534_v5  ;;  %v1820_v54 = vadd.f32 %v8843_v63, %v1596_v55 }
 0x177   : > { %7657 = vmatmul.msk.bf16.vlgmr.msrb.gmra.mxu3 %vm1075_vm3, %v8534_v5 }
 0x178   : > { %v1821_v60 = vadd.f32 %v8843_v63, %v1597_v50  ;;  %v1948_v11 = vmax.f32 %v1820_v54, 0.0 }
 0x179   : > { %v1207_v41 = vpop.f32.mrf.mxu2 }
 0x17a   : > { %v1256_v45 = vpop.f32.mrf.mxu3  ;;  %v1949_v52 = vmax.f32 %v1821_v60, 0.0  ;;  %v8847_v23 = vpack.c.bf16 %v1948_v11, %v1940_v34  ;;  %v1590_v6 = vmul.f32 %v8823_v44, %v1207_v41 }
 0x17b   : > { %v1591_v5 = vmul.f32 %v8823_v44, %v1256_v45  ;;  %v1114_v30 = vpop.f32.mrf.mxu0 }
 0x17c   : > { %12620 = vst [vmem:[#allocation23_spill] sm:$0xff] %v8847_v23  ;;  %v8849_v62 = vpack.c.bf16 %v1949_v52, %v1941_v16  ;;  %v1814_v28 = vadd.f32 %v8831_v18, %v1590_v6  ;;  %v1604_v12 = vmul.f32 %v8805_v61, %v1114_v30 }
 0x17d   : > { %v1163_v24 = vpop.f32.mrf.mxu1  ;;  %v1815_v48 = vadd.f32 %v8831_v18, %v1591_v5 }
 0x17e   : > { %12621 = vst [vmem:[#allocation24_spill] sm:$0xff] %v8849_v62  ;;  %7634 = vmatmul.msk.bf16.gmra.mxu0 %vm1075_vm3, %v8549_v21  ;;  %v1605_v4 = vmul.f32 %v8805_v61, %v1163_v24  ;;  %v1942_v50 = vmax.f32 %v1814_v28, 0.0  ;;  %v1828_v60 = vadd.f32 %v8821_v9, %v1604_v12 }
 0x17f   : > { %v1943_v54 = vmax.f32 %v1815_v48, 0.0 }
 0x180   : > { %7642 = vmatmul.msk.bf16.gmra.mxu1 %vm1075_vm3, %v8549_v21  ;;  %v1829_v41 = vadd.f32 %v8821_v9, %v1605_v4  ;;  %v1956_v4 = vmax.f32 %v1828_v60, 0.0 }
 0x181   : > { %v1209_v20 = vpop.f32.mrf.mxu2 }
 0x182   : > { %v1258_v0 = vpop.f32.mrf.mxu3  ;;  %v1598_v49 = vmul.f32 %v8833_v33, %v1209_v20  ;;  %v1957_v20 = vmax.f32 %v1829_v41, 0.0 }
 0x183   : > { %v1599_v57 = vmul.f32 %v8833_v33, %v1258_v0  ;;  %v1116_v45 = vpop.f32.mrf.mxu0 }
 0x184   : > { %v1822_v19 = vadd.f32 %v8843_v63, %v1598_v49  ;;  %v1612_v52 = vmul.f32 %v8813_v15, %v1116_v45 }
 0x185   : > { %v1823_v55 = vadd.f32 %v8843_v63, %v1599_v57  ;;  %v1165_v34 = vpop.f32.mrf.mxu1 }
 0x186   : > { %v1950_v16 = vmax.f32 %v1822_v19, 0.0  ;;  %v1613_v6 = vmul.f32 %v8813_v15, %v1165_v34  ;;  %7650 = vmatmul.msk.bf16.gmra.mxu2 %vm1075_vm3, %v8549_v21  ;;  %v1836_v24 = vadd.f32 %v8819_v53, %v1612_v52 }
 0x187   : > { %v1951_v11 = vmax.f32 %v1823_v55, 0.0  ;;  %7658 = vmatmul.msk.bf16.gmra.mxu3 %vm1075_vm3, %v8549_v21 }
 0x188   : > { %v8873_v5 = vpack.c.bf16 %v1950_v16, %v1942_v50  ;;  %v1837_v28 = vadd.f32 %v8819_v53, %v1613_v6  ;;  %v1964_v0 = vmax.f32 %v1836_v24, 0.0 }
 0x189   : > { %v8875_v30 = vpack.c.bf16 %v1951_v11, %v1943_v54  ;;  %v1212_v48 = vpop.f32.mrf.mxu2 }
 0x18a   : > { %12622 = vst [vmem:[#allocation25_spill] sm:$0xff] %v8873_v5  ;;  %v1261_v12 = vpop.f32.mrf.mxu3  ;;  %v1965_v49 = vmax.f32 %v1837_v28, 0.0  ;;  %v8879_v57 = vpack.c.bf16 %v1964_v0, %v1956_v4  ;;  %v1606_v21 = vmul.f32 %v8805_v61, %v1212_v48 }
 0x18b   : > { %12623 = vst [vmem:[#allocation26_spill] sm:$0xff] %v8875_v30  ;;  %v1607_v55 = vmul.f32 %v8805_v61, %v1261_v12  ;;  %v1119_v50 = vpop.f32.mrf.mxu0 }
 0x18c   : > { %12624 = vst [vmem:[#allocation27_spill] sm:$0xff] %v8879_v57  ;;  %v8881_v19 = vpack.c.bf16 %v1965_v49, %v1957_v20  ;;  %v1830_v60 = vadd.f32 %v8821_v9, %v1606_v21  ;;  %v1620_v45 = vmul.f32 %v8792_v3, %v1119_v50 }
 0x18d   : > { %v1168_v54 = vpop.f32.mrf.mxu1  ;;  %v1831_v41 = vadd.f32 %v8821_v9, %v1607_v55 }
 0x18e   : > { %12625 = vst [vmem:[#allocation28_spill] sm:$0xff] %v8881_v19  ;;  %7635 = vmatmul.msk.bf16.gmra.mxu0 %vm1075_vm3, %v8570_v8  ;;  %v1621_v34 = vmul.f32 %v8792_v3, %v1168_v54  ;;  %v1958_v48 = vmax.f32 %v1830_v60, 0.0  ;;  %v1844_v4 = vadd.f32 %v8798_v43, %v1620_v45 }
 0x18f   : > { %v1959_v12 = vmax.f32 %v1831_v41, 0.0 }
 0x190   : > { %7643 = vmatmul.msk.bf16.gmra.mxu1 %vm1075_vm3, %v8570_v8  ;;  %v1845_v20 = vadd.f32 %v8798_v43, %v1621_v34 }
 0x191   : > { %v1214_v16 = vpop.f32.mrf.mxu2 }
 0x192   : > { %v1263_v11 = vpop.f32.mrf.mxu3  ;;  %v1614_v52 = vmul.f32 %v8813_v15, %v1214_v16 }
 0x193   : > { %v1615_v6 = vmul.f32 %v8813_v15, %v1263_v11  ;;  %v1121_v0 = vpop.f32.mrf.mxu0 }
 0x194   : > { %v1838_v24 = vadd.f32 %v8819_v53, %v1614_v52  ;;  %v1628_v50 = vmul.f32 %v8790_v13, %v1121_v0  ;;  %v1972_v52 = vmax.f32 %v1844_v4, 0.0 }
 0x195   : > { %v1839_v28 = vadd.f32 %v8819_v53, %v1615_v6  ;;  %v1170_v49 = vpop.f32.mrf.mxu1  ;;  %v1973_v6 = vmax.f32 %v1845_v20, 0.0 }
 0x196   : > { %v1966_v21 = vmax.f32 %v1838_v24, 0.0  ;;  %v1629_v54 = vmul.f32 %v8790_v13, %v1170_v49  ;;  %7651 = vmatmul.msk.bf16.gmra.mxu2 %vm1075_vm3, %v8570_v8  ;;  %v1852_v45 = vadd.f32 %v8807_v58, %v1628_v50 }
 0x197   : > { %v1967_v55 = vmax.f32 %v1839_v28, 0.0  ;;  %7659 = vmatmul.msk.bf16.gmra.mxu3 %vm1075_vm3, %v8570_v8 }
 0x198   : > { %v8905_v60 = vpack.c.bf16 %v1966_v21, %v1958_v48  ;;  %v1853_v34 = vadd.f32 %v8807_v58, %v1629_v54  ;;  %v1980_v24 = vmax.f32 %v1852_v45, 0.0 }
 0x199   : > { %v8907_v41 = vpack.c.bf16 %v1967_v55, %v1959_v12  ;;  %v1217_v16 = vpop.f32.mrf.mxu2 }
 0x19a   : > { %12626 = vst [vmem:[#allocation29_spill] sm:$0xff] %v8905_v60  ;;  %v1266_v11 = vpop.f32.mrf.mxu3  ;;  %v1981_v28 = vmax.f32 %v1853_v34, 0.0  ;;  %v8911_v0 = vpack.c.bf16 %v1980_v24, %v1972_v52  ;;  %v1622_v8 = vmul.f32 %v8792_v3, %v1217_v16 }
 0x19b   : > { %12627 = vst [vmem:[#allocation30_spill] sm:$0xff] %v8907_v41  ;;  %v1623_v48 = vmul.f32 %v8792_v3, %v1266_v11  ;;  %v1124_v12 = vpop.f32.mrf.mxu0 }
 0x19c   : > { %12628 = vst [vmem:[#allocation31_spill] sm:$0xff] %v8911_v0  ;;  %v8913_v49 = vpack.c.bf16 %v1981_v28, %v1973_v6  ;;  %v1846_v4 = vadd.f32 %v8798_v43, %v1622_v8  ;;  %v1636_v55 = vmul.f32 %v8769_v46, %v1124_v12 }
 0x19d   : > { %v1173_v21 = vpop.f32.mrf.mxu1  ;;  %v1847_v20 = vadd.f32 %v8798_v43, %v1623_v48 }
 0x19e   : > { %12629 = vst [vmem:[#allocation32_spill] sm:$0xff] %v8913_v49  ;;  %7636 = vmatmul.msk.bf16.gmra.mxu0 %vm1075_vm3, %v8672_v14  ;;  %v1637_v50 = vmul.f32 %v8769_v46, %v1173_v21  ;;  %v1974_v6 = vmax.f32 %v1846_v4, 0.0  ;;  %v1860_v28 = vadd.f32 %v8775_v2, %v1636_v55 }
 0x19f   : > { %v1975_v24 = vmax.f32 %v1847_v20, 0.0 }
 0x1a0   : > { %7644 = vmatmul.msk.bf16.gmra.mxu1 %vm1075_vm3, %v8672_v14  ;;  %v1861_v8 = vadd.f32 %v8775_v2, %v1637_v50 }
 0x1a1   : > { %v1219_v54 = vpop.f32.mrf.mxu2 }
 0x1a2   : > { %v1268_v45 = vpop.f32.mrf.mxu3  ;;  %v1630_v34 = vmul.f32 %v8790_v13, %v1219_v54 }
 0x1a3   : > { %v1631_v16 = vmul.f32 %v8790_v13, %v1268_v45  ;;  %v1126_v48 = vpop.f32.mrf.mxu0 }
 0x1a4   : > { %v1854_v11 = vadd.f32 %v8807_v58, %v1630_v34  ;;  %v1644_v9 = vmul.f32 %v8777_v38, %v1126_v48 }
 0x1a5   : > { %v1855_v52 = vadd.f32 %v8807_v58, %v1631_v16  ;;  %v1175_v12 = vpop.f32.mrf.mxu1  ;;  %v1988_v16 = vmax.f32 %v1860_v28, 0.0 }
 0x1a6   : > { %v1982_v43 = vmax.f32 %v1854_v11, 0.0  ;;  %v1645_v54 = vmul.f32 %v8777_v38, %v1175_v12  ;;  %7652 = vmatmul.msk.bf16.gmra.mxu2 %vm1075_vm3, %v8672_v14  ;;  %v1868_v55 = vadd.f32 %v8784_v35, %v1644_v9  ;;  %v1989_v11 = vmax.f32 %v1861_v8, 0.0 }
 0x1a7   : > { %v1983_v21 = vmax.f32 %v1855_v52, 0.0  ;;  %7660 = vmatmul.msk.bf16.gmra.mxu3 %vm1075_vm3, %v8672_v14 }
 0x1a8   : > { %v8937_v4 = vpack.c.bf16 %v1982_v43, %v1974_v6  ;;  %v1869_v50 = vadd.f32 %v8784_v35, %v1645_v54  ;;  %v1996_v52 = vmax.f32 %v1868_v55, 0.0 }
 0x1a9   : > { %v8939_v20 = vpack.c.bf16 %v1983_v21, %v1975_v24  ;;  %v1222_v45 = vpop.f32.mrf.mxu2 }
 0x1aa   : > { %12630 = vst [vmem:[#allocation33_spill] sm:$0xff] %v8937_v4  ;;  %v1271_v34 = vpop.f32.mrf.mxu3  ;;  %v1997_v48 = vmax.f32 %v1869_v50, 0.0  ;;  %v8943_v12 = vpack.c.bf16 %v1996_v52, %v1988_v16  ;;  %v1638_v43 = vmul.f32 %v8769_v46, %v1222_v45 }
 0x1ab   : > { %12631 = vst [vmem:[#allocation34_spill] sm:$0xff] %v8939_v20  ;;  %v1129_v53 = vpop.f32.mrf.mxu0  ;;  %v1639_v6 = vmul.f32 %v8769_v46, %v1271_v34 }
 0x1ac   : > { %12632 = vst [vmem:[#allocation35_spill] sm:$0xff] %v8943_v12  ;;  %v8945_v58 = vpack.c.bf16 %v1997_v48, %v1989_v11  ;;  %v1862_v28 = vadd.f32 %v8775_v2, %v1638_v43  ;;  %v1652_v63 = vmul.f32 %v8750_v29, %v1129_v53 }
 0x1ad   : > { %v1178_v14 = vpop.f32.mrf.mxu1  ;;  %v1863_v8 = vadd.f32 %v8775_v2, %v1639_v6 }
 0x1ae   : > { %12633 = vst [vmem:[#allocation36_spill] sm:$0xff] %v8945_v58  ;;  %7637 = vmatmul.msk.bf16.gmra.mxu0 %vm1075_vm3, %v8734_v10  ;;  %v1990_v16 = vmax.f32 %v1862_v28, 0.0  ;;  %v1653_v61 = vmul.f32 %v8750_v29, %v1178_v14  ;;  %v9012_v33 = vadd.f32 %v8767_v31, %v1652_v63 }
 0x1af   : > { %v1991_v11 = vmax.f32 %v1863_v8, 0.0 }
 0x1b0   : > { %7645 = vmatmul.msk.bf16.gmra.mxu1 %vm1075_vm3, %v8734_v10  ;;  %v9017_v5 = vadd.f32 %v8767_v31, %v1653_v61 }
 0x1b1   : > { %v1224_v9 = vpop.f32.mrf.mxu2 }
 0x1b2   : > { %v1273_v24 = vpop.f32.mrf.mxu3  ;;  %v1646_v21 = vmul.f32 %v8777_v38, %v1224_v9 }
 0x1b3   : > { %v1647_v54 = vmul.f32 %v8777_v38, %v1273_v24  ;;  %v1131_v45 = vpop.f32.mrf.mxu0 }
 0x1b4   : > { %v1870_v55 = vadd.f32 %v8784_v35, %v1646_v21 }
 0x1b5   : > { %v1871_v50 = vadd.f32 %v8784_v35, %v1647_v54  ;;  %v1180_v34 = vpop.f32.mrf.mxu1 }
 0x1b6   : > { %v1998_v52 = vmax.f32 %v1870_v55, 0.0  ;;  %7653 = vmatmul.msk.bf16.gmra.mxu2 %vm1075_vm3, %v8734_v10 }
 0x1b7   : > { %v1999_v48 = vmax.f32 %v1871_v50, 0.0  ;;  %7661 = vmatmul.msk.bf16.gmra.mxu3 %vm1075_vm3, %v8734_v10 }
 0x1b8   : > { %v8963_v43 = vpack.c.bf16 %v1998_v52, %v1990_v16 }
 0x1b9   : > { %v8965_v6 = vpack.c.bf16 %v1999_v48, %v1991_v11  ;;  %v8967_v9 = vpop.f32.mrf.mxu2 }
 0x1ba   : > { %12634 = vst [vmem:[#allocation37_spill] sm:$0xff] %v8963_v43  ;;  %v8969_v24 = vpop.f32.mrf.mxu3 }
 0x1bb   : > { %12635 = vst [vmem:[#allocation38_spill] sm:$0xff] %v8965_v6  ;;  %v1134_v21 = vpop.f32.mrf.mxu0 }
 0x1bd   : > { %v1183_v54 = vpop.f32.mrf.mxu1 }
 0x1be   : > { %7638 = vmatmul.msk.bf16.gmra.mxu0 %vm1075_vm3, %v8759_v39 }
 0x1c0   : > { %7646 = vmatmul.msk.bf16.gmra.mxu1 %vm1075_vm3, %v8759_v39 }
 0x1c1   : > { %v8975_v28 = vpop.f32.mrf.mxu2 }
 0x1c2   : > { %v8977_v8 = vpop.f32.mrf.mxu3 }
 0x1c3   : > { %v1136_v10 = vpop.f32.mrf.mxu0 }
 0x1c5   : > { %v1185_v55 = vpop.f32.mrf.mxu1 }
 0x1c6   : > { %7654 = vmatmul.msk.bf16.gmra.mxu2 %vm1075_vm3, %v8759_v39  ;;  %v1677_v61 = vmul.f32 %v8736_v32, %v1185_v55 }
 0x1c7   : > { %7662 = vmatmul.msk.bf16.gmra.mxu3 %vm1075_vm3, %v8759_v39 }
 0x1c9   : > { %v8983_v50 = vpop.f32.mrf.mxu2 }
 0x1ca   : > { %v8985_v16 = vpop.f32.mrf.mxu3 }
 0x1cb   : > { %v1139_v11 = vpop.f32.mrf.mxu0 }
 0x1cc   : > { %v1684_v41 = vmul.f32 %v8667_v1, %v1139_v11 }
 0x1cd   : > { %v1188_v52 = vpop.f32.mrf.mxu1 }
 0x1ce   : > { %7639 = vmatmul.msk.bf16.gmra.mxu0 %vm1075_vm3, %v8782_v42  ;;  %v1685_v14 = vmul.f32 %v8667_v1, %v1188_v52  ;;  %v1668_v52 = vmul.f32 %v8738_v56, %v1134_v21  ;;  %v1901_v21 = vadd.f32 %v8752_v47, %v1677_v61 }
 0x1d0   : > { %7647 = vmatmul.msk.bf16.gmra.mxu1 %vm1075_vm3, %v8782_v42 }
 0x1d1   : > { %v8991_v48 = vpop.f32.mrf.mxu2 }
 0x1d2   : > { %v8993_v2 = vpop.f32.mrf.mxu3 }
 0x1d3   : > { %v1141_v35 = vpop.f32.mrf.mxu0 }
 0x1d4   : > { %v1692_v30 = vmul.f32 %v8701_v37, %v1141_v35  ;;  %v1661_v35 = vmul.f32 %v8754_v25, %v1180_v34  ;;  %v1909_v34 = vadd.f32 %v8699_v40, %v1685_v14  ;;  %v1892_v14 = vadd.f32 %v8740_v7, %v1668_v52 }
 0x1d5   : > { %v1190_v46 = vpop.f32.mrf.mxu1 }
 0x1d6   : > { %7655 = vmatmul.msk.bf16.gmra.mxu2 %vm1075_vm3, %v8782_v42  ;;  %v1693_v53 = vmul.f32 %v8701_v37, %v1190_v46  ;;  %v1660_v46 = vmul.f32 %v8754_v25, %v1131_v45  ;;  %v1908_v45 = vadd.f32 %v8699_v40, %v1684_v41 }
 0x1d7   : > { %7663 = vmatmul.msk.bf16.gmra.mxu3 %vm1075_vm3, %v8782_v42 }
 0x1d9   : > { %v8999_v39 = vpop.f32.mrf.mxu2 }
 0x1da   : > { %v9001_v18 = vpop.f32.mrf.mxu3 }
 0x1db   : > { %v1144_v38 = vpop.f32.mrf.mxu0 }
 0x1dc   : > { %v1700_v13 = vmul.f32 %v8578_v27, %v1144_v38 }
 0x1dd   : > { %v1193_v3 = vpop.f32.mrf.mxu1 }
 0x1de   : > { %7640 = vmatmul.msk.bf16.gmra.mxu0 %vm1075_vm3, %v8803_v36  ;;  %v1701_v44 = vmul.f32 %v8578_v27, %v1193_v3  ;;  %v1924_v38 = vadd.f32 %v8657_v26, %v1700_v13  ;;  %v1676_v13 = vmul.f32 %v8736_v32, %v1136_v10 }
 0x1e0   : > { %7648 = vmatmul.msk.bf16.gmra.mxu1 %vm1075_vm3, %v8803_v36  ;;  %v1925_v3 = vadd.f32 %v8657_v26, %v1701_v44  ;;  %v1916_v44 = vadd.f32 %v8707_v22, %v1692_v30  ;;  %v2052_v43 = vmax.f32 %v1924_v38, 0.0 }
 0x1e1   : > { %v1239_v15 = vpop.f32.mrf.mxu2 }
 0x1e2   : > { %v1288_v42 = vpop.f32.mrf.mxu3  ;;  %v2053_v55 = vmax.f32 %v1925_v3, 0.0  ;;  %v2044_v23 = vmax.f32 %v1916_v44, 0.0 }
 0x1e3   : > { %v1146_v60 = vpop.f32.mrf.mxu0 }
 0x1e4   : > { %v1708_v63 = vmul.f32 %v8589_v51, %v1146_v60  ;;  %v1917_v60 = vadd.f32 %v8707_v22, %v1693_v53  ;;  %v1884_v53 = vadd.f32 %v8765_v59, %v1660_v46 }
 0x1e5   : > { %v1195_v20 = vpop.f32.mrf.mxu1 }
 0x1e6   : > { %v1709_v4 = vmul.f32 %v8589_v51, %v1195_v20  ;;  %7656 = vmatmul.msk.bf16.gmra.mxu2 %vm1075_vm3, %v8803_v36  ;;  %v1932_v20 = vadd.f32 %v8655_v17, %v1708_v63  ;;  %v1885_v63 = vadd.f32 %v8765_v59, %v1661_v35  ;;  %v2036_v35 = vmax.f32 %v1908_v45, 0.0 }
 0x1e7   : > { %7664 = vmatmul.msk.bf16.gmra.mxu3 %vm1075_vm3, %v8803_v36  ;;  %v1669_v36 = vmul.f32 %v8738_v56, %v1183_v54  ;;  %v2045_v54 = vmax.f32 %v1917_v60, 0.0  ;;  %v2012_v44 = vmax.f32 %v1884_v53, 0.0  ;;  %v1694_v45 = vmul.f32 %v8701_v37, %v1239_v15 }
 0x1e8   : > { %v1933_v11 = vadd.f32 %v8655_v17, %v1709_v4  ;;  %v2060_v62 = vmax.f32 %v1932_v20, 0.0  ;;  %v1900_v4 = vadd.f32 %v8752_v47, %v1676_v13  ;;  %v2037_v13 = vmax.f32 %v1909_v34, 0.0 }
 0x1e9   : > { %v1242_v6 = vpop.f32.mrf.mxu2  ;;  %v1893_v46 = vadd.f32 %v8740_v7, %v1669_v36  ;;  %v9061_v52 = vpack.c.bf16 %v2044_v23, %v2036_v35  ;;  %v2020_v36 = vmax.f32 %v1892_v14, 0.0  ;;  %v1695_v34 = vmul.f32 %v8701_v37, %v1288_v42 }
 0x1ea   : > { %v1291_v10 = vpop.f32.mrf.mxu3  ;;  %v2061_v30 = vmax.f32 %v1933_v11, 0.0  ;;  %v9045_v19 = vpack.c.bf16 %v2060_v62, %v2052_v43  ;;  %v1702_v38 = vmul.f32 %v8578_v27, %v1242_v6  ;;  %v2004_v62 = vmax.f32 %v9012_v33, 0.0 }
 0x1eb   : > { %v9051_v3 = vpop.f32.mrf.mxu0  ;;  %v1703_v61 = vmul.f32 %v8578_v27, %v1291_v10  ;;  %v2005_v43 = vmax.f32 %v9017_v5, 0.0  ;;  %v2013_v6 = vmax.f32 %v1885_v63, 0.0  ;;  %v2028_v60 = vmax.f32 %v1900_v4, 0.0  ;;  %12638 = vst [vmem:[#allocation41_spill] sm:$0xff] %v9061_v52 }
 0x1ec   : > { %12636 = vst [vmem:[#allocation39_spill] sm:$0xff] %v9045_v19  ;;  %v9047_v41 = vpack.c.bf16 %v2061_v30, %v2053_v55  ;;  %2392 = vmatpush.bf16.msra.mxu0 %v9045_v19  ;;  %v2029_v11 = vmax.f32 %v1901_v21, 0.0  ;;  %v9063_v55 = vpack.c.bf16 %v2045_v54, %v2037_v13  ;;  %v1926_v10 = vadd.f32 %v8657_v26, %v1702_v38 }
 0x1ed   : > { %v9053_v20 = vpop.f32.mrf.mxu1  ;;  %v2021_v33 = vmax.f32 %v1893_v46, 0.0  ;;  %v1927_v5 = vadd.f32 %v8657_v26, %v1703_v61  ;;  %v9073_v23 = vpack.c.bf16 %v2012_v44, %v2004_v62  ;;  %v9075_v15 = vpack.c.bf16 %v2013_v6, %v2005_v43 }
 0x1ee   : > { %12637 = vst [vmem:[#allocation40_spill] sm:$0xff] %v9047_v41  ;;  %2481 = vmatpush.bf16.msra.mxu1 %v9047_v41  ;;  %v1686_v42 = vmul.f32 %v8667_v1, %v8999_v39  ;;  %v1687_v4 = vmul.f32 %v8667_v1, %v9001_v18  ;;  %v9081_v21 = vpack.c.bf16 %v2028_v60, %v2020_v36  ;;  %v2054_v61 = vmax.f32 %v1926_v10, 0.0 }
 0x1ef   : > { %12639 = vst [vmem:[#allocation42_spill] sm:$0xff] %v9063_v55  ;;  %v9083_v54 = vpack.c.bf16 %v2029_v11, %v2021_v33  ;;  %v1678_v38 = vmul.f32 %v8736_v32, %v8991_v48  ;;  %v1679_v46 = vmul.f32 %v8736_v32, %v8993_v2  ;;  %v1918_v35 = vadd.f32 %v8707_v22, %v1694_v45 }
 0x1f0   : > { %2393 = vmatpush.bf16.msra.mxu0 %v9061_v52  ;;  %12640 = vst [vmem:[#allocation43_spill] sm:$0xff] %v9073_v23  ;;  %v1919_v39 = vadd.f32 %v8707_v22, %v1695_v34  ;;  %v2055_v62 = vmax.f32 %v1927_v5, 0.0  ;;  %v1670_v48 = vmul.f32 %v8738_v56, %v8983_v50  ;;  %v1671_v2 = vmul.f32 %v8738_v56, %v8985_v16 }
 0x1f1   : > { %v1244_v30 = vpop.f32.mrf.mxu2  ;;  %12641 = vst [vmem:[#allocation44_spill] sm:$0xff] %v9075_v15  ;;  %v1910_v6 = vadd.f32 %v8699_v40, %v1686_v42  ;;  %v1911_v60 = vadd.f32 %v8699_v40, %v1687_v4  ;;  %v1662_v11 = vmul.f32 %v8754_v25, %v8975_v28  ;;  %v1663_v36 = vmul.f32 %v8754_v25, %v8977_v8 }
 0x1f2   : > { %v1293_v41 = vpop.f32.mrf.mxu3  ;;  %v1710_v53 = vmul.f32 %v8589_v51, %v1244_v30  ;;  %2482 = vmatpush.bf16.msra.mxu1 %v9063_v55  ;;  %12642 = vst [vmem:[#allocation45_spill] sm:$0xff] %v9081_v21  ;;  %v1902_v10 = vadd.f32 %v8752_v47, %v1678_v38  ;;  %v1903_v50 = vadd.f32 %v8752_v47, %v1679_v46  ;;  %v2046_v30 = vmax.f32 %v1918_v35, 0.0 }
 0x1f3   : > { %v1711_v63 = vmul.f32 %v8589_v51, %v1293_v41  ;;  %12643 = vst [vmem:[#allocation46_spill] sm:$0xff] %v9083_v54  ;;  %v9093_v13 = vpop.f32.mrf.mxu0  ;;  %v2047_v16 = vmax.f32 %v1919_v39, 0.0  ;;  %v1654_v28 = vmul.f32 %v8750_v29, %v8967_v9  ;;  %v1655_v8 = vmul.f32 %v8750_v29, %v8969_v24 }
 0x1f4   : > { %v1934_v41 = vadd.f32 %v8655_v17, %v1710_v53  ;;  %2394 = vmatpush.bf16.msra.mxu0 %v9081_v21  ;;  %v1894_v53 = vadd.f32 %v8740_v7, %v1670_v48  ;;  %v2038_v42 = vmax.f32 %v1910_v6, 0.0  ;;  %v2039_v4 = vmax.f32 %v1911_v60, 0.0 }
 0x1f5   : > { %v1935_v14 = vadd.f32 %v8655_v17, %v1711_v63  ;;  %v9095_v18 = vpop.f32.mrf.mxu1  ;;  %v1895_v63 = vadd.f32 %v8740_v7, %v1671_v2  ;;  %v1887_v9 = vadd.f32 %v8765_v59, %v1663_v36  ;;  %v2031_v24 = vmax.f32 %v1903_v50, 0.0 }
 0x1f6   : > { %v2062_v43 = vmax.f32 %v1934_v41, 0.0  ;;  %2483 = vmatpush.bf16.msra.mxu1 %v9083_v54  ;;  %v1886_v41 = vadd.f32 %v8765_v59, %v1662_v11  ;;  %v9131_v38 = vpack.c.bf16 %v2046_v30, %v2038_v42  ;;  %v9133_v46 = vpack.c.bf16 %v2047_v16, %v2039_v4  ;;  %v9176_v4 = vld [vmem:[%s12405_s7] sm:$0xff] }
 0x1f7   : > { %v2063_v44 = vmax.f32 %v1935_v14, 0.0  ;;  %v2030_v14 = vmax.f32 %v1902_v10, 0.0  ;;  %v2015_v2 = vmax.f32 %v1887_v9, 0.0  ;;  %12659 = vst [vmem:[#allocation61_spill] sm:$0xff] %v9176_v4  ;;  %v12661_v9 = vld [vmem:[#allocation24_spill] sm:$0xff]  ;;  %v12705_v59 = vld [vmem:[#allocation18_spill] sm:$0xff] }
 0x1f8   : > { %v9109_v45 = vpack.c.bf16 %v2062_v43, %v2054_v61  ;;  %2395 = vmatpush.bf16.msra.mxu0 %v9073_v23  ;;  %12648 = vst [vmem:[#allocation51_spill] sm:$0xff] %v9131_v38  ;;  %v1878_v61 = vadd.f32 %v8767_v31, %v1654_v28  ;;  %v2022_v43 = vmax.f32 %v1894_v53, 0.0  ;;  %v2014_v48 = vmax.f32 %v1886_v41, 0.0  ;;  %v12656_v53 = vld [vmem:[#allocation28_spill] sm:$0xff]  ;;  %v12660_v41 = vld [vmem:[#allocation23_spill] sm:$0xff] }
 0x1f9   : > { %v9111_v34 = vpack.c.bf16 %v2063_v44, %v2055_v62  ;;  %v9115_v33 = vpop.f32.mrf.mxu2  ;;  %12649 = vst [vmem:[#allocation52_spill] sm:$0xff] %v9133_v46  ;;  %v1879_v62 = vadd.f32 %v8767_v31, %v1655_v8  ;;  %v2023_v44 = vmax.f32 %v1895_v63, 0.0 }
 0x1fa   : > { %12644 = vst [vmem:[#allocation47_spill] sm:$0xff] %v9109_v45  ;;  %v9117_v5 = vpop.f32.mrf.mxu3  ;;  %2484 = vmatpush.bf16.msra.mxu1 %v9075_v15  ;;  %2570 = vmatpush.bf16.msra.mxu2 %v9109_v45  ;;  %v9145_v6 = vpack.c.bf16 %v2030_v14, %v2022_v43  ;;  %v2006_v10 = vmax.f32 %v1878_v61, 0.0  ;;  %v12662_v14 = vld [vmem:[#allocation37_spill] sm:$0xff] }
 0x1fb   : > { %12645 = vst [vmem:[#allocation48_spill] sm:$0xff] %v9111_v34  ;;  %2659 = vmatpush.bf16.msra.mxu3 %v9111_v34  ;;  %v9135_v35 = vpop.f32.mrf.mxu0  ;;  %v9147_v60 = vpack.c.bf16 %v2031_v24, %v2023_v44  ;;  %v2007_v50 = vmax.f32 %v1879_v62, 0.0  ;;  %v12663_v24 = vld [vmem:[#allocation38_spill] sm:$0xff]  ;;  %v12664_v43 = vld [vmem:[#allocation33_spill] sm:$0xff] }
 0x1fc   : > { %12646 = vst [vmem:[#allocation49_spill] sm:$0xff] %v9115_v33  ;;  %2396 = vmatpush.bf16.msra.mxu0 %v8943_v12  ;;  %v9157_v30 = vpack.c.bf16 %v2014_v48, %v2006_v10  ;;  %v12665_v44 = vld [vmem:[#allocation34_spill] sm:$0xff]  ;;  %v12668_v10 = vld [vmem:[#allocation29_spill] sm:$0xff] }
 0x1fd   : > { %12647 = vst [vmem:[#allocation50_spill] sm:$0xff] %v9117_v5  ;;  %v9137_v39 = vpop.f32.mrf.mxu1  ;;  %v9159_v16 = vpack.c.bf16 %v2015_v2, %v2007_v50  ;;  %v12669_v50 = vld [vmem:[#allocation30_spill] sm:$0xff] }
 0x1fe   : > { %2485 = vmatpush.bf16.msra.mxu1 %v8945_v58  ;;  %2571 = vmatpush.bf16.msra.mxu2 %v9131_v38  ;;  %12650 = vst [vmem:[#allocation53_spill] sm:$0xff] %v9145_v6 }
 0x1ff   : > { %2660 = vmatpush.bf16.msra.mxu3 %v9133_v46  ;;  %12651 = vst [vmem:[#allocation54_spill] sm:$0xff] %v9147_v60 }
 0x200   : > { %2397 = vmatpush.bf16.msra.mxu0 %v8911_v0  ;;  %12654 = vst [vmem:[#allocation57_spill] sm:$0xff] %v9157_v30 }
 0x201   : > { %v9149_v11 = vpop.f32.mrf.mxu2  ;;  %12655 = vst [vmem:[#allocation58_spill] sm:$0xff] %v9159_v16 }
 0x202   : > { %12652 = vst [vmem:[#allocation55_spill] sm:$0xff] %v9149_v11  ;;  %v9151_v36 = vpop.f32.mrf.mxu3  ;;  %2486 = vmatpush.bf16.msra.mxu1 %v8913_v49  ;;  %2572 = vmatpush.bf16.msra.mxu2 %v9145_v6 }
 0x203   : > { %12653 = vst [vmem:[#allocation56_spill] sm:$0xff] %v9151_v36  ;;  %2661 = vmatpush.bf16.msra.mxu3 %v9147_v60  ;;  %v9161_v28 = vpop.f32.mrf.mxu0 }
 0x204   : > { %2398 = vmatpush.bf16.msra.mxu0 %v8879_v57 }
 0x205   : > { %v9163_v8 = vpop.f32.mrf.mxu1 }
 0x206   : > { %2487 = vmatpush.bf16.msra.mxu1 %v12656_v53  ;;  %2573 = vmatpush.bf16.msra.mxu2 %v9157_v30 }
 0x207   : > { %2662 = vmatpush.bf16.msra.mxu3 %v9159_v16 }
 0x208   : > { %2399 = vmatpush.bf16.msra.mxu0 %v12660_v41  ;;  %v12671_v41 = vld [vmem:[#allocation26_spill] sm:$0xff] }
 0x209   : > { %v9169_v63 = vpop.f32.mrf.mxu2 }
 0x20a   : > { %12657 = vst [vmem:[#allocation59_spill] sm:$0xff] %v9169_v63  ;;  %v9171_v42 = vpop.f32.mrf.mxu3  ;;  %2488 = vmatpush.bf16.msra.mxu1 %v12661_v9  ;;  %2574 = vmatpush.bf16.msra.mxu2 %v12662_v14  ;;  %v12670_v9 = vld [vmem:[#allocation25_spill] sm:$0xff] }
 0x20b   : > { %12658 = vst [vmem:[#allocation60_spill] sm:$0xff] %v9171_v42  ;;  %2663 = vmatpush.bf16.msra.mxu3 %v12663_v24  ;;  %v9182_v61 = vpop.f32.mrf.mxu0  ;;  %2400 = vmatmul.bf16.vlgmr.msra.gmra.mxu0 %v9176_v4  ;;  %v12691_v42 = vld [vmem:[#allocation21_spill] sm:$0xff] }
 0x20c   : > { %v1600_v63 = vmul.f32 %v12691_v42, %v9093_v13 }
 0x20d   : > { %v9184_v62 = vpop.f32.mrf.mxu1  ;;  %2489 = vmatmul.bf16.vlgmr.msra.gmra.mxu1 %v9176_v4 }
 0x20e   : > { %2575 = vmatpush.bf16.msra.mxu2 %v12664_v43 }
 0x20f   : > { %2664 = vmatpush.bf16.msra.mxu3 %v12665_v44  ;;  %v9207_v44 = vld [vmem:[%s12405_s7 + $0x8] sm:$0xff] }
 0x210   : > { %12674 = vst [vmem:[#allocation66_spill] sm:$0xff] %v9207_v44 }
 0x211   : > { %v9190_v48 = vpop.f32.mrf.mxu2 }
 0x212   : > { %12666 = vst [vmem:[#allocation62_spill] sm:$0xff] %v9190_v48  ;;  %v9192_v2 = vpop.f32.mrf.mxu3  ;;  %2576 = vmatpush.bf16.msra.mxu2 %v12668_v10 }
 0x213   : > { %12667 = vst [vmem:[#allocation63_spill] sm:$0xff] %v9192_v2  ;;  %2665 = vmatpush.bf16.msra.mxu3 %v12669_v50  ;;  %v1317_v24 = vpop.f32.mrf.mxu0 }
 0x215   : > { %v9196_v14 = vpop.f32.mrf.mxu1 }
 0x216   : > { %2577 = vmatpush.bf16.msra.mxu2 %v12670_v9 }
 0x217   : > { %2666 = vmatpush.bf16.msra.mxu3 %v12671_v41 }
 0x219   : > { %v9200_v16 = vpop.f32.mrf.mxu2  ;;  %2578 = vmatmul.bf16.vlgmr.msra.gmra.mxu2 %v9176_v4 }
 0x21a   : > { %12672 = vst [vmem:[#allocation64_spill] sm:$0xff] %v9200_v16  ;;  %v9202_v43 = vpop.f32.mrf.mxu3  ;;  %2667 = vmatmul.bf16.vlgmr.msra.gmra.mxu3 %v9176_v4  ;;  %v9228_v4 = vld [vmem:[%s12405_s7 + $0x10] sm:$0xff] }
 0x21b   : > { %12673 = vst [vmem:[#allocation65_spill] sm:$0xff] %v9202_v43  ;;  %v9211_v50 = vpop.f32.mrf.mxu0  ;;  %2405 = vmatmul.bf16.gmra.mxu0 %v9207_v44  ;;  %v12692_v43 = vld [vmem:[#allocation19_spill] sm:$0xff] }
 0x21c   : > { %12679 = vst [vmem:[#allocation71_spill] sm:$0xff] %v9228_v4  ;;  %v1592_v16 = vmul.f32 %v12692_v43, %v9051_v3  ;;  %v9302_v3 = vld [vmem:[%s12405_s7 + $0x28] sm:$0xff] }
 0x21d   : > { %v9213_v10 = vpop.f32.mrf.mxu1  ;;  %2494 = vmatmul.bf16.gmra.mxu1 %v9207_v44 }
 0x221   : > { %v9217_v41 = vpop.f32.mrf.mxu2 }
 0x222   : > { %12675 = vst [vmem:[#allocation67_spill] sm:$0xff] %v9217_v41  ;;  %v9219_v9 = vpop.f32.mrf.mxu3  ;;  %v12694_v41 = vld [vmem:[#allocation11_spill] sm:$0xff] }
 0x223   : > { %12676 = vst [vmem:[#allocation68_spill] sm:$0xff] %v9219_v9  ;;  %v1322_v30 = vpop.f32.mrf.mxu0 }
 0x225   : > { %v1371_v53 = vpop.f32.mrf.mxu1 }
 0x229   : > { %v9221_v57 = vpop.f32.mrf.mxu2  ;;  %2583 = vmatmul.bf16.gmra.mxu2 %v9207_v44 }
 0x22a   : > { %12677 = vst [vmem:[#allocation69_spill] sm:$0xff] %v9221_v57  ;;  %v9223_v60 = vpop.f32.mrf.mxu3  ;;  %2672 = vmatmul.bf16.gmra.mxu3 %v9207_v44  ;;  %v7940_v44 = vld [vmem:[%s12405_s7 + $0x18] sm:$0xff]  ;;  %v12695_v57 = vld [vmem:[#allocation14_spill] sm:$0xff] }
 0x22b   : > { %12678 = vst [vmem:[#allocation70_spill] sm:$0xff] %v9223_v60  ;;  %v9232_v6 = vpop.f32.mrf.mxu0  ;;  %2410 = vmatmul.bf16.gmra.mxu0 %v9228_v4  ;;  %v1632_v60 = vmul.f32 %v12694_v41, %v1317_v24 }
 0x22d   : > { %v9234_v49 = vpop.f32.mrf.mxu1  ;;  %2499 = vmatmul.bf16.gmra.mxu1 %v9228_v4 }
 0x231   : > { %v9238_v0 = vpop.f32.mrf.mxu2 }
 0x232   : > { %12680 = vst [vmem:[#allocation72_spill] sm:$0xff] %v9238_v0  ;;  %v9240_v46 = vpop.f32.mrf.mxu3  ;;  %v12697_v0 = vld [vmem:[#allocation12_spill] sm:$0xff] }
 0x233   : > { %12681 = vst [vmem:[#allocation73_spill] sm:$0xff] %v9240_v46  ;;  %v9242_v38 = vpop.f32.mrf.mxu0  ;;  %v1608_v46 = vmul.f32 %v12695_v57, %v9135_v35  ;;  %v1593_v35 = vmul.f32 %v12692_v43, %v9053_v20 }
 0x235   : > { %v9244_v58 = vpop.f32.mrf.mxu1  ;;  %v1832_v31 = vadd.f32 %v12705_v59, %v1608_v46 }
 0x236   : > { %12682 = vst [vmem:[#allocation74_spill] sm:$0xff] %v9244_v58 }
 0x239   : > { %v9246_v12 = vpop.f32.mrf.mxu2  ;;  %2588 = vmatmul.bf16.gmra.mxu2 %v9228_v4 }
 0x23a   : > { %12683 = vst [vmem:[#allocation75_spill] sm:$0xff] %v9246_v12  ;;  %v9248_v34 = vpop.f32.mrf.mxu3  ;;  %2677 = vmatmul.bf16.gmra.mxu3 %v9228_v4  ;;  %v7941_v4 = vld [vmem:[%s12405_s7 + $0x20] sm:$0xff] }
 0x23b   : > { %12684 = vst [vmem:[#allocation76_spill] sm:$0xff] %v9248_v34  ;;  %v9255_v45 = vpop.f32.mrf.mxu0  ;;  %2415 = vmatmul.bf16.gmra.mxu0 %v7940_v44  ;;  %v12696_v34 = vld [vmem:[#allocation22_spill] sm:$0xff] }
 0x23c   : > { %v1824_v12 = vadd.f32 %v12696_v34, %v1600_v63  ;;  %v12702_v63 = vld [vmem:[#allocation17_spill] sm:$0xff] }
 0x23d   : > { %v9257_v15 = vpop.f32.mrf.mxu1  ;;  %2504 = vmatmul.bf16.gmra.mxu1 %v7940_v44 }
 0x23e   : > { %v1952_v20 = vmax.f32 %v1824_v12, 0.0 }
 0x241   : > { %v9259_v23 = vpop.f32.mrf.mxu2 }
 0x242   : > { %12685 = vst [vmem:[#allocation77_spill] sm:$0xff] %v9259_v23  ;;  %v9261_v54 = vpop.f32.mrf.mxu3  ;;  %v12698_v23 = vld [vmem:[#allocation9_spill] sm:$0xff] }
 0x243   : > { %12686 = vst [vmem:[#allocation78_spill] sm:$0xff] %v9261_v54  ;;  %v9263_v21 = vpop.f32.mrf.mxu0  ;;  %v1624_v54 = vmul.f32 %v12697_v0, %v9182_v61  ;;  %v1648_v13 = vmul.f32 %v12698_v23, %v1322_v30  ;;  %v12703_v61 = vld [vmem:[#allocation15_spill] sm:$0xff]  ;;  %v1649_v47 = vmul.f32 %v12698_v23, %v1371_v53  ;;  %v1633_v53 = vmul.f32 %v12694_v41, %v9196_v14 }
 0x244   : > { %v1856_v30 = vadd.f32 %v12703_v61, %v1632_v60  ;;  %v12707_v60 = vld [vmem:[#allocation10_spill] sm:$0xff] }
 0x245   : > { %v9265_v55 = vpop.f32.mrf.mxu1  ;;  %v1872_v7 = vadd.f32 %v12707_v60, %v1648_v13  ;;  %v12708_v13 = vld [vmem:[#allocation8_spill] sm:$0xff] }
 0x249   : > { %v9267_v52 = vpop.f32.mrf.mxu2  ;;  %2593 = vmatmul.bf16.gmra.mxu2 %v7940_v44 }
 0x24a   : > { %12687 = vst [vmem:[#allocation79_spill] sm:$0xff] %v9267_v52  ;;  %v9269_v19 = vpop.f32.mrf.mxu3  ;;  %2682 = vmatmul.bf16.gmra.mxu3 %v7940_v44  ;;  %v12693_v44 = vld [vmem:[#allocation16_spill] sm:$0xff] }
 0x24b   : > { %12688 = vst [vmem:[#allocation80_spill] sm:$0xff] %v9269_v19  ;;  %v9274_v5 = vpop.f32.mrf.mxu0  ;;  %2420 = vmatmul.bf16.gmra.mxu0 %v7941_v4  ;;  %v1616_v9 = vmul.f32 %v12693_v44, %v9161_v28  ;;  %v12701_v28 = vld [vmem:[#allocation20_spill] sm:$0xff]  ;;  %v1617_v12 = vmul.f32 %v12693_v44, %v9163_v8 }
 0x24c   : > { %v1816_v24 = vadd.f32 %v12701_v28, %v1592_v16  ;;  %v9324_v46 = vadd.f32 %v12701_v28, %v1593_v35 }
 0x24d   : > { %v9276_v33 = vpop.f32.mrf.mxu1  ;;  %2509 = vmatmul.bf16.gmra.mxu1 %v7941_v4 }
 0x251   : > { %v9278_v36 = vpop.f32.mrf.mxu2 }
 0x252   : > { %12689 = vst [vmem:[#allocation81_spill] sm:$0xff] %v9278_v36  ;;  %v9280_v11 = vpop.f32.mrf.mxu3  ;;  %v12704_v36 = vld [vmem:[#allocation7_spill] sm:$0xff] }
 0x253   : > { %12690 = vst [vmem:[#allocation82_spill] sm:$0xff] %v9280_v11  ;;  %v1337_v2 = vpop.f32.mrf.mxu0  ;;  %v1840_v11 = vadd.f32 %v12702_v63, %v1616_v9  ;;  %v1641_v16 = vmul.f32 %v12704_v36, %v9213_v10  ;;  %v1609_v9 = vmul.f32 %v12695_v57, %v9137_v39  ;;  %v1625_v39 = vmul.f32 %v12697_v0, %v9184_v62 }
 0x255   : > { %v1386_v48 = vpop.f32.mrf.mxu1  ;;  %v1968_v10 = vmax.f32 %v1840_v11, 0.0  ;;  %v1865_v35 = vadd.f32 %v12708_v13, %v1641_v16  ;;  %v1873_v11 = vadd.f32 %v12707_v60, %v1649_v47  ;;  %v9341_v8 = vadd.f32 %v12705_v59, %v1609_v9 }
 0x257   : > { %v1993_v9 = vmax.f32 %v1865_v35, 0.0 }
 0x259   : > { %v9295_v19 = vpop.f32.mrf.mxu2  ;;  %2598 = vmatmul.bf16.gmra.mxu2 %v7941_v4 }
 0x25a   : > { %12699 = vst [vmem:[#allocation11_spill] sm:$0xff] %v9295_v19  ;;  %v9297_v52 = vpop.f32.mrf.mxu3  ;;  %2687 = vmatmul.bf16.gmra.mxu3 %v7941_v4  ;;  %v1640_v19 = vmul.f32 %v12704_v36, %v9211_v50  ;;  %v12706_v4 = vld [vmem:[#allocation13_spill] sm:$0xff] }
 0x25b   : > { %12700 = vst [vmem:[#allocation12_spill] sm:$0xff] %v9297_v52  ;;  %v1601_v52 = vmul.f32 %v12691_v42, %v9095_v18  ;;  %v1848_v43 = vadd.f32 %v12706_v4, %v1624_v54  ;;  %v1340_v58 = vpop.f32.mrf.mxu0  ;;  %2425 = vmatmul.bf16.gmra.mxu0 %v9302_v3  ;;  %v1944_v18 = vmax.f32 %v1816_v24, 0.0  ;;  %v1984_v54 = vmax.f32 %v1856_v30, 0.0 }
 0x25c   : > { %v1864_v42 = vadd.f32 %v12708_v13, %v1640_v19  ;;  %v1960_v24 = vmax.f32 %v1832_v31, 0.0  ;;  %v2000_v30 = vmax.f32 %v1872_v7, 0.0  ;;  %v1704_v31 = vmul.f32 %v8578_v27, %v1340_v58 }
 0x25d   : > { %v1389_v50 = vpop.f32.mrf.mxu1  ;;  %2514 = vmatmul.bf16.gmra.mxu1 %v9302_v3  ;;  %v9334_v57 = vadd.f32 %v12696_v34, %v1601_v52  ;;  %v9338_v28 = vpack.c.bf16 %v1952_v20, %v1944_v18  ;;  %v1976_v62 = vmax.f32 %v1848_v43, 0.0  ;;  %v9350_v52 = vadd.f32 %v12702_v63, %v1617_v12  ;;  %v12715_v34 = vld [vmem:[#allocation4_spill] sm:$0xff] }
 0x25e   : > { %v9347_v19 = vpack.c.bf16 %v1968_v10, %v1960_v24  ;;  %v1705_v47 = vmul.f32 %v8578_v27, %v1389_v50  ;;  %v9355_v16 = vadd.f32 %v12706_v4, %v1625_v39  ;;  %v9360_v7 = vadd.f32 %v12703_v61, %v1633_v53 }
 0x25f   : > { %12709 = vst [vmem:[#allocation9_spill] sm:$0xff] %v9338_v28  ;;  %v9357_v20 = vpack.c.bf16 %v1984_v54, %v1976_v62  ;;  %v1992_v43 = vmax.f32 %v1864_v42, 0.0  ;;  %v2001_v18 = vmax.f32 %v1873_v11, 0.0  ;;  %v1696_v10 = vmul.f32 %v8701_v37, %v1337_v2 }
 0x260   : > { %12710 = vst [vmem:[#allocation15_spill] sm:$0xff] %v9347_v19  ;;  %v1697_v12 = vmul.f32 %v8701_v37, %v1386_v48  ;;  %v1656_v58 = vmul.f32 %v8750_v29, %v9232_v6  ;;  %v1688_v50 = vmul.f32 %v8667_v1, %v9274_v5  ;;  %v1689_v39 = vmul.f32 %v8667_v1, %v9276_v33 }
 0x261   : > { %v9343_v44 = vpop.f32.mrf.mxu2  ;;  %12711 = vst [vmem:[#allocation7_spill] sm:$0xff] %v9357_v20  ;;  %v9364_v24 = vpack.c.bf16 %v2000_v30, %v1992_v43  ;;  %v1928_v42 = vadd.f32 %v8657_v26, %v1704_v31  ;;  %v1929_v35 = vadd.f32 %v8657_v26, %v1705_v47  ;;  %v1657_v11 = vmul.f32 %v8750_v29, %v9234_v49 }
 0x262   : > { %v9345_v14 = vpop.f32.mrf.mxu3  ;;  %v1672_v6 = vmul.f32 %v8738_v56, %v9255_v45  ;;  %v1680_v5 = vmul.f32 %v8736_v32, %v9263_v21  ;;  %v1681_v33 = vmul.f32 %v8736_v32, %v9265_v55  ;;  %v1920_v62 = vadd.f32 %v8707_v22, %v1696_v10  ;;  %v9397_v10 = vld [vmem:[%s12405_s7 + $0x30] sm:$0xff] }
 0x263   : > { %12712 = vst [vmem:[#allocation10_spill] sm:$0xff] %v9364_v24  ;;  %v1342_v54 = vpop.f32.mrf.mxu0  ;;  %v1921_v30 = vadd.f32 %v8707_v22, %v1697_v12  ;;  %v1664_v49 = vmul.f32 %v8754_v25, %v9242_v38  ;;  %v1673_v45 = vmul.f32 %v8738_v56, %v9257_v15  ;;  %v1912_v43 = vadd.f32 %v8699_v40, %v1688_v50  ;;  %v12713_v15 = vld [vmem:[#allocation74_spill] sm:$0xff]  ;;  %v12714_v50 = vld [vmem:[#allocation3_spill] sm:$0xff] }
 0x264   : > { %v1712_v2 = vmul.f32 %v8589_v51, %v1342_v54  ;;  %v1913_v21 = vadd.f32 %v8699_v40, %v1689_v39  ;;  %v2056_v12 = vmax.f32 %v1928_v42, 0.0  ;;  %v1665_v38 = vmul.f32 %v8754_v25, %v12713_v15 }
 0x265   : > { %v1391_v53 = vpop.f32.mrf.mxu1  ;;  %v1896_v39 = vadd.f32 %v12714_v50, %v1672_v6  ;;  %v1904_v59 = vadd.f32 %v12715_v34, %v1680_v5  ;;  %v1905_v28 = vadd.f32 %v12715_v34, %v1681_v33  ;;  %v2048_v63 = vmax.f32 %v1920_v62, 0.0  ;;  %v12719_v6 = vld [vmem:[#allocation6_spill] sm:$0xff] }
 0x266   : > { %v1713_v48 = vmul.f32 %v8589_v51, %v1391_v53  ;;  %v1936_v31 = vadd.f32 %v8655_v17, %v1712_v2  ;;  %v2057_v53 = vmax.f32 %v1929_v35, 0.0  ;;  %v2049_v4 = vmax.f32 %v1921_v30, 0.0 }
 0x267   : > { %v1945_v35 = vmax.f32 %v9324_v46, 0.0  ;;  %v1880_v5 = vadd.f32 %v12719_v6, %v1656_v58  ;;  %v2040_v33 = vmax.f32 %v1912_v43, 0.0  ;;  %v2041_v62 = vmax.f32 %v1913_v21, 0.0  ;;  %v12764_v46 = vld [vmem:[#allocation55_spill] sm:$0xff] }
 0x268   : > { %v1937_v47 = vadd.f32 %v8655_v17, %v1713_v48  ;;  %v2064_v2 = vmax.f32 %v1936_v31, 0.0  ;;  %v9411_v31 = vpack.c.bf16 %v2001_v18, %v1993_v9  ;;  %v12720_v9 = vld [vmem:[#allocation5_spill] sm:$0xff]  ;;  %v1699_v21 = vmul.f32 %v8701_v37, %v9345_v14  ;;  %v12725_v14 = vld [vmem:[#allocation11_spill] sm:$0xff] }
 0x269   : > { %v1438_v54 = vpop.f32.mrf.mxu2  ;;  %2603 = vmatmul.bf16.gmra.mxu2 %v9302_v3  ;;  %v1888_v18 = vadd.f32 %v12720_v9, %v1664_v49  ;;  %v9426_v58 = vpack.c.bf16 %v2049_v4, %v2041_v62  ;;  %v12727_v62 = vld [vmem:[#allocation81_spill] sm:$0xff] }
 0x26a   : > { %v1487_v55 = vpop.f32.mrf.mxu3  ;;  %v2065_v48 = vmax.f32 %v1937_v47, 0.0  ;;  %2692 = vmatmul.bf16.gmra.mxu3 %v9302_v3  ;;  %v9406_v19 = vpack.c.bf16 %v2064_v2, %v2056_v12  ;;  %12718 = vst [vmem:[#allocation3_spill] sm:$0xff] %v9411_v31  ;;  %v1897_v47 = vadd.f32 %v12714_v50, %v1673_v45  ;;  %v1706_v15 = vmul.f32 %v8578_v27, %v1438_v54 }
 0x26b   : > { %2430 = vmatmul.bf16.gmra.mxu0 %v9397_v10  ;;  %v1707_v30 = vmul.f32 %v8578_v27, %v1487_v55  ;;  %v1889_v45 = vadd.f32 %v12720_v9, %v1665_v38  ;;  %v2032_v12 = vmax.f32 %v1904_v59, 0.0  ;;  %v2033_v54 = vmax.f32 %v1905_v28, 0.0  ;;  %12722 = vst [vmem:[#allocation6_spill] sm:$0xff] %v9426_v58 }
 0x26c   : > { %12716 = vst [vmem:[#allocation8_spill] sm:$0xff] %v9406_v19  ;;  %v9408_v42 = vpack.c.bf16 %v2065_v48, %v2057_v53  ;;  %2748 = vmatpush.bf16.msrb.mxu0 %v9406_v19  ;;  %v1881_v53 = vadd.f32 %v12719_v6, %v1657_v11  ;;  %v2024_v2 = vmax.f32 %v1896_v39, 0.0  ;;  %v9424_v48 = vpack.c.bf16 %v2048_v63, %v2040_v33 }
 0x26d   : > { %2519 = vmatmul.bf16.gmra.mxu1 %v9397_v10  ;;  %v2025_v43 = vmax.f32 %v1897_v47, 0.0  ;;  %v1698_v27 = vmul.f32 %v8701_v37, %v9343_v44  ;;  %v1930_v49 = vadd.f32 %v8657_v26, %v1706_v15  ;;  %v1961_v59 = vmax.f32 %v9341_v8, 0.0  ;;  %v12726_v15 = vld [vmem:[#allocation12_spill] sm:$0xff]  ;;  %v12753_v8 = vld [vmem:[#allocation62_spill] sm:$0xff] }
 0x26e   : > { %12717 = vst [vmem:[#allocation74_spill] sm:$0xff] %v9408_v42  ;;  %2837 = vmatpush.bf16.msrb.mxu1 %v9408_v42  ;;  %v1931_v28 = vadd.f32 %v8657_v26, %v1707_v30  ;;  %v2016_v44 = vmax.f32 %v1888_v18, 0.0  ;;  %v2017_v11 = vmax.f32 %v1889_v45, 0.0  ;;  %v9439_v39 = vpack.c.bf16 %v2032_v12, %v2024_v2 }
 0x26f   : > { %12721 = vst [vmem:[#allocation4_spill] sm:$0xff] %v9424_v48  ;;  %v9441_v37 = vpack.c.bf16 %v2033_v54, %v2025_v43  ;;  %v1690_v47 = vmul.f32 %v8667_v1, %v12725_v14  ;;  %v1691_v26 = vmul.f32 %v8667_v1, %v12726_v15  ;;  %v1682_v30 = vmul.f32 %v8736_v32, %v12727_v62  ;;  %v12730_v14 = vld [vmem:[#allocation80_spill] sm:$0xff] }
 0x270   : > { %2749 = vmatpush.bf16.msrb.mxu0 %v9424_v48  ;;  %12723 = vst [vmem:[#allocation5_spill] sm:$0xff] %v9439_v39  ;;  %v1922_v45 = vadd.f32 %v8707_v22, %v1698_v27  ;;  %v1923_v12 = vadd.f32 %v8707_v22, %v1699_v21  ;;  %v2058_v54 = vmax.f32 %v1930_v49, 0.0  ;;  %v2059_v2 = vmax.f32 %v1931_v28, 0.0  ;;  %v12737_v62 = vld [vmem:[#allocation72_spill] sm:$0xff] }
 0x271   : > { %v1440_v55 = vpop.f32.mrf.mxu2  ;;  %12724 = vst [vmem:[#allocation83_spill] sm:$0xff] %v9441_v37  ;;  %v2008_v1 = vmax.f32 %v1880_v5, 0.0  ;;  %v1914_v27 = vadd.f32 %v8699_v40, %v1690_v47  ;;  %v1915_v22 = vadd.f32 %v8699_v40, %v1691_v26  ;;  %v12735_v5 = vld [vmem:[#allocation77_spill] sm:$0xff]  ;;  %v1906_v40 = vadd.f32 %v12715_v34, %v1682_v30 }
 0x272   : > { %v1489_v38 = vpop.f32.mrf.mxu3  ;;  %v1714_v63 = vmul.f32 %v8589_v51, %v1440_v55  ;;  %2838 = vmatpush.bf16.msrb.mxu1 %v9426_v58  ;;  %v12728_v55 = vld [vmem:[#allocation82_spill] sm:$0xff]  ;;  %v2050_v26 = vmax.f32 %v1922_v45, 0.0 }
 0x273   : > { %v1715_v4 = vmul.f32 %v8589_v51, %v1489_v38  ;;  %v1683_v18 = vmul.f32 %v8736_v32, %v12728_v55  ;;  %v1675_v32 = vmul.f32 %v8738_v56, %v12730_v14  ;;  %v9467_v28 = vpack.c.bf16 %v2016_v44, %v2008_v1  ;;  %v12738_v55 = vld [vmem:[#allocation75_spill] sm:$0xff] }
 0x274   : > { %v1938_v33 = vadd.f32 %v8655_v17, %v1714_v63  ;;  %2750 = vmatpush.bf16.msrb.mxu0 %v9439_v39  ;;  %v12729_v63 = vld [vmem:[#allocation79_spill] sm:$0xff]  ;;  %v2051_v44 = vmax.f32 %v1923_v12, 0.0  ;;  %v2043_v45 = vmax.f32 %v1915_v22, 0.0  ;;  %v12740_v12 = vld [vmem:[#allocation73_spill] sm:$0xff]  ;;  %v1969_v14 = vmax.f32 %v9350_v52, 0.0 }
 0x275   : > { %v1939_v51 = vadd.f32 %v8655_v17, %v1715_v4  ;;  %v2009_v17 = vmax.f32 %v1881_v53, 0.0  ;;  %v1674_v4 = vmul.f32 %v8738_v56, %v12729_v63  ;;  %12733 = vst [vmem:[#allocation81_spill] sm:$0xff] %v9467_v28  ;;  %v1666_v53 = vmul.f32 %v8754_v25, %v12735_v5  ;;  %v9478_v56 = vld [vmem:[%s12405_s7 + $0x38] sm:$0xff]  ;;  %v12746_v52 = vld [vmem:[#allocation67_spill] sm:$0xff] }
 0x276   : > { %v2066_v43 = vmax.f32 %v1938_v33, 0.0  ;;  %2839 = vmatpush.bf16.msrb.mxu1 %v9441_v37  ;;  %v12736_v33 = vld [vmem:[#allocation78_spill] sm:$0xff]  ;;  %v1907_v47 = vadd.f32 %v12715_v34, %v1683_v18  ;;  %v1899_v30 = vadd.f32 %v12714_v50, %v1675_v32  ;;  %v2042_v18 = vmax.f32 %v1914_v27, 0.0  ;;  %v12744_v32 = vld [vmem:[#allocation69_spill] sm:$0xff] }
 0x277   : > { %v2067_v38 = vmax.f32 %v1939_v51, 0.0  ;;  %v9469_v15 = vpack.c.bf16 %v2017_v11, %v2009_v17  ;;  %v1667_v51 = vmul.f32 %v8754_v25, %v12736_v33  ;;  %v1985_v11 = vmax.f32 %v9360_v7, 0.0  ;;  %v12745_v27 = vld [vmem:[#allocation70_spill] sm:$0xff] }
 0x278   : > { %v9463_v21 = vpack.c.bf16 %v2066_v43, %v2058_v54  ;;  %v1650_v25 = vmul.f32 %v12698_v23, %v12737_v62  ;;  %v1658_v54 = vmul.f32 %v8750_v29, %v12738_v55  ;;  %2751 = vmatpush.bf16.msrb.mxu0 %v9467_v28  ;;  %v1898_v34 = vadd.f32 %v12714_v50, %v1674_v4 }
 0x279   : > { %v9465_v49 = vpack.c.bf16 %v2067_v38, %v2059_v2  ;;  %12734 = vst [vmem:[#allocation82_spill] sm:$0xff] %v9469_v15  ;;  %2608 = vmatmul.bf16.gmra.mxu2 %v9397_v10  ;;  %v12739_v2 = vld [vmem:[#allocation76_spill] sm:$0xff]  ;;  %v1977_v7 = vmax.f32 %v9355_v16, 0.0  ;;  %v1651_v38 = vmul.f32 %v12698_v23, %v12740_v12  ;;  %v1891_v1 = vadd.f32 %v12720_v9, %v1667_v51 }
 0x27a   : > { %12731 = vst [vmem:[#allocation11_spill] sm:$0xff] %v9463_v21  ;;  %2697 = vmatmul.bf16.gmra.mxu3 %v9397_v10  ;;  %v1659_v43 = vmul.f32 %v8750_v29, %v12739_v2  ;;  %2840 = vmatpush.bf16.msrb.mxu1 %v9469_v15  ;;  %v1890_v29 = vadd.f32 %v12720_v9, %v1666_v53  ;;  %v2034_v50 = vmax.f32 %v1906_v40, 0.0  ;;  %v2035_v17 = vmax.f32 %v1907_v47, 0.0  ;;  %v12747_v40 = vld [vmem:[#allocation68_spill] sm:$0xff] }
 0x27b   : > { %12732 = vst [vmem:[#allocation12_spill] sm:$0xff] %v9465_v49  ;;  %2926 = vmatpush.bf16.msrb.mxu2 %v9463_v21  ;;  %3015 = vmatpush.bf16.msrb.mxu3 %v9465_v49  ;;  %v9504_v63 = vpack.c.bf16 %v2050_v26, %v2042_v18  ;;  %v9506_v4 = vpack.c.bf16 %v2051_v44, %v2043_v45  ;;  %v2026_v53 = vmax.f32 %v1898_v34, 0.0  ;;  %v2027_v33 = vmax.f32 %v1899_v30, 0.0  ;;  %v12751_v2 = vld [vmem:[#allocation64_spill] sm:$0xff]  ;;  %v12755_v45 = vld [vmem:[#allocation63_spill] sm:$0xff] }
 0x27c   : > { %2435 = vmatmul.bf16.gmra.mxu0 %v9478_v56  ;;  %v9509_v16 = vpack.c.bf16 %v1985_v11, %v1977_v7  ;;  %v1642_v23 = vmul.f32 %v12704_v36, %v12744_v32  ;;  %v1643_v9 = vmul.f32 %v12704_v36, %v12745_v27  ;;  %v1882_v22 = vadd.f32 %v12719_v6, %v1658_v54 }
 0x27d   : > { %2524 = vmatmul.bf16.gmra.mxu1 %v9478_v56  ;;  %12741 = vst [vmem:[#allocation79_spill] sm:$0xff] %v9504_v63  ;;  %2752 = vmatpush.bf16.msrb.mxu0 %v9364_v24  ;;  %v1883_v5 = vadd.f32 %v12719_v6, %v1659_v43  ;;  %v1634_v51 = vmul.f32 %v12694_v41, %v12746_v52  ;;  %v2018_v44 = vmax.f32 %v1890_v29, 0.0  ;;  %v2019_v11 = vmax.f32 %v1891_v1, 0.0 }
 0x27e   : > { %12742 = vst [vmem:[#allocation80_spill] sm:$0xff] %v9506_v4  ;;  %2841 = vmatpush.bf16.msrb.mxu1 %v9411_v31  ;;  %v1635_v36 = vmul.f32 %v12694_v41, %v12747_v40  ;;  %v1874_v47 = vadd.f32 %v12707_v60, %v1650_v25  ;;  %v1875_v26 = vadd.f32 %v12707_v60, %v1651_v38  ;;  %v1953_v55 = vmax.f32 %v9334_v57, 0.0  ;;  %v12752_v41 = vld [vmem:[#allocation65_spill] sm:$0xff] }
 0x27f   : > { %12743 = vst [vmem:[#allocation77_spill] sm:$0xff] %v9509_v16  ;;  %2927 = vmatpush.bf16.msrb.mxu2 %v9504_v63  ;;  %3016 = vmatpush.bf16.msrb.mxu3 %v9506_v4  ;;  %v9527_v62 = vpack.c.bf16 %v2034_v50, %v2026_v53  ;;  %v9529_v6 = vpack.c.bf16 %v2035_v17, %v2027_v33  ;;  %v2010_v30 = vmax.f32 %v1882_v22, 0.0  ;;  %v2011_v57 = vmax.f32 %v1883_v5, 0.0  ;;  %v12759_v17 = vld [vmem:[#allocation59_spill] sm:$0xff] }
 0x280   : > { %v9534_v54 = vpack.c.bf16 %v1969_v14, %v1961_v59  ;;  %v1626_v43 = vmul.f32 %v12697_v0, %v12751_v2  ;;  %v1627_v25 = vmul.f32 %v12697_v0, %v12752_v41  ;;  %v1866_v60 = vadd.f32 %v12708_v13, %v1642_v23  ;;  %v12754_v59 = vld [vmem:[#allocation16_spill] sm:$0xff]  ;;  %v12760_v14 = vld [vmem:[#allocation14_spill] sm:$0xff] }
 0x281   : > { %12748 = vst [vmem:[#allocation78_spill] sm:$0xff] %v9527_v62  ;;  %2753 = vmatpush.bf16.msrb.mxu0 %v9357_v20  ;;  %v1867_v34 = vadd.f32 %v12708_v13, %v1643_v9  ;;  %v1618_v18 = vmul.f32 %v12754_v59, %v12753_v8  ;;  %v1619_v0 = vmul.f32 %v12754_v59, %v12755_v45  ;;  %v2002_v38 = vmax.f32 %v1874_v47, 0.0  ;;  %v12761_v23 = vld [vmem:[#allocation60_spill] sm:$0xff]  ;;  %v12762_v9 = vld [vmem:[#allocation15_spill] sm:$0xff]  ;;  %v12773_v59 = vld [vmem:[#allocation9_spill] sm:$0xff] }
 0x282   : > { %12749 = vst [vmem:[#allocation72_spill] sm:$0xff] %v9529_v6  ;;  %2842 = vmatpush.bf16.msrb.mxu1 %v9509_v16  ;;  %v1858_v7 = vadd.f32 %v12703_v61, %v1634_v51  ;;  %v1859_v12 = vadd.f32 %v12703_v61, %v1635_v36  ;;  %v2003_v29 = vmax.f32 %v1875_v26, 0.0  ;;  %v9552_v1 = vpack.c.bf16 %v2018_v44, %v2010_v30  ;;  %v12763_v61 = vld [vmem:[#allocation13_spill] sm:$0xff]  ;;  %v12766_v51 = vld [vmem:[#allocation56_spill] sm:$0xff] }
 0x283   : > { %12750 = vst [vmem:[#allocation75_spill] sm:$0xff] %v9534_v54  ;;  %2928 = vmatpush.bf16.msrb.mxu2 %v9527_v62  ;;  %3017 = vmatpush.bf16.msrb.mxu3 %v9529_v6  ;;  %v9554_v13 = vpack.c.bf16 %v2019_v11, %v2011_v57  ;;  %v9558_v50 = vpack.c.bf16 %v1953_v55, %v1945_v35  ;;  %v1994_v53 = vmax.f32 %v1866_v60, 0.0  ;;  %v1995_v33 = vmax.f32 %v1867_v34, 0.0  ;;  %v12765_v35 = vld [vmem:[#allocation21_spill] sm:$0xff]  ;;  %v12771_v34 = vld [vmem:[#allocation19_spill] sm:$0xff]  ;;  %v12772_v57 = vld [vmem:[#allocation50_spill] sm:$0xff] }
 0x284   : > { %12756 = vst [vmem:[#allocation76_spill] sm:$0xff] %v9552_v1  ;;  %v1610_v32 = vmul.f32 %v12760_v14, %v12759_v17  ;;  %v1611_v27 = vmul.f32 %v12760_v14, %v12761_v23  ;;  %v1850_v22 = vadd.f32 %v12763_v61, %v1626_v43  ;;  %v1851_v5 = vadd.f32 %v12763_v61, %v1627_v25  ;;  %v12767_v36 = vld [vmem:[#allocation17_spill] sm:$0xff]  ;;  %v9589_v25 = vld [vmem:[%s12405_s7 + $0x40] sm:$0xff]  ;;  %v12776_v14 = vld [vmem:[#allocation39_spill] sm:$0xff] }
 0x285   : > { %12757 = vst [vmem:[#allocation73_spill] sm:$0xff] %v9554_v13  ;;  %2754 = vmatpush.bf16.msrb.mxu0 %v12762_v9  ;;  %v1602_v52 = vmul.f32 %v12765_v35, %v12764_v46  ;;  %v1603_v40 = vmul.f32 %v12765_v35, %v12766_v51  ;;  %v1842_v47 = vadd.f32 %v12767_v36, %v1618_v18  ;;  %v1986_v44 = vmax.f32 %v1858_v7, 0.0  ;;  %v12770_v60 = vld [vmem:[#allocation49_spill] sm:$0xff]  ;;  %v12774_v18 = vld [vmem:[#allocation18_spill] sm:$0xff]  ;;  %v12777_v23 = vld [vmem:[#allocation40_spill] sm:$0xff] }
 0x286   : > { %12758 = vst [vmem:[#allocation69_spill] sm:$0xff] %v9558_v50  ;;  %2843 = vmatpush.bf16.msrb.mxu1 %v9534_v54  ;;  %v1843_v26 = vadd.f32 %v12767_v36, %v1619_v0  ;;  %v1987_v11 = vmax.f32 %v1859_v12, 0.0  ;;  %v9576_v55 = vpack.c.bf16 %v2002_v38, %v1994_v53  ;;  %v9578_v2 = vpack.c.bf16 %v2003_v29, %v1995_v33  ;;  %v12775_v38 = vld [vmem:[#allocation22_spill] sm:$0xff] }
 0x287   : > { %2929 = vmatpush.bf16.msrb.mxu2 %v9552_v1  ;;  %3018 = vmatpush.bf16.msrb.mxu3 %v9554_v13  ;;  %v1594_v30 = vmul.f32 %v12771_v34, %v12770_v60  ;;  %v1595_v8 = vmul.f32 %v12771_v34, %v12772_v57  ;;  %v1834_v45 = vadd.f32 %v12774_v18, %v1610_v32  ;;  %v1978_v7 = vmax.f32 %v1850_v22, 0.0  ;;  %v12782_v51 = vld [vmem:[#allocation42_spill] sm:$0xff] }
 0x288   : > { %12768 = vst [vmem:[#allocation70_spill] sm:$0xff] %v9576_v55  ;;  %v9582_v43 = vpop.f32.mrf.mxu0  ;;  %v1835_v0 = vadd.f32 %v12774_v18, %v1611_v27  ;;  %v1979_v12 = vmax.f32 %v1851_v5, 0.0  ;;  %v1826_v29 = vadd.f32 %v12775_v38, %v1602_v52  ;;  %v1827_v17 = vadd.f32 %v12775_v38, %v1603_v40  ;;  %v12780_v27 = vld [vmem:[#allocation20_spill] sm:$0xff]  ;;  %v12781_v52 = vld [vmem:[#allocation41_spill] sm:$0xff]  ;;  %v12786_v57 = vld [vmem:[#allocation46_spill] sm:$0xff] }
 0x289   : > { %12769 = vst [vmem:[#allocation67_spill] sm:$0xff] %v9578_v2  ;;  %2613 = vmatmul.bf16.gmra.mxu2 %v9478_v56  ;;  %2755 = vmatpush.bf16.msrb.mxu0 %v12773_v59  ;;  %v1970_v61 = vmax.f32 %v1842_v47, 0.0  ;;  %v1971_v53 = vmax.f32 %v1843_v26, 0.0  ;;  %v9605_v33 = vpack.c.bf16 %v1986_v44, %v1978_v7  ;;  %v1818_v22 = vadd.f32 %v12780_v27, %v1594_v30  ;;  %v12785_v30 = vld [vmem:[#allocation45_spill] sm:$0xff]  ;;  %v12791_v7 = vld [vmem:[#allocation47_spill] sm:$0xff] }
 0x28a   : > { %2702 = vmatmul.bf16.gmra.mxu3 %v9478_v56  ;;  %v9584_v41 = vpop.f32.mrf.mxu1  ;;  %2844 = vmatpush.bf16.msrb.mxu1 %v9558_v50  ;;  %v9607_v32 = vpack.c.bf16 %v1987_v11, %v1979_v12  ;;  %v1819_v5 = vadd.f32 %v12780_v27, %v1595_v8  ;;  %v1962_v46 = vmax.f32 %v1834_v45, 0.0  ;;  %v1963_v35 = vmax.f32 %v1835_v0, 0.0  ;;  %v12789_v45 = vld [vmem:[#allocation43_spill] sm:$0xff]  ;;  %v12790_v0 = vld [vmem:[#allocation44_spill] sm:$0xff] }
 0x28b   : > { %2930 = vmatpush.bf16.msrb.mxu2 %v9576_v55  ;;  %3019 = vmatpush.bf16.msrb.mxu3 %v9578_v2  ;;  %12778 = vst [vmem:[#allocation68_spill] sm:$0xff] %v9605_v33  ;;  %v1954_v40 = vmax.f32 %v1826_v29, 0.0  ;;  %v1955_v36 = vmax.f32 %v1827_v17, 0.0  ;;  %v1946_v60 = vmax.f32 %v1818_v22, 0.0  ;;  %v12792_v12 = vld [vmem:[#allocation48_spill] sm:$0xff]  ;;  %v9648_v17 = vld [vmem:[%s12405_s7 + $0x48] sm:$0xff] }
 0x28c   : > { %12779 = vst [vmem:[#allocation64_spill] sm:$0xff] %v9607_v32  ;;  %2440 = vmatmul.bf16.gmra.mxu0 %v9589_v25  ;;  %v9617_v47 = vpack.c.bf16 %v1970_v61, %v1962_v46  ;;  %v9619_v26 = vpack.c.bf16 %v1971_v53, %v1963_v35  ;;  %v1947_v34 = vmax.f32 %v1819_v5, 0.0  ;;  %v12793_v61 = vld [vmem:[#allocation35_spill] sm:$0xff]  ;;  %v12794_v53 = vld [vmem:[#allocation36_spill] sm:$0xff] }
 0x28d   : > { %3552 = vmatpush.bf16.msra.mxu0 %v12776_v14  ;;  %2529 = vmatmul.bf16.gmra.mxu1 %v9589_v25  ;;  %v9629_v8 = vpack.c.bf16 %v1954_v40, %v1946_v60  ;;  %v12795_v5 = vld [vmem:[#allocation51_spill] sm:$0xff]  ;;  %v12796_v46 = vld [vmem:[#allocation52_spill] sm:$0xff]  ;;  %v12800_v60 = vld [vmem:[#allocation54_spill] sm:$0xff] }
 0x28e   : > { %3641 = vmatpush.bf16.msra.mxu1 %v12777_v23  ;;  %12783 = vst [vmem:[#allocation65_spill] sm:$0xff] %v9617_v47  ;;  %v9631_v18 = vpack.c.bf16 %v1955_v36, %v1947_v34  ;;  %v12797_v35 = vld [vmem:[#allocation31_spill] sm:$0xff]  ;;  %v12798_v40 = vld [vmem:[#allocation32_spill] sm:$0xff]  ;;  %v12799_v36 = vld [vmem:[#allocation53_spill] sm:$0xff] }
 0x28f   : > { %2931 = vmatpush.bf16.msrb.mxu2 %v9605_v33  ;;  %3020 = vmatpush.bf16.msrb.mxu3 %v9607_v32  ;;  %12784 = vst [vmem:[#allocation62_spill] sm:$0xff] %v9619_v26  ;;  %v12817_v23 = vld [vmem:[#allocation25_spill] sm:$0xff] }
 0x290   : > { %v9621_v44 = vpop.f32.mrf.mxu0  ;;  %12787 = vst [vmem:[#allocation16_spill] sm:$0xff] %v9629_v8 }
 0x291   : > { %3553 = vmatpush.bf16.msra.mxu0 %v12781_v52  ;;  %12788 = vst [vmem:[#allocation63_spill] sm:$0xff] %v9631_v18 }
 0x292   : > { %3642 = vmatpush.bf16.msra.mxu1 %v12782_v51  ;;  %v9623_v11 = vpop.f32.mrf.mxu1 }
 0x293   : > { %2932 = vmatpush.bf16.msrb.mxu2 %v9617_v47  ;;  %3021 = vmatpush.bf16.msrb.mxu3 %v9619_v26 }
 0x295   : > { %3554 = vmatpush.bf16.msra.mxu0 %v12785_v30 }
 0x296   : > { %3643 = vmatpush.bf16.msra.mxu1 %v12786_v57 }
 0x297   : > { %2933 = vmatpush.bf16.msrb.mxu2 %v9629_v8  ;;  %3022 = vmatpush.bf16.msrb.mxu3 %v9631_v18 }
 0x298   : > { %v9639_v38 = vpop.f32.mrf.mxu0 }
 0x299   : > { %3555 = vmatpush.bf16.msra.mxu0 %v12789_v45  ;;  %2618 = vmatmul.bf16.gmra.mxu2 %v9589_v25 }
 0x29a   : > { %3644 = vmatpush.bf16.msra.mxu1 %v12790_v0  ;;  %v9641_v29 = vpop.f32.mrf.mxu1  ;;  %2707 = vmatmul.bf16.gmra.mxu3 %v9589_v25  ;;  %v12808_v0 = vld [vmem:[#allocation38_spill] sm:$0xff] }
 0x29b   : > { %3730 = vmatpush.bf16.msra.mxu2 %v12791_v7  ;;  %3819 = vmatpush.bf16.msra.mxu3 %v12792_v12  ;;  %v12803_v7 = vld [vmem:[#allocation57_spill] sm:$0xff] }
 0x29c   : > { %v9652_v27 = vpop.f32.mrf.mxu2  ;;  %2445 = vmatmul.bf16.gmra.mxu0 %v9648_v17 }
 0x29d   : > { %3556 = vmatpush.bf16.msra.mxu0 %v12793_v61  ;;  %v9654_v22 = vpop.f32.mrf.mxu3  ;;  %2534 = vmatmul.bf16.gmra.mxu1 %v9648_v17  ;;  %v12801_v61 = vld [vmem:[#allocation27_spill] sm:$0xff] }
 0x29e   : > { %3645 = vmatpush.bf16.msra.mxu1 %v12794_v53 }
 0x29f   : > { %3731 = vmatpush.bf16.msra.mxu2 %v12795_v5  ;;  %3820 = vmatpush.bf16.msra.mxu3 %v12796_v46  ;;  %v12802_v5 = vld [vmem:[#allocation28_spill] sm:$0xff] }
 0x2a0   : > { %v9664_v34 = vpop.f32.mrf.mxu0 }
 0x2a1   : > { %3557 = vmatpush.bf16.msra.mxu0 %v12797_v35  ;;  %v12804_v35 = vld [vmem:[#allocation58_spill] sm:$0xff] }
 0x2a2   : > { %3646 = vmatpush.bf16.msra.mxu1 %v12798_v40  ;;  %v9666_v53 = vpop.f32.mrf.mxu1  ;;  %v12805_v40 = vld [vmem:[#allocation23_spill] sm:$0xff] }
 0x2a3   : > { %3732 = vmatpush.bf16.msra.mxu2 %v12799_v36  ;;  %3821 = vmatpush.bf16.msra.mxu3 %v12800_v60  ;;  %v12806_v36 = vld [vmem:[#allocation24_spill] sm:$0xff]  ;;  %v12807_v60 = vld [vmem:[#allocation37_spill] sm:$0xff] }
 0x2a4   : > { %v9670_v46 = vpop.f32.mrf.mxu2 }
 0x2a5   : > { %3558 = vmatpush.bf16.msra.mxu0 %v12801_v61  ;;  %v9672_v12 = vpop.f32.mrf.mxu3 }
 0x2a6   : > { %3647 = vmatpush.bf16.msra.mxu1 %v12802_v5  ;;  %v12814_v5 = vld [vmem:[#allocation30_spill] sm:$0xff] }
 0x2a7   : > { %3733 = vmatpush.bf16.msra.mxu2 %v12803_v7  ;;  %3822 = vmatpush.bf16.msra.mxu3 %v12804_v35  ;;  %v9689_v35 = vld [vmem:[%s12405_s7 + $0x50] sm:$0xff]  ;;  %v12813_v7 = vld [vmem:[#allocation29_spill] sm:$0xff] }
 0x2a8   : > { %v9680_v45 = vpop.f32.mrf.mxu0 }
 0x2a9   : > { %3559 = vmatpush.bf16.msra.mxu0 %v12805_v40  ;;  %12809 = vst [vmem:[#allocation59_spill] sm:$0xff] %v9680_v45  ;;  %2623 = vmatmul.bf16.gmra.mxu2 %v9648_v17  ;;  %v12863_v45 = vld [vmem:[#allocation61_spill] sm:$0xff] }
 0x2aa   : > { %3648 = vmatpush.bf16.msra.mxu1 %v12806_v36  ;;  %v9682_v61 = vpop.f32.mrf.mxu1  ;;  %2712 = vmatmul.bf16.gmra.mxu3 %v9648_v17 }
 0x2ab   : > { %3734 = vmatpush.bf16.msra.mxu2 %v12807_v60  ;;  %3823 = vmatpush.bf16.msra.mxu3 %v12808_v0  ;;  %12810 = vst [vmem:[#allocation14_spill] sm:$0xff] %v9682_v61  ;;  %v12811_v60 = vld [vmem:[#allocation33_spill] sm:$0xff]  ;;  %v12812_v0 = vld [vmem:[#allocation34_spill] sm:$0xff] }
 0x2ac   : > { %v9691_v40 = vpop.f32.mrf.mxu2  ;;  %2450 = vmatmul.bf16.gmra.mxu0 %v9689_v35 }
 0x2ad   : > { %v9693_v36 = vpop.f32.mrf.mxu3  ;;  %2539 = vmatmul.bf16.gmra.mxu1 %v9689_v35 }
 0x2af   : > { %3735 = vmatpush.bf16.msra.mxu2 %v12811_v60  ;;  %3824 = vmatpush.bf16.msra.mxu3 %v12812_v0  ;;  %v12818_v60 = vld [vmem:[#allocation26_spill] sm:$0xff] }
 0x2b0   : > { %v9701_v57 = vpop.f32.mrf.mxu0 }
 0x2b1   : > { %12815 = vst [vmem:[#allocation60_spill] sm:$0xff] %v9701_v57 }
 0x2b2   : > { %v9703_v30 = vpop.f32.mrf.mxu1 }
 0x2b3   : > { %3736 = vmatpush.bf16.msra.mxu2 %v12813_v7  ;;  %3825 = vmatpush.bf16.msra.mxu3 %v12814_v5  ;;  %12816 = vst [vmem:[#allocation13_spill] sm:$0xff] %v9703_v30  ;;  %v9720_v5 = vld [vmem:[%s12405_s7 + $0x58] sm:$0xff] }
 0x2b4   : > { %v9705_v51 = vpop.f32.mrf.mxu2  ;;  %12821 = vst [vmem:[#allocation56_spill] sm:$0xff] %v9720_v5 }
 0x2b5   : > { %v9707_v52 = vpop.f32.mrf.mxu3 }
 0x2b7   : > { %3737 = vmatpush.bf16.msra.mxu2 %v12817_v23  ;;  %3826 = vmatpush.bf16.msra.mxu3 %v12818_v60 }
 0x2b8   : > { %v9711_v0 = vpop.f32.mrf.mxu0 }
 0x2b9   : > { %12819 = vst [vmem:[#allocation55_spill] sm:$0xff] %v9711_v0  ;;  %2628 = vmatmul.bf16.gmra.mxu2 %v9689_v35 }
 0x2ba   : > { %v9713_v14 = vpop.f32.mrf.mxu1  ;;  %2717 = vmatmul.bf16.gmra.mxu3 %v9689_v35 }
 0x2bb   : > { %12820 = vst [vmem:[#allocation21_spill] sm:$0xff] %v9713_v14 }
 0x2bc   : > { %v9722_v7 = vpop.f32.mrf.mxu2  ;;  %2455 = vmatmul.bf16.gmra.mxu0 %v9720_v5 }
 0x2bd   : > { %12822 = vst [vmem:[#allocation17_spill] sm:$0xff] %v9722_v7  ;;  %v9724_v30 = vpop.f32.mrf.mxu3  ;;  %2544 = vmatmul.bf16.gmra.mxu1 %v9720_v5 }
 0x2be   : > { %12823 = vst [vmem:[#allocation49_spill] sm:$0xff] %v9724_v30  ;;  %v9745_v30 = vld [vmem:[%s12405_s7 + $0x60] sm:$0xff] }
 0x2bf   : > { %12830 = vst [vmem:[#allocation85_spill] sm:$0xff] %v9745_v30 }
 0x2c0   : > { %v9728_v60 = vpop.f32.mrf.mxu0 }
 0x2c1   : > { %12824 = vst [vmem:[#allocation19_spill] sm:$0xff] %v9728_v60 }
 0x2c2   : > { %v9730_v23 = vpop.f32.mrf.mxu1 }
 0x2c3   : > { %12825 = vst [vmem:[#allocation50_spill] sm:$0xff] %v9730_v23 }
 0x2c4   : > { %v9732_v14 = vpop.f32.mrf.mxu2 }
 0x2c5   : > { %12826 = vst [vmem:[#allocation18_spill] sm:$0xff] %v9732_v14  ;;  %v9734_v0 = vpop.f32.mrf.mxu3 }
 0x2c6   : > { %12827 = vst [vmem:[#allocation22_spill] sm:$0xff] %v9734_v0 }
 0x2c8   : > { %v9736_v57 = vpop.f32.mrf.mxu0 }
 0x2c9   : > { %12828 = vst [vmem:[#allocation20_spill] sm:$0xff] %v9736_v57  ;;  %2633 = vmatmul.bf16.gmra.mxu2 %v9720_v5 }
 0x2ca   : > { %v9738_v61 = vpop.f32.mrf.mxu1  ;;  %2722 = vmatmul.bf16.gmra.mxu3 %v9720_v5 }
 0x2cb   : > { %12829 = vst [vmem:[#allocation84_spill] sm:$0xff] %v9738_v61 }
 0x2cc   : > { %v9747_v60 = vpop.f32.mrf.mxu2  ;;  %2460 = vmatmul.bf16.gmra.mxu0 %v9745_v30 }
 0x2cd   : > { %12831 = vst [vmem:[#allocation86_spill] sm:$0xff] %v9747_v60  ;;  %v9749_v23 = vpop.f32.mrf.mxu3  ;;  %2549 = vmatmul.bf16.gmra.mxu1 %v9745_v30 }
 0x2ce   : > { %12832 = vst [vmem:[#allocation87_spill] sm:$0xff] %v9749_v23  ;;  %v9770_v23 = vld [vmem:[%s12405_s7 + $0x68] sm:$0xff] }
 0x2cf   : > { %12839 = vst [vmem:[#allocation94_spill] sm:$0xff] %v9770_v23 }
 0x2d0   : > { %v9753_v57 = vpop.f32.mrf.mxu0 }
 0x2d1   : > { %12833 = vst [vmem:[#allocation88_spill] sm:$0xff] %v9753_v57 }
 0x2d2   : > { %v9755_v61 = vpop.f32.mrf.mxu1 }
 0x2d3   : > { %12834 = vst [vmem:[#allocation89_spill] sm:$0xff] %v9755_v61 }
 0x2d4   : > { %v9757_v0 = vpop.f32.mrf.mxu2 }
 0x2d5   : > { %12835 = vst [vmem:[#allocation90_spill] sm:$0xff] %v9757_v0  ;;  %v9759_v14 = vpop.f32.mrf.mxu3 }
 0x2d6   : > { %12836 = vst [vmem:[#allocation91_spill] sm:$0xff] %v9759_v14 }
 0x2d8   : > { %v9761_v5 = vpop.f32.mrf.mxu0 }
 0x2d9   : > { %12837 = vst [vmem:[#allocation92_spill] sm:$0xff] %v9761_v5  ;;  %2638 = vmatmul.bf16.gmra.mxu2 %v9745_v30 }
 0x2da   : > { %v9763_v7 = vpop.f32.mrf.mxu1  ;;  %2727 = vmatmul.bf16.gmra.mxu3 %v9745_v30 }
 0x2db   : > { %12838 = vst [vmem:[#allocation93_spill] sm:$0xff] %v9763_v7 }
 0x2dc   : > { %v9772_v57 = vpop.f32.mrf.mxu2  ;;  %2465 = vmatmul.bf16.gmra.mxu0 %v9770_v23 }
 0x2dd   : > { %12840 = vst [vmem:[#allocation95_spill] sm:$0xff] %v9772_v57  ;;  %v9774_v61 = vpop.f32.mrf.mxu3  ;;  %2554 = vmatmul.bf16.gmra.mxu1 %v9770_v23 }
 0x2de   : > { %12841 = vst [vmem:[#allocation96_spill] sm:$0xff] %v9774_v61  ;;  %v9795_v61 = vld [vmem:[%s12405_s7 + $0x70] sm:$0xff] }
 0x2df   : > { %12848 = vst [vmem:[#allocation103_spill] sm:$0xff] %v9795_v61 }
 0x2e0   : > { %v9778_v5 = vpop.f32.mrf.mxu0 }
 0x2e1   : > { %12842 = vst [vmem:[#allocation97_spill] sm:$0xff] %v9778_v5 }
 0x2e2   : > { %v9780_v7 = vpop.f32.mrf.mxu1 }
 0x2e3   : > { %12843 = vst [vmem:[#allocation98_spill] sm:$0xff] %v9780_v7 }
 0x2e4   : > { %v9782_v14 = vpop.f32.mrf.mxu2 }
 0x2e5   : > { %12844 = vst [vmem:[#allocation99_spill] sm:$0xff] %v9782_v14  ;;  %v9784_v0 = vpop.f32.mrf.mxu3 }
 0x2e6   : > { %12845 = vst [vmem:[#allocation100_spill] sm:$0xff] %v9784_v0 }
 0x2e8   : > { %v9786_v30 = vpop.f32.mrf.mxu0 }
 0x2e9   : > { %12846 = vst [vmem:[#allocation101_spill] sm:$0xff] %v9786_v30  ;;  %2643 = vmatmul.bf16.gmra.mxu2 %v9770_v23 }
 0x2ea   : > { %v9788_v60 = vpop.f32.mrf.mxu1  ;;  %2732 = vmatmul.bf16.gmra.mxu3 %v9770_v23 }
 0x2eb   : > { %12847 = vst [vmem:[#allocation102_spill] sm:$0xff] %v9788_v60 }
 0x2ec   : > { %v9797_v5 = vpop.f32.mrf.mxu2  ;;  %2470 = vmatmul.bf16.gmra.mxu0 %v9795_v61 }
 0x2ed   : > { %12849 = vst [vmem:[#allocation104_spill] sm:$0xff] %v9797_v5  ;;  %v9799_v7 = vpop.f32.mrf.mxu3  ;;  %2559 = vmatmul.bf16.gmra.mxu1 %v9795_v61 }
 0x2ee   : > { %12850 = vst [vmem:[#allocation105_spill] sm:$0xff] %v9799_v7  ;;  %v9820_v7 = vld [vmem:[%s12405_s7 + $0x78] sm:$0xff] }
 0x2f0   : > { %v9803_v30 = vpop.f32.mrf.mxu0 }
 0x2f1   : > { %12851 = vst [vmem:[#allocation106_spill] sm:$0xff] %v9803_v30 }
 0x2f2   : > { %v9805_v60 = vpop.f32.mrf.mxu1 }
 0x2f3   : > { %12852 = vst [vmem:[#allocation107_spill] sm:$0xff] %v9805_v60 }
 0x2f4   : > { %v9807_v0 = vpop.f32.mrf.mxu2 }
 0x2f5   : > { %12853 = vst [vmem:[#allocation108_spill] sm:$0xff] %v9807_v0  ;;  %v9809_v14 = vpop.f32.mrf.mxu3 }
 0x2f6   : > { %12854 = vst [vmem:[#allocation109_spill] sm:$0xff] %v9809_v14 }
 0x2f9   : > { %v9811_v23 = vpop.f32.mrf.mxu0  ;;  %2648 = vmatmul.bf16.gmra.mxu2 %v9795_v61 }
 0x2fa   : > { %12855 = vst [vmem:[#allocation110_spill] sm:$0xff] %v9811_v23  ;;  %v9813_v57 = vpop.f32.mrf.mxu1  ;;  %2737 = vmatmul.bf16.gmra.mxu3 %v9795_v61 }
 0x2fb   : > { %12856 = vst [vmem:[#allocation111_spill] sm:$0xff] %v9813_v57 }
 0x2fc   : > { %v9822_v30 = vpop.f32.mrf.mxu2  ;;  %2475 = vmatmul.bf16.gmra.mxu0 %v9820_v7 }
 0x2fd   : > { %12857 = vst [vmem:[#allocation112_spill] sm:$0xff] %v9822_v30  ;;  %v9824_v60 = vpop.f32.mrf.mxu3  ;;  %2564 = vmatmul.bf16.gmra.mxu1 %v9820_v7 }
 0x2fe   : > { %12858 = vst [vmem:[#allocation113_spill] sm:$0xff] %v9824_v60 }
 0x301   : > { %v9828_v23 = vpop.f32.mrf.mxu0 }
 0x302   : > { %12859 = vst [vmem:[#allocation114_spill] sm:$0xff] %v9828_v23  ;;  %v9830_v57 = vpop.f32.mrf.mxu1 }
 0x303   : > { %12860 = vst [vmem:[#allocation115_spill] sm:$0xff] %v9830_v57 }
 0x304   : > { %v9832_v14 = vpop.f32.mrf.mxu2 }
 0x305   : > { %v9834_v0 = vpop.f32.mrf.mxu3 }
 0x309   : > { %2653 = vmatmul.bf16.gmra.mxu2 %v9820_v7  ;;  %v9838_v61 = vpop.f32.mrf.mxu0 }
 0x30a   : > { %2742 = vmatmul.bf16.gmra.mxu3 %v9820_v7  ;;  %12861 = vst [vmem:[#allocation116_spill] sm:$0xff] %v9838_v61  ;;  %v9840_v30 = vpop.f32.mrf.mxu1 }
 0x30b   : > { %12862 = vst [vmem:[#allocation117_spill] sm:$0xff] %v9840_v30 }
 0x30c   : > { %v9842_v60 = vpop.f32.mrf.mxu2  ;;  %2756 = vmatmul.bf16.vlgmr.msrb.gmra.mxu0 %v12863_v45 }
 0x30d   : > { %v9844_v5 = vpop.f32.mrf.mxu3  ;;  %2845 = vmatmul.bf16.vlgmr.msrb.gmra.mxu1 %v12863_v45  ;;  %3908 = vmatpush.bf16.msrb.mxu0 %v9406_v19 }
 0x30e   : > { %3997 = vmatpush.bf16.msrb.mxu1 %v9408_v42 }
 0x311   : > { %v9850_v57 = vpop.f32.mrf.mxu0  ;;  %3909 = vmatpush.bf16.msrb.mxu0 %v9424_v48 }
 0x312   : > { %v9852_v23 = vpop.f32.mrf.mxu1  ;;  %3998 = vmatpush.bf16.msrb.mxu1 %v9426_v58 }
 0x314   : > { %v9856_v30 = vpop.f32.mrf.mxu2 }
 0x315   : > { %v9858_v61 = vpop.f32.mrf.mxu3  ;;  %3910 = vmatpush.bf16.msrb.mxu0 %v9439_v39 }
 0x316   : > { %3999 = vmatpush.bf16.msrb.mxu1 %v9441_v37  ;;  %v12864_v37 = vld [vmem:[#allocation66_spill] sm:$0xff] }
 0x319   : > { %2934 = vmatmul.bf16.vlgmr.msrb.gmra.mxu2 %v12863_v45  ;;  %3911 = vmatpush.bf16.msrb.mxu0 %v9467_v28  ;;  %v9866_v42 = vpop.f32.mrf.mxu0 }
 0x31a   : > { %3023 = vmatmul.bf16.vlgmr.msrb.gmra.mxu3 %v12863_v45  ;;  %4000 = vmatpush.bf16.msrb.mxu1 %v9469_v15  ;;  %v9868_v48 = vpop.f32.mrf.mxu1 }
 0x31b   : > { %4086 = vmatpush.bf16.msrb.mxu2 %v9463_v21  ;;  %4175 = vmatpush.bf16.msrb.mxu3 %v9465_v49 }
 0x31c   : > { %v9872_v58 = vpop.f32.mrf.mxu2  ;;  %2761 = vmatmul.bf16.gmra.mxu0 %v12864_v37 }
 0x31d   : > { %v9874_v39 = vpop.f32.mrf.mxu3  ;;  %2850 = vmatmul.bf16.gmra.mxu1 %v12864_v37  ;;  %3912 = vmatpush.bf16.msrb.mxu0 %v9364_v24 }
 0x31e   : > { %4001 = vmatpush.bf16.msrb.mxu1 %v9411_v31  ;;  %v8033_v31 = vld [vmem:[%s12405_s7 + $0x20] sm:$0xff] }
 0x31f   : > { %4087 = vmatpush.bf16.msrb.mxu2 %v9504_v63  ;;  %4176 = vmatpush.bf16.msrb.mxu3 %v9506_v4 }
 0x321   : > { %3913 = vmatpush.bf16.msrb.mxu0 %v9357_v20  ;;  %v9884_v45 = vpop.f32.mrf.mxu0 }
 0x322   : > { %4002 = vmatpush.bf16.msrb.mxu1 %v9509_v16  ;;  %v9886_v49 = vpop.f32.mrf.mxu1 }
 0x323   : > { %4088 = vmatpush.bf16.msrb.mxu2 %v9527_v62  ;;  %4177 = vmatpush.bf16.msrb.mxu3 %v9529_v6  ;;  %v8030_v62 = vld [vmem:[%s12405_s7 + $0x8] sm:$0xff] }
 0x324   : > { %v9890_v21 = vpop.f32.mrf.mxu2 }
 0x325   : > { %v9892_v24 = vpop.f32.mrf.mxu3  ;;  %3914 = vmatpush.bf16.msrb.mxu0 %v12762_v9 }
 0x326   : > { %4003 = vmatpush.bf16.msrb.mxu1 %v9534_v54 }
 0x327   : > { %4089 = vmatpush.bf16.msrb.mxu2 %v9552_v1  ;;  %4178 = vmatpush.bf16.msrb.mxu3 %v9554_v13  ;;  %v12865_v1 = vld [vmem:[#allocation71_spill] sm:$0xff] }
 0x329   : > { %2939 = vmatmul.bf16.gmra.mxu2 %v12864_v37  ;;  %3915 = vmatpush.bf16.msrb.mxu0 %v12773_v59  ;;  %v9904_v6 = vpop.f32.mrf.mxu0 }
 0x32a   : > { %3028 = vmatmul.bf16.gmra.mxu3 %v8030_v62  ;;  %4004 = vmatpush.bf16.msrb.mxu1 %v9558_v50  ;;  %v9906_v9 = vpop.f32.mrf.mxu1 }
 0x32b   : > { %4090 = vmatpush.bf16.msrb.mxu2 %v9576_v55  ;;  %4179 = vmatpush.bf16.msrb.mxu3 %v9578_v2 }
 0x32c   : > { %v9910_v13 = vpop.f32.mrf.mxu2  ;;  %2766 = vmatmul.bf16.gmra.mxu0 %v12865_v1 }
 0x32d   : > { %v9912_v37 = vpop.f32.mrf.mxu3  ;;  %2855 = vmatmul.bf16.gmra.mxu1 %v12865_v1  ;;  %v8031_v1 = vld [vmem:[%s12405_s7 + $0x10] sm:$0xff] }
 0x32f   : > { %4091 = vmatpush.bf16.msrb.mxu2 %v9605_v33  ;;  %4180 = vmatpush.bf16.msrb.mxu3 %v9607_v32 }
 0x331   : > { %v9918_v62 = vpop.f32.mrf.mxu0 }
 0x332   : > { %v9920_v50 = vpop.f32.mrf.mxu1 }
 0x333   : > { %4092 = vmatpush.bf16.msrb.mxu2 %v9617_v47  ;;  %4181 = vmatpush.bf16.msrb.mxu3 %v9619_v26 }
 0x334   : > { %v9924_v2 = vpop.f32.mrf.mxu2 }
 0x335   : > { %v9926_v55 = vpop.f32.mrf.mxu3 }
 0x337   : > { %4093 = vmatpush.bf16.msrb.mxu2 %v9629_v8  ;;  %4182 = vmatpush.bf16.msrb.mxu3 %v9631_v18  ;;  %v8032_v8 = vld [vmem:[%s12405_s7 + $0x18] sm:$0xff] }
 0x339   : > { %2944 = vmatmul.bf16.gmra.mxu2 %v8031_v1  ;;  %v9933_v32 = vpop.f32.mrf.mxu0 }
 0x33a   : > { %3033 = vmatmul.bf16.gmra.mxu3 %v8031_v1  ;;  %12866 = vst [vmem:[#allocation61_spill] sm:$0xff] %v9933_v32  ;;  %v9935_v33 = vpop.f32.mrf.mxu1 }
 0x33b   : > { %12867 = vst [vmem:[#allocation66_spill] sm:$0xff] %v9935_v33 }
 0x33c   : > { %v9937_v47 = vpop.f32.mrf.mxu2  ;;  %2771 = vmatmul.bf16.gmra.mxu0 %v8032_v8 }
 0x33d   : > { %v9939_v26 = vpop.f32.mrf.mxu3  ;;  %2860 = vmatmul.bf16.gmra.mxu1 %v8032_v8 }
 0x341   : > { %v9944_v18 = vpop.f32.mrf.mxu0 }
 0x342   : > { %12868 = vst [vmem:[#allocation71_spill] sm:$0xff] %v9944_v18  ;;  %v9946_v59 = vpop.f32.mrf.mxu1 }
 0x343   : > { %12869 = vst [vmem:[#allocation118_spill] sm:$0xff] %v9946_v59 }
 0x344   : > { %v9948_v54 = vpop.f32.mrf.mxu2 }
 0x345   : > { %v9950_v1 = vpop.f32.mrf.mxu3 }
 0x346   : > { %12870 = vst [vmem:[#allocation119_spill] sm:$0xff] %v9950_v1 }
 0x349   : > { %2949 = vmatmul.bf16.gmra.mxu2 %v8032_v8  ;;  %v9952_v16 = vpop.f32.mrf.mxu0 }
 0x34a   : > { %3038 = vmatmul.bf16.gmra.mxu3 %v8032_v8  ;;  %12871 = vst [vmem:[#allocation120_spill] sm:$0xff] %v9952_v16  ;;  %v9954_v20 = vpop.f32.mrf.mxu1 }
 0x34b   : > { %12872 = vst [vmem:[#allocation121_spill] sm:$0xff] %v9954_v20 }
 0x34c   : > { %v9956_v4 = vpop.f32.mrf.mxu2  ;;  %2776 = vmatmul.bf16.gmra.mxu0 %v8033_v31 }
 0x34d   : > { %12873 = vst [vmem:[#allocation122_spill] sm:$0xff] %v9956_v4  ;;  %v9958_v63 = vpop.f32.mrf.mxu3  ;;  %2865 = vmatmul.bf16.gmra.mxu1 %v8033_v31 }
 0x34e   : > { %12874 = vst [vmem:[#allocation123_spill] sm:$0xff] %v9958_v63 }
 0x351   : > { %v9963_v15 = vpop.f32.mrf.mxu0 }
 0x352   : > { %12875 = vst [vmem:[#allocation124_spill] sm:$0xff] %v9963_v15  ;;  %v9965_v28 = vpop.f32.mrf.mxu1 }
 0x353   : > { %12876 = vst [vmem:[#allocation125_spill] sm:$0xff] %v9965_v28 }
 0x354   : > { %v9967_v19 = vpop.f32.mrf.mxu2 }
 0x355   : > { %12877 = vst [vmem:[#allocation126_spill] sm:$0xff] %v9967_v19  ;;  %v9969_v8 = vpop.f32.mrf.mxu3 }
 0x356   : > { %12878 = vst [vmem:[#allocation127_spill] sm:$0xff] %v9969_v8 }
 0x359   : > { %2954 = vmatmul.bf16.gmra.mxu2 %v8033_v31  ;;  %v9971_v20 = vpop.f32.mrf.mxu0 }
 0x35a   : > { %3043 = vmatmul.bf16.gmra.mxu3 %v8033_v31  ;;  %12879 = vst [vmem:[#allocation128_spill] sm:$0xff] %v9971_v20  ;;  %v9973_v16 = vpop.f32.mrf.mxu1 }
 0x35b   : > { %12880 = vst [vmem:[#allocation129_spill] sm:$0xff] %v9973_v16 }
 0x35c   : > { %v9975_v59 = vpop.f32.mrf.mxu2  ;;  %2781 = vmatmul.bf16.gmra.mxu0 %v9302_v3 }
 0x35d   : > { %12881 = vst [vmem:[#allocation130_spill] sm:$0xff] %v9975_v59  ;;  %v9977_v18 = vpop.f32.mrf.mxu3  ;;  %2870 = vmatmul.bf16.gmra.mxu1 %v9302_v3 }
 0x35e   : > { %12882 = vst [vmem:[#allocation131_spill] sm:$0xff] %v9977_v18 }
 0x361   : > { %v9981_v15 = vpop.f32.mrf.mxu0 }
 0x362   : > { %12883 = vst [vmem:[#allocation132_spill] sm:$0xff] %v9981_v15  ;;  %v9983_v28 = vpop.f32.mrf.mxu1 }
 0x363   : > { %12884 = vst [vmem:[#allocation133_spill] sm:$0xff] %v9983_v28 }
 0x364   : > { %v9985_v19 = vpop.f32.mrf.mxu2 }
 0x365   : > { %12885 = vst [vmem:[#allocation134_spill] sm:$0xff] %v9985_v19  ;;  %v9987_v8 = vpop.f32.mrf.mxu3 }
 0x366   : > { %12886 = vst [vmem:[#allocation135_spill] sm:$0xff] %v9987_v8 }
 0x369   : > { %2959 = vmatmul.bf16.gmra.mxu2 %v9302_v3  ;;  %v9991_v31 = vpop.f32.mrf.mxu0 }
 0x36a   : > { %3048 = vmatmul.bf16.gmra.mxu3 %v9302_v3  ;;  %12887 = vst [vmem:[#allocation136_spill] sm:$0xff] %v9991_v31  ;;  %v9993_v16 = vpop.f32.mrf.mxu1 }
 0x36b   : > { %12888 = vst [vmem:[#allocation137_spill] sm:$0xff] %v9993_v16 }
 0x36c   : > { %v9995_v20 = vpop.f32.mrf.mxu2  ;;  %2786 = vmatmul.bf16.gmra.mxu0 %v9397_v10 }
 0x36d   : > { %12889 = vst [vmem:[#allocation138_spill] sm:$0xff] %v9995_v20  ;;  %v9997_v18 = vpop.f32.mrf.mxu3  ;;  %2875 = vmatmul.bf16.gmra.mxu1 %v9397_v10 }
 0x36e   : > { %12890 = vst [vmem:[#allocation139_spill] sm:$0xff] %v9997_v18 }
 0x371   : > { %v10001_v28 = vpop.f32.mrf.mxu0 }
 0x372   : > { %12891 = vst [vmem:[#allocation140_spill] sm:$0xff] %v10001_v28  ;;  %v10003_v15 = vpop.f32.mrf.mxu1 }
 0x373   : > { %12892 = vst [vmem:[#allocation141_spill] sm:$0xff] %v10003_v15 }
 0x374   : > { %v10005_v8 = vpop.f32.mrf.mxu2 }
 0x375   : > { %12893 = vst [vmem:[#allocation142_spill] sm:$0xff] %v10005_v8  ;;  %v10007_v19 = vpop.f32.mrf.mxu3 }
 0x376   : > { %12894 = vst [vmem:[#allocation143_spill] sm:$0xff] %v10007_v19 }
 0x379   : > { %2964 = vmatmul.bf16.gmra.mxu2 %v9397_v10  ;;  %v10011_v3 = vpop.f32.mrf.mxu0 }
 0x37a   : > { %3053 = vmatmul.bf16.gmra.mxu3 %v9397_v10  ;;  %12895 = vst [vmem:[#allocation144_spill] sm:$0xff] %v10011_v3  ;;  %v10013_v16 = vpop.f32.mrf.mxu1 }
 0x37b   : > { %12896 = vst [vmem:[#allocation145_spill] sm:$0xff] %v10013_v16 }
 0x37c   : > { %v10015_v31 = vpop.f32.mrf.mxu2  ;;  %2791 = vmatmul.bf16.gmra.mxu0 %v9478_v56 }
 0x37d   : > { %12897 = vst [vmem:[#allocation146_spill] sm:$0xff] %v10015_v31  ;;  %v10017_v18 = vpop.f32.mrf.mxu3  ;;  %2880 = vmatmul.bf16.gmra.mxu1 %v9478_v56 }
 0x37e   : > { %12898 = vst [vmem:[#allocation147_spill] sm:$0xff] %v10017_v18 }
 0x381   : > { %v10021_v15 = vpop.f32.mrf.mxu0 }
 0x382   : > { %12899 = vst [vmem:[#allocation148_spill] sm:$0xff] %v10021_v15  ;;  %v10023_v28 = vpop.f32.mrf.mxu1 }
 0x383   : > { %12900 = vst [vmem:[#allocation149_spill] sm:$0xff] %v10023_v28 }
 0x384   : > { %v10025_v19 = vpop.f32.mrf.mxu2 }
 0x385   : > { %12901 = vst [vmem:[#allocation150_spill] sm:$0xff] %v10025_v19  ;;  %v10027_v8 = vpop.f32.mrf.mxu3 }
 0x386   : > { %12902 = vst [vmem:[#allocation151_spill] sm:$0xff] %v10027_v8 }
 0x389   : > { %2969 = vmatmul.bf16.gmra.mxu2 %v9478_v56  ;;  %v2757_v10 = vpop.f32.mrf.mxu0 }
 0x38a   : > { %3058 = vmatmul.bf16.gmra.mxu3 %v9478_v56  ;;  %v2846_v16 = vpop.f32.mrf.mxu1 }
 0x38b   : > { %v3105_v59 = vmax.f32 %v9584_v41, %v2846_v16 }
 0x38c   : > { %v10031_v3 = vpop.f32.mrf.mxu2  ;;  %2796 = vmatmul.bf16.gmra.mxu0 %v9589_v25 }
 0x38d   : > { %12903 = vst [vmem:[#allocation152_spill] sm:$0xff] %v10031_v3  ;;  %v10033_v18 = vpop.f32.mrf.mxu3  ;;  %2885 = vmatmul.bf16.gmra.mxu1 %v9589_v25  ;;  %v3104_v3 = vmax.f32 %v9582_v43, %v2757_v10 }
 0x38e   : > { %12904 = vst [vmem:[#allocation153_spill] sm:$0xff] %v10033_v18 }
 0x391   : > { %v2759_v15 = vpop.f32.mrf.mxu0 }
 0x392   : > { %v2848_v28 = vpop.f32.mrf.mxu1  ;;  %v3108_v10 = vmax.f32 %v9621_v44, %v2759_v15 }
 0x393   : > { %v3109_v16 = vmax.f32 %v9623_v11, %v2848_v28 }
 0x394   : > { %v10037_v31 = vpop.f32.mrf.mxu2 }
 0x395   : > { %12905 = vst [vmem:[#allocation154_spill] sm:$0xff] %v10037_v31  ;;  %v10039_v19 = vpop.f32.mrf.mxu3 }
 0x396   : > { %12906 = vst [vmem:[#allocation155_spill] sm:$0xff] %v10039_v19 }
 0x399   : > { %2974 = vmatmul.bf16.gmra.mxu2 %v9589_v25  ;;  %v2762_v56 = vpop.f32.mrf.mxu0 }
 0x39a   : > { %3063 = vmatmul.bf16.gmra.mxu3 %v9589_v25  ;;  %v2851_v8 = vpop.f32.mrf.mxu1 }
 0x39b   : > { %v3113_v28 = vmax.f32 %v9641_v29, %v2851_v8 }
 0x39c   : > { %v2935_v20 = vpop.f32.mrf.mxu2  ;;  %2801 = vmatmul.bf16.gmra.mxu0 %v9648_v17 }
 0x39d   : > { %v3024_v18 = vpop.f32.mrf.mxu3  ;;  %v3106_v63 = vmax.f32 %v9652_v27, %v2935_v20  ;;  %2890 = vmatmul.bf16.gmra.mxu1 %v9648_v17 }
 0x39e   : > { %v3107_v4 = vmax.f32 %v9654_v22, %v3024_v18 }
 0x39f   : > { %v3232_v19 = vmax.f32 %v3104_v3, %v3106_v63 }
 0x3a0   : > { %v3233_v31 = vmax.f32 %v3105_v59, %v3107_v4  ;;  %v3112_v59 = vmax.f32 %v9639_v38, %v2762_v56 }
 0x3a1   : > { %v2764_v25 = vpop.f32.mrf.mxu0 }
 0x3a2   : > { %v3296_v33 = vmax.f32 %v3232_v19, %v3233_v31  ;;  %v2853_v32 = vpop.f32.mrf.mxu1  ;;  %v3116_v3 = vmax.f32 %v9664_v34, %v2764_v25  ;;  %v12908_v25 = vld [vmem:[#allocation14_spill] sm:$0xff] }
 0x3a3   : > { %v3117_v29 = vmax.f32 %v9666_v53, %v2853_v32  ;;  %v12909_v53 = vld [vmem:[#allocation17_spill] sm:$0xff] }
 0x3a4   : > { %7035 = vmax.xlane.f32.xlu0 %v3296_v33  ;;  %v2937_v1 = vpop.f32.mrf.mxu2 }
 0x3a5   : > { %v3026_v43 = vpop.f32.mrf.mxu3  ;;  %v3110_v20 = vmax.f32 %v9670_v46, %v2937_v1 }
 0x3a6   : > { %v3111_v41 = vmax.f32 %v9672_v12, %v3026_v43 }
 0x3a7   : > { %v3234_v18 = vmax.f32 %v3108_v10, %v3110_v20  ;;  %v12907_v20 = vld [vmem:[#allocation59_spill] sm:$0xff] }
 0x3a8   : > { %v3235_v27 = vmax.f32 %v3109_v16, %v3111_v41 }
 0x3a9   : > { %2979 = vmatmul.bf16.gmra.mxu2 %v9648_v17  ;;  %v2767_v63 = vpop.f32.mrf.mxu0 }
 0x3aa   : > { %3068 = vmatmul.bf16.gmra.mxu3 %v9648_v17  ;;  %v3297_v19 = vmax.f32 %v3234_v18, %v3235_v27  ;;  %v2856_v4 = vpop.f32.mrf.mxu1  ;;  %v3120_v41 = vmax.f32 %v12907_v20, %v2767_v63  ;;  %v12910_v27 = vld [vmem:[#allocation49_spill] sm:$0xff] }
 0x3ab   : > { %v3121_v32 = vmax.f32 %v12908_v25, %v2856_v4 }
 0x3ac   : > { %7037 = vmax.xlane.f32.xlu1 %v3297_v19  ;;  %v2940_v33 = vpop.f32.mrf.mxu2  ;;  %2806 = vmatmul.bf16.gmra.mxu0 %v9689_v35  ;;  %v12911_v19 = vld [vmem:[#allocation56_spill] sm:$0xff] }
 0x3ad   : > { %v3029_v15 = vpop.f32.mrf.mxu3  ;;  %v3114_v44 = vmax.f32 %v9691_v40, %v2940_v33  ;;  %2895 = vmatmul.bf16.gmra.mxu1 %v9689_v35 }
 0x3ae   : > { %v3115_v11 = vmax.f32 %v9693_v36, %v3029_v15 }
 0x3af   : > { %v3236_v12 = vmax.f32 %v3112_v59, %v3114_v44 }
 0x3b0   : > { %v3237_v17 = vmax.f32 %v3113_v28, %v3115_v11  ;;  %v12912_v11 = vld [vmem:[#allocation60_spill] sm:$0xff] }
 0x3b1   : > { %v2769_v46 = vpop.f32.mrf.mxu0 }
 0x3b2   : > { %v3298_v22 = vmax.f32 %v3236_v12, %v3237_v17  ;;  %v2858_v1 = vpop.f32.mrf.mxu1  ;;  %v3124_v12 = vmax.f32 %v12912_v11, %v2769_v46  ;;  %v12913_v17 = vld [vmem:[#allocation13_spill] sm:$0xff]  ;;  %v12922_v11 = vld [vmem:[#allocation50_spill] sm:$0xff] }
 0x3b3   : > { %v3125_v4 = vmax.f32 %v12913_v17, %v2858_v1 }
 0x3b4   : > { %7039 = vmax.xlane.f32.xlu2 %v3298_v22  ;;  %v2942_v31 = vpop.f32.mrf.mxu2  ;;  %v12914_v22 = vld [vmem:[#allocation18_spill] sm:$0xff] }
 0x3b5   : > { %v3031_v38 = vpop.f32.mrf.mxu3  ;;  %v3118_v40 = vmax.f32 %v9705_v51, %v2942_v31 }
 0x3b6   : > { %v3119_v36 = vmax.f32 %v9707_v52, %v3031_v38  ;;  %v12915_v38 = vld [vmem:[#allocation22_spill] sm:$0xff] }
 0x3b7   : > { %v3238_v8 = vmax.f32 %v3116_v3, %v3118_v40 }
 0x3b8   : > { %v3239_v56 = vmax.f32 %v3117_v29, %v3119_v36 }
 0x3b9   : > { %2984 = vmatmul.bf16.gmra.mxu2 %v9689_v35  ;;  %v2772_v10 = vpop.f32.mrf.mxu0 }
 0x3ba   : > { %3073 = vmatmul.bf16.gmra.mxu3 %v9689_v35  ;;  %v3299_v43 = vmax.f32 %v3238_v8, %v3239_v56  ;;  %v2861_v16 = vpop.f32.mrf.mxu1 }
 0x3bc   : > { %7041 = vmax.xlane.f32.xlu2 %v3299_v43  ;;  %v2945_v18 = vpop.f32.mrf.mxu2  ;;  %2811 = vmatmul.bf16.gmra.mxu0 %v12911_v19  ;;  %v12916_v43 = vld [vmem:[#allocation55_spill] sm:$0xff] }
 0x3bd   : > { %v3034_v34 = vpop.f32.mrf.mxu3  ;;  %v3122_v51 = vmax.f32 %v12909_v53, %v2945_v18  ;;  %2900 = vmatmul.bf16.gmra.mxu1 %v12911_v19  ;;  %v3128_v20 = vmax.f32 %v12916_v43, %v2772_v10  ;;  %v12917_v18 = vld [vmem:[#allocation21_spill] sm:$0xff] }
 0x3be   : > { %v3123_v52 = vmax.f32 %v12910_v27, %v3034_v34  ;;  %v3129_v1 = vmax.f32 %v12917_v18, %v2861_v16  ;;  %v12918_v34 = vld [vmem:[#allocation86_spill] sm:$0xff] }
 0x3bf   : > { %v3240_v59 = vmax.f32 %v3120_v41, %v3122_v51  ;;  %v12920_v51 = vld [vmem:[#allocation85_spill] sm:$0xff] }
 0x3c0   : > { %v3241_v35 = vmax.f32 %v3121_v32, %v3123_v52  ;;  %v12919_v32 = vld [vmem:[#allocation87_spill] sm:$0xff] }
 0x3c1   : > { %v2774_v15 = vpop.f32.mrf.mxu0 }
 0x3c2   : > { %v3300_v33 = vmax.f32 %v3240_v59, %v3241_v35  ;;  %v2863_v28 = vpop.f32.mrf.mxu1 }
 0x3c3   : > { %v3133_v16 = vmax.f32 %v12922_v11, %v2863_v28 }
 0x3c4   : > { %7043 = vmax.xlane.f32.xlu0 %v3300_v33  ;;  %v2947_v44 = vpop.f32.mrf.mxu2 }
 0x3c5   : > { %v3036_v63 = vpop.f32.mrf.mxu3  ;;  %v3126_v31 = vmax.f32 %v12914_v22, %v2947_v44  ;;  %v12921_v44 = vld [vmem:[#allocation19_spill] sm:$0xff] }
 0x3c6   : > { %v3127_v3 = vmax.f32 %v12915_v38, %v3036_v63  ;;  %v3132_v63 = vmax.f32 %v12921_v44, %v2774_v15  ;;  %v12931_v44 = vld [vmem:[#allocation89_spill] sm:$0xff] }
 0x3c7   : > { %v3242_v29 = vmax.f32 %v3124_v12, %v3126_v31  ;;  %v12923_v12 = vld [vmem:[#allocation90_spill] sm:$0xff] }
 0x3c8   : > { %v3243_v40 = vmax.f32 %v3125_v4, %v3127_v3  ;;  %v12924_v4 = vld [vmem:[#allocation91_spill] sm:$0xff] }
 0x3c9   : > { %2989 = vmatmul.bf16.gmra.mxu2 %v12911_v19  ;;  %v2777_v8 = vpop.f32.mrf.mxu0 }
 0x3ca   : > { %3078 = vmatmul.bf16.gmra.mxu3 %v12911_v19  ;;  %v3301_v36 = vmax.f32 %v3242_v29, %v3243_v40  ;;  %v2866_v56 = vpop.f32.mrf.mxu1 }
 0x3cc   : > { %7045 = vmax.xlane.f32.xlu1 %v3301_v36  ;;  %v2950_v41 = vpop.f32.mrf.mxu2  ;;  %2816 = vmatmul.bf16.gmra.mxu0 %v12920_v51  ;;  %v12925_v36 = vld [vmem:[#allocation20_spill] sm:$0xff] }
 0x3cd   : > { %v3039_v46 = vpop.f32.mrf.mxu3  ;;  %v3130_v25 = vmax.f32 %v12918_v34, %v2950_v41  ;;  %2905 = vmatmul.bf16.gmra.mxu1 %v12920_v51  ;;  %v3136_v43 = vmax.f32 %v12925_v36, %v2777_v8  ;;  %v12926_v41 = vld [vmem:[#allocation84_spill] sm:$0xff] }
 0x3ce   : > { %v3131_v53 = vmax.f32 %v12919_v32, %v3039_v46  ;;  %v3137_v28 = vmax.f32 %v12926_v41, %v2866_v56  ;;  %v12927_v46 = vld [vmem:[#allocation95_spill] sm:$0xff] }
 0x3cf   : > { %v3244_v27 = vmax.f32 %v3128_v20, %v3130_v25  ;;  %v12929_v25 = vld [vmem:[#allocation94_spill] sm:$0xff] }
 0x3d0   : > { %v3245_v52 = vmax.f32 %v3129_v1, %v3131_v53  ;;  %v12928_v1 = vld [vmem:[#allocation96_spill] sm:$0xff] }
 0x3d1   : > { %v2779_v59 = vpop.f32.mrf.mxu0 }
 0x3d2   : > { %v3302_v19 = vmax.f32 %v3244_v27, %v3245_v52  ;;  %v2868_v35 = vpop.f32.mrf.mxu1 }
 0x3d3   : > { %v3141_v56 = vmax.f32 %v12931_v44, %v2868_v35 }
 0x3d4   : > { %7047 = vmax.xlane.f32.xlu2 %v3302_v19  ;;  %v2952_v33 = vpop.f32.mrf.mxu2 }
 0x3d5   : > { %v3041_v10 = vpop.f32.mrf.mxu3  ;;  %v3134_v17 = vmax.f32 %v12923_v12, %v2952_v33  ;;  %v12930_v33 = vld [vmem:[#allocation88_spill] sm:$0xff] }
 0x3d6   : > { %v3135_v22 = vmax.f32 %v12924_v4, %v3041_v10  ;;  %v3140_v10 = vmax.f32 %v12930_v33, %v2779_v59  ;;  %v12940_v33 = vld [vmem:[#allocation98_spill] sm:$0xff] }
 0x3d7   : > { %v3246_v31 = vmax.f32 %v3132_v63, %v3134_v17  ;;  %v12932_v63 = vld [vmem:[#allocation99_spill] sm:$0xff] }
 0x3d8   : > { %v3247_v38 = vmax.f32 %v3133_v16, %v3135_v22  ;;  %v12933_v16 = vld [vmem:[#allocation100_spill] sm:$0xff] }
 0x3d9   : > { %2994 = vmatmul.bf16.gmra.mxu2 %v12920_v51  ;;  %v2782_v29 = vpop.f32.mrf.mxu0 }
 0x3da   : > { %3083 = vmatmul.bf16.gmra.mxu3 %v12920_v51  ;;  %v3303_v3 = vmax.f32 %v3246_v31, %v3247_v38  ;;  %v2871_v40 = vpop.f32.mrf.mxu1 }
 0x3dc   : > { %7049 = vmax.xlane.f32.xlu0 %v3303_v3  ;;  %v2955_v20 = vpop.f32.mrf.mxu2  ;;  %2821 = vmatmul.bf16.gmra.mxu0 %v12929_v25  ;;  %v12934_v3 = vld [vmem:[#allocation92_spill] sm:$0xff] }
 0x3dd   : > { %v3044_v15 = vpop.f32.mrf.mxu3  ;;  %v3138_v18 = vmax.f32 %v12927_v46, %v2955_v20  ;;  %2910 = vmatmul.bf16.gmra.mxu1 %v12929_v25  ;;  %v3144_v36 = vmax.f32 %v12934_v3, %v2782_v29  ;;  %v12935_v20 = vld [vmem:[#allocation93_spill] sm:$0xff] }
 0x3de   : > { %v3139_v34 = vmax.f32 %v12928_v1, %v3044_v15  ;;  %v3145_v35 = vmax.f32 %v12935_v20, %v2871_v40  ;;  %v12936_v15 = vld [vmem:[#allocation104_spill] sm:$0xff] }
 0x3df   : > { %v3248_v32 = vmax.f32 %v3136_v43, %v3138_v18  ;;  %v12938_v18 = vld [vmem:[#allocation103_spill] sm:$0xff] }
 0x3e0   : > { %v3249_v53 = vmax.f32 %v3137_v28, %v3139_v34  ;;  %v12937_v28 = vld [vmem:[#allocation105_spill] sm:$0xff] }
 0x3e1   : > { %v2784_v27 = vpop.f32.mrf.mxu0 }
 0x3e2   : > { %v3304_v51 = vmax.f32 %v3248_v32, %v3249_v53  ;;  %v2873_v52 = vpop.f32.mrf.mxu1 }
 0x3e3   : > { %v3149_v40 = vmax.f32 %v12940_v33, %v2873_v52 }
 0x3e4   : > { %7051 = vmax.xlane.f32.xlu1 %v3304_v51  ;;  %v2957_v19 = vpop.f32.mrf.mxu2 }
 0x3e5   : > { %v3046_v8 = vpop.f32.mrf.mxu3  ;;  %v3142_v11 = vmax.f32 %v12932_v63, %v2957_v19  ;;  %v12939_v19 = vld [vmem:[#allocation97_spill] sm:$0xff] }
 0x3e6   : > { %v3143_v12 = vmax.f32 %v12933_v16, %v3046_v8  ;;  %v3148_v8 = vmax.f32 %v12939_v19, %v2784_v27 }
 0x3e7   : > { %v3250_v17 = vmax.f32 %v3140_v10, %v3142_v11  ;;  %v12941_v10 = vld [vmem:[#allocation108_spill] sm:$0xff] }
 0x3e8   : > { %v3251_v4 = vmax.f32 %v3141_v56, %v3143_v12  ;;  %v12942_v56 = vld [vmem:[#allocation109_spill] sm:$0xff] }
 0x3e9   : > { %2999 = vmatmul.bf16.gmra.mxu2 %v12929_v25  ;;  %v2787_v31 = vpop.f32.mrf.mxu0 }
 0x3ea   : > { %3088 = vmatmul.bf16.gmra.mxu3 %v12929_v25  ;;  %v3305_v22 = vmax.f32 %v3250_v17, %v3251_v4  ;;  %v2876_v38 = vpop.f32.mrf.mxu1 }
 0x3ec   : > { %7053 = vmax.xlane.f32.xlu2 %v3305_v22  ;;  %v2960_v43 = vpop.f32.mrf.mxu2  ;;  %2826 = vmatmul.bf16.gmra.mxu0 %v12938_v18  ;;  %v12943_v22 = vld [vmem:[#allocation101_spill] sm:$0xff] }
 0x3ed   : > { %v3049_v59 = vpop.f32.mrf.mxu3  ;;  %v3146_v41 = vmax.f32 %v12936_v15, %v2960_v43  ;;  %2915 = vmatmul.bf16.gmra.mxu1 %v12938_v18  ;;  %v3152_v3 = vmax.f32 %v12943_v22, %v2787_v31  ;;  %v12944_v43 = vld [vmem:[#allocation102_spill] sm:$0xff]  ;;  %v12951_v22 = vld [vmem:[#allocation39_spill] sm:$0xff] }
 0x3ee   : > { %v3147_v46 = vmax.f32 %v12937_v28, %v3049_v59  ;;  %v3153_v52 = vmax.f32 %v12944_v43, %v2876_v38  ;;  %v12945_v59 = vld [vmem:[#allocation112_spill] sm:$0xff] }
 0x3ef   : > { %v3252_v1 = vmax.f32 %v3144_v36, %v3146_v41 }
 0x3f0   : > { %v3253_v34 = vmax.f32 %v3145_v35, %v3147_v46  ;;  %v12946_v35 = vld [vmem:[#allocation113_spill] sm:$0xff] }
 0x3f1   : > { %v2789_v32 = vpop.f32.mrf.mxu0 }
 0x3f2   : > { %v3306_v25 = vmax.f32 %v3252_v1, %v3253_v34  ;;  %v2878_v53 = vpop.f32.mrf.mxu1 }
 0x3f4   : > { %7055 = vmax.xlane.f32.xlu0 %v3306_v25  ;;  %v2962_v51 = vpop.f32.mrf.mxu2  ;;  %v12947_v25 = vld [vmem:[#allocation106_spill] sm:$0xff] }
 0x3f5   : > { %v3051_v29 = vpop.f32.mrf.mxu3  ;;  %v3150_v44 = vmax.f32 %v12941_v10, %v2962_v51  ;;  %v3156_v51 = vmax.f32 %v12947_v25, %v2789_v32 }
 0x3f6   : > { %v3151_v63 = vmax.f32 %v12942_v56, %v3051_v29  ;;  %v12948_v29 = vld [vmem:[#allocation107_spill] sm:$0xff] }
 0x3f7   : > { %v3254_v11 = vmax.f32 %v3148_v8, %v3150_v44  ;;  %v3157_v38 = vmax.f32 %v12948_v29, %v2878_v53  ;;  %v10130_v44 = vld [vmem:[%s12405_s7 + $0x80] sm:$0xff] }
 0x3f8   : > { %v3255_v16 = vmax.f32 %v3149_v40, %v3151_v63  ;;  %v12949_v53 = vld [vmem:[#allocation110_spill] sm:$0xff] }
 0x3f9   : > { %3004 = vmatmul.bf16.gmra.mxu2 %v12938_v18  ;;  %v2792_v17 = vpop.f32.mrf.mxu0 }
 0x3fa   : > { %3093 = vmatmul.bf16.gmra.mxu3 %v12938_v18  ;;  %v3307_v12 = vmax.f32 %v3254_v11, %v3255_v16  ;;  %v2881_v4 = vpop.f32.mrf.mxu1  ;;  %v12950_v11 = vld [vmem:[#allocation111_spill] sm:$0xff] }
 0x3fb   : > { %v3161_v16 = vmax.f32 %v12950_v11, %v2881_v4 }
 0x3fc   : > { %7057 = vmax.xlane.f32.xlu1 %v3307_v12  ;;  %v2965_v36 = vpop.f32.mrf.mxu2  ;;  %2831 = vmatmul.bf16.gmra.mxu0 %v9820_v7 }
 0x3fd   : > { %v3054_v27 = vpop.f32.mrf.mxu3  ;;  %v3154_v20 = vmax.f32 %v12945_v59, %v2965_v36  ;;  %2920 = vmatmul.bf16.gmra.mxu1 %v9820_v7 }
 0x3fe   : > { %v3155_v15 = vmax.f32 %v12946_v35, %v3054_v27 }
 0x3ff   : > { %v3256_v41 = vmax.f32 %v3152_v3, %v3154_v20  ;;  %v12952_v3 = vld [vmem:[#allocation40_spill] sm:$0xff]  ;;  %v12955_v20 = vld [vmem:[#allocation114_spill] sm:$0xff] }
 0x400   : > { %v3257_v28 = vmax.f32 %v3153_v52, %v3155_v15  ;;  %v12954_v52 = vld [vmem:[#allocation42_spill] sm:$0xff]  ;;  %v12956_v15 = vld [vmem:[#allocation115_spill] sm:$0xff] }
 0x401   : > { %v2794_v18 = vpop.f32.mrf.mxu0 }
 0x402   : > { %v3308_v46 = vmax.f32 %v3256_v41, %v3257_v28  ;;  %v2883_v1 = vpop.f32.mrf.mxu1  ;;  %v3164_v35 = vmax.f32 %v12955_v20, %v2794_v18 }
 0x403   : > { %v3165_v41 = vmax.f32 %v12956_v15, %v2883_v1  ;;  %v12960_v1 = vld [vmem:[#allocation44_spill] sm:$0xff]  ;;  %v12972_v15 = vld [vmem:[#allocation54_spill] sm:$0xff] }
 0x404   : > { %7059 = vmax.xlane.f32.xlu2 %v3308_v46  ;;  %v2967_v34 = vpop.f32.mrf.mxu2 }
 0x405   : > { %v3056_v31 = vpop.f32.mrf.mxu3  ;;  %v3158_v19 = vmax.f32 %v9832_v14, %v2967_v34  ;;  %v3160_v14 = vmax.f32 %v12949_v53, %v2792_v17  ;;  %v12953_v17 = vld [vmem:[#allocation41_spill] sm:$0xff] }
 0x406   : > { %v3159_v8 = vmax.f32 %v9834_v0, %v3056_v31  ;;  %v12957_v34 = vld [vmem:[#allocation45_spill] sm:$0xff]  ;;  %v12958_v31 = vld [vmem:[#allocation46_spill] sm:$0xff] }
 0x407   : > { %v3258_v33 = vmax.f32 %v3156_v51, %v3158_v19 }
 0x408   : > { %v3259_v40 = vmax.f32 %v3157_v38, %v3159_v8  ;;  %v12961_v8 = vld [vmem:[#allocation47_spill] sm:$0xff] }
 0x409   : > { %3009 = vmatmul.bf16.gmra.mxu2 %v9820_v7  ;;  %v2797_v56 = vpop.f32.mrf.mxu0 }
 0x40a   : > { %3098 = vmatmul.bf16.gmra.mxu3 %v9820_v7  ;;  %v3309_v10 = vmax.f32 %v3258_v33, %v3259_v40  ;;  %v2886_v32 = vpop.f32.mrf.mxu1  ;;  %v12962_v33 = vld [vmem:[#allocation48_spill] sm:$0xff] }
 0x40b   : > { %v12963_v40 = vld [vmem:[#allocation116_spill] sm:$0xff] }
 0x40c   : > { %7061 = vmax.xlane.f32.xlu0 %v3309_v10  ;;  %v2970_v63 = vpop.f32.mrf.mxu2  ;;  %3560 = vmatmul.bf16.vlgmr.msra.gmra.mxu0 %v10130_v44  ;;  %v3168_v10 = vmax.f32 %v12963_v40, %v2797_v56  ;;  %v12974_v40 = vld [vmem:[#allocation28_spill] sm:$0xff] }
 0x40d   : > { %v3059_v0 = vpop.f32.mrf.mxu3  ;;  %v3162_v12 = vmax.f32 %v9842_v60, %v2970_v63  ;;  %3649 = vmatmul.bf16.vlgmr.msra.gmra.mxu1 %v10130_v44  ;;  %4712 = vmatpush.bf16.msra.mxu0 %v12951_v22  ;;  %v12964_v63 = vld [vmem:[#allocation117_spill] sm:$0xff] }
 0x40e   : > { %v3163_v7 = vmax.f32 %v9844_v5, %v3059_v0  ;;  %4801 = vmatpush.bf16.msra.mxu1 %v12952_v3  ;;  %v3169_v0 = vmax.f32 %v12964_v63, %v2886_v32  ;;  %v12969_v32 = vld [vmem:[#allocation31_spill] sm:$0xff] }
 0x40f   : > { %v3260_v36 = vmax.f32 %v3160_v14, %v3162_v12  ;;  %v12965_v12 = vld [vmem:[#allocation35_spill] sm:$0xff] }
 0x410   : > { %v3261_v27 = vmax.f32 %v3161_v16, %v3163_v7  ;;  %v12966_v7 = vld [vmem:[#allocation36_spill] sm:$0xff] }
 0x411   : > { %4713 = vmatpush.bf16.msra.mxu0 %v12953_v17  ;;  %v10143_v4 = vpop.f32.mrf.mxu0 }
 0x412   : > { %v3310_v43 = vmax.f32 %v3260_v36, %v3261_v27  ;;  %4802 = vmatpush.bf16.msra.mxu1 %v12954_v52  ;;  %v10145_v60 = vpop.f32.mrf.mxu1 }
 0x414   : > { %7063 = vmax.xlane.f32.xlu1 %v3310_v43  ;;  %v2972_v5 = vpop.f32.mrf.mxu2  ;;  %v12967_v43 = vld [vmem:[#allocation51_spill] sm:$0xff] }
 0x415   : > { %v3061_v59 = vpop.f32.mrf.mxu3  ;;  %v3166_v28 = vmax.f32 %v9856_v30, %v2972_v5  ;;  %4714 = vmatpush.bf16.msra.mxu0 %v12957_v34  ;;  %v10165_v30 = vld [vmem:[%s12405_s7 + $0x88] sm:$0xff]  ;;  %v12968_v5 = vld [vmem:[#allocation52_spill] sm:$0xff] }
 0x416   : > { %v3167_v46 = vmax.f32 %v9858_v61, %v3061_v59  ;;  %4803 = vmatpush.bf16.msra.mxu1 %v12958_v31  ;;  %v12959_v61 = vld [vmem:[#allocation43_spill] sm:$0xff] }
 0x417   : > { %v7036_v25 = vpop.xlane.xlu0 %7035  ;;  %v3262_v51 = vmax.f32 %v3164_v35, %v3166_v28  ;;  %v12971_v35 = vld [vmem:[#allocation53_spill] sm:$0xff] }
 0x418   : > { %7292 = vst.msk [vmem:[%s10150_s17] sm:$0xff] %vm7291_vm4, %v7036_v25  ;;  %v3263_v29 = vmax.f32 %v3165_v41, %v3167_v46  ;;  %v3172_v46 = vmax.f32 %v9850_v57, %v10143_v4  ;;  %v3173_v25 = vmax.f32 %v9852_v23, %v10145_v60  ;;  %v12977_v23 = vld [vmem:[#allocation23_spill] sm:$0xff]  ;;  %v12978_v4 = vld [vmem:[#allocation24_spill] sm:$0xff] }
 0x419   : > { %3738 = vmatmul.bf16.vlgmr.msra.gmra.mxu2 %v10130_v44  ;;  %4715 = vmatpush.bf16.msra.mxu0 %v12959_v61  ;;  %v10169_v38 = vpop.f32.mrf.mxu0 }
 0x41a   : > { %3827 = vmatmul.bf16.vlgmr.msra.gmra.mxu3 %v10130_v44  ;;  %v3311_v18 = vmax.f32 %v3262_v51, %v3263_v29  ;;  %4804 = vmatpush.bf16.msra.mxu1 %v12960_v1  ;;  %v10171_v19 = vpop.f32.mrf.mxu1 }
 0x41b   : > { %4890 = vmatpush.bf16.msra.mxu2 %v12961_v8  ;;  %4979 = vmatpush.bf16.msra.mxu3 %v12962_v33 }
 0x41c   : > { %7065 = vmax.xlane.f32.xlu2 %v3311_v18  ;;  %v2975_v53 = vpop.f32.mrf.mxu2  ;;  %3565 = vmatmul.bf16.gmra.mxu0 %v10165_v30  ;;  %v12973_v18 = vld [vmem:[#allocation27_spill] sm:$0xff] }
 0x41d   : > { %v3064_v14 = vpop.f32.mrf.mxu3  ;;  %v3170_v11 = vmax.f32 %v9872_v58, %v2975_v53  ;;  %3654 = vmatmul.bf16.gmra.mxu1 %v10165_v30  ;;  %4716 = vmatpush.bf16.msra.mxu0 %v12965_v12  ;;  %v12975_v53 = vld [vmem:[#allocation57_spill] sm:$0xff] }
 0x41e   : > { %v3171_v16 = vmax.f32 %v9874_v39, %v3064_v14  ;;  %4805 = vmatpush.bf16.msra.mxu1 %v12966_v7  ;;  %v12970_v39 = vld [vmem:[#allocation32_spill] sm:$0xff]  ;;  %v12976_v14 = vld [vmem:[#allocation58_spill] sm:$0xff] }
 0x41f   : > { %v7038_v36 = vpop.xlane.xlu1 %7037  ;;  %v3264_v56 = vmax.f32 %v3168_v10, %v3170_v11  ;;  %4891 = vmatpush.bf16.msra.mxu2 %v12967_v43  ;;  %4980 = vmatpush.bf16.msra.mxu3 %v12968_v5  ;;  %v12979_v11 = vld [vmem:[#allocation37_spill] sm:$0xff] }
 0x420   : > { %v3265_v27 = vmax.f32 %v3169_v0, %v3171_v16  ;;  %7293 = vst.msk [vmem:[%s10150_s17 + $0x8] sm:$0xff] %vm7291_vm4, %v7038_v36  ;;  %v12980_v16 = vld [vmem:[#allocation38_spill] sm:$0xff]  ;;  %v3176_v36 = vmax.f32 %v9866_v42, %v10169_v38 }
 0x421   : > { %4717 = vmatpush.bf16.msra.mxu0 %v12969_v32  ;;  %v2804_v59 = vpop.f32.mrf.mxu0  ;;  %v12982_v42 = vld [vmem:[#allocation34_spill] sm:$0xff] }
 0x422   : > { %v3312_v58 = vmax.f32 %v3264_v56, %v3265_v27  ;;  %4806 = vmatpush.bf16.msra.mxu1 %v12970_v39  ;;  %v2893_v20 = vpop.f32.mrf.mxu1 }
 0x423   : > { %4892 = vmatpush.bf16.msra.mxu2 %v12971_v35  ;;  %4981 = vmatpush.bf16.msra.mxu3 %v12972_v15 }
 0x424   : > { %7067 = vmax.xlane.f32.xlu0 %v3312_v58  ;;  %v2977_v41 = vpop.f32.mrf.mxu2  ;;  %v3177_v58 = vmax.f32 %v9868_v48, %v10171_v19 }
 0x425   : > { %v3066_v28 = vpop.f32.mrf.mxu3  ;;  %v3174_v51 = vmax.f32 %v9890_v21, %v2977_v41  ;;  %4718 = vmatpush.bf16.msra.mxu0 %v12973_v18 }
 0x426   : > { %v3175_v29 = vmax.f32 %v9892_v24, %v3066_v28  ;;  %4807 = vmatpush.bf16.msra.mxu1 %v12974_v40  ;;  %v10208_v24 = vld [vmem:[%s12405_s7 + $0x90] sm:$0xff] }
 0x427   : > { %v7040_v10 = vpop.xlane.xlu2 %7039  ;;  %4893 = vmatpush.bf16.msra.mxu2 %v12975_v53  ;;  %4982 = vmatpush.bf16.msra.mxu3 %v12976_v14  ;;  %v3266_v63 = vmax.f32 %v3172_v46, %v3174_v51 }
 0x428   : > { %7294 = vst.msk [vmem:[%s10150_s17 + $0x10] sm:$0xff] %vm7291_vm4, %v7040_v10  ;;  %v3267_v57 = vmax.f32 %v3173_v25, %v3175_v29  ;;  %v12981_v29 = vld [vmem:[#allocation33_spill] sm:$0xff] }
 0x429   : > { %3743 = vmatmul.bf16.gmra.mxu2 %v10165_v30  ;;  %4719 = vmatpush.bf16.msra.mxu0 %v12977_v23  ;;  %v2807_v60 = vpop.f32.mrf.mxu0 }
 0x42a   : > { %3832 = vmatmul.bf16.gmra.mxu3 %v10165_v30  ;;  %v3313_v21 = vmax.f32 %v3266_v63, %v3267_v57  ;;  %4808 = vmatpush.bf16.msra.mxu1 %v12978_v4  ;;  %v2896_v0 = vpop.f32.mrf.mxu1  ;;  %v3180_v57 = vmax.f32 %v9884_v45, %v2804_v59  ;;  %v3184_v59 = vmax.f32 %v9904_v6, %v2807_v60 }
 0x42b   : > { %4894 = vmatpush.bf16.msra.mxu2 %v12979_v11  ;;  %4983 = vmatpush.bf16.msra.mxu3 %v12980_v16 }
 0x42c   : > { %7069 = vmax.xlane.f32.xlu1 %v3313_v21  ;;  %v2980_v56 = vpop.f32.mrf.mxu2  ;;  %3570 = vmatmul.bf16.gmra.mxu0 %v10208_v24  ;;  %v3181_v21 = vmax.f32 %v9886_v49, %v2893_v20  ;;  %v10241_v49 = vld [vmem:[%s12405_s7 + $0x98] sm:$0xff] }
 0x42d   : > { %v3069_v27 = vpop.f32.mrf.mxu3  ;;  %v3178_v41 = vmax.f32 %v9910_v13, %v2980_v56  ;;  %3659 = vmatmul.bf16.gmra.mxu1 %v10208_v24  ;;  %v12983_v13 = vld [vmem:[#allocation29_spill] sm:$0xff] }
 0x42e   : > { %v3179_v28 = vmax.f32 %v9912_v37, %v3069_v27  ;;  %v12984_v37 = vld [vmem:[#allocation30_spill] sm:$0xff] }
 0x42f   : > { %v7042_v46 = vpop.xlane.xlu2 %7041  ;;  %v3268_v25 = vmax.f32 %v3176_v36, %v3178_v41  ;;  %4895 = vmatpush.bf16.msra.mxu2 %v12981_v29  ;;  %4984 = vmatpush.bf16.msra.mxu3 %v12982_v42  ;;  %v12986_v41 = vld [vmem:[#allocation26_spill] sm:$0xff] }
 0x430   : > { %v3269_v51 = vmax.f32 %v3177_v58, %v3179_v28  ;;  %7295 = vst.msk [vmem:[%s10150_s17 + $0x18] sm:$0xff] %vm7291_vm4, %v7042_v46  ;;  %v12985_v58 = vld [vmem:[#allocation25_spill] sm:$0xff] }
 0x431   : > { %v2809_v48 = vpop.f32.mrf.mxu0 }
 0x432   : > { %v3314_v38 = vmax.f32 %v3268_v25, %v3269_v51  ;;  %v2898_v19 = vpop.f32.mrf.mxu1  ;;  %v3185_v51 = vmax.f32 %v9906_v9, %v2896_v0 }
 0x433   : > { %4896 = vmatpush.bf16.msra.mxu2 %v12983_v13  ;;  %4985 = vmatpush.bf16.msra.mxu3 %v12984_v37 }
 0x434   : > { %7071 = vmax.xlane.f32.xlu2 %v3314_v38  ;;  %v2982_v10 = vpop.f32.mrf.mxu2 }
 0x435   : > { %v3071_v63 = vpop.f32.mrf.mxu3  ;;  %v3182_v36 = vmax.f32 %v9924_v2, %v2982_v10 }
 0x436   : > { %v3183_v56 = vmax.f32 %v9926_v55, %v3071_v63 }
 0x437   : > { %v7044_v27 = vpop.xlane.xlu0 %7043  ;;  %4897 = vmatpush.bf16.msra.mxu2 %v12985_v58  ;;  %4986 = vmatpush.bf16.msra.mxu3 %v12986_v41  ;;  %v3270_v28 = vmax.f32 %v3180_v57, %v3182_v36 }
 0x438   : > { %7296 = vst.msk [vmem:[%s10150_s17 + $0x20] sm:$0xff] %vm7291_vm4, %v7044_v27  ;;  %v3271_v46 = vmax.f32 %v3181_v21, %v3183_v56  ;;  %v12987_v27 = vld [vmem:[#allocation119_spill] sm:$0xff] }
 0x439   : > { %3748 = vmatmul.bf16.gmra.mxu2 %v10208_v24  ;;  %v2812_v55 = vpop.f32.mrf.mxu0 }
 0x43a   : > { %3837 = vmatmul.bf16.gmra.mxu3 %v10208_v24  ;;  %v3315_v45 = vmax.f32 %v3270_v28, %v3271_v46  ;;  %v2901_v2 = vpop.f32.mrf.mxu1 }
 0x43c   : > { %7073 = vmax.xlane.f32.xlu0 %v3315_v45  ;;  %v2985_v20 = vpop.f32.mrf.mxu2  ;;  %3575 = vmatmul.bf16.gmra.mxu0 %v10241_v49 }
 0x43d   : > { %v3074_v25 = vpop.f32.mrf.mxu3  ;;  %v3186_v38 = vmax.f32 %v9937_v47, %v2985_v20  ;;  %3664 = vmatmul.bf16.gmra.mxu1 %v10241_v49  ;;  %v3188_v47 = vmax.f32 %v9918_v62, %v2809_v48  ;;  %v10262_v62 = vld [vmem:[%s12405_s7 + $0xa0] sm:$0xff]  ;;  %v12988_v48 = vld [vmem:[#allocation61_spill] sm:$0xff] }
 0x43e   : > { %v3187_v10 = vmax.f32 %v9939_v26, %v3074_v25  ;;  %v3189_v26 = vmax.f32 %v9920_v50, %v2898_v19  ;;  %v3192_v19 = vmax.f32 %v12988_v48, %v2812_v55 }
 0x43f   : > { %v7046_v63 = vpop.xlane.xlu1 %7045  ;;  %v3272_v57 = vmax.f32 %v3184_v59, %v3186_v38  ;;  %v12989_v38 = vld [vmem:[#allocation66_spill] sm:$0xff] }
 0x440   : > { %v3273_v21 = vmax.f32 %v3185_v51, %v3187_v10  ;;  %7297 = vst.msk [vmem:[%s10150_s17 + $0x28] sm:$0xff] %vm7291_vm4, %v7046_v63  ;;  %v3193_v10 = vmax.f32 %v12989_v38, %v2901_v2  ;;  %v12990_v63 = vld [vmem:[#allocation122_spill] sm:$0xff] }
 0x441   : > { %v2814_v6 = vpop.f32.mrf.mxu0 }
 0x442   : > { %v3316_v36 = vmax.f32 %v3272_v57, %v3273_v21  ;;  %v2903_v60 = vpop.f32.mrf.mxu1  ;;  %v12991_v21 = vld [vmem:[#allocation123_spill] sm:$0xff] }
 0x444   : > { %7075 = vmax.xlane.f32.xlu1 %v3316_v36  ;;  %v2987_v56 = vpop.f32.mrf.mxu2 }
 0x445   : > { %v3076_v9 = vpop.f32.mrf.mxu3  ;;  %v3190_v0 = vmax.f32 %v9948_v54, %v2987_v56 }
 0x446   : > { %v3191_v28 = vmax.f32 %v12987_v27, %v3076_v9 }
 0x447   : > { %v7048_v46 = vpop.xlane.xlu2 %7047  ;;  %v3274_v45 = vmax.f32 %v3188_v47, %v3190_v0 }
 0x448   : > { %7298 = vst.msk [vmem:[%s10150_s17 + $0x30] sm:$0xff] %vm7291_vm4, %v7048_v46  ;;  %v3275_v59 = vmax.f32 %v3189_v26, %v3191_v28  ;;  %v12992_v28 = vld [vmem:[#allocation71_spill] sm:$0xff] }
 0x449   : > { %3753 = vmatmul.bf16.gmra.mxu2 %v10241_v49  ;;  %v2817_v50 = vpop.f32.mrf.mxu0  ;;  %v3196_v46 = vmax.f32 %v12992_v28, %v2814_v6  ;;  %v10283_v6 = vld [vmem:[%s12405_s7 + $0xa8] sm:$0xff] }
 0x44a   : > { %3842 = vmatmul.bf16.gmra.mxu3 %v10241_v49  ;;  %v3317_v20 = vmax.f32 %v3274_v45, %v3275_v59  ;;  %v2906_v54 = vpop.f32.mrf.mxu1  ;;  %v12993_v45 = vld [vmem:[#allocation118_spill] sm:$0xff]  ;;  %v12999_v28 = vld [vmem:[#allocation131_spill] sm:$0xff] }
 0x44b   : > { %v3197_v59 = vmax.f32 %v12993_v45, %v2903_v60 }
 0x44c   : > { %7077 = vmax.xlane.f32.xlu2 %v3317_v20  ;;  %v2990_v25 = vpop.f32.mrf.mxu2  ;;  %3580 = vmatmul.bf16.gmra.mxu0 %v10262_v62  ;;  %v12994_v20 = vld [vmem:[#allocation126_spill] sm:$0xff] }
 0x44d   : > { %v3079_v51 = vpop.f32.mrf.mxu3  ;;  %v3194_v57 = vmax.f32 %v12990_v63, %v2990_v25  ;;  %3669 = vmatmul.bf16.gmra.mxu1 %v10262_v62  ;;  %v12995_v25 = vld [vmem:[#allocation127_spill] sm:$0xff] }
 0x44e   : > { %v3195_v36 = vmax.f32 %v12991_v21, %v3079_v51  ;;  %v12996_v21 = vld [vmem:[#allocation120_spill] sm:$0xff] }
 0x44f   : > { %v7050_v56 = vpop.xlane.xlu0 %7049  ;;  %v3276_v9 = vmax.f32 %v3192_v19, %v3194_v57 }
 0x450   : > { %v3277_v47 = vmax.f32 %v3193_v10, %v3195_v36  ;;  %7299 = vst.msk [vmem:[%s10150_s17 + $0x38] sm:$0xff] %vm7291_vm4, %v7050_v56  ;;  %v3200_v36 = vmax.f32 %v12996_v21, %v2817_v50  ;;  %v13002_v21 = vld [vmem:[#allocation134_spill] sm:$0xff] }
 0x451   : > { %v2819_v55 = vpop.f32.mrf.mxu0 }
 0x452   : > { %v3318_v26 = vmax.f32 %v3276_v9, %v3277_v47  ;;  %v2908_v0 = vpop.f32.mrf.mxu1  ;;  %v12997_v47 = vld [vmem:[#allocation121_spill] sm:$0xff] }
 0x454   : > { %7079 = vmax.xlane.f32.xlu0 %v3318_v26  ;;  %v2992_v27 = vpop.f32.mrf.mxu2  ;;  %v3201_v26 = vmax.f32 %v12997_v47, %v2906_v54 }
 0x455   : > { %v3081_v2 = vpop.f32.mrf.mxu3  ;;  %v3198_v48 = vmax.f32 %v12994_v20, %v2992_v27  ;;  %v12998_v27 = vld [vmem:[#allocation130_spill] sm:$0xff] }
 0x456   : > { %v3199_v51 = vmax.f32 %v12995_v25, %v3081_v2 }
 0x457   : > { %v7052_v38 = vpop.xlane.xlu1 %7051  ;;  %v3278_v19 = vmax.f32 %v3196_v46, %v3198_v48 }
 0x458   : > { %7300 = vst.msk [vmem:[%s10150_s17 + $0x40] sm:$0xff] %vm7291_vm4, %v7052_v38  ;;  %v3279_v10 = vmax.f32 %v3197_v59, %v3199_v51  ;;  %v13000_v38 = vld [vmem:[#allocation124_spill] sm:$0xff] }
 0x459   : > { %3758 = vmatmul.bf16.gmra.mxu2 %v10262_v62  ;;  %v2822_v60 = vpop.f32.mrf.mxu0 }
 0x45a   : > { %3847 = vmatmul.bf16.gmra.mxu3 %v10262_v62  ;;  %v3319_v63 = vmax.f32 %v3278_v19, %v3279_v10  ;;  %v2911_v57 = vpop.f32.mrf.mxu1  ;;  %v3204_v19 = vmax.f32 %v13000_v38, %v2819_v55  ;;  %v13001_v10 = vld [vmem:[#allocation125_spill] sm:$0xff]  ;;  %v10304_v55 = vld [vmem:[%s12405_s7 + $0xb0] sm:$0xff] }
 0x45c   : > { %7081 = vmax.xlane.f32.xlu1 %v3319_v63  ;;  %v2995_v56 = vpop.f32.mrf.mxu2  ;;  %3585 = vmatmul.bf16.gmra.mxu0 %v10283_v6  ;;  %v3205_v63 = vmax.f32 %v13001_v10, %v2908_v0 }
 0x45d   : > { %v3084_v9 = vpop.f32.mrf.mxu3  ;;  %v3202_v2 = vmax.f32 %v12998_v27, %v2995_v56  ;;  %3674 = vmatmul.bf16.gmra.mxu1 %v10283_v6 }
 0x45e   : > { %v3203_v46 = vmax.f32 %v12999_v28, %v3084_v9  ;;  %v13003_v9 = vld [vmem:[#allocation135_spill] sm:$0xff] }
 0x45f   : > { %v7054_v45 = vpop.xlane.xlu2 %7053  ;;  %v3280_v59 = vmax.f32 %v3200_v36, %v3202_v2 }
 0x460   : > { %v3281_v20 = vmax.f32 %v3201_v26, %v3203_v46  ;;  %7301 = vst.msk [vmem:[%s10150_s17 + $0x48] sm:$0xff] %vm7291_vm4, %v7054_v45  ;;  %v13004_v46 = vld [vmem:[#allocation128_spill] sm:$0xff] }
 0x461   : > { %v2824_v50 = vpop.f32.mrf.mxu0  ;;  %v3208_v45 = vmax.f32 %v13004_v46, %v2822_v60 }
 0x462   : > { %v3320_v48 = vmax.f32 %v3280_v59, %v3281_v20  ;;  %v2913_v25 = vpop.f32.mrf.mxu1 }
 0x464   : > { %7083 = vmax.xlane.f32.xlu2 %v3320_v48  ;;  %v2997_v51 = vpop.f32.mrf.mxu2  ;;  %v13005_v48 = vld [vmem:[#allocation129_spill] sm:$0xff] }
 0x465   : > { %v3086_v54 = vpop.f32.mrf.mxu3  ;;  %v3206_v56 = vmax.f32 %v13002_v21, %v2997_v51  ;;  %v3209_v51 = vmax.f32 %v13005_v48, %v2911_v57  ;;  %v13011_v48 = vld [vmem:[#allocation143_spill] sm:$0xff] }
 0x466   : > { %v3207_v47 = vmax.f32 %v13003_v9, %v3086_v54  ;;  %v13006_v54 = vld [vmem:[#allocation138_spill] sm:$0xff] }
 0x467   : > { %v7056_v27 = vpop.xlane.xlu0 %7055  ;;  %v3282_v36 = vmax.f32 %v3204_v19, %v3206_v56  ;;  %v13007_v19 = vld [vmem:[#allocation139_spill] sm:$0xff] }
 0x468   : > { %7302 = vst.msk [vmem:[%s10150_s17 + $0x50] sm:$0xff] %vm7291_vm4, %v7056_v27  ;;  %v3283_v26 = vmax.f32 %v3205_v63, %v3207_v47 }
 0x469   : > { %3763 = vmatmul.bf16.gmra.mxu2 %v10283_v6  ;;  %v2827_v0 = vpop.f32.mrf.mxu0 }
 0x46a   : > { %3852 = vmatmul.bf16.gmra.mxu3 %v10283_v6  ;;  %v3321_v2 = vmax.f32 %v3282_v36, %v3283_v26  ;;  %v2916_v28 = vpop.f32.mrf.mxu1  ;;  %v13008_v36 = vld [vmem:[#allocation132_spill] sm:$0xff] }
 0x46b   : > { %v3212_v26 = vmax.f32 %v13008_v36, %v2824_v50  ;;  %v10325_v50 = vld [vmem:[%s12405_s7 + $0xb8] sm:$0xff]  ;;  %v13014_v36 = vld [vmem:[#allocation146_spill] sm:$0xff] }
 0x46c   : > { %7085 = vmax.xlane.f32.xlu0 %v3321_v2  ;;  %v3000_v59 = vpop.f32.mrf.mxu2  ;;  %3590 = vmatmul.bf16.gmra.mxu0 %v10304_v55  ;;  %v13009_v2 = vld [vmem:[#allocation133_spill] sm:$0xff] }
 0x46d   : > { %v3089_v20 = vpop.f32.mrf.mxu3  ;;  %v3210_v38 = vmax.f32 %v13006_v54, %v3000_v59  ;;  %3679 = vmatmul.bf16.gmra.mxu1 %v10304_v55  ;;  %v3213_v46 = vmax.f32 %v13009_v2, %v2913_v25  ;;  %v13010_v59 = vld [vmem:[#allocation142_spill] sm:$0xff]  ;;  %v13015_v2 = vld [vmem:[#allocation147_spill] sm:$0xff] }
 0x46e   : > { %v3211_v10 = vmax.f32 %v13007_v19, %v3089_v20 }
 0x46f   : > { %v7058_v63 = vpop.xlane.xlu1 %7057  ;;  %v3284_v21 = vmax.f32 %v3208_v45, %v3210_v38 }
 0x470   : > { %v3285_v56 = vmax.f32 %v3209_v51, %v3211_v10  ;;  %7303 = vst.msk [vmem:[%s10150_s17 + $0x58] sm:$0xff] %vm7291_vm4, %v7058_v63  ;;  %v13012_v63 = vld [vmem:[#allocation136_spill] sm:$0xff] }
 0x471   : > { %v2829_v60 = vpop.f32.mrf.mxu0 }
 0x472   : > { %v3322_v9 = vmax.f32 %v3284_v21, %v3285_v56  ;;  %v2918_v47 = vpop.f32.mrf.mxu1  ;;  %v3216_v21 = vmax.f32 %v13012_v63, %v2827_v0  ;;  %v13017_v63 = vld [vmem:[#allocation141_spill] sm:$0xff] }
 0x474   : > { %7087 = vmax.xlane.f32.xlu1 %v3322_v9  ;;  %v3002_v27 = vpop.f32.mrf.mxu2 }
 0x475   : > { %v3091_v57 = vpop.f32.mrf.mxu3  ;;  %v3214_v20 = vmax.f32 %v13010_v59, %v3002_v27  ;;  %v13013_v27 = vld [vmem:[#allocation137_spill] sm:$0xff] }
 0x476   : > { %v3215_v54 = vmax.f32 %v13011_v48, %v3091_v57  ;;  %v3217_v57 = vmax.f32 %v13013_v27, %v2916_v28 }
 0x477   : > { %v7060_v19 = vpop.xlane.xlu2 %7059  ;;  %v3286_v45 = vmax.f32 %v3212_v26, %v3214_v20 }
 0x478   : > { %7304 = vst.msk [vmem:[%s10150_s17 + $0x60] sm:$0xff] %vm7291_vm4, %v7060_v19  ;;  %v3287_v51 = vmax.f32 %v3213_v46, %v3215_v54 }
 0x479   : > { %3768 = vmatmul.bf16.gmra.mxu2 %v10304_v55  ;;  %v2832_v25 = vpop.f32.mrf.mxu0 }
 0x47a   : > { %3857 = vmatmul.bf16.gmra.mxu3 %v10304_v55  ;;  %v3323_v38 = vmax.f32 %v3286_v45, %v3287_v51  ;;  %v2921_v10 = vpop.f32.mrf.mxu1  ;;  %v13016_v51 = vld [vmem:[#allocation140_spill] sm:$0xff] }
 0x47c   : > { %7089 = vmax.xlane.f32.xlu2 %v3323_v38  ;;  %v3005_v56 = vpop.f32.mrf.mxu2  ;;  %3595 = vmatmul.bf16.gmra.mxu0 %v10325_v50  ;;  %v3220_v38 = vmax.f32 %v13016_v51, %v2829_v60  ;;  %v10346_v60 = vld [vmem:[%s12405_s7 + $0xc0] sm:$0xff] }
 0x47d   : > { %v3094_v9 = vpop.f32.mrf.mxu3  ;;  %v3218_v26 = vmax.f32 %v13014_v36, %v3005_v56  ;;  %3684 = vmatmul.bf16.gmra.mxu1 %v10325_v50  ;;  %v3221_v56 = vmax.f32 %v13017_v63, %v2918_v47  ;;  %v13019_v36 = vld [vmem:[#allocation151_spill] sm:$0xff] }
 0x47e   : > { %v3219_v46 = vmax.f32 %v13015_v2, %v3094_v9  ;;  %v13018_v9 = vld [vmem:[#allocation150_spill] sm:$0xff] }
 0x47f   : > { %v7062_v59 = vpop.xlane.xlu0 %7061  ;;  %v3288_v20 = vmax.f32 %v3216_v21, %v3218_v26 }
 0x480   : > { %v3289_v48 = vmax.f32 %v3217_v57, %v3219_v46  ;;  %7305 = vst.msk [vmem:[%s10150_s17 + $0x68] sm:$0xff] %vm7291_vm4, %v7062_v59  ;;  %v13020_v59 = vld [vmem:[#allocation144_spill] sm:$0xff] }
 0x481   : > { %v2834_v0 = vpop.f32.mrf.mxu0 }
 0x482   : > { %v3324_v54 = vmax.f32 %v3288_v20, %v3289_v48  ;;  %v2923_v19 = vpop.f32.mrf.mxu1 }
 0x484   : > { %7091 = vmax.xlane.f32.xlu0 %v3324_v54  ;;  %v3007_v45 = vpop.f32.mrf.mxu2  ;;  %v13021_v54 = vld [vmem:[#allocation145_spill] sm:$0xff] }
 0x485   : > { %v3096_v28 = vpop.f32.mrf.mxu3  ;;  %v3222_v27 = vmax.f32 %v13018_v9, %v3007_v45  ;;  %v3225_v45 = vmax.f32 %v13021_v54, %v2921_v10 }
 0x486   : > { %v3223_v2 = vmax.f32 %v13019_v36, %v3096_v28  ;;  %v13022_v28 = vld [vmem:[#allocation152_spill] sm:$0xff] }
 0x487   : > { %v7064_v41 = vpop.xlane.xlu1 %7063  ;;  %v3290_v21 = vmax.f32 %v3220_v38, %v3222_v27  ;;  %v13023_v38 = vld [vmem:[#allocation153_spill] sm:$0xff] }
 0x488   : > { %7306 = vst.msk [vmem:[%s10150_s17 + $0x70] sm:$0xff] %vm7291_vm4, %v7064_v41  ;;  %v3291_v57 = vmax.f32 %v3221_v56, %v3223_v2  ;;  %v3224_v41 = vmax.f32 %v13020_v59, %v2832_v25  ;;  %v13025_v59 = vld [vmem:[#allocation149_spill] sm:$0xff] }
 0x489   : > { %3773 = vmatmul.bf16.gmra.mxu2 %v10325_v50  ;;  %v10348_v47 = vpop.f32.mrf.mxu0 }
 0x48a   : > { %3862 = vmatmul.bf16.gmra.mxu3 %v10325_v50  ;;  %v3325_v26 = vmax.f32 %v3290_v21, %v3291_v57  ;;  %v10350_v46 = vpop.f32.mrf.mxu1  ;;  %v13024_v57 = vld [vmem:[#allocation148_spill] sm:$0xff] }
 0x48c   : > { %7093 = vmax.xlane.f32.xlu1 %v3325_v26  ;;  %v3010_v20 = vpop.f32.mrf.mxu2  ;;  %3600 = vmatmul.bf16.gmra.mxu0 %v10346_v60  ;;  %v3228_v26 = vmax.f32 %v13024_v57, %v2834_v0  ;;  %v10375_v0 = vld [vmem:[%s12405_s7 + $0xc8] sm:$0xff] }
 0x48d   : > { %v3099_v48 = vpop.f32.mrf.mxu3  ;;  %v3226_v51 = vmax.f32 %v13022_v28, %v3010_v20  ;;  %3689 = vmatmul.bf16.gmra.mxu1 %v10346_v60  ;;  %v3229_v20 = vmax.f32 %v13025_v59, %v2923_v19 }
 0x48e   : > { %v3227_v63 = vmax.f32 %v13023_v38, %v3099_v48  ;;  %v13026_v48 = vld [vmem:[#allocation154_spill] sm:$0xff] }
 0x48f   : > { %v3292_v56 = vmax.f32 %v3224_v41, %v3226_v51  ;;  %v7066_v27 = vpop.xlane.xlu2 %7065  ;;  %v13027_v41 = vld [vmem:[#allocation155_spill] sm:$0xff] }
 0x490   : > { %v3293_v9 = vmax.f32 %v3225_v45, %v3227_v63  ;;  %7307 = vst.msk [vmem:[%s10150_s17 + $0x78] sm:$0xff] %vm7291_vm4, %v7066_v27 }
 0x491   : > { %v10360_v25 = vpop.f32.mrf.mxu0 }
 0x492   : > { %v3326_v36 = vmax.f32 %v3292_v56, %v3293_v9  ;;  %v10362_v2 = vpop.f32.mrf.mxu1 }
 0x494   : > { %7095 = vmax.xlane.f32.xlu2 %v3326_v36  ;;  %v3012_v10 = vpop.f32.mrf.mxu2 }
 0x495   : > { %v3101_v21 = vpop.f32.mrf.mxu3  ;;  %v3230_v54 = vmax.f32 %v13026_v48, %v3012_v10 }
 0x496   : > { %v3231_v45 = vmax.f32 %v13027_v41, %v3101_v21 }
 0x497   : > { %v7068_v28 = vpop.xlane.xlu0 %7067  ;;  %v3294_v51 = vmax.f32 %v3228_v26, %v3230_v54 }
 0x498   : > { %v3295_v38 = vmax.f32 %v3229_v20, %v3231_v45  ;;  %7308 = vst.msk [vmem:[%s10150_s17 + $0x80] sm:$0xff] %vm7291_vm4, %v7068_v28  ;;  %v10404_v20 = vld [vmem:[%s12405_s7 + $0xd0] sm:$0xff] }
 0x499   : > { %3778 = vmatmul.bf16.gmra.mxu2 %v10346_v60  ;;  %v10377_v19 = vpop.f32.mrf.mxu0 }
 0x49a   : > { %3867 = vmatmul.bf16.gmra.mxu3 %v10346_v60  ;;  %v3327_v63 = vmax.f32 %v3294_v51, %v3295_v38  ;;  %v10379_v56 = vpop.f32.mrf.mxu1 }
 0x49c   : > { %7097 = vmax.xlane.f32.xlu0 %v3327_v63  ;;  %v10381_v9 = vpop.f32.mrf.mxu2  ;;  %3605 = vmatmul.bf16.gmra.mxu0 %v10375_v0 }
 0x49d   : > { %v10383_v27 = vpop.f32.mrf.mxu3  ;;  %3694 = vmatmul.bf16.gmra.mxu1 %v10375_v0 }
 0x49f   : > { %v7070_v36 = vpop.xlane.xlu1 %7069 }
 0x4a0   : > { %7309 = vst.msk [vmem:[%s10150_s17 + $0x88] sm:$0xff] %vm7291_vm4, %v7070_v36 }
 0x4a1   : > { %v10389_v10 = vpop.f32.mrf.mxu0 }
 0x4a2   : > { %v10391_v21 = vpop.f32.mrf.mxu1 }
 0x4a4   : > { %v10393_v57 = vpop.f32.mrf.mxu2 }
 0x4a5   : > { %v10395_v26 = vpop.f32.mrf.mxu3 }
 0x4a7   : > { %v7072_v59 = vpop.xlane.xlu2 %7071 }
 0x4a8   : > { %7310 = vst.msk [vmem:[%s10150_s17 + $0x90] sm:$0xff] %vm7291_vm4, %v7072_v59 }
 0x4a9   : > { %3783 = vmatmul.bf16.gmra.mxu2 %v10375_v0  ;;  %v10406_v48 = vpop.f32.mrf.mxu0 }
 0x4aa   : > { %3872 = vmatmul.bf16.gmra.mxu3 %v10375_v0  ;;  %v10408_v54 = vpop.f32.mrf.mxu1 }
 0x4ac   : > { %v10410_v41 = vpop.f32.mrf.mxu2  ;;  %3610 = vmatmul.bf16.gmra.mxu0 %v10404_v20 }
 0x4ad   : > { %v10412_v45 = vpop.f32.mrf.mxu3  ;;  %3699 = vmatmul.bf16.gmra.mxu1 %v10404_v20 }
 0x4af   : > { %v7074_v28 = vpop.xlane.xlu0 %7073 }
 0x4b0   : > { %7311 = vst.msk [vmem:[%s10150_s17 + $0x98] sm:$0xff] %vm7291_vm4, %v7074_v28  ;;  %v10433_v28 = vld [vmem:[%s12405_s7 + $0xd8] sm:$0xff] }
 0x4b1   : > { %v10418_v51 = vpop.f32.mrf.mxu0 }
 0x4b2   : > { %v10420_v38 = vpop.f32.mrf.mxu1 }
 0x4b4   : > { %v10422_v63 = vpop.f32.mrf.mxu2 }
 0x4b5   : > { %v10424_v36 = vpop.f32.mrf.mxu3 }
 0x4b7   : > { %v7076_v59 = vpop.xlane.xlu1 %7075 }
 0x4b8   : > { %7312 = vst.msk [vmem:[%s10150_s17 + $0xa0] sm:$0xff] %vm7291_vm4, %v7076_v59 }
 0x4b9   : > { %3788 = vmatmul.bf16.gmra.mxu2 %v10404_v20  ;;  %v10435_v58 = vpop.f32.mrf.mxu0 }
 0x4ba   : > { %3877 = vmatmul.bf16.gmra.mxu3 %v10404_v20  ;;  %v10437_v37 = vpop.f32.mrf.mxu1 }
 0x4bc   : > { %v10439_v13 = vpop.f32.mrf.mxu2  ;;  %3615 = vmatmul.bf16.gmra.mxu0 %v10433_v28 }
 0x4bd   : > { %v10441_v42 = vpop.f32.mrf.mxu3  ;;  %3704 = vmatmul.bf16.gmra.mxu1 %v10433_v28 }
 0x4bf   : > { %v7078_v59 = vpop.xlane.xlu2 %7077 }
 0x4c0   : > { %7313 = vst.msk [vmem:[%s10150_s17 + $0xa8] sm:$0xff] %vm7291_vm4, %v7078_v59  ;;  %v10462_v59 = vld [vmem:[%s12405_s7 + $0xe0] sm:$0xff] }
 0x4c1   : > { %v10447_v29 = vpop.f32.mrf.mxu0 }
 0x4c2   : > { %v10449_v16 = vpop.f32.mrf.mxu1 }
 0x4c4   : > { %v10451_v11 = vpop.f32.mrf.mxu2 }
 0x4c5   : > { %v10453_v4 = vpop.f32.mrf.mxu3 }
 0x4c7   : > { %v7080_v23 = vpop.xlane.xlu0 %7079 }
 0x4c8   : > { %7314 = vst.msk [vmem:[%s10150_s17 + $0xb0] sm:$0xff] %vm7291_vm4, %v7080_v23 }
 0x4c9   : > { %3793 = vmatmul.bf16.gmra.mxu2 %v10433_v28  ;;  %v10464_v14 = vpop.f32.mrf.mxu0 }
 0x4ca   : > { %3882 = vmatmul.bf16.gmra.mxu3 %v10433_v28  ;;  %v10466_v53 = vpop.f32.mrf.mxu1 }
 0x4cc   : > { %v10468_v40 = vpop.f32.mrf.mxu2  ;;  %3620 = vmatmul.bf16.gmra.mxu0 %v10462_v59 }
 0x4cd   : > { %v10470_v18 = vpop.f32.mrf.mxu3  ;;  %3709 = vmatmul.bf16.gmra.mxu1 %v10462_v59 }
 0x4cf   : > { %v7082_v23 = vpop.xlane.xlu1 %7081 }
 0x4d0   : > { %7315 = vst.msk [vmem:[%s10150_s17 + $0xb8] sm:$0xff] %vm7291_vm4, %v7082_v23  ;;  %v10491_v23 = vld [vmem:[%s12405_s7 + $0xe8] sm:$0xff] }
 0x4d1   : > { %v10476_v15 = vpop.f32.mrf.mxu0 }
 0x4d2   : > { %v10478_v35 = vpop.f32.mrf.mxu1 }
 0x4d4   : > { %v10480_v39 = vpop.f32.mrf.mxu2 }
 0x4d5   : > { %v10482_v32 = vpop.f32.mrf.mxu3 }
 0x4d7   : > { %v7084_v5 = vpop.xlane.xlu2 %7083 }
 0x4d8   : > { %7316 = vst.msk [vmem:[%s10150_s17 + $0xc0] sm:$0xff] %vm7291_vm4, %v7084_v5 }
 0x4d9   : > { %3798 = vmatmul.bf16.gmra.mxu2 %v10462_v59  ;;  %v10493_v43 = vpop.f32.mrf.mxu0 }
 0x4da   : > { %3887 = vmatmul.bf16.gmra.mxu3 %v10462_v59  ;;  %13028 = vst [vmem:[#allocation59_spill] sm:$0xff] %v10493_v43  ;;  %v10495_v7 = vpop.f32.mrf.mxu1  ;;  %v13062_v43 = vld [vmem:[#allocation5_spill] sm:$0xff] }
 0x4db   : > { %13029 = vst [vmem:[#allocation14_spill] sm:$0xff] %v10495_v7 }
 0x4dc   : > { %v10497_v12 = vpop.f32.mrf.mxu2  ;;  %3625 = vmatmul.bf16.gmra.mxu0 %v10491_v23 }
 0x4dd   : > { %v10499_v33 = vpop.f32.mrf.mxu3  ;;  %3714 = vmatmul.bf16.gmra.mxu1 %v10491_v23 }
 0x4df   : > { %v7086_v5 = vpop.xlane.xlu0 %7085 }
 0x4e0   : > { %7317 = vst.msk [vmem:[%s10150_s17 + $0xc8] sm:$0xff] %vm7291_vm4, %v7086_v5  ;;  %v10520_v5 = vld [vmem:[%s12405_s7 + $0xf0] sm:$0xff] }
 0x4e1   : > { %v10505_v8 = vpop.f32.mrf.mxu0  ;;  %13032 = vst [vmem:[#allocation56_spill] sm:$0xff] %v10520_v5 }
 0x4e2   : > { %13030 = vst [vmem:[#allocation17_spill] sm:$0xff] %v10505_v8  ;;  %v10507_v1 = vpop.f32.mrf.mxu1 }
 0x4e3   : > { %13031 = vst [vmem:[#allocation49_spill] sm:$0xff] %v10507_v1 }
 0x4e4   : > { %v10509_v61 = vpop.f32.mrf.mxu2 }
 0x4e5   : > { %v10511_v31 = vpop.f32.mrf.mxu3 }
 0x4e7   : > { %v7088_v34 = vpop.xlane.xlu1 %7087 }
 0x4e8   : > { %7318 = vst.msk [vmem:[%s10150_s17 + $0xd0] sm:$0xff] %vm7291_vm4, %v7088_v34 }
 0x4e9   : > { %3803 = vmatmul.bf16.gmra.mxu2 %v10491_v23  ;;  %v10522_v52 = vpop.f32.mrf.mxu0 }
 0x4ea   : > { %3892 = vmatmul.bf16.gmra.mxu3 %v10491_v23  ;;  %13033 = vst [vmem:[#allocation60_spill] sm:$0xff] %v10522_v52  ;;  %v10524_v17 = vpop.f32.mrf.mxu1 }
 0x4eb   : > { %13034 = vst [vmem:[#allocation13_spill] sm:$0xff] %v10524_v17 }
 0x4ec   : > { %v10526_v3 = vpop.f32.mrf.mxu2  ;;  %3630 = vmatmul.bf16.gmra.mxu0 %v10520_v5 }
 0x4ed   : > { %13035 = vst [vmem:[#allocation18_spill] sm:$0xff] %v10526_v3  ;;  %v10528_v22 = vpop.f32.mrf.mxu3  ;;  %3719 = vmatmul.bf16.gmra.mxu1 %v10520_v5 }
 0x4ee   : > { %13036 = vst [vmem:[#allocation22_spill] sm:$0xff] %v10528_v22 }
 0x4ef   : > { %v7090_v34 = vpop.xlane.xlu2 %7089 }
 0x4f0   : > { %7319 = vst.msk [vmem:[%s10150_s17 + $0xd8] sm:$0xff] %vm7291_vm4, %v7090_v34  ;;  %v10549_v34 = vld [vmem:[%s12405_s7 + $0xf8] sm:$0xff] }
 0x4f1   : > { %v10534_v1 = vpop.f32.mrf.mxu0  ;;  %13041 = vst [vmem:[#allocation85_spill] sm:$0xff] %v10549_v34 }
 0x4f2   : > { %13037 = vst [vmem:[#allocation55_spill] sm:$0xff] %v10534_v1  ;;  %v10536_v8 = vpop.f32.mrf.mxu1 }
 0x4f3   : > { %13038 = vst [vmem:[#allocation21_spill] sm:$0xff] %v10536_v8 }
 0x4f4   : > { %v10538_v7 = vpop.f32.mrf.mxu2 }
 0x4f5   : > { %13039 = vst [vmem:[#allocation86_spill] sm:$0xff] %v10538_v7  ;;  %v10540_v52 = vpop.f32.mrf.mxu3 }
 0x4f6   : > { %13040 = vst [vmem:[#allocation87_spill] sm:$0xff] %v10540_v52 }
 0x4f7   : > { %v7092_v17 = vpop.xlane.xlu0 %7091 }
 0x4f8   : > { %7320 = vst.msk [vmem:[%s10150_s17 + $0xe0] sm:$0xff] %vm7291_vm4, %v7092_v17 }
 0x4f9   : > { %3808 = vmatmul.bf16.gmra.mxu2 %v10520_v5  ;;  %v10551_v1 = vpop.f32.mrf.mxu0 }
 0x4fa   : > { %3897 = vmatmul.bf16.gmra.mxu3 %v10520_v5  ;;  %13042 = vst [vmem:[#allocation19_spill] sm:$0xff] %v10551_v1  ;;  %v10553_v8 = vpop.f32.mrf.mxu1 }
 0x4fb   : > { %13043 = vst [vmem:[#allocation50_spill] sm:$0xff] %v10553_v8 }
 0x4fc   : > { %v10555_v7 = vpop.f32.mrf.mxu2  ;;  %3635 = vmatmul.bf16.gmra.mxu0 %v10549_v34 }
 0x4fd   : > { %13044 = vst [vmem:[#allocation90_spill] sm:$0xff] %v10555_v7  ;;  %v10557_v52 = vpop.f32.mrf.mxu3  ;;  %3724 = vmatmul.bf16.gmra.mxu1 %v10549_v34 }
 0x4fe   : > { %13045 = vst [vmem:[#allocation91_spill] sm:$0xff] %v10557_v52 }
 0x4ff   : > { %v7094_v17 = vpop.xlane.xlu1 %7093 }
 0x500   : > { %7321 = vst.msk [vmem:[%s10150_s17 + $0xe8] sm:$0xff] %vm7291_vm4, %v7094_v17 }
 0x501   : > { %v10563_v5 = vpop.f32.mrf.mxu0 }
 0x502   : > { %13046 = vst [vmem:[#allocation20_spill] sm:$0xff] %v10563_v5  ;;  %v10565_v22 = vpop.f32.mrf.mxu1 }
 0x503   : > { %13047 = vst [vmem:[#allocation84_spill] sm:$0xff] %v10565_v22  ;;  %v13054_v22 = vld [vmem:[#allocation8_spill] sm:$0xff] }
 0x504   : > { %v10567_v3 = vpop.f32.mrf.mxu2 }
 0x505   : > { %13048 = vst [vmem:[#allocation95_spill] sm:$0xff] %v10567_v3  ;;  %v10569_v1 = vpop.f32.mrf.mxu3  ;;  %v13056_v3 = vld [vmem:[#allocation4_spill] sm:$0xff] }
 0x506   : > { %13049 = vst [vmem:[#allocation96_spill] sm:$0xff] %v10569_v1  ;;  %v13055_v1 = vld [vmem:[#allocation74_spill] sm:$0xff] }
 0x507   : > { %v7096_v8 = vpop.xlane.xlu2 %7095 }
 0x508   : > { %7322 = vst.msk [vmem:[%s10150_s17 + $0xf0] sm:$0xff] %vm7291_vm4, %v7096_v8 }
 0x509   : > { %3813 = vmatmul.bf16.gmra.mxu2 %v10549_v34  ;;  %v10575_v52 = vpop.f32.mrf.mxu0 }
 0x50a   : > { %3902 = vmatmul.bf16.gmra.mxu3 %v10549_v34  ;;  %13050 = vst [vmem:[#allocation94_spill] sm:$0xff] %v10575_v52  ;;  %v10577_v7 = vpop.f32.mrf.mxu1  ;;  %v13057_v52 = vld [vmem:[#allocation6_spill] sm:$0xff] }
 0x50b   : > { %13051 = vst [vmem:[#allocation88_spill] sm:$0xff] %v10577_v7 }
 0x50c   : > { %v10579_v17 = vpop.f32.mrf.mxu2  ;;  %3916 = vmatmul.bf16.vlgmr.msrb.gmra.mxu0 %v10130_v44 }
 0x50d   : > { %13052 = vst [vmem:[#allocation89_spill] sm:$0xff] %v10579_v17  ;;  %v10581_v5 = vpop.f32.mrf.mxu3  ;;  %4005 = vmatmul.bf16.vlgmr.msrb.gmra.mxu1 %v10130_v44  ;;  %5068 = vmatpush.bf16.msrb.mxu0 %v13054_v22  ;;  %v13063_v22 = vld [vmem:[#allocation83_spill] sm:$0xff] }
 0x50e   : > { %13053 = vst [vmem:[#allocation99_spill] sm:$0xff] %v10581_v5  ;;  %5157 = vmatpush.bf16.msrb.mxu1 %v13055_v1 }
 0x50f   : > { %v7098_v8 = vpop.xlane.xlu0 %7097 }
 0x510   : > { %7323 = vst.msk [vmem:[%s10150_s17 + $0xf8] sm:$0xff] %vm7291_vm4, %v7098_v8  ;;  %v13064_v8 = vld [vmem:[#allocation81_spill] sm:$0xff] }
 0x511   : > { %5069 = vmatpush.bf16.msrb.mxu0 %v13056_v3  ;;  %v10591_v7 = vpop.f32.mrf.mxu0  ;;  %v13065_v3 = vld [vmem:[#allocation82_spill] sm:$0xff] }
 0x512   : > { %5158 = vmatpush.bf16.msrb.mxu1 %v13057_v52  ;;  %13058 = vst [vmem:[#allocation100_spill] sm:$0xff] %v10591_v7  ;;  %v10593_v17 = vpop.f32.mrf.mxu1  ;;  %v13069_v7 = vld [vmem:[#allocation12_spill] sm:$0xff] }
 0x513   : > { %13059 = vst [vmem:[#allocation92_spill] sm:$0xff] %v10593_v17  ;;  %v13068_v17 = vld [vmem:[#allocation11_spill] sm:$0xff] }
 0x514   : > { %v10595_v5 = vpop.f32.mrf.mxu2 }
 0x515   : > { %13060 = vst [vmem:[#allocation93_spill] sm:$0xff] %v10595_v5  ;;  %v10597_v34 = vpop.f32.mrf.mxu3  ;;  %5070 = vmatpush.bf16.msrb.mxu0 %v13062_v43 }
 0x516   : > { %13061 = vst [vmem:[#allocation104_spill] sm:$0xff] %v10597_v34  ;;  %5159 = vmatpush.bf16.msrb.mxu1 %v13063_v22  ;;  %v13075_v22 = vld [vmem:[#allocation80_spill] sm:$0xff] }
 0x519   : > { %4094 = vmatmul.bf16.vlgmr.msrb.gmra.mxu2 %v10130_v44  ;;  %5071 = vmatpush.bf16.msrb.mxu0 %v13064_v8  ;;  %v10605_v52 = vpop.f32.mrf.mxu0  ;;  %v13073_v8 = vld [vmem:[#allocation3_spill] sm:$0xff] }
 0x51a   : > { %4183 = vmatmul.bf16.vlgmr.msrb.gmra.mxu3 %v10130_v44  ;;  %5160 = vmatpush.bf16.msrb.mxu1 %v13065_v3  ;;  %13066 = vst [vmem:[#allocation105_spill] sm:$0xff] %v10605_v52  ;;  %v10607_v1 = vpop.f32.mrf.mxu1  ;;  %v13072_v44 = vld [vmem:[#allocation10_spill] sm:$0xff]  ;;  %v13074_v3 = vld [vmem:[#allocation79_spill] sm:$0xff] }
 0x51b   : > { %13067 = vst [vmem:[#allocation103_spill] sm:$0xff] %v10607_v1  ;;  %5246 = vmatpush.bf16.msrb.mxu2 %v13068_v17  ;;  %5335 = vmatpush.bf16.msrb.mxu3 %v13069_v7  ;;  %v13076_v1 = vld [vmem:[#allocation7_spill] sm:$0xff]  ;;  %v13077_v17 = vld [vmem:[#allocation77_spill] sm:$0xff] }
 0x51c   : > { %v10611_v34 = vpop.f32.mrf.mxu2  ;;  %3921 = vmatmul.bf16.gmra.mxu0 %v10165_v30 }
 0x51d   : > { %13070 = vst [vmem:[#allocation97_spill] sm:$0xff] %v10611_v34  ;;  %v10613_v43 = vpop.f32.mrf.mxu3  ;;  %4010 = vmatmul.bf16.gmra.mxu1 %v10165_v30  ;;  %5072 = vmatpush.bf16.msrb.mxu0 %v13072_v44  ;;  %v13081_v34 = vld [vmem:[#allocation72_spill] sm:$0xff] }
 0x51e   : > { %13071 = vst [vmem:[#allocation98_spill] sm:$0xff] %v10613_v43  ;;  %5161 = vmatpush.bf16.msrb.mxu1 %v13073_v8  ;;  %v13080_v43 = vld [vmem:[#allocation78_spill] sm:$0xff]  ;;  %v13083_v8 = vld [vmem:[#allocation15_spill] sm:$0xff] }
 0x51f   : > { %5247 = vmatpush.bf16.msrb.mxu2 %v13074_v3  ;;  %5336 = vmatpush.bf16.msrb.mxu3 %v13075_v22  ;;  %v13084_v3 = vld [vmem:[#allocation75_spill] sm:$0xff]  ;;  %v13085_v22 = vld [vmem:[#allocation76_spill] sm:$0xff] }
 0x521   : > { %5073 = vmatpush.bf16.msrb.mxu0 %v13076_v1  ;;  %v10623_v7 = vpop.f32.mrf.mxu0  ;;  %v13086_v1 = vld [vmem:[#allocation73_spill] sm:$0xff] }
 0x522   : > { %5162 = vmatpush.bf16.msrb.mxu1 %v13077_v17  ;;  %13078 = vst [vmem:[#allocation108_spill] sm:$0xff] %v10623_v7  ;;  %v10625_v52 = vpop.f32.mrf.mxu1  ;;  %v13087_v17 = vld [vmem:[#allocation9_spill] sm:$0xff]  ;;  %v13091_v7 = vld [vmem:[#allocation70_spill] sm:$0xff] }
 0x523   : > { %13079 = vst [vmem:[#allocation109_spill] sm:$0xff] %v10625_v52  ;;  %5248 = vmatpush.bf16.msrb.mxu2 %v13080_v43  ;;  %5337 = vmatpush.bf16.msrb.mxu3 %v13081_v34  ;;  %v13088_v43 = vld [vmem:[#allocation69_spill] sm:$0xff] }
 0x524   : > { %v10629_v5 = vpop.f32.mrf.mxu2 }
 0x525   : > { %v10631_v44 = vpop.f32.mrf.mxu3  ;;  %5074 = vmatpush.bf16.msrb.mxu0 %v13083_v8  ;;  %v13092_v8 = vld [vmem:[#allocation67_spill] sm:$0xff] }
 0x526   : > { %13082 = vst [vmem:[#allocation101_spill] sm:$0xff] %v10631_v44  ;;  %5163 = vmatpush.bf16.msrb.mxu1 %v13084_v3 }
 0x527   : > { %5249 = vmatpush.bf16.msrb.mxu2 %v13085_v22  ;;  %5338 = vmatpush.bf16.msrb.mxu3 %v13086_v1 }
 0x529   : > { %4099 = vmatmul.bf16.gmra.mxu2 %v10165_v30  ;;  %5075 = vmatpush.bf16.msrb.mxu0 %v13087_v17  ;;  %v10641_v34 = vpop.f32.mrf.mxu0  ;;  %v13096_v17 = vld [vmem:[#allocation64_spill] sm:$0xff] }
 0x52a   : > { %4188 = vmatmul.bf16.gmra.mxu3 %v10165_v30  ;;  %5164 = vmatpush.bf16.msrb.mxu1 %v13088_v43  ;;  %13089 = vst [vmem:[#allocation102_spill] sm:$0xff] %v10641_v34  ;;  %v10643_v52 = vpop.f32.mrf.mxu1  ;;  %v13095_v30 = vld [vmem:[#allocation68_spill] sm:$0xff] }
 0x52b   : > { %13090 = vst [vmem:[#allocation112_spill] sm:$0xff] %v10643_v52  ;;  %5250 = vmatpush.bf16.msrb.mxu2 %v13091_v7  ;;  %5339 = vmatpush.bf16.msrb.mxu3 %v13092_v8  ;;  %v13099_v52 = vld [vmem:[#allocation65_spill] sm:$0xff]  ;;  %v13100_v7 = vld [vmem:[#allocation62_spill] sm:$0xff] }
 0x52c   : > { %v10647_v3 = vpop.f32.mrf.mxu2  ;;  %3926 = vmatmul.bf16.gmra.mxu0 %v10208_v24 }
 0x52d   : > { %13093 = vst [vmem:[#allocation113_spill] sm:$0xff] %v10647_v3  ;;  %v10649_v22 = vpop.f32.mrf.mxu3  ;;  %4015 = vmatmul.bf16.gmra.mxu1 %v10208_v24  ;;  %v13104_v3 = vld [vmem:[#allocation63_spill] sm:$0xff] }
 0x52e   : > { %13094 = vst [vmem:[#allocation106_spill] sm:$0xff] %v10649_v22  ;;  %v13103_v22 = vld [vmem:[#allocation16_spill] sm:$0xff] }
 0x52f   : > { %5251 = vmatpush.bf16.msrb.mxu2 %v13095_v30  ;;  %5340 = vmatpush.bf16.msrb.mxu3 %v13096_v17 }
 0x531   : > { %v10655_v43 = vpop.f32.mrf.mxu0 }
 0x532   : > { %13097 = vst [vmem:[#allocation107_spill] sm:$0xff] %v10655_v43  ;;  %v10657_v1 = vpop.f32.mrf.mxu1 }
 0x533   : > { %13098 = vst [vmem:[#allocation110_spill] sm:$0xff] %v10657_v1  ;;  %5252 = vmatpush.bf16.msrb.mxu2 %v13099_v52  ;;  %5341 = vmatpush.bf16.msrb.mxu3 %v13100_v7 }
 0x534   : > { %v10661_v8 = vpop.f32.mrf.mxu2 }
 0x535   : > { %13101 = vst [vmem:[#allocation111_spill] sm:$0xff] %v10661_v8  ;;  %v10663_v34 = vpop.f32.mrf.mxu3 }
 0x536   : > { %13102 = vst [vmem:[#allocation114_spill] sm:$0xff] %v10663_v34 }
 0x537   : > { %5253 = vmatpush.bf16.msrb.mxu2 %v13103_v22  ;;  %5342 = vmatpush.bf16.msrb.mxu3 %v13104_v3 }
 0x539   : > { %4104 = vmatmul.bf16.gmra.mxu2 %v10208_v24  ;;  %v10669_v17 = vpop.f32.mrf.mxu0 }
 0x53a   : > { %4193 = vmatmul.bf16.gmra.mxu3 %v10208_v24  ;;  %13105 = vst [vmem:[#allocation115_spill] sm:$0xff] %v10669_v17  ;;  %v10671_v30 = vpop.f32.mrf.mxu1 }
 0x53b   : > { %13106 = vst [vmem:[#allocation116_spill] sm:$0xff] %v10671_v30 }
 0x53c   : > { %v10673_v1 = vpop.f32.mrf.mxu2  ;;  %3931 = vmatmul.bf16.gmra.mxu0 %v10241_v49 }
 0x53d   : > { %13107 = vst [vmem:[#allocation117_spill] sm:$0xff] %v10673_v1  ;;  %v10675_v52 = vpop.f32.mrf.mxu3  ;;  %4020 = vmatmul.bf16.gmra.mxu1 %v10241_v49 }
 0x53e   : > { %13108 = vst [vmem:[#allocation119_spill] sm:$0xff] %v10675_v52 }
 0x541   : > { %v10679_v7 = vpop.f32.mrf.mxu0 }
 0x542   : > { %13109 = vst [vmem:[#allocation61_spill] sm:$0xff] %v10679_v7  ;;  %v10681_v22 = vpop.f32.mrf.mxu1 }
 0x543   : > { %13110 = vst [vmem:[#allocation66_spill] sm:$0xff] %v10681_v22 }
 0x544   : > { %v10683_v3 = vpop.f32.mrf.mxu2 }
 0x545   : > { %13111 = vst [vmem:[#allocation122_spill] sm:$0xff] %v10683_v3  ;;  %v10685_v43 = vpop.f32.mrf.mxu3 }
 0x546   : > { %13112 = vst [vmem:[#allocation123_spill] sm:$0xff] %v10685_v43 }
 0x549   : > { %4109 = vmatmul.bf16.gmra.mxu2 %v10241_v49  ;;  %v10689_v24 = vpop.f32.mrf.mxu0 }
 0x54a   : > { %4198 = vmatmul.bf16.gmra.mxu3 %v10241_v49  ;;  %13113 = vst [vmem:[#allocation71_spill] sm:$0xff] %v10689_v24  ;;  %v10691_v30 = vpop.f32.mrf.mxu1 }
 0x54b   : > { %13114 = vst [vmem:[#allocation118_spill] sm:$0xff] %v10691_v30 }
 0x54c   : > { %v10693_v17 = vpop.f32.mrf.mxu2  ;;  %3936 = vmatmul.bf16.gmra.mxu0 %v10262_v62 }
 0x54d   : > { %13115 = vst [vmem:[#allocation126_spill] sm:$0xff] %v10693_v17  ;;  %v10695_v52 = vpop.f32.mrf.mxu3  ;;  %4025 = vmatmul.bf16.gmra.mxu1 %v10262_v62 }
 0x54e   : > { %13116 = vst [vmem:[#allocation127_spill] sm:$0xff] %v10695_v52 }
 0x551   : > { %v10699_v22 = vpop.f32.mrf.mxu0 }
 0x552   : > { %13117 = vst [vmem:[#allocation120_spill] sm:$0xff] %v10699_v22  ;;  %v10701_v7 = vpop.f32.mrf.mxu1 }
 0x553   : > { %13118 = vst [vmem:[#allocation121_spill] sm:$0xff] %v10701_v7 }
 0x554   : > { %v10703_v43 = vpop.f32.mrf.mxu2 }
 0x555   : > { %13119 = vst [vmem:[#allocation130_spill] sm:$0xff] %v10703_v43  ;;  %v10705_v3 = vpop.f32.mrf.mxu3 }
 0x556   : > { %13120 = vst [vmem:[#allocation131_spill] sm:$0xff] %v10705_v3 }
 0x559   : > { %4114 = vmatmul.bf16.gmra.mxu2 %v10262_v62  ;;  %v10709_v49 = vpop.f32.mrf.mxu0 }
 0x55a   : > { %4203 = vmatmul.bf16.gmra.mxu3 %v10262_v62  ;;  %13121 = vst [vmem:[#allocation124_spill] sm:$0xff] %v10709_v49  ;;  %v10711_v30 = vpop.f32.mrf.mxu1 }
 0x55b   : > { %13122 = vst [vmem:[#allocation125_spill] sm:$0xff] %v10711_v30 }
 0x55c   : > { %v10713_v24 = vpop.f32.mrf.mxu2  ;;  %3941 = vmatmul.bf16.gmra.mxu0 %v10283_v6 }
 0x55d   : > { %13123 = vst [vmem:[#allocation134_spill] sm:$0xff] %v10713_v24  ;;  %v10715_v52 = vpop.f32.mrf.mxu3  ;;  %4030 = vmatmul.bf16.gmra.mxu1 %v10283_v6 }
 0x55e   : > { %13124 = vst [vmem:[#allocation135_spill] sm:$0xff] %v10715_v52 }
 0x561   : > { %v10719_v7 = vpop.f32.mrf.mxu0 }
 0x562   : > { %13125 = vst [vmem:[#allocation128_spill] sm:$0xff] %v10719_v7  ;;  %v10721_v22 = vpop.f32.mrf.mxu1 }
 0x563   : > { %13126 = vst [vmem:[#allocation129_spill] sm:$0xff] %v10721_v22 }
 0x564   : > { %v10723_v3 = vpop.f32.mrf.mxu2 }
 0x565   : > { %13127 = vst [vmem:[#allocation138_spill] sm:$0xff] %v10723_v3  ;;  %v10725_v43 = vpop.f32.mrf.mxu3 }
 0x566   : > { %13128 = vst [vmem:[#allocation139_spill] sm:$0xff] %v10725_v43 }
 0x569   : > { %4119 = vmatmul.bf16.gmra.mxu2 %v10283_v6  ;;  %v10729_v62 = vpop.f32.mrf.mxu0 }
 0x56a   : > { %4208 = vmatmul.bf16.gmra.mxu3 %v10283_v6  ;;  %13129 = vst [vmem:[#allocation132_spill] sm:$0xff] %v10729_v62  ;;  %v10731_v30 = vpop.f32.mrf.mxu1 }
 0x56b   : > { %13130 = vst [vmem:[#allocation133_spill] sm:$0xff] %v10731_v30 }
 0x56c   : > { %v10733_v49 = vpop.f32.mrf.mxu2  ;;  %3946 = vmatmul.bf16.gmra.mxu0 %v10304_v55 }
 0x56d   : > { %13131 = vst [vmem:[#allocation142_spill] sm:$0xff] %v10733_v49  ;;  %v10735_v52 = vpop.f32.mrf.mxu3  ;;  %4035 = vmatmul.bf16.gmra.mxu1 %v10304_v55 }
 0x56e   : > { %13132 = vst [vmem:[#allocation143_spill] sm:$0xff] %v10735_v52 }
 0x571   : > { %v10739_v22 = vpop.f32.mrf.mxu0 }
 0x572   : > { %13133 = vst [vmem:[#allocation136_spill] sm:$0xff] %v10739_v22  ;;  %v10741_v7 = vpop.f32.mrf.mxu1 }
 0x573   : > { %13134 = vst [vmem:[#allocation137_spill] sm:$0xff] %v10741_v7 }
 0x574   : > { %v10743_v43 = vpop.f32.mrf.mxu2 }
 0x575   : > { %13135 = vst [vmem:[#allocation146_spill] sm:$0xff] %v10743_v43  ;;  %v10745_v3 = vpop.f32.mrf.mxu3 }
 0x576   : > { %13136 = vst [vmem:[#allocation147_spill] sm:$0xff] %v10745_v3 }
 0x579   : > { %4124 = vmatmul.bf16.gmra.mxu2 %v10304_v55  ;;  %v10749_v6 = vpop.f32.mrf.mxu0 }
 0x57a   : > { %4213 = vmatmul.bf16.gmra.mxu3 %v10304_v55  ;;  %13137 = vst [vmem:[#allocation140_spill] sm:$0xff] %v10749_v6  ;;  %v10751_v30 = vpop.f32.mrf.mxu1 }
 0x57b   : > { %13138 = vst [vmem:[#allocation141_spill] sm:$0xff] %v10751_v30 }
 0x57c   : > { %v10753_v62 = vpop.f32.mrf.mxu2  ;;  %3951 = vmatmul.bf16.gmra.mxu0 %v10325_v50 }
 0x57d   : > { %13139 = vst [vmem:[#allocation150_spill] sm:$0xff] %v10753_v62  ;;  %v10755_v52 = vpop.f32.mrf.mxu3  ;;  %4040 = vmatmul.bf16.gmra.mxu1 %v10325_v50 }
 0x57e   : > { %13140 = vst [vmem:[#allocation151_spill] sm:$0xff] %v10755_v52 }
 0x581   : > { %v10759_v7 = vpop.f32.mrf.mxu0 }
 0x582   : > { %13141 = vst [vmem:[#allocation144_spill] sm:$0xff] %v10759_v7  ;;  %v10761_v22 = vpop.f32.mrf.mxu1 }
 0x583   : > { %13142 = vst [vmem:[#allocation145_spill] sm:$0xff] %v10761_v22 }
 0x584   : > { %v10763_v3 = vpop.f32.mrf.mxu2 }
 0x585   : > { %13143 = vst [vmem:[#allocation152_spill] sm:$0xff] %v10763_v3  ;;  %v10765_v43 = vpop.f32.mrf.mxu3 }
 0x586   : > { %13144 = vst [vmem:[#allocation153_spill] sm:$0xff] %v10765_v43 }
 0x589   : > { %4129 = vmatmul.bf16.gmra.mxu2 %v10325_v50  ;;  %v3917_v55 = vpop.f32.mrf.mxu0 }
 0x58a   : > { %4218 = vmatmul.bf16.gmra.mxu3 %v10325_v50  ;;  %v4006_v30 = vpop.f32.mrf.mxu1 }
 0x58b   : > { %v4265_v24 = vmax.f32 %v10350_v46, %v4006_v30 }
 0x58c   : > { %v10769_v6 = vpop.f32.mrf.mxu2  ;;  %3956 = vmatmul.bf16.gmra.mxu0 %v10346_v60 }
 0x58d   : > { %13145 = vst [vmem:[#allocation148_spill] sm:$0xff] %v10769_v6  ;;  %v10771_v52 = vpop.f32.mrf.mxu3  ;;  %4045 = vmatmul.bf16.gmra.mxu1 %v10346_v60  ;;  %v4264_v6 = vmax.f32 %v10348_v47, %v3917_v55 }
 0x58e   : > { %13146 = vst [vmem:[#allocation149_spill] sm:$0xff] %v10771_v52 }
 0x591   : > { %v3919_v7 = vpop.f32.mrf.mxu0 }
 0x592   : > { %v4008_v22 = vpop.f32.mrf.mxu1  ;;  %v4268_v55 = vmax.f32 %v10360_v25, %v3919_v7 }
 0x593   : > { %v4269_v46 = vmax.f32 %v10362_v2, %v4008_v22 }
 0x594   : > { %v10775_v62 = vpop.f32.mrf.mxu2 }
 0x595   : > { %13147 = vst [vmem:[#allocation154_spill] sm:$0xff] %v10775_v62  ;;  %v10777_v3 = vpop.f32.mrf.mxu3 }
 0x596   : > { %13148 = vst [vmem:[#allocation155_spill] sm:$0xff] %v10777_v3 }
 0x599   : > { %4134 = vmatmul.bf16.gmra.mxu2 %v10346_v60  ;;  %v3922_v50 = vpop.f32.mrf.mxu0 }
 0x59a   : > { %4223 = vmatmul.bf16.gmra.mxu3 %v10346_v60  ;;  %v4011_v43 = vpop.f32.mrf.mxu1 }
 0x59b   : > { %v4273_v22 = vmax.f32 %v10379_v56, %v4011_v43 }
 0x59c   : > { %v4095_v49 = vpop.f32.mrf.mxu2  ;;  %3961 = vmatmul.bf16.gmra.mxu0 %v10375_v0 }
 0x59d   : > { %v4184_v52 = vpop.f32.mrf.mxu3  ;;  %v4266_v17 = vmax.f32 %v10381_v9, %v4095_v49  ;;  %4050 = vmatmul.bf16.gmra.mxu1 %v10375_v0 }
 0x59e   : > { %v4267_v1 = vmax.f32 %v10383_v27, %v4184_v52 }
 0x59f   : > { %v4392_v3 = vmax.f32 %v4264_v6, %v4266_v17 }
 0x5a0   : > { %v4393_v62 = vmax.f32 %v4265_v24, %v4267_v1 }
 0x5a1   : > { %v3924_v60 = vpop.f32.mrf.mxu0 }
 0x5a2   : > { %v4456_v34 = vmax.f32 %v4392_v3, %v4393_v62  ;;  %v4013_v8 = vpop.f32.mrf.mxu1  ;;  %v4276_v6 = vmax.f32 %v10389_v10, %v3924_v60 }
 0x5a3   : > { %v4277_v43 = vmax.f32 %v10391_v21, %v4013_v8 }
 0x5a4   : > { %7099 = vmax.xlane.f32.xlu1 %v4456_v34  ;;  %v4097_v44 = vpop.f32.mrf.mxu2  ;;  %v4272_v34 = vmax.f32 %v10377_v19, %v3922_v50 }
 0x5a5   : > { %v4186_v47 = vpop.f32.mrf.mxu3  ;;  %v4270_v9 = vmax.f32 %v10393_v57, %v4097_v44 }
 0x5a6   : > { %v4271_v52 = vmax.f32 %v10395_v26, %v4186_v47 }
 0x5a7   : > { %v4394_v27 = vmax.f32 %v4268_v55, %v4270_v9 }
 0x5a8   : > { %v4395_v30 = vmax.f32 %v4269_v46, %v4271_v52 }
 0x5a9   : > { %4139 = vmatmul.bf16.gmra.mxu2 %v10375_v0  ;;  %v3927_v1 = vpop.f32.mrf.mxu0 }
 0x5aa   : > { %4228 = vmatmul.bf16.gmra.mxu3 %v10375_v0  ;;  %v4457_v3 = vmax.f32 %v4394_v27, %v4395_v30  ;;  %v4016_v17 = vpop.f32.mrf.mxu1  ;;  %v4280_v9 = vmax.f32 %v10406_v48, %v3927_v1 }
 0x5ab   : > { %v4281_v21 = vmax.f32 %v10408_v54, %v4016_v17 }
 0x5ac   : > { %7101 = vmax.xlane.f32.xlu2 %v4457_v3  ;;  %v4100_v24 = vpop.f32.mrf.mxu2  ;;  %3966 = vmatmul.bf16.gmra.mxu0 %v10404_v20 }
 0x5ad   : > { %v4189_v7 = vpop.f32.mrf.mxu3  ;;  %v4274_v25 = vmax.f32 %v10410_v41, %v4100_v24  ;;  %4055 = vmatmul.bf16.gmra.mxu1 %v10404_v20 }
 0x5ae   : > { %v4275_v2 = vmax.f32 %v10412_v45, %v4189_v7 }
 0x5af   : > { %v4396_v57 = vmax.f32 %v4272_v34, %v4274_v25 }
 0x5b0   : > { %v4397_v0 = vmax.f32 %v4273_v22, %v4275_v2 }
 0x5b1   : > { %v3929_v44 = vpop.f32.mrf.mxu0 }
 0x5b2   : > { %v4458_v26 = vmax.f32 %v4396_v57, %v4397_v0  ;;  %v4018_v49 = vpop.f32.mrf.mxu1  ;;  %v4284_v1 = vmax.f32 %v10418_v51, %v3929_v44 }
 0x5b3   : > { %v4285_v54 = vmax.f32 %v10420_v38, %v4018_v49 }
 0x5b4   : > { %7103 = vmax.xlane.f32.xlu0 %v4458_v26  ;;  %v4102_v62 = vpop.f32.mrf.mxu2 }
 0x5b5   : > { %v4191_v19 = vpop.f32.mrf.mxu3  ;;  %v4278_v56 = vmax.f32 %v10422_v63, %v4102_v62 }
 0x5b6   : > { %v4279_v41 = vmax.f32 %v10424_v36, %v4191_v19 }
 0x5b7   : > { %v4398_v45 = vmax.f32 %v4276_v6, %v4278_v56 }
 0x5b8   : > { %v4399_v50 = vmax.f32 %v4277_v43, %v4279_v41 }
 0x5b9   : > { %4144 = vmatmul.bf16.gmra.mxu2 %v10404_v20  ;;  %v3932_v55 = vpop.f32.mrf.mxu0 }
 0x5ba   : > { %4233 = vmatmul.bf16.gmra.mxu3 %v10404_v20  ;;  %v4459_v47 = vmax.f32 %v4398_v45, %v4399_v50  ;;  %v4021_v46 = vpop.f32.mrf.mxu1  ;;  %v4288_v25 = vmax.f32 %v10435_v58, %v3932_v55 }
 0x5bb   : > { %v4289_v38 = vmax.f32 %v10437_v37, %v4021_v46 }
 0x5bc   : > { %7105 = vmax.xlane.f32.xlu1 %v4459_v47  ;;  %v4105_v52 = vpop.f32.mrf.mxu2  ;;  %3971 = vmatmul.bf16.gmra.mxu0 %v10433_v28 }
 0x5bd   : > { %v4194_v10 = vpop.f32.mrf.mxu3  ;;  %v4282_v63 = vmax.f32 %v10439_v13, %v4105_v52  ;;  %4060 = vmatmul.bf16.gmra.mxu1 %v10433_v28 }
 0x5be   : > { %v4283_v36 = vmax.f32 %v10441_v42, %v4194_v10 }
 0x5bf   : > { %v4400_v8 = vmax.f32 %v4280_v9, %v4282_v63 }
 0x5c0   : > { %v4401_v20 = vmax.f32 %v4281_v21, %v4283_v36 }
 0x5c1   : > { %v3934_v27 = vpop.f32.mrf.mxu0 }
 0x5c2   : > { %v4460_v60 = vmax.f32 %v4400_v8, %v4401_v20  ;;  %v4023_v30 = vpop.f32.mrf.mxu1  ;;  %v4292_v62 = vmax.f32 %v10447_v29, %v3934_v27 }
 0x5c3   : > { %v4293_v37 = vmax.f32 %v10449_v16, %v4023_v30 }
 0x5c4   : > { %7107 = vmax.xlane.f32.xlu2 %v4460_v60  ;;  %v4107_v3 = vpop.f32.mrf.mxu2  ;;  %v13149_v60 = vld [vmem:[#allocation59_spill] sm:$0xff] }
 0x5c5   : > { %v4196_v48 = vpop.f32.mrf.mxu3  ;;  %v4286_v13 = vmax.f32 %v10451_v11, %v4107_v3  ;;  %v13150_v3 = vld [vmem:[#allocation14_spill] sm:$0xff] }
 0x5c6   : > { %v4287_v42 = vmax.f32 %v10453_v4, %v4196_v48  ;;  %v13151_v48 = vld [vmem:[#allocation18_spill] sm:$0xff] }
 0x5c7   : > { %v4402_v17 = vmax.f32 %v4284_v1, %v4286_v13  ;;  %v13152_v1 = vld [vmem:[#allocation22_spill] sm:$0xff] }
 0x5c8   : > { %v4403_v34 = vmax.f32 %v4285_v54, %v4287_v42  ;;  %v13153_v54 = vld [vmem:[#allocation56_spill] sm:$0xff] }
 0x5c9   : > { %4149 = vmatmul.bf16.gmra.mxu2 %v10433_v28  ;;  %v3937_v7 = vpop.f32.mrf.mxu0 }
 0x5ca   : > { %4238 = vmatmul.bf16.gmra.mxu3 %v10433_v28  ;;  %v4461_v24 = vmax.f32 %v4402_v17, %v4403_v34  ;;  %v4026_v22 = vpop.f32.mrf.mxu1  ;;  %v4296_v45 = vmax.f32 %v10464_v14, %v3937_v7 }
 0x5cb   : > { %v4297_v16 = vmax.f32 %v10466_v53, %v4026_v22  ;;  %v13154_v22 = vld [vmem:[#allocation17_spill] sm:$0xff] }
 0x5cc   : > { %7109 = vmax.xlane.f32.xlu0 %v4461_v24  ;;  %v4110_v2 = vpop.f32.mrf.mxu2  ;;  %3976 = vmatmul.bf16.gmra.mxu0 %v10462_v59 }
 0x5cd   : > { %v4199_v51 = vpop.f32.mrf.mxu3  ;;  %v4290_v11 = vmax.f32 %v10468_v40, %v4110_v2  ;;  %4065 = vmatmul.bf16.gmra.mxu1 %v10462_v59  ;;  %v13155_v2 = vld [vmem:[#allocation49_spill] sm:$0xff] }
 0x5ce   : > { %v4291_v4 = vmax.f32 %v10470_v18, %v4199_v51 }
 0x5cf   : > { %v4404_v57 = vmax.f32 %v4288_v25, %v4290_v11 }
 0x5d0   : > { %v4405_v28 = vmax.f32 %v4289_v38, %v4291_v4  ;;  %v13156_v38 = vld [vmem:[#allocation86_spill] sm:$0xff]  ;;  %v13157_v4 = vld [vmem:[#allocation87_spill] sm:$0xff] }
 0x5d1   : > { %v3939_v26 = vpop.f32.mrf.mxu0 }
 0x5d2   : > { %v4462_v0 = vmax.f32 %v4404_v57, %v4405_v28  ;;  %v4028_v44 = vpop.f32.mrf.mxu1  ;;  %v4300_v10 = vmax.f32 %v10476_v15, %v3939_v26 }
 0x5d3   : > { %v4301_v53 = vmax.f32 %v10478_v35, %v4028_v44 }
 0x5d4   : > { %7111 = vmax.xlane.f32.xlu1 %v4462_v0  ;;  %v4112_v49 = vpop.f32.mrf.mxu2 }
 0x5d5   : > { %v4201_v58 = vpop.f32.mrf.mxu3  ;;  %v4294_v40 = vmax.f32 %v10480_v39, %v4112_v49 }
 0x5d6   : > { %v4295_v18 = vmax.f32 %v10482_v32, %v4201_v58  ;;  %v13158_v58 = vld [vmem:[#allocation60_spill] sm:$0xff] }
 0x5d7   : > { %v4406_v19 = vmax.f32 %v4292_v62, %v4294_v40 }
 0x5d8   : > { %v4407_v6 = vmax.f32 %v4293_v37, %v4295_v18  ;;  %v13159_v18 = vld [vmem:[#allocation13_spill] sm:$0xff] }
 0x5d9   : > { %4154 = vmatmul.bf16.gmra.mxu2 %v10462_v59  ;;  %v3942_v56 = vpop.f32.mrf.mxu0 }
 0x5da   : > { %4243 = vmatmul.bf16.gmra.mxu3 %v10462_v59  ;;  %v4463_v43 = vmax.f32 %v4406_v19, %v4407_v6  ;;  %v4031_v41 = vpop.f32.mrf.mxu1  ;;  %v4304_v27 = vmax.f32 %v13149_v60, %v3942_v56  ;;  %v13160_v6 = vld [vmem:[#allocation90_spill] sm:$0xff]  ;;  %v13161_v56 = vld [vmem:[#allocation91_spill] sm:$0xff] }
 0x5db   : > { %v4305_v35 = vmax.f32 %v13150_v3, %v4031_v41  ;;  %v13167_v60 = vld [vmem:[#allocation19_spill] sm:$0xff]  ;;  %v13168_v3 = vld [vmem:[#allocation50_spill] sm:$0xff] }
 0x5dc   : > { %7113 = vmax.xlane.f32.xlu2 %v4463_v43  ;;  %v4115_v50 = vpop.f32.mrf.mxu2  ;;  %3981 = vmatmul.bf16.gmra.mxu0 %v10491_v23 }
 0x5dd   : > { %v4204_v29 = vpop.f32.mrf.mxu3  ;;  %v4298_v39 = vmax.f32 %v10497_v12, %v4115_v50  ;;  %4070 = vmatmul.bf16.gmra.mxu1 %v10491_v23 }
 0x5de   : > { %v4299_v32 = vmax.f32 %v10499_v33, %v4204_v29 }
 0x5df   : > { %v4408_v47 = vmax.f32 %v4296_v45, %v4298_v39  ;;  %v13162_v45 = vld [vmem:[#allocation85_spill] sm:$0xff] }
 0x5e0   : > { %v4409_v59 = vmax.f32 %v4297_v16, %v4299_v32 }
 0x5e1   : > { %v3944_v46 = vpop.f32.mrf.mxu0 }
 0x5e2   : > { %v4464_v55 = vmax.f32 %v4408_v47, %v4409_v59  ;;  %v4033_v9 = vpop.f32.mrf.mxu1  ;;  %v4308_v25 = vmax.f32 %v13154_v22, %v3944_v46 }
 0x5e3   : > { %v4309_v51 = vmax.f32 %v13155_v2, %v4033_v9  ;;  %v13164_v9 = vld [vmem:[#allocation21_spill] sm:$0xff] }
 0x5e4   : > { %7115 = vmax.xlane.f32.xlu0 %v4464_v55  ;;  %v4117_v52 = vpop.f32.mrf.mxu2  ;;  %v13163_v55 = vld [vmem:[#allocation55_spill] sm:$0xff] }
 0x5e5   : > { %v4206_v14 = vpop.f32.mrf.mxu3  ;;  %v4302_v12 = vmax.f32 %v10509_v61, %v4117_v52 }
 0x5e6   : > { %v4303_v33 = vmax.f32 %v10511_v31, %v4206_v14  ;;  %v13165_v14 = vld [vmem:[#allocation95_spill] sm:$0xff] }
 0x5e7   : > { %v4410_v21 = vmax.f32 %v4300_v10, %v4302_v12 }
 0x5e8   : > { %v4411_v63 = vmax.f32 %v4301_v53, %v4303_v33  ;;  %v13166_v53 = vld [vmem:[#allocation96_spill] sm:$0xff] }
 0x5e9   : > { %4159 = vmatmul.bf16.gmra.mxu2 %v10491_v23  ;;  %v3947_v8 = vpop.f32.mrf.mxu0 }
 0x5ea   : > { %4248 = vmatmul.bf16.gmra.mxu3 %v10491_v23  ;;  %v4465_v36 = vmax.f32 %v4410_v21, %v4411_v63  ;;  %v4036_v20 = vpop.f32.mrf.mxu1  ;;  %v4312_v62 = vmax.f32 %v13158_v58, %v3947_v8 }
 0x5eb   : > { %v4313_v19 = vmax.f32 %v13159_v18, %v4036_v20  ;;  %v10897_v18 = vld [vmem:[%s12405_s7 + $0x108] sm:$0xff] }
 0x5ec   : > { %7117 = vmax.xlane.f32.xlu1 %v4465_v36  ;;  %v4120_v30 = vpop.f32.mrf.mxu2  ;;  %3986 = vmatmul.bf16.gmra.mxu0 %v13153_v54  ;;  %v10868_v36 = vld [vmem:[%s12405_s7 + $0x100] sm:$0xff] }
 0x5ed   : > { %v4209_v15 = vpop.f32.mrf.mxu3  ;;  %v4306_v61 = vmax.f32 %v13151_v48, %v4120_v30  ;;  %4075 = vmatmul.bf16.gmra.mxu1 %v13153_v54  ;;  %v13169_v48 = vld [vmem:[#allocation89_spill] sm:$0xff] }
 0x5ee   : > { %v4307_v31 = vmax.f32 %v13152_v1, %v4209_v15  ;;  %v13170_v1 = vld [vmem:[#allocation99_spill] sm:$0xff] }
 0x5ef   : > { %v4412_v13 = vmax.f32 %v4304_v27, %v4306_v61 }
 0x5f0   : > { %v4413_v23 = vmax.f32 %v4305_v35, %v4307_v31 }
 0x5f1   : > { %v3949_v17 = vpop.f32.mrf.mxu0 }
 0x5f2   : > { %v4466_v42 = vmax.f32 %v4412_v13, %v4413_v23  ;;  %v4038_v34 = vpop.f32.mrf.mxu1  ;;  %v4316_v46 = vmax.f32 %v13163_v55, %v3949_v17  ;;  %v13172_v13 = vld [vmem:[#allocation40_spill] sm:$0xff] }
 0x5f3   : > { %v4317_v52 = vmax.f32 %v13164_v9, %v4038_v34  ;;  %v13173_v34 = vld [vmem:[#allocation41_spill] sm:$0xff] }
 0x5f4   : > { %7119 = vmax.xlane.f32.xlu2 %v4466_v42  ;;  %v4122_v24 = vpop.f32.mrf.mxu2 }
 0x5f5   : > { %v4211_v7 = vpop.f32.mrf.mxu3  ;;  %v4310_v11 = vmax.f32 %v13156_v38, %v4122_v24  ;;  %v13174_v24 = vld [vmem:[#allocation42_spill] sm:$0xff] }
 0x5f6   : > { %v4311_v57 = vmax.f32 %v13157_v4, %v4211_v7 }
 0x5f7   : > { %v4414_v28 = vmax.f32 %v4308_v25, %v4310_v11  ;;  %v13176_v11 = vld [vmem:[#allocation84_spill] sm:$0xff] }
 0x5f8   : > { %v4415_v0 = vmax.f32 %v4309_v51, %v4311_v57  ;;  %v13175_v51 = vld [vmem:[#allocation20_spill] sm:$0xff]  ;;  %v13177_v57 = vld [vmem:[#allocation93_spill] sm:$0xff] }
 0x5f9   : > { %4164 = vmatmul.bf16.gmra.mxu2 %v13153_v54  ;;  %v3952_v44 = vpop.f32.mrf.mxu0 }
 0x5fa   : > { %4253 = vmatmul.bf16.gmra.mxu3 %v13153_v54  ;;  %v4467_v26 = vmax.f32 %v4414_v28, %v4415_v0  ;;  %v4041_v49 = vpop.f32.mrf.mxu1  ;;  %v4320_v27 = vmax.f32 %v13167_v60, %v3952_v44  ;;  %v13171_v54 = vld [vmem:[#allocation39_spill] sm:$0xff]  ;;  %v13178_v0 = vld [vmem:[#allocation104_spill] sm:$0xff]  ;;  %v13179_v44 = vld [vmem:[#allocation45_spill] sm:$0xff] }
 0x5fb   : > { %v4321_v35 = vmax.f32 %v13168_v3, %v4041_v49  ;;  %v13180_v49 = vld [vmem:[#allocation46_spill] sm:$0xff] }
 0x5fc   : > { %7121 = vmax.xlane.f32.xlu0 %v4467_v26  ;;  %v4125_v37 = vpop.f32.mrf.mxu2  ;;  %3991 = vmatmul.bf16.gmra.mxu0 %v13162_v45 }
 0x5fd   : > { %v4214_v40 = vpop.f32.mrf.mxu3  ;;  %v4314_v43 = vmax.f32 %v13160_v6, %v4125_v37  ;;  %4080 = vmatmul.bf16.gmra.mxu1 %v13162_v45  ;;  %v13182_v6 = vld [vmem:[#allocation44_spill] sm:$0xff] }
 0x5fe   : > { %v4315_v41 = vmax.f32 %v13161_v56, %v4214_v40 }
 0x5ff   : > { %v4416_v50 = vmax.f32 %v4312_v62, %v4314_v43 }
 0x600   : > { %v4417_v29 = vmax.f32 %v4313_v19, %v4315_v41  ;;  %v13181_v19 = vld [vmem:[#allocation43_spill] sm:$0xff] }
 0x601   : > { %v3954_v39 = vpop.f32.mrf.mxu0  ;;  %v13183_v41 = vld [vmem:[#allocation47_spill] sm:$0xff] }
 0x602   : > { %v4468_v16 = vmax.f32 %v4416_v50, %v4417_v29  ;;  %v4043_v32 = vpop.f32.mrf.mxu1  ;;  %v4324_v38 = vmax.f32 %v13175_v51, %v3954_v39  ;;  %v13185_v50 = vld [vmem:[#allocation94_spill] sm:$0xff]  ;;  %v13204_v51 = vld [vmem:[#allocation23_spill] sm:$0xff] }
 0x603   : > { %v4325_v4 = vmax.f32 %v13176_v11, %v4043_v32  ;;  %v13186_v32 = vld [vmem:[#allocation88_spill] sm:$0xff] }
 0x604   : > { %7123 = vmax.xlane.f32.xlu1 %v4468_v16  ;;  %v4127_v47 = vpop.f32.mrf.mxu2 }
 0x605   : > { %v4216_v59 = vpop.f32.mrf.mxu3  ;;  %v4318_v10 = vmax.f32 %v13165_v14, %v4127_v47  ;;  %v13190_v14 = vld [vmem:[#allocation36_spill] sm:$0xff] }
 0x606   : > { %v4319_v12 = vmax.f32 %v13166_v53, %v4216_v59  ;;  %v13187_v59 = vld [vmem:[#allocation97_spill] sm:$0xff] }
 0x607   : > { %v4418_v33 = vmax.f32 %v4316_v46, %v4318_v10  ;;  %v13188_v46 = vld [vmem:[#allocation98_spill] sm:$0xff] }
 0x608   : > { %v4419_v21 = vmax.f32 %v4317_v52, %v4319_v12  ;;  %v13189_v52 = vld [vmem:[#allocation35_spill] sm:$0xff] }
 0x609   : > { %4169 = vmatmul.bf16.gmra.mxu2 %v13162_v45  ;;  %v3957_v8 = vpop.f32.mrf.mxu0 }
 0x60a   : > { %4258 = vmatmul.bf16.gmra.mxu3 %v13162_v45  ;;  %v4469_v63 = vmax.f32 %v4418_v33, %v4419_v21  ;;  %v4046_v20 = vpop.f32.mrf.mxu1  ;;  %v13184_v45 = vld [vmem:[#allocation48_spill] sm:$0xff]  ;;  %v4328_v29 = vmax.f32 %v13185_v50, %v3957_v8  ;;  %v13191_v33 = vld [vmem:[#allocation51_spill] sm:$0xff] }
 0x60b   : > { %v4329_v47 = vmax.f32 %v13186_v32, %v4046_v20  ;;  %v13192_v21 = vld [vmem:[#allocation52_spill] sm:$0xff]  ;;  %v13193_v8 = vld [vmem:[#allocation31_spill] sm:$0xff]  ;;  %v13214_v32 = vld [vmem:[#allocation29_spill] sm:$0xff] }
 0x60c   : > { %7125 = vmax.xlane.f32.xlu2 %v4469_v63  ;;  %v4130_v30 = vpop.f32.mrf.mxu2  ;;  %4720 = vmatmul.bf16.vlgmr.msra.gmra.mxu0 %v10868_v36  ;;  %v13194_v20 = vld [vmem:[#allocation32_spill] sm:$0xff] }
 0x60d   : > { %v4219_v15 = vpop.f32.mrf.mxu3  ;;  %v4322_v61 = vmax.f32 %v13169_v48, %v4130_v30  ;;  %4809 = vmatmul.bf16.vlgmr.msra.gmra.mxu1 %v10868_v36  ;;  %5872 = vmatpush.bf16.msra.mxu0 %v13171_v54  ;;  %v13195_v30 = vld [vmem:[#allocation53_spill] sm:$0xff]  ;;  %v13197_v48 = vld [vmem:[#allocation100_spill] sm:$0xff] }
 0x60e   : > { %v4323_v31 = vmax.f32 %v13170_v1, %v4219_v15  ;;  %5961 = vmatpush.bf16.msra.mxu1 %v13172_v13  ;;  %v13196_v15 = vld [vmem:[#allocation54_spill] sm:$0xff]  ;;  %v13198_v1 = vld [vmem:[#allocation92_spill] sm:$0xff]  ;;  %v13199_v13 = vld [vmem:[#allocation101_spill] sm:$0xff] }
 0x60f   : > { %v4420_v23 = vmax.f32 %v4320_v27, %v4322_v61 }
 0x610   : > { %v4421_v42 = vmax.f32 %v4321_v35, %v4323_v31 }
 0x611   : > { %5873 = vmatpush.bf16.msra.mxu0 %v13173_v34  ;;  %v10880_v7 = vpop.f32.mrf.mxu0 }
 0x612   : > { %v4470_v17 = vmax.f32 %v4420_v23, %v4421_v42  ;;  %5962 = vmatpush.bf16.msra.mxu1 %v13174_v24  ;;  %v10882_v22 = vpop.f32.mrf.mxu1  ;;  %v4332_v61 = vmax.f32 %v13197_v48, %v10880_v7  ;;  %v13200_v42 = vld [vmem:[#allocation27_spill] sm:$0xff]  ;;  %v13202_v24 = vld [vmem:[#allocation57_spill] sm:$0xff] }
 0x613   : > { %v4333_v31 = vmax.f32 %v13198_v1, %v10882_v22  ;;  %v10940_v22 = vld [vmem:[%s12405_s7 + $0x110] sm:$0xff] }
 0x614   : > { %7127 = vmax.xlane.f32.xlu0 %v4470_v17  ;;  %v4132_v25 = vpop.f32.mrf.mxu2  ;;  %v13201_v17 = vld [vmem:[#allocation28_spill] sm:$0xff] }
 0x615   : > { %v4221_v2 = vpop.f32.mrf.mxu3  ;;  %v4326_v28 = vmax.f32 %v13177_v57, %v4132_v25  ;;  %5874 = vmatpush.bf16.msra.mxu0 %v13179_v44  ;;  %v13203_v25 = vld [vmem:[#allocation58_spill] sm:$0xff]  ;;  %v13206_v57 = vld [vmem:[#allocation37_spill] sm:$0xff] }
 0x616   : > { %v4327_v26 = vmax.f32 %v13178_v0, %v4221_v2  ;;  %5963 = vmatpush.bf16.msra.mxu1 %v13180_v49  ;;  %v13208_v0 = vld [vmem:[#allocation105_spill] sm:$0xff] }
 0x617   : > { %v7100_v58 = vpop.xlane.xlu1 %7099  ;;  %v4422_v62 = vmax.f32 %v4324_v38, %v4326_v28  ;;  %v13205_v38 = vld [vmem:[#allocation24_spill] sm:$0xff]  ;;  %v13207_v28 = vld [vmem:[#allocation38_spill] sm:$0xff] }
 0x618   : > { %7324 = vst.msk [vmem:[%s10150_s17 + $0x100] sm:$0xff] %vm7291_vm4, %v7100_v58  ;;  %v4423_v37 = vmax.f32 %v4325_v4, %v4327_v26  ;;  %v13209_v58 = vld [vmem:[#allocation103_spill] sm:$0xff] }
 0x619   : > { %4898 = vmatmul.bf16.vlgmr.msra.gmra.mxu2 %v10868_v36  ;;  %5875 = vmatpush.bf16.msra.mxu0 %v13181_v19  ;;  %v10901_v43 = vpop.f32.mrf.mxu0  ;;  %v13211_v19 = vld [vmem:[#allocation106_spill] sm:$0xff] }
 0x61a   : > { %4987 = vmatmul.bf16.vlgmr.msra.gmra.mxu3 %v10868_v36  ;;  %v4471_v40 = vmax.f32 %v4422_v62, %v4423_v37  ;;  %5964 = vmatpush.bf16.msra.mxu1 %v13182_v6  ;;  %v10903_v56 = vpop.f32.mrf.mxu1  ;;  %v4336_v26 = vmax.f32 %v13208_v0, %v10901_v43  ;;  %v13210_v37 = vld [vmem:[#allocation113_spill] sm:$0xff]  ;;  %v13213_v43 = vld [vmem:[#allocation34_spill] sm:$0xff] }
 0x61b   : > { %6050 = vmatpush.bf16.msra.mxu2 %v13183_v41  ;;  %6139 = vmatpush.bf16.msra.mxu3 %v13184_v45  ;;  %v4337_v62 = vmax.f32 %v13209_v58, %v10903_v56  ;;  %v13228_v0 = vld [vmem:[#allocation122_spill] sm:$0xff] }
 0x61c   : > { %7129 = vmax.xlane.f32.xlu1 %v4471_v40  ;;  %v4135_v16 = vpop.f32.mrf.mxu2  ;;  %4725 = vmatmul.bf16.gmra.mxu0 %v10897_v18 }
 0x61d   : > { %v4224_v39 = vpop.f32.mrf.mxu3  ;;  %v4330_v55 = vmax.f32 %v13187_v59, %v4135_v16  ;;  %4814 = vmatmul.bf16.gmra.mxu1 %v10897_v18  ;;  %5876 = vmatpush.bf16.msra.mxu0 %v13189_v52  ;;  %v13217_v52 = vld [vmem:[#allocation109_spill] sm:$0xff] }
 0x61e   : > { %v4331_v9 = vmax.f32 %v13188_v46, %v4224_v39  ;;  %5965 = vmatpush.bf16.msra.mxu1 %v13190_v14  ;;  %v13216_v46 = vld [vmem:[#allocation108_spill] sm:$0xff] }
 0x61f   : > { %v7102_v10 = vpop.xlane.xlu2 %7101  ;;  %v4424_v53 = vmax.f32 %v4328_v29, %v4330_v55  ;;  %6051 = vmatpush.bf16.msra.mxu2 %v13191_v33  ;;  %6140 = vmatpush.bf16.msra.mxu3 %v13192_v21  ;;  %v13212_v29 = vld [vmem:[#allocation33_spill] sm:$0xff] }
 0x620   : > { %v4425_v12 = vmax.f32 %v4329_v47, %v4331_v9  ;;  %7325 = vst.msk [vmem:[%s10150_s17 + $0x108] sm:$0xff] %vm7291_vm4, %v7102_v10  ;;  %v13215_v47 = vld [vmem:[#allocation30_spill] sm:$0xff]  ;;  %v13218_v10 = vld [vmem:[#allocation111_spill] sm:$0xff] }
 0x621   : > { %5877 = vmatpush.bf16.msra.mxu0 %v13193_v8  ;;  %v3964_v60 = vpop.f32.mrf.mxu0  ;;  %v13221_v8 = vld [vmem:[#allocation26_spill] sm:$0xff] }
 0x622   : > { %v4472_v63 = vmax.f32 %v4424_v53, %v4425_v12  ;;  %5966 = vmatpush.bf16.msra.mxu1 %v13194_v20  ;;  %v4053_v27 = vpop.f32.mrf.mxu1  ;;  %v4340_v9 = vmax.f32 %v13216_v46, %v3964_v60  ;;  %v13219_v12 = vld [vmem:[#allocation114_spill] sm:$0xff] }
 0x623   : > { %6052 = vmatpush.bf16.msra.mxu2 %v13195_v30  ;;  %6141 = vmatpush.bf16.msra.mxu3 %v13196_v15  ;;  %v4341_v14 = vmax.f32 %v13217_v52, %v4053_v27  ;;  %v10973_v27 = vld [vmem:[%s12405_s7 + $0x118] sm:$0xff] }
 0x624   : > { %7131 = vmax.xlane.f32.xlu2 %v4472_v63  ;;  %v4137_v3 = vpop.f32.mrf.mxu2  ;;  %v13220_v63 = vld [vmem:[#allocation25_spill] sm:$0xff] }
 0x625   : > { %v4226_v35 = vpop.f32.mrf.mxu3  ;;  %v4334_v54 = vmax.f32 %v10629_v5, %v4137_v3  ;;  %5878 = vmatpush.bf16.msra.mxu0 %v13200_v42  ;;  %v13225_v42 = vld [vmem:[#allocation119_spill] sm:$0xff] }
 0x626   : > { %v4335_v23 = vmax.f32 %v13199_v13, %v4226_v35  ;;  %5967 = vmatpush.bf16.msra.mxu1 %v13201_v17  ;;  %v13222_v35 = vld [vmem:[#allocation102_spill] sm:$0xff]  ;;  %v13224_v13 = vld [vmem:[#allocation117_spill] sm:$0xff] }
 0x627   : > { %v7104_v34 = vpop.xlane.xlu0 %7103  ;;  %6053 = vmatpush.bf16.msra.mxu2 %v13202_v24  ;;  %6142 = vmatpush.bf16.msra.mxu3 %v13203_v25  ;;  %v4426_v2 = vmax.f32 %v4332_v61, %v4334_v54 }
 0x628   : > { %7326 = vst.msk [vmem:[%s10150_s17 + $0x110] sm:$0xff] %vm7291_vm4, %v7104_v34  ;;  %v4427_v7 = vmax.f32 %v4333_v31, %v4335_v23  ;;  %v13223_v31 = vld [vmem:[#allocation112_spill] sm:$0xff] }
 0x629   : > { %4903 = vmatmul.bf16.gmra.mxu2 %v10897_v18  ;;  %5879 = vmatpush.bf16.msra.mxu0 %v13204_v51  ;;  %v3967_v11 = vpop.f32.mrf.mxu0 }
 0x62a   : > { %4992 = vmatmul.bf16.gmra.mxu3 %v10897_v18  ;;  %v4473_v5 = vmax.f32 %v4426_v2, %v4427_v7  ;;  %5968 = vmatpush.bf16.msra.mxu1 %v13205_v38  ;;  %v4056_v4 = vpop.f32.mrf.mxu1  ;;  %v4344_v48 = vmax.f32 %v13222_v35, %v3967_v11  ;;  %v13226_v11 = vld [vmem:[#allocation107_spill] sm:$0xff] }
 0x62b   : > { %6054 = vmatpush.bf16.msra.mxu2 %v13206_v57  ;;  %6143 = vmatpush.bf16.msra.mxu3 %v13207_v28  ;;  %v4345_v54 = vmax.f32 %v13223_v31, %v4056_v4  ;;  %v13227_v57 = vld [vmem:[#allocation110_spill] sm:$0xff] }
 0x62c   : > { %7133 = vmax.xlane.f32.xlu0 %v4473_v5  ;;  %v4140_v44 = vpop.f32.mrf.mxu2  ;;  %4730 = vmatmul.bf16.gmra.mxu0 %v10940_v22 }
 0x62d   : > { %v4229_v49 = vpop.f32.mrf.mxu3  ;;  %v4338_v40 = vmax.f32 %v13210_v37, %v4140_v44  ;;  %4819 = vmatmul.bf16.gmra.mxu1 %v10940_v22  ;;  %v13229_v44 = vld [vmem:[#allocation123_spill] sm:$0xff] }
 0x62e   : > { %v4339_v6 = vmax.f32 %v13211_v19, %v4229_v49  ;;  %v10994_v19 = vld [vmem:[%s12405_s7 + $0x120] sm:$0xff] }
 0x62f   : > { %v7106_v41 = vpop.xlane.xlu1 %7105  ;;  %v4428_v45 = vmax.f32 %v4336_v26, %v4338_v40  ;;  %6055 = vmatpush.bf16.msra.mxu2 %v13212_v29  ;;  %6144 = vmatpush.bf16.msra.mxu3 %v13213_v43 }
 0x630   : > { %v4429_v50 = vmax.f32 %v4337_v62, %v4339_v6  ;;  %7327 = vst.msk [vmem:[%s10150_s17 + $0x118] sm:$0xff] %vm7291_vm4, %v7106_v41 }
 0x631   : > { %v3969_v56 = vpop.f32.mrf.mxu0 }
 0x632   : > { %v4474_v16 = vmax.f32 %v4428_v45, %v4429_v50  ;;  %v4058_v39 = vpop.f32.mrf.mxu1  ;;  %v4348_v4 = vmax.f32 %v13226_v11, %v3969_v56  ;;  %v13230_v45 = vld [vmem:[#allocation115_spill] sm:$0xff] }
 0x633   : > { %6056 = vmatpush.bf16.msra.mxu2 %v13214_v32  ;;  %6145 = vmatpush.bf16.msra.mxu3 %v13215_v47  ;;  %v4349_v28 = vmax.f32 %v13227_v57, %v4058_v39  ;;  %v13232_v39 = vld [vmem:[#allocation126_spill] sm:$0xff]  ;;  %v13233_v47 = vld [vmem:[#allocation127_spill] sm:$0xff] }
 0x634   : > { %7135 = vmax.xlane.f32.xlu1 %v4474_v16  ;;  %v4142_v59 = vpop.f32.mrf.mxu2  ;;  %v13231_v16 = vld [vmem:[#allocation116_spill] sm:$0xff] }
 0x635   : > { %v4231_v55 = vpop.f32.mrf.mxu3  ;;  %v4342_v53 = vmax.f32 %v13218_v10, %v4142_v59 }
 0x636   : > { %v4343_v33 = vmax.f32 %v13219_v12, %v4231_v55 }
 0x637   : > { %v7108_v21 = vpop.xlane.xlu2 %7107  ;;  %6057 = vmatpush.bf16.msra.mxu2 %v13220_v63  ;;  %6146 = vmatpush.bf16.msra.mxu3 %v13221_v8  ;;  %v4430_v20 = vmax.f32 %v4340_v9, %v4342_v53  ;;  %v13235_v63 = vld [vmem:[#allocation66_spill] sm:$0xff] }
 0x638   : > { %7328 = vst.msk [vmem:[%s10150_s17 + $0x120] sm:$0xff] %vm7291_vm4, %v7108_v21  ;;  %v4431_v30 = vmax.f32 %v4341_v14, %v4343_v33  ;;  %v13234_v33 = vld [vmem:[#allocation61_spill] sm:$0xff] }
 0x639   : > { %4908 = vmatmul.bf16.gmra.mxu2 %v10940_v22  ;;  %v3972_v15 = vpop.f32.mrf.mxu0 }
 0x63a   : > { %4997 = vmatmul.bf16.gmra.mxu3 %v10940_v22  ;;  %v4475_v60 = vmax.f32 %v4430_v20, %v4431_v30  ;;  %v4061_v3 = vpop.f32.mrf.mxu1  ;;  %v4352_v50 = vmax.f32 %v13230_v45, %v3972_v15  ;;  %v13236_v20 = vld [vmem:[#allocation130_spill] sm:$0xff] }
 0x63b   : > { %v4353_v56 = vmax.f32 %v13231_v16, %v4061_v3  ;;  %v11036_v16 = vld [vmem:[%s12405_s7 + $0x130] sm:$0xff] }
 0x63c   : > { %7137 = vmax.xlane.f32.xlu2 %v4475_v60  ;;  %v4145_v61 = vpop.f32.mrf.mxu2  ;;  %4735 = vmatmul.bf16.gmra.mxu0 %v10973_v27  ;;  %v13237_v60 = vld [vmem:[#allocation131_spill] sm:$0xff] }
 0x63d   : > { %v4234_v1 = vpop.f32.mrf.mxu3  ;;  %v4346_v23 = vmax.f32 %v13224_v13, %v4145_v61  ;;  %4824 = vmatmul.bf16.gmra.mxu1 %v10973_v27  ;;  %v13238_v13 = vld [vmem:[#allocation71_spill] sm:$0xff] }
 0x63e   : > { %v4347_v17 = vmax.f32 %v13225_v42, %v4234_v1  ;;  %v11015_v1 = vld [vmem:[%s12405_s7 + $0x128] sm:$0xff] }
 0x63f   : > { %v7110_v34 = vpop.xlane.xlu0 %7109  ;;  %v4432_v24 = vmax.f32 %v4344_v48, %v4346_v23 }
 0x640   : > { %v4433_v25 = vmax.f32 %v4345_v54, %v4347_v17  ;;  %7329 = vst.msk [vmem:[%s10150_s17 + $0x128] sm:$0xff] %vm7291_vm4, %v7110_v34  ;;  %v13239_v34 = vld [vmem:[#allocation118_spill] sm:$0xff] }
 0x641   : > { %v3974_v7 = vpop.f32.mrf.mxu0 }
 0x642   : > { %v4476_v2 = vmax.f32 %v4432_v24, %v4433_v25  ;;  %v4063_v5 = vpop.f32.mrf.mxu1  ;;  %v4356_v21 = vmax.f32 %v13234_v33, %v3974_v7  ;;  %v13240_v25 = vld [vmem:[#allocation134_spill] sm:$0xff]  ;;  %v13241_v7 = vld [vmem:[#allocation135_spill] sm:$0xff] }
 0x643   : > { %v4357_v8 = vmax.f32 %v13235_v63, %v4063_v5 }
 0x644   : > { %7139 = vmax.xlane.f32.xlu0 %v4476_v2  ;;  %v4147_v51 = vpop.f32.mrf.mxu2 }
 0x645   : > { %v4236_v38 = vpop.f32.mrf.mxu3  ;;  %v4350_v26 = vmax.f32 %v13228_v0, %v4147_v51 }
 0x646   : > { %v4351_v49 = vmax.f32 %v13229_v44, %v4236_v38  ;;  %v13242_v44 = vld [vmem:[#allocation120_spill] sm:$0xff] }
 0x647   : > { %v7112_v58 = vpop.xlane.xlu1 %7111  ;;  %v4434_v62 = vmax.f32 %v4348_v4, %v4350_v26 }
 0x648   : > { %7330 = vst.msk [vmem:[%s10150_s17 + $0x130] sm:$0xff] %vm7291_vm4, %v7112_v58  ;;  %v4435_v37 = vmax.f32 %v4349_v28, %v4351_v49  ;;  %v13243_v58 = vld [vmem:[#allocation121_spill] sm:$0xff] }
 0x649   : > { %4913 = vmatmul.bf16.gmra.mxu2 %v10973_v27  ;;  %v3977_v6 = vpop.f32.mrf.mxu0 }
 0x64a   : > { %5002 = vmatmul.bf16.gmra.mxu3 %v10973_v27  ;;  %v4477_v40 = vmax.f32 %v4434_v62, %v4435_v37  ;;  %v4066_v41 = vpop.f32.mrf.mxu1  ;;  %v4360_v23 = vmax.f32 %v13238_v13, %v3977_v6  ;;  %v13244_v37 = vld [vmem:[#allocation138_spill] sm:$0xff]  ;;  %v13245_v6 = vld [vmem:[#allocation139_spill] sm:$0xff] }
 0x64b   : > { %v4361_v24 = vmax.f32 %v13239_v34, %v4066_v41 }
 0x64c   : > { %7141 = vmax.xlane.f32.xlu1 %v4477_v40  ;;  %v4150_v29 = vpop.f32.mrf.mxu2  ;;  %4740 = vmatmul.bf16.gmra.mxu0 %v10994_v19 }
 0x64d   : > { %v4239_v43 = vpop.f32.mrf.mxu3  ;;  %v4354_v32 = vmax.f32 %v13232_v39, %v4150_v29  ;;  %4829 = vmatmul.bf16.gmra.mxu1 %v10994_v19 }
 0x64e   : > { %v4355_v59 = vmax.f32 %v13233_v47, %v4239_v43 }
 0x64f   : > { %v7114_v55 = vpop.xlane.xlu2 %7113  ;;  %v4436_v46 = vmax.f32 %v4352_v50, %v4354_v32  ;;  %v13246_v32 = vld [vmem:[#allocation124_spill] sm:$0xff] }
 0x650   : > { %v4437_v9 = vmax.f32 %v4353_v56, %v4355_v59  ;;  %7331 = vst.msk [vmem:[%s10150_s17 + $0x138] sm:$0xff] %vm7291_vm4, %v7114_v55 }
 0x651   : > { %v3979_v14 = vpop.f32.mrf.mxu0 }
 0x652   : > { %v4478_v52 = vmax.f32 %v4436_v46, %v4437_v9  ;;  %v4068_v10 = vpop.f32.mrf.mxu1  ;;  %v4364_v49 = vmax.f32 %v13242_v44, %v3979_v14  ;;  %v13247_v46 = vld [vmem:[#allocation125_spill] sm:$0xff] }
 0x653   : > { %v4365_v62 = vmax.f32 %v13243_v58, %v4068_v10  ;;  %v13249_v10 = vld [vmem:[#allocation143_spill] sm:$0xff] }
 0x654   : > { %7143 = vmax.xlane.f32.xlu2 %v4478_v52  ;;  %v4152_v53 = vpop.f32.mrf.mxu2  ;;  %v13248_v52 = vld [vmem:[#allocation142_spill] sm:$0xff] }
 0x655   : > { %v4241_v12 = vpop.f32.mrf.mxu3  ;;  %v4358_v30 = vmax.f32 %v13236_v20, %v4152_v53 }
 0x656   : > { %v4359_v15 = vmax.f32 %v13237_v60, %v4241_v12 }
 0x657   : > { %v7116_v3 = vpop.xlane.xlu0 %7115  ;;  %v4438_v35 = vmax.f32 %v4356_v21, %v4358_v30 }
 0x658   : > { %7332 = vst.msk [vmem:[%s10150_s17 + $0x140] sm:$0xff] %vm7291_vm4, %v7116_v3  ;;  %v4439_v48 = vmax.f32 %v4357_v8, %v4359_v15  ;;  %v13250_v15 = vld [vmem:[#allocation128_spill] sm:$0xff] }
 0x659   : > { %4918 = vmatmul.bf16.gmra.mxu2 %v10994_v19  ;;  %v3982_v31 = vpop.f32.mrf.mxu0 }
 0x65a   : > { %5007 = vmatmul.bf16.gmra.mxu3 %v10994_v19  ;;  %v4479_v61 = vmax.f32 %v4438_v35, %v4439_v48  ;;  %v4071_v54 = vpop.f32.mrf.mxu1  ;;  %v4368_v47 = vmax.f32 %v13246_v32, %v3982_v31  ;;  %v13251_v35 = vld [vmem:[#allocation129_spill] sm:$0xff] }
 0x65b   : > { %v4369_v9 = vmax.f32 %v13247_v46, %v4071_v54  ;;  %v13253_v54 = vld [vmem:[#allocation147_spill] sm:$0xff]  ;;  %v13261_v32 = vld [vmem:[#allocation153_spill] sm:$0xff] }
 0x65c   : > { %7145 = vmax.xlane.f32.xlu0 %v4479_v61  ;;  %v4155_v42 = vpop.f32.mrf.mxu2  ;;  %4745 = vmatmul.bf16.gmra.mxu0 %v11015_v1  ;;  %v13252_v61 = vld [vmem:[#allocation146_spill] sm:$0xff] }
 0x65d   : > { %v4244_v17 = vpop.f32.mrf.mxu3  ;;  %v4362_v2 = vmax.f32 %v13240_v25, %v4155_v42  ;;  %4834 = vmatmul.bf16.gmra.mxu1 %v11015_v1 }
 0x65e   : > { %v4363_v5 = vmax.f32 %v13241_v7, %v4244_v17  ;;  %v13254_v7 = vld [vmem:[#allocation132_spill] sm:$0xff] }
 0x65f   : > { %v7118_v51 = vpop.xlane.xlu1 %7117  ;;  %v4440_v38 = vmax.f32 %v4360_v23, %v4362_v2 }
 0x660   : > { %v4441_v11 = vmax.f32 %v4361_v24, %v4363_v5  ;;  %7333 = vst.msk [vmem:[%s10150_s17 + $0x148] sm:$0xff] %vm7291_vm4, %v7118_v51  ;;  %v11057_v24 = vld [vmem:[%s12405_s7 + $0x138] sm:$0xff] }
 0x661   : > { %v3984_v57 = vpop.f32.mrf.mxu0 }
 0x662   : > { %v4480_v4 = vmax.f32 %v4440_v38, %v4441_v11  ;;  %v4073_v28 = vpop.f32.mrf.mxu1  ;;  %v4372_v3 = vmax.f32 %v13250_v15, %v3984_v57  ;;  %v13255_v11 = vld [vmem:[#allocation133_spill] sm:$0xff]  ;;  %v13256_v57 = vld [vmem:[#allocation150_spill] sm:$0xff] }
 0x663   : > { %v4373_v48 = vmax.f32 %v13251_v35, %v4073_v28 }
 0x664   : > { %7147 = vmax.xlane.f32.xlu1 %v4480_v4  ;;  %v4157_v0 = vpop.f32.mrf.mxu2 }
 0x665   : > { %v4246_v26 = vpop.f32.mrf.mxu3  ;;  %v4366_v40 = vmax.f32 %v13244_v37, %v4157_v0  ;;  %v13257_v0 = vld [vmem:[#allocation151_spill] sm:$0xff] }
 0x666   : > { %v4367_v41 = vmax.f32 %v13245_v6, %v4246_v26 }
 0x667   : > { %v7120_v45 = vpop.xlane.xlu2 %7119  ;;  %v4442_v50 = vmax.f32 %v4364_v49, %v4366_v40 }
 0x668   : > { %7334 = vst.msk [vmem:[%s10150_s17 + $0x150] sm:$0xff] %vm7291_vm4, %v7120_v45  ;;  %v4443_v29 = vmax.f32 %v4365_v62, %v4367_v41  ;;  %v13258_v45 = vld [vmem:[#allocation136_spill] sm:$0xff] }
 0x669   : > { %4923 = vmatmul.bf16.gmra.mxu2 %v11015_v1  ;;  %v3987_v56 = vpop.f32.mrf.mxu0 }
 0x66a   : > { %5012 = vmatmul.bf16.gmra.mxu3 %v11015_v1  ;;  %v4481_v43 = vmax.f32 %v4442_v50, %v4443_v29  ;;  %v4076_v39 = vpop.f32.mrf.mxu1  ;;  %v4376_v5 = vmax.f32 %v13254_v7, %v3987_v56  ;;  %v13259_v29 = vld [vmem:[#allocation137_spill] sm:$0xff]  ;;  %v13260_v56 = vld [vmem:[#allocation152_spill] sm:$0xff] }
 0x66b   : > { %v4377_v4 = vmax.f32 %v13255_v11, %v4076_v39 }
 0x66c   : > { %7149 = vmax.xlane.f32.xlu2 %v4481_v43  ;;  %v4160_v59 = vpop.f32.mrf.mxu2  ;;  %4750 = vmatmul.bf16.gmra.mxu0 %v11036_v16 }
 0x66d   : > { %v4249_v55 = vpop.f32.mrf.mxu3  ;;  %v4370_v14 = vmax.f32 %v13248_v52, %v4160_v59  ;;  %4839 = vmatmul.bf16.gmra.mxu1 %v11036_v16  ;;  %v11078_v52 = vld [vmem:[%s12405_s7 + $0x140] sm:$0xff] }
 0x66e   : > { %v4371_v53 = vmax.f32 %v13249_v10, %v4249_v55 }
 0x66f   : > { %v7122_v12 = vpop.xlane.xlu0 %7121  ;;  %v4444_v33 = vmax.f32 %v4368_v47, %v4370_v14 }
 0x670   : > { %v4445_v21 = vmax.f32 %v4369_v9, %v4371_v53  ;;  %7335 = vst.msk [vmem:[%s10150_s17 + $0x158] sm:$0xff] %vm7291_vm4, %v7122_v12  ;;  %v13262_v53 = vld [vmem:[#allocation140_spill] sm:$0xff] }
 0x671   : > { %v3989_v8 = vpop.f32.mrf.mxu0 }
 0x672   : > { %v4482_v63 = vmax.f32 %v4444_v33, %v4445_v21  ;;  %v4078_v20 = vpop.f32.mrf.mxu1  ;;  %v4380_v50 = vmax.f32 %v13258_v45, %v3989_v8  ;;  %v11136_v45 = vld [vmem:[%s12405_s7 + $0x150] sm:$0xff] }
 0x673   : > { %v4381_v43 = vmax.f32 %v13259_v29, %v4078_v20  ;;  %v13264_v20 = vld [vmem:[#allocation148_spill] sm:$0xff] }
 0x674   : > { %7151 = vmax.xlane.f32.xlu0 %v4482_v63  ;;  %v4162_v30 = vpop.f32.mrf.mxu2  ;;  %v13263_v63 = vld [vmem:[#allocation141_spill] sm:$0xff] }
 0x675   : > { %v4251_v60 = vpop.f32.mrf.mxu3  ;;  %v4374_v31 = vmax.f32 %v13252_v61, %v4162_v30 }
 0x676   : > { %v4375_v13 = vmax.f32 %v13253_v54, %v4251_v60  ;;  %v13265_v60 = vld [vmem:[#allocation149_spill] sm:$0xff] }
 0x677   : > { %v7124_v23 = vpop.xlane.xlu1 %7123  ;;  %v4446_v42 = vmax.f32 %v4372_v3, %v4374_v31 }
 0x678   : > { %7336 = vst.msk [vmem:[%s10150_s17 + $0x160] sm:$0xff] %vm7291_vm4, %v7124_v23  ;;  %v4447_v17 = vmax.f32 %v4373_v48, %v4375_v13 }
 0x679   : > { %4928 = vmatmul.bf16.gmra.mxu2 %v11036_v16  ;;  %v3992_v25 = vpop.f32.mrf.mxu0 }
 0x67a   : > { %5017 = vmatmul.bf16.gmra.mxu3 %v11036_v16  ;;  %v4483_v34 = vmax.f32 %v4446_v42, %v4447_v17  ;;  %v4081_v2 = vpop.f32.mrf.mxu1  ;;  %v4384_v12 = vmax.f32 %v13262_v53, %v3992_v25  ;;  %v13266_v42 = vld [vmem:[#allocation144_spill] sm:$0xff] }
 0x67b   : > { %v4385_v8 = vmax.f32 %v13263_v63, %v4081_v2  ;;  %v13268_v2 = vld [vmem:[#allocation154_spill] sm:$0xff] }
 0x67c   : > { %7153 = vmax.xlane.f32.xlu1 %v4483_v34  ;;  %v4165_v51 = vpop.f32.mrf.mxu2  ;;  %4755 = vmatmul.bf16.gmra.mxu0 %v11057_v24  ;;  %v13267_v34 = vld [vmem:[#allocation145_spill] sm:$0xff] }
 0x67d   : > { %v4254_v38 = vpop.f32.mrf.mxu3  ;;  %v4378_v28 = vmax.f32 %v13256_v57, %v4165_v51  ;;  %4844 = vmatmul.bf16.gmra.mxu1 %v11057_v24 }
 0x67e   : > { %v4379_v26 = vmax.f32 %v13257_v0, %v4254_v38 }
 0x67f   : > { %v7126_v44 = vpop.xlane.xlu2 %7125  ;;  %v4448_v49 = vmax.f32 %v4376_v5, %v4378_v28  ;;  %v13269_v5 = vld [vmem:[#allocation155_spill] sm:$0xff] }
 0x680   : > { %v4449_v58 = vmax.f32 %v4377_v4, %v4379_v26  ;;  %7337 = vst.msk [vmem:[%s10150_s17 + $0x168] sm:$0xff] %vm7291_vm4, %v7126_v44  ;;  %v11107_v28 = vld [vmem:[%s12405_s7 + $0x148] sm:$0xff] }
 0x681   : > { %v3994_v37 = vpop.f32.mrf.mxu0 }
 0x682   : > { %v4484_v62 = vmax.f32 %v4448_v49, %v4449_v58  ;;  %v4083_v40 = vpop.f32.mrf.mxu1  ;;  %v4388_v17 = vmax.f32 %v13266_v42, %v3994_v37 }
 0x683   : > { %v4389_v25 = vmax.f32 %v13267_v34, %v4083_v40 }
 0x684   : > { %7155 = vmax.xlane.f32.xlu2 %v4484_v62  ;;  %v4167_v6 = vpop.f32.mrf.mxu2 }
 0x685   : > { %v4256_v41 = vpop.f32.mrf.mxu3  ;;  %v4382_v39 = vmax.f32 %v13260_v56, %v4167_v6 }
 0x686   : > { %v4383_v47 = vmax.f32 %v13261_v32, %v4256_v41 }
 0x687   : > { %v7128_v59 = vpop.xlane.xlu0 %7127  ;;  %v4450_v55 = vmax.f32 %v4380_v50, %v4382_v39 }
 0x688   : > { %7338 = vst.msk [vmem:[%s10150_s17 + $0x170] sm:$0xff] %vm7291_vm4, %v7128_v59  ;;  %v4451_v46 = vmax.f32 %v4381_v43, %v4383_v47 }
 0x689   : > { %4933 = vmatmul.bf16.gmra.mxu2 %v11057_v24  ;;  %v11080_v14 = vpop.f32.mrf.mxu0 }
 0x68a   : > { %5022 = vmatmul.bf16.gmra.mxu3 %v11057_v24  ;;  %v4485_v9 = vmax.f32 %v4450_v55, %v4451_v46  ;;  %v11082_v10 = vpop.f32.mrf.mxu1 }
 0x68c   : > { %7157 = vmax.xlane.f32.xlu0 %v4485_v9  ;;  %v4170_v33 = vpop.f32.mrf.mxu2  ;;  %4760 = vmatmul.bf16.gmra.mxu0 %v11078_v52  ;;  %v11165_v9 = vld [vmem:[%s12405_s7 + $0x158] sm:$0xff] }
 0x68d   : > { %v4259_v21 = vpop.f32.mrf.mxu3  ;;  %v4386_v30 = vmax.f32 %v13264_v20, %v4170_v33  ;;  %4849 = vmatmul.bf16.gmra.mxu1 %v11078_v52 }
 0x68e   : > { %v4387_v15 = vmax.f32 %v13265_v60, %v4259_v21 }
 0x68f   : > { %v4452_v3 = vmax.f32 %v4384_v12, %v4386_v30  ;;  %v7130_v48 = vpop.xlane.xlu1 %7129 }
 0x690   : > { %v4453_v35 = vmax.f32 %v4385_v8, %v4387_v15  ;;  %7339 = vst.msk [vmem:[%s10150_s17 + $0x178] sm:$0xff] %vm7291_vm4, %v7130_v48 }
 0x691   : > { %v11092_v31 = vpop.f32.mrf.mxu0 }
 0x692   : > { %v4486_v61 = vmax.f32 %v4452_v3, %v4453_v35  ;;  %v11094_v54 = vpop.f32.mrf.mxu1  ;;  %v11194_v3 = vld [vmem:[%s12405_s7 + $0x160] sm:$0xff] }
 0x694   : > { %7159 = vmax.xlane.f32.xlu1 %v4486_v61  ;;  %v4172_v13 = vpop.f32.mrf.mxu2 }
 0x695   : > { %v4261_v23 = vpop.f32.mrf.mxu3  ;;  %v4390_v7 = vmax.f32 %v13268_v2, %v4172_v13 }
 0x696   : > { %v4391_v51 = vmax.f32 %v13269_v5, %v4261_v23 }
 0x697   : > { %v7132_v38 = vpop.xlane.xlu2 %7131  ;;  %v4454_v11 = vmax.f32 %v4388_v17, %v4390_v7  ;;  %v11223_v7 = vld [vmem:[%s12405_s7 + $0x168] sm:$0xff] }
 0x698   : > { %v4455_v4 = vmax.f32 %v4389_v25, %v4391_v51  ;;  %7340 = vst.msk [vmem:[%s10150_s17 + $0x180] sm:$0xff] %vm7291_vm4, %v7132_v38 }
 0x699   : > { %4938 = vmatmul.bf16.gmra.mxu2 %v11078_v52  ;;  %v11109_v0 = vpop.f32.mrf.mxu0 }
 0x69a   : > { %5027 = vmatmul.bf16.gmra.mxu3 %v11078_v52  ;;  %v4487_v57 = vmax.f32 %v4454_v11, %v4455_v4  ;;  %v11111_v26 = vpop.f32.mrf.mxu1 }
 0x69c   : > { %7161 = vmax.xlane.f32.xlu2 %v4487_v57  ;;  %v11113_v44 = vpop.f32.mrf.mxu2  ;;  %4765 = vmatmul.bf16.gmra.mxu0 %v11107_v28 }
 0x69d   : > { %v11115_v49 = vpop.f32.mrf.mxu3  ;;  %4854 = vmatmul.bf16.gmra.mxu1 %v11107_v28 }
 0x69f   : > { %v7134_v58 = vpop.xlane.xlu0 %7133 }
 0x6a0   : > { %7341 = vst.msk [vmem:[%s10150_s17 + $0x188] sm:$0xff] %vm7291_vm4, %v7134_v58 }
 0x6a1   : > { %v11121_v62 = vpop.f32.mrf.mxu0 }
 0x6a2   : > { %v11123_v37 = vpop.f32.mrf.mxu1 }
 0x6a4   : > { %v11125_v40 = vpop.f32.mrf.mxu2 }
 0x6a5   : > { %v11127_v6 = vpop.f32.mrf.mxu3 }
 0x6a7   : > { %v7136_v41 = vpop.xlane.xlu1 %7135 }
 0x6a8   : > { %7342 = vst.msk [vmem:[%s10150_s17 + $0x190] sm:$0xff] %vm7291_vm4, %v7136_v41 }
 0x6a9   : > { %4943 = vmatmul.bf16.gmra.mxu2 %v11107_v28  ;;  %v11138_v50 = vpop.f32.mrf.mxu0 }
 0x6aa   : > { %5032 = vmatmul.bf16.gmra.mxu3 %v11107_v28  ;;  %v11140_v29 = vpop.f32.mrf.mxu1 }
 0x6ac   : > { %v11142_v43 = vpop.f32.mrf.mxu2  ;;  %4770 = vmatmul.bf16.gmra.mxu0 %v11136_v45 }
 0x6ad   : > { %v11144_v56 = vpop.f32.mrf.mxu3  ;;  %4859 = vmatmul.bf16.gmra.mxu1 %v11136_v45 }
 0x6af   : > { %v7138_v39 = vpop.xlane.xlu2 %7137 }
 0x6b0   : > { %7343 = vst.msk [vmem:[%s10150_s17 + $0x198] sm:$0xff] %vm7291_vm4, %v7138_v39 }
 0x6b1   : > { %v11150_v32 = vpop.f32.mrf.mxu0 }
 0x6b2   : > { %v11152_v47 = vpop.f32.mrf.mxu1 }
 0x6b4   : > { %v11154_v59 = vpop.f32.mrf.mxu2 }
 0x6b5   : > { %v11156_v55 = vpop.f32.mrf.mxu3 }
 0x6b7   : > { %v7140_v46 = vpop.xlane.xlu0 %7139 }
 0x6b8   : > { %7344 = vst.msk [vmem:[%s10150_s17 + $0x1a0] sm:$0xff] %vm7291_vm4, %v7140_v46 }
 0x6b9   : > { %4948 = vmatmul.bf16.gmra.mxu2 %v11136_v45  ;;  %v11167_v53 = vpop.f32.mrf.mxu0 }
 0x6ba   : > { %5037 = vmatmul.bf16.gmra.mxu3 %v11136_v45  ;;  %v11169_v12 = vpop.f32.mrf.mxu1 }
 0x6bc   : > { %v11171_v33 = vpop.f32.mrf.mxu2  ;;  %4775 = vmatmul.bf16.gmra.mxu0 %v11165_v9 }
 0x6bd   : > { %v11173_v21 = vpop.f32.mrf.mxu3  ;;  %4864 = vmatmul.bf16.gmra.mxu1 %v11165_v9 }
 0x6bf   : > { %v7142_v63 = vpop.xlane.xlu1 %7141 }
 0x6c0   : > { %7345 = vst.msk [vmem:[%s10150_s17 + $0x1a8] sm:$0xff] %vm7291_vm4, %v7142_v63  ;;  %v11252_v63 = vld [vmem:[%s12405_s7 + $0x170] sm:$0xff] }
 0x6c1   : > { %v11179_v8 = vpop.f32.mrf.mxu0  ;;  %13274 = vst [vmem:[#allocation56_spill] sm:$0xff] %v11252_v63 }
 0x6c2   : > { %v11181_v20 = vpop.f32.mrf.mxu1 }
 0x6c4   : > { %v11183_v30 = vpop.f32.mrf.mxu2 }
 0x6c5   : > { %v11185_v60 = vpop.f32.mrf.mxu3 }
 0x6c7   : > { %v7144_v15 = vpop.xlane.xlu2 %7143 }
 0x6c8   : > { %7346 = vst.msk [vmem:[%s10150_s17 + $0x1b0] sm:$0xff] %vm7291_vm4, %v7144_v15 }
 0x6c9   : > { %4953 = vmatmul.bf16.gmra.mxu2 %v11165_v9  ;;  %v11196_v35 = vpop.f32.mrf.mxu0 }
 0x6ca   : > { %5042 = vmatmul.bf16.gmra.mxu3 %v11165_v9  ;;  %v11198_v48 = vpop.f32.mrf.mxu1 }
 0x6cc   : > { %v11200_v61 = vpop.f32.mrf.mxu2  ;;  %4780 = vmatmul.bf16.gmra.mxu0 %v11194_v3 }
 0x6cd   : > { %v11202_v13 = vpop.f32.mrf.mxu3  ;;  %4869 = vmatmul.bf16.gmra.mxu1 %v11194_v3 }
 0x6cf   : > { %v7146_v23 = vpop.xlane.xlu0 %7145 }
 0x6d0   : > { %7347 = vst.msk [vmem:[%s10150_s17 + $0x1b8] sm:$0xff] %vm7291_vm4, %v7146_v23 }
 0x6d1   : > { %v11208_v42 = vpop.f32.mrf.mxu0 }
 0x6d2   : > { %v11210_v17 = vpop.f32.mrf.mxu1 }
 0x6d4   : > { %v11212_v34 = vpop.f32.mrf.mxu2 }
 0x6d5   : > { %v11214_v25 = vpop.f32.mrf.mxu3 }
 0x6d7   : > { %v7148_v2 = vpop.xlane.xlu1 %7147 }
 0x6d8   : > { %7348 = vst.msk [vmem:[%s10150_s17 + $0x1c0] sm:$0xff] %vm7291_vm4, %v7148_v2 }
 0x6d9   : > { %4958 = vmatmul.bf16.gmra.mxu2 %v11194_v3  ;;  %v11225_v5 = vpop.f32.mrf.mxu0 }
 0x6da   : > { %5047 = vmatmul.bf16.gmra.mxu3 %v11194_v3  ;;  %13270 = vst [vmem:[#allocation59_spill] sm:$0xff] %v11225_v5  ;;  %v11227_v51 = vpop.f32.mrf.mxu1  ;;  %v13304_v5 = vld [vmem:[#allocation5_spill] sm:$0xff] }
 0x6db   : > { %13271 = vst [vmem:[#allocation14_spill] sm:$0xff] %v11227_v51 }
 0x6dc   : > { %v11229_v38 = vpop.f32.mrf.mxu2  ;;  %4785 = vmatmul.bf16.gmra.mxu0 %v11223_v7 }
 0x6dd   : > { %v11231_v11 = vpop.f32.mrf.mxu3  ;;  %4874 = vmatmul.bf16.gmra.mxu1 %v11223_v7 }
 0x6df   : > { %v7150_v4 = vpop.xlane.xlu2 %7149 }
 0x6e0   : > { %7349 = vst.msk [vmem:[%s10150_s17 + $0x1c8] sm:$0xff] %vm7291_vm4, %v7150_v4 }
 0x6e1   : > { %v11237_v57 = vpop.f32.mrf.mxu0 }
 0x6e2   : > { %13272 = vst [vmem:[#allocation18_spill] sm:$0xff] %v11237_v57  ;;  %v11239_v58 = vpop.f32.mrf.mxu1 }
 0x6e3   : > { %13273 = vst [vmem:[#allocation22_spill] sm:$0xff] %v11239_v58 }
 0x6e4   : > { %v11241_v41 = vpop.f32.mrf.mxu2 }
 0x6e5   : > { %v11243_v39 = vpop.f32.mrf.mxu3 }
 0x6e7   : > { %v7152_v46 = vpop.xlane.xlu0 %7151 }
 0x6e8   : > { %7350 = vst.msk [vmem:[%s10150_s17 + $0x1d0] sm:$0xff] %vm7291_vm4, %v7152_v46 }
 0x6e9   : > { %4963 = vmatmul.bf16.gmra.mxu2 %v11223_v7  ;;  %v11254_v15 = vpop.f32.mrf.mxu0 }
 0x6ea   : > { %5052 = vmatmul.bf16.gmra.mxu3 %v11223_v7  ;;  %13275 = vst [vmem:[#allocation17_spill] sm:$0xff] %v11254_v15  ;;  %v11256_v23 = vpop.f32.mrf.mxu1 }
 0x6eb   : > { %13276 = vst [vmem:[#allocation49_spill] sm:$0xff] %v11256_v23 }
 0x6ec   : > { %v11258_v2 = vpop.f32.mrf.mxu2  ;;  %4790 = vmatmul.bf16.gmra.mxu0 %v11252_v63 }
 0x6ed   : > { %13277 = vst [vmem:[#allocation86_spill] sm:$0xff] %v11258_v2  ;;  %v11260_v4 = vpop.f32.mrf.mxu3  ;;  %4879 = vmatmul.bf16.gmra.mxu1 %v11252_v63 }
 0x6ee   : > { %13278 = vst [vmem:[#allocation87_spill] sm:$0xff] %v11260_v4 }
 0x6ef   : > { %v7154_v46 = vpop.xlane.xlu1 %7153 }
 0x6f0   : > { %7351 = vst.msk [vmem:[%s10150_s17 + $0x1d8] sm:$0xff] %vm7291_vm4, %v7154_v46  ;;  %v11281_v46 = vld [vmem:[%s12405_s7 + $0x178] sm:$0xff] }
 0x6f1   : > { %v11266_v58 = vpop.f32.mrf.mxu0  ;;  %13283 = vst [vmem:[#allocation85_spill] sm:$0xff] %v11281_v46 }
 0x6f2   : > { %13279 = vst [vmem:[#allocation60_spill] sm:$0xff] %v11266_v58  ;;  %v11268_v57 = vpop.f32.mrf.mxu1 }
 0x6f3   : > { %13280 = vst [vmem:[#allocation13_spill] sm:$0xff] %v11268_v57 }
 0x6f4   : > { %v11270_v51 = vpop.f32.mrf.mxu2 }
 0x6f5   : > { %13281 = vst [vmem:[#allocation90_spill] sm:$0xff] %v11270_v51  ;;  %v11272_v15 = vpop.f32.mrf.mxu3 }
 0x6f6   : > { %13282 = vst [vmem:[#allocation91_spill] sm:$0xff] %v11272_v15 }
 0x6f7   : > { %v7156_v23 = vpop.xlane.xlu2 %7155 }
 0x6f8   : > { %7352 = vst.msk [vmem:[%s10150_s17 + $0x1e0] sm:$0xff] %vm7291_vm4, %v7156_v23 }
 0x6f9   : > { %4968 = vmatmul.bf16.gmra.mxu2 %v11252_v63  ;;  %v11283_v58 = vpop.f32.mrf.mxu0 }
 0x6fa   : > { %5057 = vmatmul.bf16.gmra.mxu3 %v11252_v63  ;;  %13284 = vst [vmem:[#allocation55_spill] sm:$0xff] %v11283_v58  ;;  %v11285_v57 = vpop.f32.mrf.mxu1 }
 0x6fb   : > { %13285 = vst [vmem:[#allocation21_spill] sm:$0xff] %v11285_v57 }
 0x6fc   : > { %v11287_v51 = vpop.f32.mrf.mxu2  ;;  %4795 = vmatmul.bf16.gmra.mxu0 %v11281_v46 }
 0x6fd   : > { %13286 = vst [vmem:[#allocation95_spill] sm:$0xff] %v11287_v51  ;;  %v11289_v15 = vpop.f32.mrf.mxu3  ;;  %4884 = vmatmul.bf16.gmra.mxu1 %v11281_v46 }
 0x6fe   : > { %13287 = vst [vmem:[#allocation96_spill] sm:$0xff] %v11289_v15 }
 0x6ff   : > { %v7158_v23 = vpop.xlane.xlu0 %7157 }
 0x700   : > { %7353 = vst.msk [vmem:[%s10150_s17 + $0x1e8] sm:$0xff] %vm7291_vm4, %v7158_v23 }
 0x701   : > { %v11295_v63 = vpop.f32.mrf.mxu0 }
 0x702   : > { %13288 = vst [vmem:[#allocation19_spill] sm:$0xff] %v11295_v63  ;;  %v11297_v4 = vpop.f32.mrf.mxu1 }
 0x703   : > { %13289 = vst [vmem:[#allocation50_spill] sm:$0xff] %v11297_v4  ;;  %v13296_v4 = vld [vmem:[#allocation8_spill] sm:$0xff] }
 0x704   : > { %v11299_v2 = vpop.f32.mrf.mxu2 }
 0x705   : > { %13290 = vst [vmem:[#allocation89_spill] sm:$0xff] %v11299_v2  ;;  %v11301_v58 = vpop.f32.mrf.mxu3  ;;  %v13298_v2 = vld [vmem:[#allocation4_spill] sm:$0xff] }
 0x706   : > { %13291 = vst [vmem:[#allocation99_spill] sm:$0xff] %v11301_v58  ;;  %v13297_v58 = vld [vmem:[#allocation74_spill] sm:$0xff] }
 0x707   : > { %v7160_v57 = vpop.xlane.xlu1 %7159 }
 0x708   : > { %7354 = vst.msk [vmem:[%s10150_s17 + $0x1f0] sm:$0xff] %vm7291_vm4, %v7160_v57 }
 0x709   : > { %4973 = vmatmul.bf16.gmra.mxu2 %v11281_v46  ;;  %v11307_v15 = vpop.f32.mrf.mxu0 }
 0x70a   : > { %5062 = vmatmul.bf16.gmra.mxu3 %v11281_v46  ;;  %13292 = vst [vmem:[#allocation39_spill] sm:$0xff] %v11307_v15  ;;  %v11309_v51 = vpop.f32.mrf.mxu1  ;;  %v13299_v15 = vld [vmem:[#allocation6_spill] sm:$0xff] }
 0x70b   : > { %13293 = vst [vmem:[#allocation40_spill] sm:$0xff] %v11309_v51 }
 0x70c   : > { %v11311_v23 = vpop.f32.mrf.mxu2  ;;  %5076 = vmatmul.bf16.vlgmr.msrb.gmra.mxu0 %v10868_v36 }
 0x70d   : > { %13294 = vst [vmem:[#allocation41_spill] sm:$0xff] %v11311_v23  ;;  %v11313_v63 = vpop.f32.mrf.mxu3  ;;  %5165 = vmatmul.bf16.vlgmr.msrb.gmra.mxu1 %v10868_v36  ;;  %6228 = vmatpush.bf16.msrb.mxu0 %v13296_v4  ;;  %v13305_v4 = vld [vmem:[#allocation83_spill] sm:$0xff] }
 0x70e   : > { %13295 = vst [vmem:[#allocation42_spill] sm:$0xff] %v11313_v63  ;;  %6317 = vmatpush.bf16.msrb.mxu1 %v13297_v58  ;;  %v13306_v58 = vld [vmem:[#allocation81_spill] sm:$0xff] }
 0x70f   : > { %v7162_v57 = vpop.xlane.xlu2 %7161 }
 0x710   : > { %7355 = vst.msk [vmem:[%s10150_s17 + $0x1f8] sm:$0xff] %vm7291_vm4, %v7162_v57 }
 0x711   : > { %6229 = vmatpush.bf16.msrb.mxu0 %v13298_v2  ;;  %v11323_v51 = vpop.f32.mrf.mxu0  ;;  %v13307_v2 = vld [vmem:[#allocation82_spill] sm:$0xff] }
 0x712   : > { %6318 = vmatpush.bf16.msrb.mxu1 %v13299_v15  ;;  %13300 = vst [vmem:[#allocation20_spill] sm:$0xff] %v11323_v51  ;;  %v11325_v23 = vpop.f32.mrf.mxu1  ;;  %v13311_v51 = vld [vmem:[#allocation12_spill] sm:$0xff] }
 0x713   : > { %13301 = vst [vmem:[#allocation84_spill] sm:$0xff] %v11325_v23  ;;  %v13310_v23 = vld [vmem:[#allocation11_spill] sm:$0xff] }
 0x714   : > { %v11327_v63 = vpop.f32.mrf.mxu2 }
 0x715   : > { %13302 = vst [vmem:[#allocation93_spill] sm:$0xff] %v11327_v63  ;;  %v11329_v46 = vpop.f32.mrf.mxu3  ;;  %6230 = vmatpush.bf16.msrb.mxu0 %v13304_v5 }
 0x716   : > { %13303 = vst [vmem:[#allocation104_spill] sm:$0xff] %v11329_v46  ;;  %6319 = vmatpush.bf16.msrb.mxu1 %v13305_v4  ;;  %v13315_v4 = vld [vmem:[#allocation3_spill] sm:$0xff] }
 0x719   : > { %5254 = vmatmul.bf16.vlgmr.msrb.gmra.mxu2 %v10868_v36  ;;  %6231 = vmatpush.bf16.msrb.mxu0 %v13306_v58  ;;  %v11337_v15 = vpop.f32.mrf.mxu0  ;;  %v13316_v58 = vld [vmem:[#allocation79_spill] sm:$0xff] }
 0x71a   : > { %5343 = vmatmul.bf16.vlgmr.msrb.gmra.mxu3 %v10868_v36  ;;  %6320 = vmatpush.bf16.msrb.mxu1 %v13307_v2  ;;  %13308 = vst [vmem:[#allocation45_spill] sm:$0xff] %v11337_v15  ;;  %v11339_v57 = vpop.f32.mrf.mxu1  ;;  %v13314_v36 = vld [vmem:[#allocation10_spill] sm:$0xff]  ;;  %v13317_v2 = vld [vmem:[#allocation80_spill] sm:$0xff] }
 0x71b   : > { %13309 = vst [vmem:[#allocation46_spill] sm:$0xff] %v11339_v57  ;;  %6406 = vmatpush.bf16.msrb.mxu2 %v13310_v23  ;;  %6495 = vmatpush.bf16.msrb.mxu3 %v13311_v51  ;;  %v13318_v57 = vld [vmem:[#allocation7_spill] sm:$0xff]  ;;  %v13319_v23 = vld [vmem:[#allocation77_spill] sm:$0xff] }
 0x71c   : > { %v11343_v46 = vpop.f32.mrf.mxu2  ;;  %5081 = vmatmul.bf16.gmra.mxu0 %v10897_v18 }
 0x71d   : > { %13312 = vst [vmem:[#allocation43_spill] sm:$0xff] %v11343_v46  ;;  %v11345_v5 = vpop.f32.mrf.mxu3  ;;  %5170 = vmatmul.bf16.gmra.mxu1 %v10897_v18  ;;  %6232 = vmatpush.bf16.msrb.mxu0 %v13314_v36  ;;  %v13323_v46 = vld [vmem:[#allocation72_spill] sm:$0xff] }
 0x71e   : > { %13313 = vst [vmem:[#allocation44_spill] sm:$0xff] %v11345_v5  ;;  %6321 = vmatpush.bf16.msrb.mxu1 %v13315_v4  ;;  %v13322_v5 = vld [vmem:[#allocation78_spill] sm:$0xff]  ;;  %v13325_v4 = vld [vmem:[#allocation15_spill] sm:$0xff] }
 0x71f   : > { %6407 = vmatpush.bf16.msrb.mxu2 %v13316_v58  ;;  %6496 = vmatpush.bf16.msrb.mxu3 %v13317_v2  ;;  %v13326_v58 = vld [vmem:[#allocation75_spill] sm:$0xff]  ;;  %v13327_v2 = vld [vmem:[#allocation76_spill] sm:$0xff] }
 0x721   : > { %6233 = vmatpush.bf16.msrb.mxu0 %v13318_v57  ;;  %v11355_v51 = vpop.f32.mrf.mxu0  ;;  %v13328_v57 = vld [vmem:[#allocation73_spill] sm:$0xff] }
 0x722   : > { %6322 = vmatpush.bf16.msrb.mxu1 %v13319_v23  ;;  %13320 = vst [vmem:[#allocation47_spill] sm:$0xff] %v11355_v51  ;;  %v11357_v15 = vpop.f32.mrf.mxu1  ;;  %v13329_v23 = vld [vmem:[#allocation9_spill] sm:$0xff]  ;;  %v13333_v51 = vld [vmem:[#allocation70_spill] sm:$0xff] }
 0x723   : > { %13321 = vst [vmem:[#allocation48_spill] sm:$0xff] %v11357_v15  ;;  %6408 = vmatpush.bf16.msrb.mxu2 %v13322_v5  ;;  %6497 = vmatpush.bf16.msrb.mxu3 %v13323_v46  ;;  %v13330_v5 = vld [vmem:[#allocation69_spill] sm:$0xff] }
 0x724   : > { %v11361_v63 = vpop.f32.mrf.mxu2 }
 0x725   : > { %v11363_v36 = vpop.f32.mrf.mxu3  ;;  %6234 = vmatpush.bf16.msrb.mxu0 %v13325_v4  ;;  %v13334_v4 = vld [vmem:[#allocation67_spill] sm:$0xff] }
 0x726   : > { %13324 = vst [vmem:[#allocation94_spill] sm:$0xff] %v11363_v36  ;;  %6323 = vmatpush.bf16.msrb.mxu1 %v13326_v58 }
 0x727   : > { %6409 = vmatpush.bf16.msrb.mxu2 %v13327_v2  ;;  %6498 = vmatpush.bf16.msrb.mxu3 %v13328_v57  ;;  %v13338_v57 = vld [vmem:[#allocation64_spill] sm:$0xff] }
 0x729   : > { %5259 = vmatmul.bf16.gmra.mxu2 %v10897_v18  ;;  %6235 = vmatpush.bf16.msrb.mxu0 %v13329_v23  ;;  %v11373_v46 = vpop.f32.mrf.mxu0 }
 0x72a   : > { %5348 = vmatmul.bf16.gmra.mxu3 %v10897_v18  ;;  %6324 = vmatpush.bf16.msrb.mxu1 %v13330_v5  ;;  %13331 = vst [vmem:[#allocation88_spill] sm:$0xff] %v11373_v46  ;;  %v11375_v15 = vpop.f32.mrf.mxu1  ;;  %v13337_v18 = vld [vmem:[#allocation68_spill] sm:$0xff] }
 0x72b   : > { %13332 = vst [vmem:[#allocation97_spill] sm:$0xff] %v11375_v15  ;;  %6410 = vmatpush.bf16.msrb.mxu2 %v13333_v51  ;;  %6499 = vmatpush.bf16.msrb.mxu3 %v13334_v4  ;;  %v13341_v15 = vld [vmem:[#allocation65_spill] sm:$0xff]  ;;  %v13342_v51 = vld [vmem:[#allocation62_spill] sm:$0xff] }
 0x72c   : > { %v11379_v58 = vpop.f32.mrf.mxu2  ;;  %5086 = vmatmul.bf16.gmra.mxu0 %v10940_v22 }
 0x72d   : > { %13335 = vst [vmem:[#allocation98_spill] sm:$0xff] %v11379_v58  ;;  %v11381_v2 = vpop.f32.mrf.mxu3  ;;  %5175 = vmatmul.bf16.gmra.mxu1 %v10940_v22  ;;  %v13346_v58 = vld [vmem:[#allocation63_spill] sm:$0xff] }
 0x72e   : > { %13336 = vst [vmem:[#allocation35_spill] sm:$0xff] %v11381_v2  ;;  %v13345_v2 = vld [vmem:[#allocation16_spill] sm:$0xff] }
 0x72f   : > { %6411 = vmatpush.bf16.msrb.mxu2 %v13337_v18  ;;  %6500 = vmatpush.bf16.msrb.mxu3 %v13338_v57 }
 0x731   : > { %v11387_v23 = vpop.f32.mrf.mxu0 }
 0x732   : > { %13339 = vst [vmem:[#allocation36_spill] sm:$0xff] %v11387_v23  ;;  %v11389_v5 = vpop.f32.mrf.mxu1 }
 0x733   : > { %13340 = vst [vmem:[#allocation51_spill] sm:$0xff] %v11389_v5  ;;  %6412 = vmatpush.bf16.msrb.mxu2 %v13341_v15  ;;  %6501 = vmatpush.bf16.msrb.mxu3 %v13342_v51 }
 0x734   : > { %v11393_v4 = vpop.f32.mrf.mxu2 }
 0x735   : > { %13343 = vst [vmem:[#allocation52_spill] sm:$0xff] %v11393_v4  ;;  %v11395_v46 = vpop.f32.mrf.mxu3 }
 0x736   : > { %13344 = vst [vmem:[#allocation31_spill] sm:$0xff] %v11395_v46 }
 0x737   : > { %6413 = vmatpush.bf16.msrb.mxu2 %v13345_v2  ;;  %6502 = vmatpush.bf16.msrb.mxu3 %v13346_v58 }
 0x739   : > { %5264 = vmatmul.bf16.gmra.mxu2 %v10940_v22  ;;  %v11401_v18 = vpop.f32.mrf.mxu0 }
 0x73a   : > { %5353 = vmatmul.bf16.gmra.mxu3 %v10940_v22  ;;  %13347 = vst [vmem:[#allocation32_spill] sm:$0xff] %v11401_v18  ;;  %v11403_v57 = vpop.f32.mrf.mxu1 }
 0x73b   : > { %13348 = vst [vmem:[#allocation53_spill] sm:$0xff] %v11403_v57 }
 0x73c   : > { %v11405_v5 = vpop.f32.mrf.mxu2  ;;  %5091 = vmatmul.bf16.gmra.mxu0 %v10973_v27 }
 0x73d   : > { %13349 = vst [vmem:[#allocation54_spill] sm:$0xff] %v11405_v5  ;;  %v11407_v15 = vpop.f32.mrf.mxu3  ;;  %5180 = vmatmul.bf16.gmra.mxu1 %v10973_v27 }
 0x73e   : > { %13350 = vst [vmem:[#allocation100_spill] sm:$0xff] %v11407_v15 }
 0x741   : > { %v11411_v51 = vpop.f32.mrf.mxu0 }
 0x742   : > { %13351 = vst [vmem:[#allocation92_spill] sm:$0xff] %v11411_v51  ;;  %v11413_v2 = vpop.f32.mrf.mxu1 }
 0x743   : > { %13352 = vst [vmem:[#allocation101_spill] sm:$0xff] %v11413_v2 }
 0x744   : > { %v11415_v58 = vpop.f32.mrf.mxu2 }
 0x745   : > { %13353 = vst [vmem:[#allocation27_spill] sm:$0xff] %v11415_v58  ;;  %v11417_v23 = vpop.f32.mrf.mxu3 }
 0x746   : > { %13354 = vst [vmem:[#allocation28_spill] sm:$0xff] %v11417_v23 }
 0x749   : > { %5269 = vmatmul.bf16.gmra.mxu2 %v10973_v27  ;;  %v11421_v22 = vpop.f32.mrf.mxu0 }
 0x74a   : > { %5358 = vmatmul.bf16.gmra.mxu3 %v10973_v27  ;;  %13355 = vst [vmem:[#allocation57_spill] sm:$0xff] %v11421_v22  ;;  %v11423_v57 = vpop.f32.mrf.mxu1 }
 0x74b   : > { %13356 = vst [vmem:[#allocation58_spill] sm:$0xff] %v11423_v57 }
 0x74c   : > { %v11425_v18 = vpop.f32.mrf.mxu2  ;;  %5096 = vmatmul.bf16.gmra.mxu0 %v10994_v19 }
 0x74d   : > { %13357 = vst [vmem:[#allocation23_spill] sm:$0xff] %v11425_v18  ;;  %v11427_v15 = vpop.f32.mrf.mxu3  ;;  %5185 = vmatmul.bf16.gmra.mxu1 %v10994_v19 }
 0x74e   : > { %13358 = vst [vmem:[#allocation24_spill] sm:$0xff] %v11427_v15 }
 0x751   : > { %v11431_v2 = vpop.f32.mrf.mxu0 }
 0x752   : > { %13359 = vst [vmem:[#allocation37_spill] sm:$0xff] %v11431_v2  ;;  %v11433_v51 = vpop.f32.mrf.mxu1 }
 0x753   : > { %13360 = vst [vmem:[#allocation38_spill] sm:$0xff] %v11433_v51 }
 0x754   : > { %v11435_v23 = vpop.f32.mrf.mxu2 }
 0x755   : > { %13361 = vst [vmem:[#allocation105_spill] sm:$0xff] %v11435_v23  ;;  %v11437_v58 = vpop.f32.mrf.mxu3 }
 0x756   : > { %13362 = vst [vmem:[#allocation103_spill] sm:$0xff] %v11437_v58 }
 0x759   : > { %5274 = vmatmul.bf16.gmra.mxu2 %v10994_v19  ;;  %v11441_v27 = vpop.f32.mrf.mxu0 }
 0x75a   : > { %5363 = vmatmul.bf16.gmra.mxu3 %v10994_v19  ;;  %13363 = vst [vmem:[#allocation113_spill] sm:$0xff] %v11441_v27  ;;  %v11443_v57 = vpop.f32.mrf.mxu1 }
 0x75b   : > { %13364 = vst [vmem:[#allocation106_spill] sm:$0xff] %v11443_v57 }
 0x75c   : > { %v11445_v22 = vpop.f32.mrf.mxu2  ;;  %5101 = vmatmul.bf16.gmra.mxu0 %v11015_v1 }
 0x75d   : > { %13365 = vst [vmem:[#allocation33_spill] sm:$0xff] %v11445_v22  ;;  %v11447_v15 = vpop.f32.mrf.mxu3  ;;  %5190 = vmatmul.bf16.gmra.mxu1 %v11015_v1 }
 0x75e   : > { %13366 = vst [vmem:[#allocation34_spill] sm:$0xff] %v11447_v15 }
 0x761   : > { %v11451_v51 = vpop.f32.mrf.mxu0 }
 0x762   : > { %13367 = vst [vmem:[#allocation29_spill] sm:$0xff] %v11451_v51  ;;  %v11453_v2 = vpop.f32.mrf.mxu1 }
 0x763   : > { %13368 = vst [vmem:[#allocation30_spill] sm:$0xff] %v11453_v2 }
 0x764   : > { %v11455_v58 = vpop.f32.mrf.mxu2 }
 0x765   : > { %13369 = vst [vmem:[#allocation108_spill] sm:$0xff] %v11455_v58  ;;  %v11457_v23 = vpop.f32.mrf.mxu3 }
 0x766   : > { %13370 = vst [vmem:[#allocation109_spill] sm:$0xff] %v11457_v23 }
 0x769   : > { %5279 = vmatmul.bf16.gmra.mxu2 %v11015_v1  ;;  %v11461_v19 = vpop.f32.mrf.mxu0 }
 0x76a   : > { %5368 = vmatmul.bf16.gmra.mxu3 %v11015_v1  ;;  %13371 = vst [vmem:[#allocation111_spill] sm:$0xff] %v11461_v19  ;;  %v11463_v57 = vpop.f32.mrf.mxu1 }
 0x76b   : > { %13372 = vst [vmem:[#allocation114_spill] sm:$0xff] %v11463_v57 }
 0x76c   : > { %v11465_v27 = vpop.f32.mrf.mxu2  ;;  %5106 = vmatmul.bf16.gmra.mxu0 %v11036_v16 }
 0x76d   : > { %13373 = vst [vmem:[#allocation25_spill] sm:$0xff] %v11465_v27  ;;  %v11467_v15 = vpop.f32.mrf.mxu3  ;;  %5195 = vmatmul.bf16.gmra.mxu1 %v11036_v16 }
 0x76e   : > { %13374 = vst [vmem:[#allocation26_spill] sm:$0xff] %v11467_v15 }
 0x771   : > { %v11471_v2 = vpop.f32.mrf.mxu0 }
 0x772   : > { %13375 = vst [vmem:[#allocation102_spill] sm:$0xff] %v11471_v2  ;;  %v11473_v51 = vpop.f32.mrf.mxu1 }
 0x773   : > { %13376 = vst [vmem:[#allocation112_spill] sm:$0xff] %v11473_v51 }
 0x774   : > { %v11475_v23 = vpop.f32.mrf.mxu2 }
 0x775   : > { %13377 = vst [vmem:[#allocation117_spill] sm:$0xff] %v11475_v23  ;;  %v11477_v58 = vpop.f32.mrf.mxu3 }
 0x776   : > { %13378 = vst [vmem:[#allocation119_spill] sm:$0xff] %v11477_v58 }
 0x779   : > { %5284 = vmatmul.bf16.gmra.mxu2 %v11036_v16  ;;  %v11481_v1 = vpop.f32.mrf.mxu0 }
 0x77a   : > { %5373 = vmatmul.bf16.gmra.mxu3 %v11036_v16  ;;  %13379 = vst [vmem:[#allocation107_spill] sm:$0xff] %v11481_v1  ;;  %v11483_v57 = vpop.f32.mrf.mxu1 }
 0x77b   : > { %13380 = vst [vmem:[#allocation110_spill] sm:$0xff] %v11483_v57 }
 0x77c   : > { %v11485_v19 = vpop.f32.mrf.mxu2  ;;  %5111 = vmatmul.bf16.gmra.mxu0 %v11057_v24 }
 0x77d   : > { %13381 = vst [vmem:[#allocation122_spill] sm:$0xff] %v11485_v19  ;;  %v11487_v15 = vpop.f32.mrf.mxu3  ;;  %5200 = vmatmul.bf16.gmra.mxu1 %v11057_v24 }
 0x77e   : > { %13382 = vst [vmem:[#allocation123_spill] sm:$0xff] %v11487_v15 }
 0x781   : > { %v11491_v51 = vpop.f32.mrf.mxu0 }
 0x782   : > { %13383 = vst [vmem:[#allocation115_spill] sm:$0xff] %v11491_v51  ;;  %v11493_v2 = vpop.f32.mrf.mxu1 }
 0x783   : > { %13384 = vst [vmem:[#allocation116_spill] sm:$0xff] %v11493_v2 }
 0x784   : > { %v11495_v58 = vpop.f32.mrf.mxu2 }
 0x785   : > { %13385 = vst [vmem:[#allocation126_spill] sm:$0xff] %v11495_v58  ;;  %v11497_v23 = vpop.f32.mrf.mxu3 }
 0x786   : > { %13386 = vst [vmem:[#allocation127_spill] sm:$0xff] %v11497_v23 }
 0x789   : > { %5289 = vmatmul.bf16.gmra.mxu2 %v11057_v24  ;;  %v5077_v16 = vpop.f32.mrf.mxu0 }
 0x78a   : > { %5378 = vmatmul.bf16.gmra.mxu3 %v11057_v24  ;;  %v5166_v57 = vpop.f32.mrf.mxu1 }
 0x78b   : > { %v5425_v22 = vmax.f32 %v11082_v10, %v5166_v57 }
 0x78c   : > { %v11501_v1 = vpop.f32.mrf.mxu2  ;;  %5116 = vmatmul.bf16.gmra.mxu0 %v11078_v52 }
 0x78d   : > { %13387 = vst [vmem:[#allocation61_spill] sm:$0xff] %v11501_v1  ;;  %v11503_v15 = vpop.f32.mrf.mxu3  ;;  %5205 = vmatmul.bf16.gmra.mxu1 %v11078_v52  ;;  %v5424_v1 = vmax.f32 %v11080_v14, %v5077_v16 }
 0x78e   : > { %13388 = vst [vmem:[#allocation66_spill] sm:$0xff] %v11503_v15 }
 0x791   : > { %v5079_v51 = vpop.f32.mrf.mxu0 }
 0x792   : > { %v5168_v2 = vpop.f32.mrf.mxu1  ;;  %v5428_v16 = vmax.f32 %v11092_v31, %v5079_v51 }
 0x793   : > { %v5429_v10 = vmax.f32 %v11094_v54, %v5168_v2 }
 0x794   : > { %v11507_v19 = vpop.f32.mrf.mxu2 }
 0x795   : > { %13389 = vst [vmem:[#allocation130_spill] sm:$0xff] %v11507_v19  ;;  %v11509_v58 = vpop.f32.mrf.mxu3 }
 0x796   : > { %13390 = vst [vmem:[#allocation131_spill] sm:$0xff] %v11509_v58 }
 0x799   : > { %5294 = vmatmul.bf16.gmra.mxu2 %v11078_v52  ;;  %v5082_v24 = vpop.f32.mrf.mxu0 }
 0x79a   : > { %5383 = vmatmul.bf16.gmra.mxu3 %v11078_v52  ;;  %v5171_v23 = vpop.f32.mrf.mxu1 }
 0x79b   : > { %v5433_v54 = vmax.f32 %v11111_v26, %v5171_v23 }
 0x79c   : > { %v5255_v27 = vpop.f32.mrf.mxu2  ;;  %5121 = vmatmul.bf16.gmra.mxu0 %v11107_v28 }
 0x79d   : > { %v5344_v15 = vpop.f32.mrf.mxu3  ;;  %v5426_v18 = vmax.f32 %v11113_v44, %v5255_v27  ;;  %5210 = vmatmul.bf16.gmra.mxu1 %v11107_v28 }
 0x79e   : > { %v5427_v5 = vmax.f32 %v11115_v49, %v5344_v15 }
 0x79f   : > { %v5552_v58 = vmax.f32 %v5424_v1, %v5426_v18 }
 0x7a0   : > { %v5553_v19 = vmax.f32 %v5425_v22, %v5427_v5 }
 0x7a1   : > { %v5084_v52 = vpop.f32.mrf.mxu0 }
 0x7a2   : > { %v5616_v46 = vmax.f32 %v5552_v58, %v5553_v19  ;;  %v5173_v4 = vpop.f32.mrf.mxu1  ;;  %v5436_v1 = vmax.f32 %v11121_v62, %v5084_v52 }
 0x7a3   : > { %v5437_v26 = vmax.f32 %v11123_v37, %v5173_v4 }
 0x7a4   : > { %7163 = vmax.xlane.f32.xlu0 %v5616_v46  ;;  %v5257_v36 = vpop.f32.mrf.mxu2  ;;  %v5432_v46 = vmax.f32 %v11109_v0, %v5082_v24 }
 0x7a5   : > { %v5346_v14 = vpop.f32.mrf.mxu3  ;;  %v5430_v44 = vmax.f32 %v11125_v40, %v5257_v36 }
 0x7a6   : > { %v5431_v49 = vmax.f32 %v11127_v6, %v5346_v14 }
 0x7a7   : > { %v5554_v57 = vmax.f32 %v5428_v16, %v5430_v44 }
 0x7a8   : > { %v5555_v15 = vmax.f32 %v5429_v10, %v5431_v49 }
 0x7a9   : > { %5299 = vmatmul.bf16.gmra.mxu2 %v11107_v28  ;;  %v5087_v18 = vpop.f32.mrf.mxu0 }
 0x7aa   : > { %5388 = vmatmul.bf16.gmra.mxu3 %v11107_v28  ;;  %v5617_v5 = vmax.f32 %v5554_v57, %v5555_v15  ;;  %v5176_v58 = vpop.f32.mrf.mxu1  ;;  %v5440_v44 = vmax.f32 %v11138_v50, %v5087_v18 }
 0x7ab   : > { %v5441_v37 = vmax.f32 %v11140_v29, %v5176_v58 }
 0x7ac   : > { %7165 = vmax.xlane.f32.xlu1 %v5617_v5  ;;  %v5260_v22 = vpop.f32.mrf.mxu2  ;;  %5126 = vmatmul.bf16.gmra.mxu0 %v11136_v45 }
 0x7ad   : > { %v5349_v31 = vpop.f32.mrf.mxu3  ;;  %v5434_v40 = vmax.f32 %v11142_v43, %v5260_v22  ;;  %5215 = vmatmul.bf16.gmra.mxu1 %v11136_v45 }
 0x7ae   : > { %v5435_v6 = vmax.f32 %v11144_v56, %v5349_v31 }
 0x7af   : > { %v5556_v36 = vmax.f32 %v5432_v46, %v5434_v40 }
 0x7b0   : > { %v5557_v28 = vmax.f32 %v5433_v54, %v5435_v6 }
 0x7b1   : > { %v5089_v2 = vpop.f32.mrf.mxu0 }
 0x7b2   : > { %v5618_v51 = vmax.f32 %v5556_v36, %v5557_v28  ;;  %v5178_v27 = vpop.f32.mrf.mxu1  ;;  %v5444_v18 = vmax.f32 %v11150_v32, %v5089_v2 }
 0x7b3   : > { %v5445_v29 = vmax.f32 %v11152_v47, %v5178_v27 }
 0x7b4   : > { %7167 = vmax.xlane.f32.xlu2 %v5618_v51  ;;  %v5262_v19 = vpop.f32.mrf.mxu2 }
 0x7b5   : > { %v5351_v0 = vpop.f32.mrf.mxu3  ;;  %v5438_v43 = vmax.f32 %v11154_v59, %v5262_v19 }
 0x7b6   : > { %v5439_v56 = vmax.f32 %v11156_v55, %v5351_v0 }
 0x7b7   : > { %v5558_v23 = vmax.f32 %v5436_v1, %v5438_v43 }
 0x7b8   : > { %v5559_v24 = vmax.f32 %v5437_v26, %v5439_v56 }
 0x7b9   : > { %5304 = vmatmul.bf16.gmra.mxu2 %v11136_v45  ;;  %v5092_v16 = vpop.f32.mrf.mxu0 }
 0x7ba   : > { %5393 = vmatmul.bf16.gmra.mxu3 %v11136_v45  ;;  %v5619_v14 = vmax.f32 %v5558_v23, %v5559_v24  ;;  %v5181_v10 = vpop.f32.mrf.mxu1  ;;  %v5448_v40 = vmax.f32 %v11167_v53, %v5092_v16 }
 0x7bb   : > { %v5449_v47 = vmax.f32 %v11169_v12, %v5181_v10 }
 0x7bc   : > { %7169 = vmax.xlane.f32.xlu0 %v5619_v14  ;;  %v5265_v49 = vpop.f32.mrf.mxu2  ;;  %5131 = vmatmul.bf16.gmra.mxu0 %v11165_v9 }
 0x7bd   : > { %v5354_v62 = vpop.f32.mrf.mxu3  ;;  %v5442_v59 = vmax.f32 %v11171_v33, %v5265_v49  ;;  %5220 = vmatmul.bf16.gmra.mxu1 %v11165_v9 }
 0x7be   : > { %v5443_v55 = vmax.f32 %v11173_v21, %v5354_v62 }
 0x7bf   : > { %v5560_v4 = vmax.f32 %v5440_v44, %v5442_v59 }
 0x7c0   : > { %v5561_v45 = vmax.f32 %v5441_v37, %v5443_v55 }
 0x7c1   : > { %v5094_v57 = vpop.f32.mrf.mxu0 }
 0x7c2   : > { %v5620_v52 = vmax.f32 %v5560_v4, %v5561_v45  ;;  %v5183_v15 = vpop.f32.mrf.mxu1  ;;  %v5452_v19 = vmax.f32 %v11179_v8, %v5094_v57 }
 0x7c3   : > { %v5453_v12 = vmax.f32 %v11181_v20, %v5183_v15 }
 0x7c4   : > { %7171 = vmax.xlane.f32.xlu1 %v5620_v52  ;;  %v5267_v5 = vpop.f32.mrf.mxu2  ;;  %v13391_v52 = vld [vmem:[#allocation59_spill] sm:$0xff] }
 0x7c5   : > { %v5356_v50 = vpop.f32.mrf.mxu3  ;;  %v5446_v33 = vmax.f32 %v11183_v30, %v5267_v5  ;;  %v13392_v5 = vld [vmem:[#allocation14_spill] sm:$0xff] }
 0x7c6   : > { %v5447_v21 = vmax.f32 %v11185_v60, %v5356_v50  ;;  %v13393_v50 = vld [vmem:[#allocation86_spill] sm:$0xff] }
 0x7c7   : > { %v5562_v58 = vmax.f32 %v5444_v18, %v5446_v33  ;;  %v13394_v18 = vld [vmem:[#allocation87_spill] sm:$0xff] }
 0x7c8   : > { %v5563_v46 = vmax.f32 %v5445_v29, %v5447_v21  ;;  %v13395_v29 = vld [vmem:[#allocation56_spill] sm:$0xff] }
 0x7c9   : > { %5309 = vmatmul.bf16.gmra.mxu2 %v11165_v9  ;;  %v5097_v31 = vpop.f32.mrf.mxu0 }
 0x7ca   : > { %5398 = vmatmul.bf16.gmra.mxu3 %v11165_v9  ;;  %v5621_v22 = vmax.f32 %v5562_v58, %v5563_v46  ;;  %v5186_v54 = vpop.f32.mrf.mxu1  ;;  %v5456_v23 = vmax.f32 %v11196_v35, %v5097_v31 }
 0x7cb   : > { %v5457_v20 = vmax.f32 %v11198_v48, %v5186_v54  ;;  %v13396_v54 = vld [vmem:[#allocation18_spill] sm:$0xff] }
 0x7cc   : > { %7173 = vmax.xlane.f32.xlu2 %v5621_v22  ;;  %v5270_v6 = vpop.f32.mrf.mxu2  ;;  %5136 = vmatmul.bf16.gmra.mxu0 %v11194_v3 }
 0x7cd   : > { %v5359_v32 = vpop.f32.mrf.mxu3  ;;  %v5450_v30 = vmax.f32 %v11200_v61, %v5270_v6  ;;  %5225 = vmatmul.bf16.gmra.mxu1 %v11194_v3  ;;  %v13397_v6 = vld [vmem:[#allocation22_spill] sm:$0xff] }
 0x7ce   : > { %v5451_v60 = vmax.f32 %v11202_v13, %v5359_v32 }
 0x7cf   : > { %v5564_v36 = vmax.f32 %v5448_v40, %v5450_v30 }
 0x7d0   : > { %v5565_v9 = vmax.f32 %v5449_v47, %v5451_v60  ;;  %v13398_v47 = vld [vmem:[#allocation90_spill] sm:$0xff]  ;;  %v13399_v60 = vld [vmem:[#allocation91_spill] sm:$0xff] }
 0x7d1   : > { %v5099_v51 = vpop.f32.mrf.mxu0 }
 0x7d2   : > { %v5622_v28 = vmax.f32 %v5564_v36, %v5565_v9  ;;  %v5188_v2 = vpop.f32.mrf.mxu1  ;;  %v5460_v62 = vmax.f32 %v11208_v42, %v5099_v51 }
 0x7d3   : > { %v5461_v48 = vmax.f32 %v11210_v17, %v5188_v2 }
 0x7d4   : > { %7175 = vmax.xlane.f32.xlu0 %v5622_v28  ;;  %v5272_v27 = vpop.f32.mrf.mxu2 }
 0x7d5   : > { %v5361_v53 = vpop.f32.mrf.mxu3  ;;  %v5454_v61 = vmax.f32 %v11212_v34, %v5272_v27 }
 0x7d6   : > { %v5455_v13 = vmax.f32 %v11214_v25, %v5361_v53  ;;  %v13400_v53 = vld [vmem:[#allocation17_spill] sm:$0xff] }
 0x7d7   : > { %v5566_v0 = vmax.f32 %v5452_v19, %v5454_v61 }
 0x7d8   : > { %v5567_v1 = vmax.f32 %v5453_v12, %v5455_v13  ;;  %v13401_v13 = vld [vmem:[#allocation49_spill] sm:$0xff] }
 0x7d9   : > { %5314 = vmatmul.bf16.gmra.mxu2 %v11194_v3  ;;  %v5102_v43 = vpop.f32.mrf.mxu0 }
 0x7da   : > { %5403 = vmatmul.bf16.gmra.mxu3 %v11194_v3  ;;  %v5623_v26 = vmax.f32 %v5566_v0, %v5567_v1  ;;  %v5191_v56 = vpop.f32.mrf.mxu1  ;;  %v5464_v57 = vmax.f32 %v13391_v52, %v5102_v43  ;;  %v13402_v1 = vld [vmem:[#allocation95_spill] sm:$0xff]  ;;  %v13403_v43 = vld [vmem:[#allocation96_spill] sm:$0xff] }
 0x7db   : > { %v5465_v17 = vmax.f32 %v13392_v5, %v5191_v56  ;;  %v13409_v52 = vld [vmem:[#allocation55_spill] sm:$0xff]  ;;  %v13410_v5 = vld [vmem:[#allocation21_spill] sm:$0xff] }
 0x7dc   : > { %7177 = vmax.xlane.f32.xlu1 %v5623_v26  ;;  %v5275_v24 = vpop.f32.mrf.mxu2  ;;  %5141 = vmatmul.bf16.gmra.mxu0 %v11223_v7 }
 0x7dd   : > { %v5364_v8 = vpop.f32.mrf.mxu3  ;;  %v5458_v34 = vmax.f32 %v11229_v38, %v5275_v24  ;;  %5230 = vmatmul.bf16.gmra.mxu1 %v11223_v7 }
 0x7de   : > { %v5459_v25 = vmax.f32 %v11231_v11, %v5364_v8 }
 0x7df   : > { %v5568_v14 = vmax.f32 %v5456_v23, %v5458_v34  ;;  %v13404_v23 = vld [vmem:[#allocation85_spill] sm:$0xff] }
 0x7e0   : > { %v5569_v3 = vmax.f32 %v5457_v20, %v5459_v25 }
 0x7e1   : > { %v5104_v10 = vpop.f32.mrf.mxu0 }
 0x7e2   : > { %v5624_v16 = vmax.f32 %v5568_v14, %v5569_v3  ;;  %v5193_v44 = vpop.f32.mrf.mxu1  ;;  %v5468_v40 = vmax.f32 %v13396_v54, %v5104_v10 }
 0x7e3   : > { %v5469_v32 = vmax.f32 %v13397_v6, %v5193_v44  ;;  %v13406_v44 = vld [vmem:[#allocation13_spill] sm:$0xff] }
 0x7e4   : > { %7179 = vmax.xlane.f32.xlu2 %v5624_v16  ;;  %v5277_v49 = vpop.f32.mrf.mxu2  ;;  %v13405_v16 = vld [vmem:[#allocation60_spill] sm:$0xff] }
 0x7e5   : > { %v5366_v35 = vpop.f32.mrf.mxu3  ;;  %v5462_v38 = vmax.f32 %v11241_v41, %v5277_v49 }
 0x7e6   : > { %v5463_v11 = vmax.f32 %v11243_v39, %v5366_v35  ;;  %v13407_v35 = vld [vmem:[#allocation89_spill] sm:$0xff] }
 0x7e7   : > { %v5570_v37 = vmax.f32 %v5460_v62, %v5462_v38 }
 0x7e8   : > { %v5571_v59 = vmax.f32 %v5461_v48, %v5463_v11  ;;  %v13408_v48 = vld [vmem:[#allocation99_spill] sm:$0xff] }
 0x7e9   : > { %5319 = vmatmul.bf16.gmra.mxu2 %v11223_v7  ;;  %v5107_v4 = vpop.f32.mrf.mxu0 }
 0x7ea   : > { %5408 = vmatmul.bf16.gmra.mxu3 %v11223_v7  ;;  %v5625_v55 = vmax.f32 %v5570_v37, %v5571_v59  ;;  %v5196_v45 = vpop.f32.mrf.mxu1  ;;  %v5472_v19 = vmax.f32 %v13400_v53, %v5107_v4 }
 0x7eb   : > { %v5473_v0 = vmax.f32 %v13401_v13, %v5196_v45 }
 0x7ec   : > { %7181 = vmax.xlane.f32.xlu0 %v5625_v55  ;;  %v5280_v15 = vpop.f32.mrf.mxu2  ;;  %5146 = vmatmul.bf16.gmra.mxu0 %v13395_v29  ;;  %v11600_v55 = vld [vmem:[%s12405_s7 + $0x180] sm:$0xff] }
 0x7ed   : > { %v5369_v42 = vpop.f32.mrf.mxu3  ;;  %v5466_v41 = vmax.f32 %v13393_v50, %v5280_v15  ;;  %5235 = vmatmul.bf16.gmra.mxu1 %v13395_v29  ;;  %v13411_v50 = vld [vmem:[#allocation41_spill] sm:$0xff] }
 0x7ee   : > { %v5467_v39 = vmax.f32 %v13394_v18, %v5369_v42  ;;  %v13412_v18 = vld [vmem:[#allocation42_spill] sm:$0xff] }
 0x7ef   : > { %v5572_v33 = vmax.f32 %v5464_v57, %v5466_v41 }
 0x7f0   : > { %v5573_v7 = vmax.f32 %v5465_v17, %v5467_v39 }
 0x7f1   : > { %v5109_v58 = vpop.f32.mrf.mxu0 }
 0x7f2   : > { %v5626_v21 = vmax.f32 %v5572_v33, %v5573_v7  ;;  %v5198_v46 = vpop.f32.mrf.mxu1  ;;  %v5476_v10 = vmax.f32 %v13405_v16, %v5109_v58 }
 0x7f3   : > { %v5477_v49 = vmax.f32 %v13406_v44, %v5198_v46 }
 0x7f4   : > { %7183 = vmax.xlane.f32.xlu1 %v5626_v21  ;;  %v5282_v22 = vpop.f32.mrf.mxu2 }
 0x7f5   : > { %v5371_v31 = vpop.f32.mrf.mxu3  ;;  %v5470_v30 = vmax.f32 %v13398_v47, %v5282_v22 }
 0x7f6   : > { %v5471_v36 = vmax.f32 %v13399_v60, %v5371_v31  ;;  %v13413_v31 = vld [vmem:[#allocation19_spill] sm:$0xff] }
 0x7f7   : > { %v5574_v9 = vmax.f32 %v5468_v40, %v5470_v30  ;;  %v13414_v40 = vld [vmem:[#allocation50_spill] sm:$0xff]  ;;  %v13416_v30 = vld [vmem:[#allocation104_spill] sm:$0xff] }
 0x7f8   : > { %v5575_v28 = vmax.f32 %v5469_v32, %v5471_v36  ;;  %v13415_v32 = vld [vmem:[#allocation93_spill] sm:$0xff] }
 0x7f9   : > { %5324 = vmatmul.bf16.gmra.mxu2 %v13395_v29  ;;  %v5112_v2 = vpop.f32.mrf.mxu0 }
 0x7fa   : > { %5413 = vmatmul.bf16.gmra.mxu3 %v13395_v29  ;;  %v5627_v51 = vmax.f32 %v5574_v9, %v5575_v28  ;;  %v5201_v27 = vpop.f32.mrf.mxu1  ;;  %v5480_v57 = vmax.f32 %v13409_v52, %v5112_v2  ;;  %v11619_v2 = vld [vmem:[%s12405_s7 + $0x188] sm:$0xff] }
 0x7fb   : > { %v5481_v17 = vmax.f32 %v13410_v5, %v5201_v27 }
 0x7fc   : > { %7185 = vmax.xlane.f32.xlu2 %v5627_v51  ;;  %v5285_v12 = vpop.f32.mrf.mxu2  ;;  %5151 = vmatmul.bf16.gmra.mxu0 %v13404_v23 }
 0x7fd   : > { %v5374_v61 = vpop.f32.mrf.mxu3  ;;  %v5474_v26 = vmax.f32 %v13402_v1, %v5285_v12  ;;  %5240 = vmatmul.bf16.gmra.mxu1 %v13404_v23 }
 0x7fe   : > { %v5475_v56 = vmax.f32 %v13403_v43, %v5374_v61 }
 0x7ff   : > { %v5576_v24 = vmax.f32 %v5472_v19, %v5474_v26  ;;  %v13417_v19 = vld [vmem:[#allocation39_spill] sm:$0xff] }
 0x800   : > { %v5577_v8 = vmax.f32 %v5473_v0, %v5475_v56  ;;  %v13418_v0 = vld [vmem:[#allocation40_spill] sm:$0xff]  ;;  %v13419_v26 = vld [vmem:[#allocation43_spill] sm:$0xff] }
 0x801   : > { %v5114_v34 = vpop.f32.mrf.mxu0  ;;  %v13420_v56 = vld [vmem:[#allocation44_spill] sm:$0xff] }
 0x802   : > { %v5628_v20 = vmax.f32 %v5576_v24, %v5577_v8  ;;  %v5203_v25 = vpop.f32.mrf.mxu1  ;;  %v5484_v54 = vmax.f32 %v13413_v31, %v5114_v34 }
 0x803   : > { %v5485_v6 = vmax.f32 %v13414_v40, %v5203_v25  ;;  %v13428_v40 = vld [vmem:[#allocation47_spill] sm:$0xff] }
 0x804   : > { %7187 = vmax.xlane.f32.xlu0 %v5628_v20  ;;  %v5287_v14 = vpop.f32.mrf.mxu2 }
 0x805   : > { %v5376_v3 = vpop.f32.mrf.mxu3  ;;  %v5478_v62 = vmax.f32 %v13407_v35, %v5287_v14 }
 0x806   : > { %v5479_v38 = vmax.f32 %v13408_v48, %v5376_v3  ;;  %v13423_v48 = vld [vmem:[#allocation94_spill] sm:$0xff] }
 0x807   : > { %v5578_v11 = vmax.f32 %v5476_v10, %v5478_v62  ;;  %v13421_v10 = vld [vmem:[#allocation20_spill] sm:$0xff] }
 0x808   : > { %v5579_v37 = vmax.f32 %v5477_v49, %v5479_v38  ;;  %v13422_v49 = vld [vmem:[#allocation84_spill] sm:$0xff] }
 0x809   : > { %5329 = vmatmul.bf16.gmra.mxu2 %v13404_v23  ;;  %v5117_v4 = vpop.f32.mrf.mxu0 }
 0x80a   : > { %5418 = vmatmul.bf16.gmra.mxu3 %v13404_v23  ;;  %v5629_v59 = vmax.f32 %v5578_v11, %v5579_v37  ;;  %v5206_v45 = vpop.f32.mrf.mxu1  ;;  %v5488_v12 = vmax.f32 %v13417_v19, %v5117_v4  ;;  %v11661_v19 = vld [vmem:[%s12405_s7 + $0x198] sm:$0xff] }
 0x80b   : > { %v5489_v1 = vmax.f32 %v13418_v0, %v5206_v45  ;;  %v11640_v45 = vld [vmem:[%s12405_s7 + $0x190] sm:$0xff] }
 0x80c   : > { %7189 = vmax.xlane.f32.xlu1 %v5629_v59  ;;  %v5290_v15 = vpop.f32.mrf.mxu2  ;;  %5880 = vmatmul.bf16.vlgmr.msra.gmra.mxu0 %v11600_v55 }
 0x80d   : > { %v5379_v42 = vpop.f32.mrf.mxu3  ;;  %v5482_v41 = vmax.f32 %v13411_v50, %v5290_v15  ;;  %5969 = vmatmul.bf16.vlgmr.msra.gmra.mxu1 %v11600_v55 }
 0x80e   : > { %v5483_v39 = vmax.f32 %v13412_v18, %v5379_v42 }
 0x80f   : > { %v5580_v29 = vmax.f32 %v5480_v57, %v5482_v41  ;;  %v13424_v57 = vld [vmem:[#allocation45_spill] sm:$0xff]  ;;  %v13426_v41 = vld [vmem:[#allocation98_spill] sm:$0xff] }
 0x810   : > { %v5581_v33 = vmax.f32 %v5481_v17, %v5483_v39  ;;  %v13425_v17 = vld [vmem:[#allocation46_spill] sm:$0xff]  ;;  %v13427_v39 = vld [vmem:[#allocation35_spill] sm:$0xff] }
 0x811   : > { %v5119_v21 = vpop.f32.mrf.mxu0 }
 0x812   : > { %v5630_v7 = vmax.f32 %v5580_v29, %v5581_v33  ;;  %v5208_v58 = vpop.f32.mrf.mxu1  ;;  %v5492_v44 = vmax.f32 %v13421_v10, %v5119_v21 }
 0x813   : > { %v5493_v35 = vmax.f32 %v13422_v49, %v5208_v58 }
 0x814   : > { %7191 = vmax.xlane.f32.xlu2 %v5630_v7  ;;  %v5292_v46 = vpop.f32.mrf.mxu2 }
 0x815   : > { %v5381_v22 = vpop.f32.mrf.mxu3  ;;  %v5486_v47 = vmax.f32 %v13415_v32, %v5292_v46  ;;  %v13429_v32 = vld [vmem:[#allocation48_spill] sm:$0xff] }
 0x816   : > { %v5487_v60 = vmax.f32 %v13416_v30, %v5381_v22  ;;  %v13430_v30 = vld [vmem:[#allocation52_spill] sm:$0xff] }
 0x817   : > { %v7164_v36 = vpop.xlane.xlu0 %7163  ;;  %v5582_v9 = vmax.f32 %v5484_v54, %v5486_v47 }
 0x818   : > { %7356 = vst.msk [vmem:[%s10150_s17 + $0x200] sm:$0xff] %vm7291_vm4, %v7164_v36  ;;  %v5583_v28 = vmax.f32 %v5485_v6, %v5487_v60  ;;  %v13431_v36 = vld [vmem:[#allocation31_spill] sm:$0xff] }
 0x819   : > { %6058 = vmatmul.bf16.vlgmr.msra.gmra.mxu2 %v11600_v55  ;;  %v5122_v27 = vpop.f32.mrf.mxu0 }
 0x81a   : > { %6147 = vmatmul.bf16.vlgmr.msra.gmra.mxu3 %v11600_v55  ;;  %v5631_v51 = vmax.f32 %v5582_v9, %v5583_v28  ;;  %v5211_v53 = vpop.f32.mrf.mxu1  ;;  %v5496_v15 = vmax.f32 %v13424_v57, %v5122_v27 }
 0x81b   : > { %v5497_v50 = vmax.f32 %v13425_v17, %v5211_v53 }
 0x81c   : > { %7193 = vmax.xlane.f32.xlu0 %v5631_v51  ;;  %v5295_v61 = vpop.f32.mrf.mxu2  ;;  %5885 = vmatmul.bf16.gmra.mxu0 %v11619_v2 }
 0x81d   : > { %v5384_v13 = vpop.f32.mrf.mxu3  ;;  %v5490_v43 = vmax.f32 %v13419_v26, %v5295_v61  ;;  %5974 = vmatmul.bf16.gmra.mxu1 %v11619_v2 }
 0x81e   : > { %v5491_v23 = vmax.f32 %v13420_v56, %v5384_v13  ;;  %v13432_v13 = vld [vmem:[#allocation88_spill] sm:$0xff] }
 0x81f   : > { %v7166_v24 = vpop.xlane.xlu1 %7165  ;;  %v5584_v8 = vmax.f32 %v5488_v12, %v5490_v43  ;;  %v13433_v43 = vld [vmem:[#allocation97_spill] sm:$0xff] }
 0x820   : > { %v5585_v20 = vmax.f32 %v5489_v1, %v5491_v23  ;;  %7357 = vst.msk [vmem:[%s10150_s17 + $0x208] sm:$0xff] %vm7291_vm4, %v7166_v24  ;;  %v13434_v23 = vld [vmem:[#allocation54_spill] sm:$0xff] }
 0x821   : > { %v5124_v25 = vpop.f32.mrf.mxu0 }
 0x822   : > { %v5632_v34 = vmax.f32 %v5584_v8, %v5585_v20  ;;  %v5213_v14 = vpop.f32.mrf.mxu1  ;;  %v5500_v6 = vmax.f32 %v13428_v40, %v5124_v25  ;;  %v13435_v8 = vld [vmem:[#allocation100_spill] sm:$0xff] }
 0x823   : > { %v5501_v47 = vmax.f32 %v13429_v32, %v5213_v14 }
 0x824   : > { %7195 = vmax.xlane.f32.xlu1 %v5632_v34  ;;  %v5297_v3 = vpop.f32.mrf.mxu2 }
 0x825   : > { %v5386_v16 = vpop.f32.mrf.mxu3  ;;  %v5494_v62 = vmax.f32 %v11361_v63, %v5297_v3 }
 0x826   : > { %v5495_v38 = vmax.f32 %v13423_v48, %v5386_v16  ;;  %v13437_v48 = vld [vmem:[#allocation51_spill] sm:$0xff] }
 0x827   : > { %v7168_v11 = vpop.xlane.xlu2 %7167  ;;  %v5586_v37 = vmax.f32 %v5492_v44, %v5494_v62 }
 0x828   : > { %7358 = vst.msk [vmem:[%s10150_s17 + $0x210] sm:$0xff] %vm7291_vm4, %v7168_v11  ;;  %v5587_v59 = vmax.f32 %v5493_v35, %v5495_v38  ;;  %v13436_v35 = vld [vmem:[#allocation36_spill] sm:$0xff]  ;;  %v13438_v11 = vld [vmem:[#allocation27_spill] sm:$0xff] }
 0x829   : > { %6063 = vmatmul.bf16.gmra.mxu2 %v11619_v2  ;;  %v5127_v52 = vpop.f32.mrf.mxu0 }
 0x82a   : > { %6152 = vmatmul.bf16.gmra.mxu3 %v11619_v2  ;;  %v5633_v4 = vmax.f32 %v5586_v37, %v5587_v59  ;;  %v5216_v63 = vpop.f32.mrf.mxu1  ;;  %v5504_v0 = vmax.f32 %v13432_v13, %v5127_v52  ;;  %v13439_v59 = vld [vmem:[#allocation28_spill] sm:$0xff] }
 0x82b   : > { %v5505_v56 = vmax.f32 %v13433_v43, %v5216_v63 }
 0x82c   : > { %7197 = vmax.xlane.f32.xlu2 %v5633_v4  ;;  %v5300_v42 = vpop.f32.mrf.mxu2  ;;  %5890 = vmatmul.bf16.gmra.mxu0 %v11640_v45 }
 0x82d   : > { %v5389_v5 = vpop.f32.mrf.mxu3  ;;  %v5498_v18 = vmax.f32 %v13426_v41, %v5300_v42  ;;  %5979 = vmatmul.bf16.gmra.mxu1 %v11640_v45  ;;  %v11682_v42 = vld [vmem:[%s12405_s7 + $0x1a0] sm:$0xff] }
 0x82e   : > { %v5499_v29 = vmax.f32 %v13427_v39, %v5389_v5 }
 0x82f   : > { %v7170_v33 = vpop.xlane.xlu0 %7169  ;;  %v5588_v7 = vmax.f32 %v5496_v15, %v5498_v18 }
 0x830   : > { %v5589_v21 = vmax.f32 %v5497_v50, %v5499_v29  ;;  %7359 = vst.msk [vmem:[%s10150_s17 + $0x218] sm:$0xff] %vm7291_vm4, %v7170_v33  ;;  %v13440_v50 = vld [vmem:[#allocation32_spill] sm:$0xff]  ;;  %v13441_v29 = vld [vmem:[#allocation53_spill] sm:$0xff] }
 0x831   : > { %v5129_v46 = vpop.f32.mrf.mxu0 }
 0x832   : > { %v5634_v58 = vmax.f32 %v5588_v7, %v5589_v21  ;;  %v5218_v22 = vpop.f32.mrf.mxu1  ;;  %v5508_v62 = vmax.f32 %v13436_v35, %v5129_v46  ;;  %v13442_v7 = vld [vmem:[#allocation23_spill] sm:$0xff] }
 0x833   : > { %v5509_v38 = vmax.f32 %v13437_v48, %v5218_v22 }
 0x834   : > { %7199 = vmax.xlane.f32.xlu0 %v5634_v58  ;;  %v5302_v31 = vpop.f32.mrf.mxu2  ;;  %v13443_v58 = vld [vmem:[#allocation24_spill] sm:$0xff] }
 0x835   : > { %v5391_v54 = vpop.f32.mrf.mxu3  ;;  %v5502_v60 = vmax.f32 %v13430_v30, %v5302_v31 }
 0x836   : > { %v5503_v9 = vmax.f32 %v13431_v36, %v5391_v54 }
 0x837   : > { %v7172_v28 = vpop.xlane.xlu1 %7171  ;;  %v5590_v51 = vmax.f32 %v5500_v6, %v5502_v60  ;;  %v13444_v60 = vld [vmem:[#allocation92_spill] sm:$0xff] }
 0x838   : > { %7360 = vst.msk [vmem:[%s10150_s17 + $0x220] sm:$0xff] %vm7291_vm4, %v7172_v28  ;;  %v5591_v27 = vmax.f32 %v5501_v47, %v5503_v9  ;;  %v13445_v9 = vld [vmem:[#allocation101_spill] sm:$0xff] }
 0x839   : > { %6068 = vmatmul.bf16.gmra.mxu2 %v11640_v45  ;;  %v5132_v12 = vpop.f32.mrf.mxu0 }
 0x83a   : > { %6157 = vmatmul.bf16.gmra.mxu3 %v11640_v45  ;;  %v5635_v53 = vmax.f32 %v5590_v51, %v5591_v27  ;;  %v5221_v61 = vpop.f32.mrf.mxu1  ;;  %v5512_v41 = vmax.f32 %v13440_v50, %v5132_v12  ;;  %v13446_v51 = vld [vmem:[#allocation105_spill] sm:$0xff] }
 0x83b   : > { %v5513_v33 = vmax.f32 %v13441_v29, %v5221_v61  ;;  %v11724_v29 = vld [vmem:[%s12405_s7 + $0x1b0] sm:$0xff] }
 0x83c   : > { %7201 = vmax.xlane.f32.xlu1 %v5635_v53  ;;  %v5305_v1 = vpop.f32.mrf.mxu2  ;;  %5895 = vmatmul.bf16.gmra.mxu0 %v11661_v19  ;;  %v13447_v53 = vld [vmem:[#allocation103_spill] sm:$0xff] }
 0x83d   : > { %v5394_v26 = vpop.f32.mrf.mxu3  ;;  %v5506_v24 = vmax.f32 %v13434_v23, %v5305_v1  ;;  %5984 = vmatmul.bf16.gmra.mxu1 %v11661_v19  ;;  %v13448_v23 = vld [vmem:[#allocation57_spill] sm:$0xff] }
 0x83e   : > { %v5507_v20 = vmax.f32 %v13435_v8, %v5394_v26  ;;  %v11703_v26 = vld [vmem:[%s12405_s7 + $0x1a8] sm:$0xff] }
 0x83f   : > { %v7174_v34 = vpop.xlane.xlu2 %7173  ;;  %v5592_v25 = vmax.f32 %v5504_v0, %v5506_v24 }
 0x840   : > { %v5593_v14 = vmax.f32 %v5505_v56, %v5507_v20  ;;  %7361 = vst.msk [vmem:[%s10150_s17 + $0x228] sm:$0xff] %vm7291_vm4, %v7174_v34  ;;  %v13449_v34 = vld [vmem:[#allocation58_spill] sm:$0xff] }
 0x841   : > { %v5134_v16 = vpop.f32.mrf.mxu0 }
 0x842   : > { %v5636_v3 = vmax.f32 %v5592_v25, %v5593_v14  ;;  %v5223_v10 = vpop.f32.mrf.mxu1  ;;  %v5516_v36 = vmax.f32 %v13444_v60, %v5134_v16  ;;  %v13450_v14 = vld [vmem:[#allocation33_spill] sm:$0xff]  ;;  %v13451_v16 = vld [vmem:[#allocation34_spill] sm:$0xff] }
 0x843   : > { %v5517_v28 = vmax.f32 %v13445_v9, %v5223_v10 }
 0x844   : > { %7203 = vmax.xlane.f32.xlu2 %v5636_v3  ;;  %v5307_v44 = vpop.f32.mrf.mxu2 }
 0x845   : > { %v5396_v49 = vpop.f32.mrf.mxu3  ;;  %v5510_v37 = vmax.f32 %v13438_v11, %v5307_v44 }
 0x846   : > { %v5511_v4 = vmax.f32 %v13439_v59, %v5396_v49  ;;  %v13452_v59 = vld [vmem:[#allocation37_spill] sm:$0xff] }
 0x847   : > { %v7176_v52 = vpop.xlane.xlu0 %7175  ;;  %v5594_v63 = vmax.f32 %v5508_v62, %v5510_v37 }
 0x848   : > { %7362 = vst.msk [vmem:[%s10150_s17 + $0x230] sm:$0xff] %vm7291_vm4, %v7176_v52  ;;  %v5595_v57 = vmax.f32 %v5509_v38, %v5511_v4  ;;  %v13453_v52 = vld [vmem:[#allocation38_spill] sm:$0xff] }
 0x849   : > { %6073 = vmatmul.bf16.gmra.mxu2 %v11661_v19  ;;  %v5137_v5 = vpop.f32.mrf.mxu0 }
 0x84a   : > { %6162 = vmatmul.bf16.gmra.mxu3 %v11661_v19  ;;  %v5637_v15 = vmax.f32 %v5594_v63, %v5595_v57  ;;  %v5226_v17 = vpop.f32.mrf.mxu1  ;;  %v5520_v24 = vmax.f32 %v13448_v23, %v5137_v5  ;;  %v13454_v57 = vld [vmem:[#allocation108_spill] sm:$0xff]  ;;  %v13455_v5 = vld [vmem:[#allocation109_spill] sm:$0xff] }
 0x84b   : > { %v5521_v25 = vmax.f32 %v13449_v34, %v5226_v17 }
 0x84c   : > { %7205 = vmax.xlane.f32.xlu0 %v5637_v15  ;;  %v5310_v18 = vpop.f32.mrf.mxu2  ;;  %5900 = vmatmul.bf16.gmra.mxu0 %v11682_v42 }
 0x84d   : > { %v5399_v39 = vpop.f32.mrf.mxu3  ;;  %v5514_v21 = vmax.f32 %v13442_v7, %v5310_v18  ;;  %5989 = vmatmul.bf16.gmra.mxu1 %v11682_v42 }
 0x84e   : > { %v5515_v46 = vmax.f32 %v13443_v58, %v5399_v39 }
 0x84f   : > { %v7178_v22 = vpop.xlane.xlu1 %7177  ;;  %v5596_v31 = vmax.f32 %v5512_v41, %v5514_v21  ;;  %v13456_v21 = vld [vmem:[#allocation113_spill] sm:$0xff] }
 0x850   : > { %v5597_v54 = vmax.f32 %v5513_v33, %v5515_v46  ;;  %7363 = vst.msk [vmem:[%s10150_s17 + $0x238] sm:$0xff] %vm7291_vm4, %v7178_v22 }
 0x851   : > { %v5139_v6 = vpop.f32.mrf.mxu0 }
 0x852   : > { %v5638_v40 = vmax.f32 %v5596_v31, %v5597_v54  ;;  %v5228_v32 = vpop.f32.mrf.mxu1  ;;  %v5524_v4 = vmax.f32 %v13452_v59, %v5139_v6  ;;  %v13457_v31 = vld [vmem:[#allocation106_spill] sm:$0xff] }
 0x853   : > { %v5525_v63 = vmax.f32 %v13453_v52, %v5228_v32  ;;  %v13459_v32 = vld [vmem:[#allocation26_spill] sm:$0xff] }
 0x854   : > { %7207 = vmax.xlane.f32.xlu1 %v5638_v40  ;;  %v5312_v47 = vpop.f32.mrf.mxu2  ;;  %v13458_v40 = vld [vmem:[#allocation25_spill] sm:$0xff] }
 0x855   : > { %v5401_v30 = vpop.f32.mrf.mxu3  ;;  %v5518_v27 = vmax.f32 %v13446_v51, %v5312_v47 }
 0x856   : > { %v5519_v12 = vmax.f32 %v13447_v53, %v5401_v30 }
 0x857   : > { %v7180_v61 = vpop.xlane.xlu2 %7179  ;;  %v5598_v13 = vmax.f32 %v5516_v36, %v5518_v27 }
 0x858   : > { %7364 = vst.msk [vmem:[%s10150_s17 + $0x240] sm:$0xff] %vm7291_vm4, %v7180_v61  ;;  %v5599_v0 = vmax.f32 %v5517_v28, %v5519_v12  ;;  %v13460_v12 = vld [vmem:[#allocation29_spill] sm:$0xff] }
 0x859   : > { %6078 = vmatmul.bf16.gmra.mxu2 %v11682_v42  ;;  %v5142_v43 = vpop.f32.mrf.mxu0 }
 0x85a   : > { %6167 = vmatmul.bf16.gmra.mxu3 %v11682_v42  ;;  %v5639_v1 = vmax.f32 %v5598_v13, %v5599_v0  ;;  %v5231_v56 = vpop.f32.mrf.mxu1  ;;  %v5528_v58 = vmax.f32 %v13456_v21, %v5142_v43  ;;  %v13461_v13 = vld [vmem:[#allocation30_spill] sm:$0xff]  ;;  %v13471_v21 = vld [vmem:[#allocation127_spill] sm:$0xff] }
 0x85b   : > { %v5529_v54 = vmax.f32 %v13457_v31, %v5231_v56  ;;  %v13463_v56 = vld [vmem:[#allocation119_spill] sm:$0xff] }
 0x85c   : > { %7209 = vmax.xlane.f32.xlu2 %v5639_v1  ;;  %v5315_v8 = vpop.f32.mrf.mxu2  ;;  %5905 = vmatmul.bf16.gmra.mxu0 %v11703_v26  ;;  %v13462_v1 = vld [vmem:[#allocation117_spill] sm:$0xff] }
 0x85d   : > { %v5404_v20 = vpop.f32.mrf.mxu3  ;;  %v5522_v3 = vmax.f32 %v13450_v14, %v5315_v8  ;;  %5994 = vmatmul.bf16.gmra.mxu1 %v11703_v26 }
 0x85e   : > { %v5523_v10 = vmax.f32 %v13451_v16, %v5404_v20  ;;  %v13464_v16 = vld [vmem:[#allocation111_spill] sm:$0xff] }
 0x85f   : > { %v7182_v44 = vpop.xlane.xlu0 %7181  ;;  %v5600_v49 = vmax.f32 %v5520_v24, %v5522_v3 }
 0x860   : > { %v5601_v35 = vmax.f32 %v5521_v25, %v5523_v10  ;;  %7365 = vst.msk [vmem:[%s10150_s17 + $0x248] sm:$0xff] %vm7291_vm4, %v7182_v44  ;;  %v11745_v25 = vld [vmem:[%s12405_s7 + $0x1b8] sm:$0xff] }
 0x861   : > { %v5144_v48 = vpop.f32.mrf.mxu0 }
 0x862   : > { %v5640_v62 = vmax.f32 %v5600_v49, %v5601_v35  ;;  %v5233_v38 = vpop.f32.mrf.mxu1  ;;  %v5532_v61 = vmax.f32 %v13460_v12, %v5144_v48  ;;  %v13465_v35 = vld [vmem:[#allocation114_spill] sm:$0xff] }
 0x863   : > { %v5533_v0 = vmax.f32 %v13461_v13, %v5233_v38  ;;  %v13466_v48 = vld [vmem:[#allocation122_spill] sm:$0xff] }
 0x864   : > { %7211 = vmax.xlane.f32.xlu0 %v5640_v62  ;;  %v5317_v11 = vpop.f32.mrf.mxu2 }
 0x865   : > { %v5406_v37 = vpop.f32.mrf.mxu3  ;;  %v5526_v15 = vmax.f32 %v13454_v57, %v5317_v11  ;;  %v13467_v11 = vld [vmem:[#allocation123_spill] sm:$0xff] }
 0x866   : > { %v5527_v17 = vmax.f32 %v13455_v5, %v5406_v37 }
 0x867   : > { %v7184_v50 = vpop.xlane.xlu1 %7183  ;;  %v5602_v41 = vmax.f32 %v5524_v4, %v5526_v15 }
 0x868   : > { %7366 = vst.msk [vmem:[%s10150_s17 + $0x250] sm:$0xff] %vm7291_vm4, %v7184_v50  ;;  %v5603_v18 = vmax.f32 %v5525_v63, %v5527_v17  ;;  %v13468_v50 = vld [vmem:[#allocation102_spill] sm:$0xff] }
 0x869   : > { %6083 = vmatmul.bf16.gmra.mxu2 %v11703_v26  ;;  %v5147_v33 = vpop.f32.mrf.mxu0 }
 0x86a   : > { %6172 = vmatmul.bf16.gmra.mxu3 %v11703_v26  ;;  %v5641_v39 = vmax.f32 %v5602_v41, %v5603_v18  ;;  %v5236_v7 = vpop.f32.mrf.mxu1  ;;  %v5536_v10 = vmax.f32 %v13464_v16, %v5147_v33  ;;  %v13469_v18 = vld [vmem:[#allocation112_spill] sm:$0xff]  ;;  %v13470_v33 = vld [vmem:[#allocation126_spill] sm:$0xff] }
 0x86b   : > { %v5537_v62 = vmax.f32 %v13465_v35, %v5236_v7 }
 0x86c   : > { %7213 = vmax.xlane.f32.xlu1 %v5641_v39  ;;  %v5320_v46 = vpop.f32.mrf.mxu2  ;;  %5910 = vmatmul.bf16.gmra.mxu0 %v11724_v29 }
 0x86d   : > { %v5409_v22 = vpop.f32.mrf.mxu3  ;;  %v5530_v6 = vmax.f32 %v13458_v40, %v5320_v46  ;;  %5999 = vmatmul.bf16.gmra.mxu1 %v11724_v29  ;;  %v11766_v40 = vld [vmem:[%s12405_s7 + $0x1c0] sm:$0xff] }
 0x86e   : > { %v5531_v47 = vmax.f32 %v13459_v32, %v5409_v22 }
 0x86f   : > { %v7186_v30 = vpop.xlane.xlu2 %7185  ;;  %v5604_v60 = vmax.f32 %v5528_v58, %v5530_v6 }
 0x870   : > { %v5605_v36 = vmax.f32 %v5529_v54, %v5531_v47  ;;  %7367 = vst.msk [vmem:[%s10150_s17 + $0x258] sm:$0xff] %vm7291_vm4, %v7186_v30  ;;  %v13472_v47 = vld [vmem:[#allocation107_spill] sm:$0xff] }
 0x871   : > { %v5149_v28 = vpop.f32.mrf.mxu0 }
 0x872   : > { %v5642_v9 = vmax.f32 %v5604_v60, %v5605_v36  ;;  %v5238_v51 = vpop.f32.mrf.mxu1  ;;  %v5540_v41 = vmax.f32 %v13468_v50, %v5149_v28  ;;  %v11824_v50 = vld [vmem:[%s12405_s7 + $0x1d0] sm:$0xff] }
 0x873   : > { %v5541_v39 = vmax.f32 %v13469_v18, %v5238_v51  ;;  %v13474_v51 = vld [vmem:[#allocation61_spill] sm:$0xff] }
 0x874   : > { %7215 = vmax.xlane.f32.xlu2 %v5642_v9  ;;  %v5322_v27 = vpop.f32.mrf.mxu2  ;;  %v13473_v9 = vld [vmem:[#allocation110_spill] sm:$0xff] }
 0x875   : > { %v5411_v53 = vpop.f32.mrf.mxu3  ;;  %v5534_v43 = vmax.f32 %v13462_v1, %v5322_v27 }
 0x876   : > { %v5535_v23 = vmax.f32 %v13463_v56, %v5411_v53  ;;  %v13475_v53 = vld [vmem:[#allocation66_spill] sm:$0xff] }
 0x877   : > { %v7188_v24 = vpop.xlane.xlu0 %7187  ;;  %v5606_v8 = vmax.f32 %v5532_v61, %v5534_v43 }
 0x878   : > { %7368 = vst.msk [vmem:[%s10150_s17 + $0x260] sm:$0xff] %vm7291_vm4, %v7188_v24  ;;  %v5607_v20 = vmax.f32 %v5533_v0, %v5535_v23 }
 0x879   : > { %6088 = vmatmul.bf16.gmra.mxu2 %v11724_v29  ;;  %v5152_v14 = vpop.f32.mrf.mxu0 }
 0x87a   : > { %6177 = vmatmul.bf16.gmra.mxu3 %v11724_v29  ;;  %v5643_v34 = vmax.f32 %v5606_v8, %v5607_v20  ;;  %v5241_v3 = vpop.f32.mrf.mxu1  ;;  %v5544_v30 = vmax.f32 %v13472_v47, %v5152_v14  ;;  %v13476_v8 = vld [vmem:[#allocation115_spill] sm:$0xff] }
 0x87b   : > { %v5545_v28 = vmax.f32 %v13473_v9, %v5241_v3  ;;  %v13478_v3 = vld [vmem:[#allocation130_spill] sm:$0xff] }
 0x87c   : > { %7217 = vmax.xlane.f32.xlu0 %v5643_v34  ;;  %v5325_v44 = vpop.f32.mrf.mxu2  ;;  %5915 = vmatmul.bf16.gmra.mxu0 %v11745_v25  ;;  %v13477_v34 = vld [vmem:[#allocation116_spill] sm:$0xff] }
 0x87d   : > { %v5414_v49 = vpop.f32.mrf.mxu3  ;;  %v5538_v38 = vmax.f32 %v13466_v48, %v5325_v44  ;;  %6004 = vmatmul.bf16.gmra.mxu1 %v11745_v25 }
 0x87e   : > { %v5539_v37 = vmax.f32 %v13467_v11, %v5414_v49 }
 0x87f   : > { %v7190_v59 = vpop.xlane.xlu1 %7189  ;;  %v5608_v4 = vmax.f32 %v5536_v10, %v5538_v38  ;;  %v13479_v10 = vld [vmem:[#allocation131_spill] sm:$0xff] }
 0x880   : > { %v5609_v52 = vmax.f32 %v5537_v62, %v5539_v37  ;;  %7369 = vst.msk [vmem:[%s10150_s17 + $0x268] sm:$0xff] %vm7291_vm4, %v7190_v59  ;;  %v11795_v38 = vld [vmem:[%s12405_s7 + $0x1c8] sm:$0xff] }
 0x881   : > { %v5154_v57 = vpop.f32.mrf.mxu0 }
 0x882   : > { %v5644_v63 = vmax.f32 %v5608_v4, %v5609_v52  ;;  %v5243_v15 = vpop.f32.mrf.mxu1  ;;  %v5548_v20 = vmax.f32 %v13476_v8, %v5154_v57 }
 0x883   : > { %v5549_v14 = vmax.f32 %v13477_v34, %v5243_v15 }
 0x884   : > { %7219 = vmax.xlane.f32.xlu1 %v5644_v63  ;;  %v5327_v5 = vpop.f32.mrf.mxu2 }
 0x885   : > { %v5416_v17 = vpop.f32.mrf.mxu3  ;;  %v5542_v7 = vmax.f32 %v13470_v33, %v5327_v5 }
 0x886   : > { %v5543_v58 = vmax.f32 %v13471_v21, %v5416_v17 }
 0x887   : > { %v7192_v46 = vpop.xlane.xlu2 %7191  ;;  %v5610_v22 = vmax.f32 %v5540_v41, %v5542_v7 }
 0x888   : > { %7370 = vst.msk [vmem:[%s10150_s17 + $0x270] sm:$0xff] %vm7291_vm4, %v7192_v46  ;;  %v5611_v31 = vmax.f32 %v5541_v39, %v5543_v58 }
 0x889   : > { %6093 = vmatmul.bf16.gmra.mxu2 %v11745_v25  ;;  %v11768_v6 = vpop.f32.mrf.mxu0 }
 0x88a   : > { %6182 = vmatmul.bf16.gmra.mxu3 %v11745_v25  ;;  %v5645_v54 = vmax.f32 %v5610_v22, %v5611_v31  ;;  %v11770_v32 = vpop.f32.mrf.mxu1 }
 0x88c   : > { %7221 = vmax.xlane.f32.xlu2 %v5645_v54  ;;  %v5330_v60 = vpop.f32.mrf.mxu2  ;;  %5920 = vmatmul.bf16.gmra.mxu0 %v11766_v40  ;;  %v11853_v54 = vld [vmem:[%s12405_s7 + $0x1d8] sm:$0xff] }
 0x88d   : > { %v5419_v36 = vpop.f32.mrf.mxu3  ;;  %v5546_v27 = vmax.f32 %v13474_v51, %v5330_v60  ;;  %6009 = vmatmul.bf16.gmra.mxu1 %v11766_v40 }
 0x88e   : > { %v5547_v12 = vmax.f32 %v13475_v53, %v5419_v36 }
 0x88f   : > { %v7194_v61 = vpop.xlane.xlu0 %7193  ;;  %v5612_v13 = vmax.f32 %v5544_v30, %v5546_v27 }
 0x890   : > { %v5613_v0 = vmax.f32 %v5545_v28, %v5547_v12  ;;  %7371 = vst.msk [vmem:[%s10150_s17 + $0x278] sm:$0xff] %vm7291_vm4, %v7194_v61  ;;  %v11882_v61 = vld [vmem:[%s12405_s7 + $0x1e0] sm:$0xff] }
 0x891   : > { %v11780_v43 = vpop.f32.mrf.mxu0 }
 0x892   : > { %v5646_v1 = vmax.f32 %v5612_v13, %v5613_v0  ;;  %v11782_v56 = vpop.f32.mrf.mxu1 }
 0x894   : > { %7223 = vmax.xlane.f32.xlu0 %v5646_v1  ;;  %v5332_v23 = vpop.f32.mrf.mxu2 }
 0x895   : > { %v5421_v24 = vpop.f32.mrf.mxu3  ;;  %v5550_v16 = vmax.f32 %v13478_v3, %v5332_v23 }
 0x896   : > { %v5551_v44 = vmax.f32 %v13479_v10, %v5421_v24 }
 0x897   : > { %v7196_v49 = vpop.xlane.xlu1 %7195  ;;  %v5614_v35 = vmax.f32 %v5548_v20, %v5550_v16  ;;  %v11911_v16 = vld [vmem:[%s12405_s7 + $0x1e8] sm:$0xff] }
 0x898   : > { %7372 = vst.msk [vmem:[%s10150_s17 + $0x280] sm:$0xff] %vm7291_vm4, %v7196_v49  ;;  %v5615_v62 = vmax.f32 %v5549_v14, %v5551_v44 }
 0x899   : > { %6098 = vmatmul.bf16.gmra.mxu2 %v11766_v40  ;;  %v11797_v11 = vpop.f32.mrf.mxu0 }
 0x89a   : > { %6187 = vmatmul.bf16.gmra.mxu3 %v11766_v40  ;;  %v5647_v48 = vmax.f32 %v5614_v35, %v5615_v62  ;;  %v11799_v37 = vpop.f32.mrf.mxu1 }
 0x89c   : > { %7225 = vmax.xlane.f32.xlu1 %v5647_v48  ;;  %v11801_v59 = vpop.f32.mrf.mxu2  ;;  %5925 = vmatmul.bf16.gmra.mxu0 %v11795_v38 }
 0x89d   : > { %v11803_v4 = vpop.f32.mrf.mxu3  ;;  %6014 = vmatmul.bf16.gmra.mxu1 %v11795_v38 }
 0x89f   : > { %v7198_v52 = vpop.xlane.xlu2 %7197 }
 0x8a0   : > { %7373 = vst.msk [vmem:[%s10150_s17 + $0x288] sm:$0xff] %vm7291_vm4, %v7198_v52 }
 0x8a1   : > { %v11809_v63 = vpop.f32.mrf.mxu0 }
 0x8a2   : > { %v11811_v57 = vpop.f32.mrf.mxu1 }
 0x8a4   : > { %v11813_v15 = vpop.f32.mrf.mxu2 }
 0x8a5   : > { %v11815_v5 = vpop.f32.mrf.mxu3 }
 0x8a7   : > { %v7200_v17 = vpop.xlane.xlu0 %7199 }
 0x8a8   : > { %7374 = vst.msk [vmem:[%s10150_s17 + $0x290] sm:$0xff] %vm7291_vm4, %v7200_v17 }
 0x8a9   : > { %6103 = vmatmul.bf16.gmra.mxu2 %v11795_v38  ;;  %v11826_v41 = vpop.f32.mrf.mxu0 }
 0x8aa   : > { %6192 = vmatmul.bf16.gmra.mxu3 %v11795_v38  ;;  %v11828_v18 = vpop.f32.mrf.mxu1 }
 0x8ac   : > { %v11830_v39 = vpop.f32.mrf.mxu2  ;;  %5930 = vmatmul.bf16.gmra.mxu0 %v11824_v50 }
 0x8ad   : > { %v11832_v33 = vpop.f32.mrf.mxu3  ;;  %6019 = vmatmul.bf16.gmra.mxu1 %v11824_v50 }
 0x8af   : > { %v7202_v7 = vpop.xlane.xlu1 %7201 }
 0x8b0   : > { %7375 = vst.msk [vmem:[%s10150_s17 + $0x298] sm:$0xff] %vm7291_vm4, %v7202_v7 }
 0x8b1   : > { %v11838_v21 = vpop.f32.mrf.mxu0 }
 0x8b2   : > { %v11840_v58 = vpop.f32.mrf.mxu1 }
 0x8b4   : > { %v11842_v46 = vpop.f32.mrf.mxu2 }
 0x8b5   : > { %v11844_v22 = vpop.f32.mrf.mxu3 }
 0x8b7   : > { %v7204_v31 = vpop.xlane.xlu2 %7203 }
 0x8b8   : > { %7376 = vst.msk [vmem:[%s10150_s17 + $0x2a0] sm:$0xff] %vm7291_vm4, %v7204_v31 }
 0x8b9   : > { %6108 = vmatmul.bf16.gmra.mxu2 %v11824_v50  ;;  %v11855_v47 = vpop.f32.mrf.mxu0 }
 0x8ba   : > { %6197 = vmatmul.bf16.gmra.mxu3 %v11824_v50  ;;  %v11857_v30 = vpop.f32.mrf.mxu1 }
 0x8bc   : > { %v11859_v60 = vpop.f32.mrf.mxu2  ;;  %5935 = vmatmul.bf16.gmra.mxu0 %v11853_v54 }
 0x8bd   : > { %v11861_v36 = vpop.f32.mrf.mxu3  ;;  %6024 = vmatmul.bf16.gmra.mxu1 %v11853_v54 }
 0x8bf   : > { %v7206_v9 = vpop.xlane.xlu0 %7205 }
 0x8c0   : > { %7377 = vst.msk [vmem:[%s10150_s17 + $0x2a8] sm:$0xff] %vm7291_vm4, %v7206_v9  ;;  %v11940_v9 = vld [vmem:[%s12405_s7 + $0x1f0] sm:$0xff] }
 0x8c1   : > { %v11867_v28 = vpop.f32.mrf.mxu0  ;;  %13483 = vst [vmem:[#allocation135_spill] sm:$0xff] %v11940_v9 }
 0x8c2   : > { %v11869_v51 = vpop.f32.mrf.mxu1 }
 0x8c4   : > { %v11871_v27 = vpop.f32.mrf.mxu2 }
 0x8c5   : > { %v11873_v53 = vpop.f32.mrf.mxu3 }
 0x8c7   : > { %v7208_v12 = vpop.xlane.xlu1 %7207 }
 0x8c8   : > { %7378 = vst.msk [vmem:[%s10150_s17 + $0x2b0] sm:$0xff] %vm7291_vm4, %v7208_v12 }
 0x8c9   : > { %6113 = vmatmul.bf16.gmra.mxu2 %v11853_v54  ;;  %v11884_v13 = vpop.f32.mrf.mxu0 }
 0x8ca   : > { %6202 = vmatmul.bf16.gmra.mxu3 %v11853_v54  ;;  %v11886_v0 = vpop.f32.mrf.mxu1 }
 0x8cc   : > { %v11888_v1 = vpop.f32.mrf.mxu2  ;;  %5940 = vmatmul.bf16.gmra.mxu0 %v11882_v61 }
 0x8cd   : > { %v11890_v23 = vpop.f32.mrf.mxu3  ;;  %6029 = vmatmul.bf16.gmra.mxu1 %v11882_v61 }
 0x8cf   : > { %v7210_v24 = vpop.xlane.xlu2 %7209 }
 0x8d0   : > { %7379 = vst.msk [vmem:[%s10150_s17 + $0x2b8] sm:$0xff] %vm7291_vm4, %v7210_v24 }
 0x8d1   : > { %v11896_v8 = vpop.f32.mrf.mxu0 }
 0x8d2   : > { %v11898_v20 = vpop.f32.mrf.mxu1 }
 0x8d4   : > { %v11900_v34 = vpop.f32.mrf.mxu2 }
 0x8d5   : > { %v11902_v14 = vpop.f32.mrf.mxu3 }
 0x8d7   : > { %v7212_v3 = vpop.xlane.xlu0 %7211 }
 0x8d8   : > { %7380 = vst.msk [vmem:[%s10150_s17 + $0x2c0] sm:$0xff] %vm7291_vm4, %v7212_v3 }
 0x8d9   : > { %6118 = vmatmul.bf16.gmra.mxu2 %v11882_v61  ;;  %v11913_v10 = vpop.f32.mrf.mxu0 }
 0x8da   : > { %6207 = vmatmul.bf16.gmra.mxu3 %v11882_v61  ;;  %v11915_v44 = vpop.f32.mrf.mxu1 }
 0x8db   : > { %13480 = vst [vmem:[#allocation71_spill] sm:$0xff] %v11915_v44 }
 0x8dc   : > { %v11917_v49 = vpop.f32.mrf.mxu2  ;;  %5945 = vmatmul.bf16.gmra.mxu0 %v11911_v16 }
 0x8dd   : > { %v11919_v35 = vpop.f32.mrf.mxu3  ;;  %6034 = vmatmul.bf16.gmra.mxu1 %v11911_v16 }
 0x8df   : > { %v7214_v62 = vpop.xlane.xlu1 %7213 }
 0x8e0   : > { %7381 = vst.msk [vmem:[%s10150_s17 + $0x2c8] sm:$0xff] %vm7291_vm4, %v7214_v62 }
 0x8e1   : > { %v11925_v48 = vpop.f32.mrf.mxu0 }
 0x8e2   : > { %13481 = vst [vmem:[#allocation118_spill] sm:$0xff] %v11925_v48  ;;  %v11927_v52 = vpop.f32.mrf.mxu1 }
 0x8e3   : > { %13482 = vst [vmem:[#allocation134_spill] sm:$0xff] %v11927_v52 }
 0x8e4   : > { %v11929_v17 = vpop.f32.mrf.mxu2 }
 0x8e5   : > { %v11931_v7 = vpop.f32.mrf.mxu3 }
 0x8e7   : > { %v7216_v31 = vpop.xlane.xlu2 %7215 }
 0x8e8   : > { %7382 = vst.msk [vmem:[%s10150_s17 + $0x2d0] sm:$0xff] %vm7291_vm4, %v7216_v31 }
 0x8e9   : > { %6123 = vmatmul.bf16.gmra.mxu2 %v11911_v16  ;;  %v11942_v12 = vpop.f32.mrf.mxu0 }
 0x8ea   : > { %6212 = vmatmul.bf16.gmra.mxu3 %v11911_v16  ;;  %13484 = vst [vmem:[#allocation120_spill] sm:$0xff] %v11942_v12  ;;  %v11944_v24 = vpop.f32.mrf.mxu1 }
 0x8eb   : > { %13485 = vst [vmem:[#allocation121_spill] sm:$0xff] %v11944_v24 }
 0x8ec   : > { %v11946_v3 = vpop.f32.mrf.mxu2  ;;  %5950 = vmatmul.bf16.gmra.mxu0 %v11940_v9 }
 0x8ed   : > { %13486 = vst [vmem:[#allocation138_spill] sm:$0xff] %v11946_v3  ;;  %v11948_v62 = vpop.f32.mrf.mxu3  ;;  %6039 = vmatmul.bf16.gmra.mxu1 %v11940_v9 }
 0x8ee   : > { %13487 = vst [vmem:[#allocation139_spill] sm:$0xff] %v11948_v62 }
 0x8ef   : > { %v7218_v31 = vpop.xlane.xlu0 %7217 }
 0x8f0   : > { %7383 = vst.msk [vmem:[%s10150_s17 + $0x2d8] sm:$0xff] %vm7291_vm4, %v7218_v31  ;;  %v11969_v31 = vld [vmem:[%s12405_s7 + $0x1f8] sm:$0xff] }
 0x8f1   : > { %v11954_v52 = vpop.f32.mrf.mxu0  ;;  %13492 = vst [vmem:[#allocation128_spill] sm:$0xff] %v11969_v31 }
 0x8f2   : > { %13488 = vst [vmem:[#allocation124_spill] sm:$0xff] %v11954_v52  ;;  %v11956_v48 = vpop.f32.mrf.mxu1 }
 0x8f3   : > { %13489 = vst [vmem:[#allocation125_spill] sm:$0xff] %v11956_v48 }
 0x8f4   : > { %v11958_v44 = vpop.f32.mrf.mxu2 }
 0x8f5   : > { %13490 = vst [vmem:[#allocation142_spill] sm:$0xff] %v11958_v44  ;;  %v11960_v12 = vpop.f32.mrf.mxu3 }
 0x8f6   : > { %13491 = vst [vmem:[#allocation143_spill] sm:$0xff] %v11960_v12 }
 0x8f7   : > { %v7220_v24 = vpop.xlane.xlu1 %7219 }
 0x8f8   : > { %7384 = vst.msk [vmem:[%s10150_s17 + $0x2e0] sm:$0xff] %vm7291_vm4, %v7220_v24 }
 0x8f9   : > { %6128 = vmatmul.bf16.gmra.mxu2 %v11940_v9  ;;  %v11971_v52 = vpop.f32.mrf.mxu0 }
 0x8fa   : > { %6217 = vmatmul.bf16.gmra.mxu3 %v11940_v9  ;;  %13493 = vst [vmem:[#allocation129_spill] sm:$0xff] %v11971_v52  ;;  %v11973_v48 = vpop.f32.mrf.mxu1 }
 0x8fb   : > { %13494 = vst [vmem:[#allocation146_spill] sm:$0xff] %v11973_v48 }
 0x8fc   : > { %v11975_v44 = vpop.f32.mrf.mxu2  ;;  %5955 = vmatmul.bf16.gmra.mxu0 %v11969_v31 }
 0x8fd   : > { %13495 = vst [vmem:[#allocation147_spill] sm:$0xff] %v11975_v44  ;;  %v11977_v12 = vpop.f32.mrf.mxu3  ;;  %6044 = vmatmul.bf16.gmra.mxu1 %v11969_v31 }
 0x8fe   : > { %13496 = vst [vmem:[#allocation132_spill] sm:$0xff] %v11977_v12 }
 0x8ff   : > { %v7222_v24 = vpop.xlane.xlu2 %7221 }
 0x900   : > { %7385 = vst.msk [vmem:[%s10150_s17 + $0x2e8] sm:$0xff] %vm7291_vm4, %v7222_v24 }
 0x901   : > { %v11983_v9 = vpop.f32.mrf.mxu0 }
 0x902   : > { %13497 = vst [vmem:[#allocation133_spill] sm:$0xff] %v11983_v9  ;;  %v11985_v62 = vpop.f32.mrf.mxu1 }
 0x903   : > { %13498 = vst [vmem:[#allocation150_spill] sm:$0xff] %v11985_v62 }
 0x904   : > { %v11987_v3 = vpop.f32.mrf.mxu2 }
 0x905   : > { %13499 = vst [vmem:[#allocation151_spill] sm:$0xff] %v11987_v3  ;;  %v11989_v52 = vpop.f32.mrf.mxu3 }
 0x906   : > { %13500 = vst [vmem:[#allocation136_spill] sm:$0xff] %v11989_v52 }
 0x907   : > { %v7224_v48 = vpop.xlane.xlu0 %7223 }
 0x908   : > { %7386 = vst.msk [vmem:[%s10150_s17 + $0x2f0] sm:$0xff] %vm7291_vm4, %v7224_v48 }
 0x909   : > { %6133 = vmatmul.bf16.gmra.mxu2 %v11969_v31  ;;  %v11995_v12 = vpop.f32.mrf.mxu0 }
 0x90a   : > { %6222 = vmatmul.bf16.gmra.mxu3 %v11969_v31  ;;  %13501 = vst [vmem:[#allocation137_spill] sm:$0xff] %v11995_v12  ;;  %v11997_v44 = vpop.f32.mrf.mxu1 }
 0x90b   : > { %13502 = vst [vmem:[#allocation152_spill] sm:$0xff] %v11997_v44 }
 0x90c   : > { %v11999_v24 = vpop.f32.mrf.mxu2  ;;  %6236 = vmatmul.bf16.vlgmr.msrb.gmra.mxu0 %v11600_v55 }
 0x90d   : > { %13503 = vst [vmem:[#allocation153_spill] sm:$0xff] %v11999_v24  ;;  %v12001_v9 = vpop.f32.mrf.mxu3  ;;  %6325 = vmatmul.bf16.vlgmr.msrb.gmra.mxu1 %v11600_v55 }
 0x90e   : > { %13504 = vst [vmem:[#allocation140_spill] sm:$0xff] %v12001_v9 }
 0x90f   : > { %v7226_v62 = vpop.xlane.xlu1 %7225 }
 0x910   : > { %7387 = vst.msk [vmem:[%s10150_s17 + $0x2f8] sm:$0xff] %vm7291_vm4, %v7226_v62 }
 0x911   : > { %v12007_v48 = vpop.f32.mrf.mxu0 }
 0x912   : > { %13505 = vst [vmem:[#allocation141_spill] sm:$0xff] %v12007_v48  ;;  %v12009_v52 = vpop.f32.mrf.mxu1 }
 0x913   : > { %13506 = vst [vmem:[#allocation148_spill] sm:$0xff] %v12009_v52 }
 0x914   : > { %v12011_v3 = vpop.f32.mrf.mxu2 }
 0x915   : > { %13507 = vst [vmem:[#allocation149_spill] sm:$0xff] %v12011_v3  ;;  %v12013_v12 = vpop.f32.mrf.mxu3 }
 0x916   : > { %13508 = vst [vmem:[#allocation144_spill] sm:$0xff] %v12013_v12 }
 0x919   : > { %6414 = vmatmul.bf16.vlgmr.msrb.gmra.mxu2 %v11600_v55  ;;  %v12017_v44 = vpop.f32.mrf.mxu0 }
 0x91a   : > { %6503 = vmatmul.bf16.vlgmr.msrb.gmra.mxu3 %v11600_v55  ;;  %13509 = vst [vmem:[#allocation145_spill] sm:$0xff] %v12017_v44  ;;  %v12019_v9 = vpop.f32.mrf.mxu1 }
 0x91b   : > { %13510 = vst [vmem:[#allocation154_spill] sm:$0xff] %v12019_v9 }
 0x91c   : > { %v12021_v24 = vpop.f32.mrf.mxu2  ;;  %6241 = vmatmul.bf16.gmra.mxu0 %v11619_v2 }
 0x91d   : > { %13511 = vst [vmem:[#allocation155_spill] sm:$0xff] %v12021_v24  ;;  %v12023_v31 = vpop.f32.mrf.mxu3  ;;  %6330 = vmatmul.bf16.gmra.mxu1 %v11619_v2 }
 0x91e   : > { %13512 = vst [vmem:[#allocation8_spill] sm:$0xff] %v12023_v31 }
 0x921   : > { %v12027_v62 = vpop.f32.mrf.mxu0 }
 0x922   : > { %13513 = vst [vmem:[#allocation74_spill] sm:$0xff] %v12027_v62  ;;  %v12029_v52 = vpop.f32.mrf.mxu1 }
 0x923   : > { %13514 = vst [vmem:[#allocation4_spill] sm:$0xff] %v12029_v52 }
 0x924   : > { %v12031_v48 = vpop.f32.mrf.mxu2 }
 0x925   : > { %13515 = vst [vmem:[#allocation6_spill] sm:$0xff] %v12031_v48  ;;  %v12033_v12 = vpop.f32.mrf.mxu3 }
 0x926   : > { %13516 = vst [vmem:[#allocation5_spill] sm:$0xff] %v12033_v12 }
 0x929   : > { %6419 = vmatmul.bf16.gmra.mxu2 %v11619_v2  ;;  %v12037_v55 = vpop.f32.mrf.mxu0 }
 0x92a   : > { %6508 = vmatmul.bf16.gmra.mxu3 %v11619_v2  ;;  %13517 = vst [vmem:[#allocation83_spill] sm:$0xff] %v12037_v55  ;;  %v12039_v9 = vpop.f32.mrf.mxu1 }
 0x92b   : > { %13518 = vst [vmem:[#allocation81_spill] sm:$0xff] %v12039_v9 }
 0x92c   : > { %v12041_v44 = vpop.f32.mrf.mxu2  ;;  %6246 = vmatmul.bf16.gmra.mxu0 %v11640_v45 }
 0x92d   : > { %13519 = vst [vmem:[#allocation82_spill] sm:$0xff] %v12041_v44  ;;  %v12043_v31 = vpop.f32.mrf.mxu3  ;;  %6335 = vmatmul.bf16.gmra.mxu1 %v11640_v45 }
 0x92e   : > { %13520 = vst [vmem:[#allocation11_spill] sm:$0xff] %v12043_v31 }
 0x931   : > { %v12047_v52 = vpop.f32.mrf.mxu0 }
 0x932   : > { %13521 = vst [vmem:[#allocation12_spill] sm:$0xff] %v12047_v52  ;;  %v12049_v62 = vpop.f32.mrf.mxu1 }
 0x933   : > { %13522 = vst [vmem:[#allocation10_spill] sm:$0xff] %v12049_v62 }
 0x934   : > { %v12051_v12 = vpop.f32.mrf.mxu2 }
 0x935   : > { %13523 = vst [vmem:[#allocation3_spill] sm:$0xff] %v12051_v12  ;;  %v12053_v48 = vpop.f32.mrf.mxu3 }
 0x936   : > { %13524 = vst [vmem:[#allocation79_spill] sm:$0xff] %v12053_v48 }
 0x939   : > { %6424 = vmatmul.bf16.gmra.mxu2 %v11640_v45  ;;  %v12057_v2 = vpop.f32.mrf.mxu0 }
 0x93a   : > { %6513 = vmatmul.bf16.gmra.mxu3 %v11640_v45  ;;  %13525 = vst [vmem:[#allocation80_spill] sm:$0xff] %v12057_v2  ;;  %v12059_v9 = vpop.f32.mrf.mxu1 }
 0x93b   : > { %13526 = vst [vmem:[#allocation7_spill] sm:$0xff] %v12059_v9 }
 0x93c   : > { %v12061_v55 = vpop.f32.mrf.mxu2  ;;  %6251 = vmatmul.bf16.gmra.mxu0 %v11661_v19 }
 0x93d   : > { %13527 = vst [vmem:[#allocation77_spill] sm:$0xff] %v12061_v55  ;;  %v12063_v31 = vpop.f32.mrf.mxu3  ;;  %6340 = vmatmul.bf16.gmra.mxu1 %v11661_v19 }
 0x93e   : > { %13528 = vst [vmem:[#allocation78_spill] sm:$0xff] %v12063_v31 }
 0x941   : > { %v12067_v62 = vpop.f32.mrf.mxu0 }
 0x942   : > { %13529 = vst [vmem:[#allocation72_spill] sm:$0xff] %v12067_v62  ;;  %v12069_v52 = vpop.f32.mrf.mxu1 }
 0x943   : > { %13530 = vst [vmem:[#allocation15_spill] sm:$0xff] %v12069_v52 }
 0x944   : > { %v12071_v48 = vpop.f32.mrf.mxu2 }
 0x945   : > { %13531 = vst [vmem:[#allocation75_spill] sm:$0xff] %v12071_v48  ;;  %v12073_v12 = vpop.f32.mrf.mxu3 }
 0x946   : > { %13532 = vst [vmem:[#allocation76_spill] sm:$0xff] %v12073_v12 }
 0x949   : > { %6429 = vmatmul.bf16.gmra.mxu2 %v11661_v19  ;;  %v12077_v45 = vpop.f32.mrf.mxu0 }
 0x94a   : > { %6518 = vmatmul.bf16.gmra.mxu3 %v11661_v19  ;;  %13533 = vst [vmem:[#allocation73_spill] sm:$0xff] %v12077_v45  ;;  %v12079_v9 = vpop.f32.mrf.mxu1 }
 0x94b   : > { %13534 = vst [vmem:[#allocation9_spill] sm:$0xff] %v12079_v9 }
 0x94c   : > { %v12081_v2 = vpop.f32.mrf.mxu2  ;;  %6256 = vmatmul.bf16.gmra.mxu0 %v11682_v42 }
 0x94d   : > { %13535 = vst [vmem:[#allocation69_spill] sm:$0xff] %v12081_v2  ;;  %v12083_v31 = vpop.f32.mrf.mxu3  ;;  %6345 = vmatmul.bf16.gmra.mxu1 %v11682_v42 }
 0x94e   : > { %13536 = vst [vmem:[#allocation70_spill] sm:$0xff] %v12083_v31 }
 0x951   : > { %v12087_v52 = vpop.f32.mrf.mxu0 }
 0x952   : > { %13537 = vst [vmem:[#allocation67_spill] sm:$0xff] %v12087_v52  ;;  %v12089_v62 = vpop.f32.mrf.mxu1 }
 0x953   : > { %13538 = vst [vmem:[#allocation68_spill] sm:$0xff] %v12089_v62 }
 0x954   : > { %v12091_v12 = vpop.f32.mrf.mxu2 }
 0x955   : > { %13539 = vst [vmem:[#allocation64_spill] sm:$0xff] %v12091_v12  ;;  %v12093_v48 = vpop.f32.mrf.mxu3 }
 0x956   : > { %13540 = vst [vmem:[#allocation65_spill] sm:$0xff] %v12093_v48 }
 0x959   : > { %6434 = vmatmul.bf16.gmra.mxu2 %v11682_v42  ;;  %v12097_v19 = vpop.f32.mrf.mxu0 }
 0x95a   : > { %6523 = vmatmul.bf16.gmra.mxu3 %v11682_v42  ;;  %13541 = vst [vmem:[#allocation62_spill] sm:$0xff] %v12097_v19  ;;  %v12099_v9 = vpop.f32.mrf.mxu1 }
 0x95b   : > { %13542 = vst [vmem:[#allocation16_spill] sm:$0xff] %v12099_v9 }
 0x95c   : > { %v12101_v45 = vpop.f32.mrf.mxu2  ;;  %6261 = vmatmul.bf16.gmra.mxu0 %v11703_v26 }
 0x95d   : > { %13543 = vst [vmem:[#allocation63_spill] sm:$0xff] %v12101_v45  ;;  %v12103_v31 = vpop.f32.mrf.mxu3  ;;  %6350 = vmatmul.bf16.gmra.mxu1 %v11703_v26 }
 0x95e   : > { %13544 = vst [vmem:[#allocation59_spill] sm:$0xff] %v12103_v31 }
 0x961   : > { %v12107_v62 = vpop.f32.mrf.mxu0 }
 0x962   : > { %13545 = vst [vmem:[#allocation14_spill] sm:$0xff] %v12107_v62  ;;  %v12109_v52 = vpop.f32.mrf.mxu1 }
 0x963   : > { %13546 = vst [vmem:[#allocation86_spill] sm:$0xff] %v12109_v52 }
 0x964   : > { %v12111_v48 = vpop.f32.mrf.mxu2 }
 0x965   : > { %13547 = vst [vmem:[#allocation87_spill] sm:$0xff] %v12111_v48  ;;  %v12113_v12 = vpop.f32.mrf.mxu3 }
 0x966   : > { %13548 = vst [vmem:[#allocation56_spill] sm:$0xff] %v12113_v12 }
 0x969   : > { %6439 = vmatmul.bf16.gmra.mxu2 %v11703_v26  ;;  %v12117_v42 = vpop.f32.mrf.mxu0 }
 0x96a   : > { %6528 = vmatmul.bf16.gmra.mxu3 %v11703_v26  ;;  %13549 = vst [vmem:[#allocation18_spill] sm:$0xff] %v12117_v42  ;;  %v12119_v9 = vpop.f32.mrf.mxu1 }
 0x96b   : > { %13550 = vst [vmem:[#allocation22_spill] sm:$0xff] %v12119_v9 }
 0x96c   : > { %v12121_v19 = vpop.f32.mrf.mxu2  ;;  %6266 = vmatmul.bf16.gmra.mxu0 %v11724_v29 }
 0x96d   : > { %13551 = vst [vmem:[#allocation90_spill] sm:$0xff] %v12121_v19  ;;  %v12123_v31 = vpop.f32.mrf.mxu3  ;;  %6355 = vmatmul.bf16.gmra.mxu1 %v11724_v29 }
 0x96e   : > { %13552 = vst [vmem:[#allocation91_spill] sm:$0xff] %v12123_v31 }
 0x971   : > { %v12127_v52 = vpop.f32.mrf.mxu0 }
 0x972   : > { %13553 = vst [vmem:[#allocation17_spill] sm:$0xff] %v12127_v52  ;;  %v12129_v62 = vpop.f32.mrf.mxu1 }
 0x973   : > { %13554 = vst [vmem:[#allocation49_spill] sm:$0xff] %v12129_v62 }
 0x974   : > { %v12131_v12 = vpop.f32.mrf.mxu2 }
 0x975   : > { %13555 = vst [vmem:[#allocation95_spill] sm:$0xff] %v12131_v12  ;;  %v12133_v48 = vpop.f32.mrf.mxu3 }
 0x976   : > { %13556 = vst [vmem:[#allocation96_spill] sm:$0xff] %v12133_v48 }
 0x979   : > { %6444 = vmatmul.bf16.gmra.mxu2 %v11724_v29  ;;  %v12137_v26 = vpop.f32.mrf.mxu0 }
 0x97a   : > { %6533 = vmatmul.bf16.gmra.mxu3 %v11724_v29  ;;  %13557 = vst [vmem:[#allocation85_spill] sm:$0xff] %v12137_v26  ;;  %v12139_v9 = vpop.f32.mrf.mxu1 }
 0x97b   : > { %13558 = vst [vmem:[#allocation60_spill] sm:$0xff] %v12139_v9 }
 0x97c   : > { %v12141_v42 = vpop.f32.mrf.mxu2  ;;  %6271 = vmatmul.bf16.gmra.mxu0 %v11745_v25 }
 0x97d   : > { %13559 = vst [vmem:[#allocation13_spill] sm:$0xff] %v12141_v42  ;;  %v12143_v31 = vpop.f32.mrf.mxu3  ;;  %6360 = vmatmul.bf16.gmra.mxu1 %v11745_v25 }
 0x97e   : > { %13560 = vst [vmem:[#allocation89_spill] sm:$0xff] %v12143_v31 }
 0x981   : > { %v12147_v62 = vpop.f32.mrf.mxu0 }
 0x982   : > { %13561 = vst [vmem:[#allocation99_spill] sm:$0xff] %v12147_v62  ;;  %v12149_v52 = vpop.f32.mrf.mxu1 }
 0x983   : > { %13562 = vst [vmem:[#allocation55_spill] sm:$0xff] %v12149_v52 }
 0x984   : > { %v12151_v48 = vpop.f32.mrf.mxu2 }
 0x985   : > { %13563 = vst [vmem:[#allocation21_spill] sm:$0xff] %v12151_v48  ;;  %v12153_v12 = vpop.f32.mrf.mxu3 }
 0x986   : > { %13564 = vst [vmem:[#allocation41_spill] sm:$0xff] %v12153_v12 }
 0x989   : > { %6449 = vmatmul.bf16.gmra.mxu2 %v11745_v25  ;;  %v6237_v29 = vpop.f32.mrf.mxu0 }
 0x98a   : > { %6538 = vmatmul.bf16.gmra.mxu3 %v11745_v25  ;;  %v6326_v9 = vpop.f32.mrf.mxu1 }
 0x98b   : > { %v6585_v45 = vmax.f32 %v11770_v32, %v6326_v9 }
 0x98c   : > { %v12157_v26 = vpop.f32.mrf.mxu2  ;;  %6276 = vmatmul.bf16.gmra.mxu0 %v11766_v40 }
 0x98d   : > { %13565 = vst [vmem:[#allocation42_spill] sm:$0xff] %v12157_v26  ;;  %v12159_v31 = vpop.f32.mrf.mxu3  ;;  %6365 = vmatmul.bf16.gmra.mxu1 %v11766_v40  ;;  %v6584_v26 = vmax.f32 %v11768_v6, %v6237_v29 }
 0x98e   : > { %13566 = vst [vmem:[#allocation19_spill] sm:$0xff] %v12159_v31 }
 0x991   : > { %v6239_v62 = vpop.f32.mrf.mxu0 }
 0x992   : > { %v6328_v52 = vpop.f32.mrf.mxu1  ;;  %v6588_v29 = vmax.f32 %v11780_v43, %v6239_v62 }
 0x993   : > { %v6589_v32 = vmax.f32 %v11782_v56, %v6328_v52 }
 0x994   : > { %v12163_v42 = vpop.f32.mrf.mxu2 }
 0x995   : > { %13567 = vst [vmem:[#allocation50_spill] sm:$0xff] %v12163_v42  ;;  %v12165_v48 = vpop.f32.mrf.mxu3 }
 0x996   : > { %13568 = vst [vmem:[#allocation93_spill] sm:$0xff] %v12165_v48 }
 0x999   : > { %6454 = vmatmul.bf16.gmra.mxu2 %v11766_v40  ;;  %v6242_v25 = vpop.f32.mrf.mxu0 }
 0x99a   : > { %6543 = vmatmul.bf16.gmra.mxu3 %v11766_v40  ;;  %v6331_v12 = vpop.f32.mrf.mxu1 }
 0x99b   : > { %v6593_v56 = vmax.f32 %v11799_v37, %v6331_v12 }
 0x99c   : > { %v6415_v19 = vpop.f32.mrf.mxu2  ;;  %6281 = vmatmul.bf16.gmra.mxu0 %v11795_v38 }
 0x99d   : > { %v6504_v31 = vpop.f32.mrf.mxu3  ;;  %v6586_v2 = vmax.f32 %v11801_v59, %v6415_v19  ;;  %6370 = vmatmul.bf16.gmra.mxu1 %v11795_v38 }
 0x99e   : > { %v6587_v55 = vmax.f32 %v11803_v4, %v6504_v31 }
 0x99f   : > { %v6712_v48 = vmax.f32 %v6584_v26, %v6586_v2 }
 0x9a0   : > { %v6713_v42 = vmax.f32 %v6585_v45, %v6587_v55 }
 0x9a1   : > { %v6244_v40 = vpop.f32.mrf.mxu0 }
 0x9a2   : > { %v6776_v44 = vmax.f32 %v6712_v48, %v6713_v42  ;;  %v6333_v24 = vpop.f32.mrf.mxu1  ;;  %v6596_v26 = vmax.f32 %v11809_v63, %v6244_v40 }
 0x9a3   : > { %v6597_v37 = vmax.f32 %v11811_v57, %v6333_v24 }
 0x9a4   : > { %7227 = vmax.xlane.f32.xlu2 %v6776_v44  ;;  %v6417_v3 = vpop.f32.mrf.mxu2  ;;  %v6592_v44 = vmax.f32 %v11797_v11, %v6242_v25 }
 0x9a5   : > { %v6506_v6 = vpop.f32.mrf.mxu3  ;;  %v6590_v59 = vmax.f32 %v11813_v15, %v6417_v3 }
 0x9a6   : > { %v6591_v4 = vmax.f32 %v11815_v5, %v6506_v6 }
 0x9a7   : > { %v6714_v9 = vmax.f32 %v6588_v29, %v6590_v59 }
 0x9a8   : > { %v6715_v31 = vmax.f32 %v6589_v32, %v6591_v4 }
 0x9a9   : > { %6459 = vmatmul.bf16.gmra.mxu2 %v11795_v38  ;;  %v6247_v55 = vpop.f32.mrf.mxu0 }
 0x9aa   : > { %6548 = vmatmul.bf16.gmra.mxu3 %v11795_v38  ;;  %v6777_v48 = vmax.f32 %v6714_v9, %v6715_v31  ;;  %v6336_v2 = vpop.f32.mrf.mxu1  ;;  %v6600_v59 = vmax.f32 %v11826_v41, %v6247_v55 }
 0x9ab   : > { %v6601_v57 = vmax.f32 %v11828_v18, %v6336_v2 }
 0x9ac   : > { %7229 = vmax.xlane.f32.xlu0 %v6777_v48  ;;  %v6420_v45 = vpop.f32.mrf.mxu2  ;;  %6286 = vmatmul.bf16.gmra.mxu0 %v11824_v50 }
 0x9ad   : > { %v6509_v43 = vpop.f32.mrf.mxu3  ;;  %v6594_v15 = vmax.f32 %v11830_v39, %v6420_v45  ;;  %6375 = vmatmul.bf16.gmra.mxu1 %v11824_v50 }
 0x9ae   : > { %v6595_v5 = vmax.f32 %v11832_v33, %v6509_v43 }
 0x9af   : > { %v6716_v52 = vmax.f32 %v6592_v44, %v6594_v15 }
 0x9b0   : > { %v6717_v38 = vmax.f32 %v6593_v56, %v6595_v5 }
 0x9b1   : > { %v6249_v62 = vpop.f32.mrf.mxu0 }
 0x9b2   : > { %v6778_v3 = vmax.f32 %v6716_v52, %v6717_v38  ;;  %v6338_v19 = vpop.f32.mrf.mxu1  ;;  %v6604_v55 = vmax.f32 %v11838_v21, %v6249_v62 }
 0x9b3   : > { %v6605_v18 = vmax.f32 %v11840_v58, %v6338_v19 }
 0x9b4   : > { %7231 = vmax.xlane.f32.xlu1 %v6778_v3  ;;  %v6422_v42 = vpop.f32.mrf.mxu2 }
 0x9b5   : > { %v6511_v11 = vpop.f32.mrf.mxu3  ;;  %v6598_v39 = vmax.f32 %v11842_v46, %v6422_v42 }
 0x9b6   : > { %v6599_v33 = vmax.f32 %v11844_v22, %v6511_v11 }
 0x9b7   : > { %v6718_v12 = vmax.f32 %v6596_v26, %v6598_v39 }
 0x9b8   : > { %v6719_v25 = vmax.f32 %v6597_v37, %v6599_v33 }
 0x9b9   : > { %6464 = vmatmul.bf16.gmra.mxu2 %v11824_v50  ;;  %v6252_v29 = vpop.f32.mrf.mxu0 }
 0x9ba   : > { %6553 = vmatmul.bf16.gmra.mxu3 %v11824_v50  ;;  %v6779_v6 = vmax.f32 %v6718_v12, %v6719_v25  ;;  %v6341_v32 = vpop.f32.mrf.mxu1  ;;  %v6608_v15 = vmax.f32 %v11855_v47, %v6252_v29 }
 0x9bb   : > { %v6609_v58 = vmax.f32 %v11857_v30, %v6341_v32 }
 0x9bc   : > { %7233 = vmax.xlane.f32.xlu2 %v6779_v6  ;;  %v6425_v4 = vpop.f32.mrf.mxu2  ;;  %6291 = vmatmul.bf16.gmra.mxu0 %v11853_v54 }
 0x9bd   : > { %v6514_v63 = vpop.f32.mrf.mxu3  ;;  %v6602_v46 = vmax.f32 %v11859_v60, %v6425_v4  ;;  %6380 = vmatmul.bf16.gmra.mxu1 %v11853_v54 }
 0x9be   : > { %v6603_v22 = vmax.f32 %v11861_v36, %v6514_v63 }
 0x9bf   : > { %v6720_v24 = vmax.f32 %v6600_v59, %v6602_v46 }
 0x9c0   : > { %v6721_v50 = vmax.f32 %v6601_v57, %v6603_v22 }
 0x9c1   : > { %v6254_v9 = vpop.f32.mrf.mxu0 }
 0x9c2   : > { %v6780_v40 = vmax.f32 %v6720_v24, %v6721_v50  ;;  %v6343_v31 = vpop.f32.mrf.mxu1  ;;  %v6612_v42 = vmax.f32 %v11867_v28, %v6254_v9 }
 0x9c3   : > { %v6613_v30 = vmax.f32 %v11869_v51, %v6343_v31  ;;  %v13569_v31 = vld [vmem:[#allocation71_spill] sm:$0xff] }
 0x9c4   : > { %7235 = vmax.xlane.f32.xlu0 %v6780_v40  ;;  %v6427_v48 = vpop.f32.mrf.mxu2 }
 0x9c5   : > { %v6516_v41 = vpop.f32.mrf.mxu3  ;;  %v6606_v60 = vmax.f32 %v11871_v27, %v6427_v48  ;;  %v13570_v48 = vld [vmem:[#allocation138_spill] sm:$0xff] }
 0x9c6   : > { %v6607_v36 = vmax.f32 %v11873_v53, %v6516_v41  ;;  %v13571_v41 = vld [vmem:[#allocation139_spill] sm:$0xff] }
 0x9c7   : > { %v6722_v2 = vmax.f32 %v6604_v55, %v6606_v60  ;;  %v13572_v55 = vld [vmem:[#allocation135_spill] sm:$0xff] }
 0x9c8   : > { %v6723_v44 = vmax.f32 %v6605_v18, %v6607_v36 }
 0x9c9   : > { %6469 = vmatmul.bf16.gmra.mxu2 %v11853_v54  ;;  %v6257_v43 = vpop.f32.mrf.mxu0 }
 0x9ca   : > { %6558 = vmatmul.bf16.gmra.mxu3 %v11853_v54  ;;  %v6781_v45 = vmax.f32 %v6722_v2, %v6723_v44  ;;  %v6346_v56 = vpop.f32.mrf.mxu1  ;;  %v6616_v12 = vmax.f32 %v11884_v13, %v6257_v43 }
 0x9cb   : > { %v6617_v51 = vmax.f32 %v11886_v0, %v6346_v56  ;;  %v13574_v56 = vld [vmem:[#allocation134_spill] sm:$0xff] }
 0x9cc   : > { %7237 = vmax.xlane.f32.xlu1 %v6781_v45  ;;  %v6430_v5 = vpop.f32.mrf.mxu2  ;;  %6296 = vmatmul.bf16.gmra.mxu0 %v11882_v61  ;;  %v13573_v45 = vld [vmem:[#allocation118_spill] sm:$0xff] }
 0x9cd   : > { %v6519_v21 = vpop.f32.mrf.mxu3  ;;  %v6610_v27 = vmax.f32 %v11888_v1, %v6430_v5  ;;  %6385 = vmatmul.bf16.gmra.mxu1 %v11882_v61  ;;  %v13575_v5 = vld [vmem:[#allocation142_spill] sm:$0xff] }
 0x9ce   : > { %v6611_v53 = vmax.f32 %v11890_v23, %v6519_v21 }
 0x9cf   : > { %v6724_v52 = vmax.f32 %v6608_v15, %v6610_v27 }
 0x9d0   : > { %v6725_v54 = vmax.f32 %v6609_v58, %v6611_v53  ;;  %v13576_v58 = vld [vmem:[#allocation143_spill] sm:$0xff] }
 0x9d1   : > { %v6259_v3 = vpop.f32.mrf.mxu0 }
 0x9d2   : > { %v6782_v38 = vmax.f32 %v6724_v52, %v6725_v54  ;;  %v6348_v62 = vpop.f32.mrf.mxu1  ;;  %v6620_v63 = vmax.f32 %v11896_v8, %v6259_v3 }
 0x9d3   : > { %v6621_v0 = vmax.f32 %v11898_v20, %v6348_v62  ;;  %v13577_v62 = vld [vmem:[#allocation120_spill] sm:$0xff] }
 0x9d4   : > { %7239 = vmax.xlane.f32.xlu2 %v6782_v38  ;;  %v6432_v19 = vpop.f32.mrf.mxu2 }
 0x9d5   : > { %v6521_v47 = vpop.f32.mrf.mxu3  ;;  %v6614_v1 = vmax.f32 %v11900_v34, %v6432_v19 }
 0x9d6   : > { %v6615_v23 = vmax.f32 %v11902_v14, %v6521_v47 }
 0x9d7   : > { %v6726_v11 = vmax.f32 %v6612_v42, %v6614_v1 }
 0x9d8   : > { %v6727_v26 = vmax.f32 %v6613_v30, %v6615_v23  ;;  %v13578_v30 = vld [vmem:[#allocation121_spill] sm:$0xff]  ;;  %v13579_v23 = vld [vmem:[#allocation147_spill] sm:$0xff] }
 0x9d9   : > { %6474 = vmatmul.bf16.gmra.mxu2 %v11882_v61  ;;  %v6262_v39 = vpop.f32.mrf.mxu0 }
 0x9da   : > { %6563 = vmatmul.bf16.gmra.mxu3 %v11882_v61  ;;  %v6783_v37 = vmax.f32 %v6726_v11, %v6727_v26  ;;  %v6351_v33 = vpop.f32.mrf.mxu1  ;;  %v6624_v40 = vmax.f32 %v11913_v10, %v6262_v39  ;;  %v13580_v26 = vld [vmem:[#allocation132_spill] sm:$0xff] }
 0x9db   : > { %v6625_v20 = vmax.f32 %v13569_v31, %v6351_v33  ;;  %v13581_v39 = vld [vmem:[#allocation128_spill] sm:$0xff]  ;;  %v13588_v31 = vld [vmem:[#allocation153_spill] sm:$0xff] }
 0x9dc   : > { %7241 = vmax.xlane.f32.xlu0 %v6783_v37  ;;  %v6435_v25 = vpop.f32.mrf.mxu2  ;;  %6301 = vmatmul.bf16.gmra.mxu0 %v11911_v16 }
 0x9dd   : > { %v6524_v28 = vpop.f32.mrf.mxu3  ;;  %v6618_v34 = vmax.f32 %v11917_v49, %v6435_v25  ;;  %6390 = vmatmul.bf16.gmra.mxu1 %v11911_v16 }
 0x9de   : > { %v6619_v14 = vmax.f32 %v11919_v35, %v6524_v28 }
 0x9df   : > { %v6728_v6 = vmax.f32 %v6616_v12, %v6618_v34 }
 0x9e0   : > { %v6729_v61 = vmax.f32 %v6617_v51, %v6619_v14 }
 0x9e1   : > { %v6264_v32 = vpop.f32.mrf.mxu0 }
 0x9e2   : > { %v6784_v29 = vmax.f32 %v6728_v6, %v6729_v61  ;;  %v6353_v59 = vpop.f32.mrf.mxu1  ;;  %v6628_v43 = vmax.f32 %v13573_v45, %v6264_v32  ;;  %v13582_v6 = vld [vmem:[#allocation124_spill] sm:$0xff] }
 0x9e3   : > { %v6629_v15 = vmax.f32 %v13574_v56, %v6353_v59  ;;  %v13584_v59 = vld [vmem:[#allocation151_spill] sm:$0xff] }
 0x9e4   : > { %7243 = vmax.xlane.f32.xlu1 %v6784_v29  ;;  %v6437_v4 = vpop.f32.mrf.mxu2  ;;  %v13583_v29 = vld [vmem:[#allocation125_spill] sm:$0xff] }
 0x9e5   : > { %v6526_v13 = vpop.f32.mrf.mxu3  ;;  %v6622_v49 = vmax.f32 %v11929_v17, %v6437_v4 }
 0x9e6   : > { %v6623_v35 = vmax.f32 %v11931_v7, %v6526_v13  ;;  %v13585_v13 = vld [vmem:[#allocation136_spill] sm:$0xff] }
 0x9e7   : > { %v6730_v57 = vmax.f32 %v6620_v63, %v6622_v49 }
 0x9e8   : > { %v6731_v46 = vmax.f32 %v6621_v0, %v6623_v35 }
 0x9e9   : > { %6479 = vmatmul.bf16.gmra.mxu2 %v11911_v16  ;;  %v6267_v24 = vpop.f32.mrf.mxu0 }
 0x9ea   : > { %6568 = vmatmul.bf16.gmra.mxu3 %v11911_v16  ;;  %v6785_v22 = vmax.f32 %v6730_v57, %v6731_v46  ;;  %v6356_v50 = vpop.f32.mrf.mxu1  ;;  %v6632_v19 = vmax.f32 %v13577_v62, %v6267_v24  ;;  %v13594_v62 = vld [vmem:[#allocation137_spill] sm:$0xff] }
 0x9eb   : > { %v6633_v1 = vmax.f32 %v13578_v30, %v6356_v50  ;;  %v13586_v50 = vld [vmem:[#allocation129_spill] sm:$0xff]  ;;  %v13596_v30 = vld [vmem:[#allocation155_spill] sm:$0xff] }
 0x9ec   : > { %7245 = vmax.xlane.f32.xlu2 %v6785_v22  ;;  %v6440_v9 = vpop.f32.mrf.mxu2  ;;  %6306 = vmatmul.bf16.gmra.mxu0 %v13572_v55 }
 0x9ed   : > { %v6529_v8 = vpop.f32.mrf.mxu3  ;;  %v6626_v17 = vmax.f32 %v13570_v48, %v6440_v9  ;;  %6395 = vmatmul.bf16.gmra.mxu1 %v13572_v55  ;;  %v13587_v9 = vld [vmem:[#allocation146_spill] sm:$0xff]  ;;  %v13589_v48 = vld [vmem:[#allocation140_spill] sm:$0xff] }
 0x9ee   : > { %v6627_v7 = vmax.f32 %v13571_v41, %v6529_v8 }
 0x9ef   : > { %v6732_v18 = vmax.f32 %v6624_v40, %v6626_v17 }
 0x9f0   : > { %v6733_v16 = vmax.f32 %v6625_v20, %v6627_v7 }
 0x9f1   : > { %v6269_v36 = vpop.f32.mrf.mxu0 }
 0x9f2   : > { %v6786_v60 = vmax.f32 %v6732_v18, %v6733_v16  ;;  %v6358_v2 = vpop.f32.mrf.mxu1  ;;  %v6636_v61 = vmax.f32 %v13582_v6, %v6269_v36  ;;  %v13599_v6 = vld [vmem:[#allocation148_spill] sm:$0xff] }
 0x9f3   : > { %v6637_v32 = vmax.f32 %v13583_v29, %v6358_v2  ;;  %v13590_v2 = vld [vmem:[#allocation133_spill] sm:$0xff]  ;;  %v13600_v29 = vld [vmem:[#allocation6_spill] sm:$0xff] }
 0x9f4   : > { %7247 = vmax.xlane.f32.xlu0 %v6786_v60  ;;  %v6442_v44 = vpop.f32.mrf.mxu2 }
 0x9f5   : > { %v6531_v10 = vpop.f32.mrf.mxu3  ;;  %v6630_v21 = vmax.f32 %v13575_v5, %v6442_v44 }
 0x9f6   : > { %v6631_v27 = vmax.f32 %v13576_v58, %v6531_v10  ;;  %v13591_v10 = vld [vmem:[#allocation150_spill] sm:$0xff] }
 0x9f7   : > { %v6734_v53 = vmax.f32 %v6628_v43, %v6630_v21  ;;  %v13592_v43 = vld [vmem:[#allocation149_spill] sm:$0xff] }
 0x9f8   : > { %v6735_v52 = vmax.f32 %v6629_v15, %v6631_v27  ;;  %v13593_v15 = vld [vmem:[#allocation144_spill] sm:$0xff] }
 0x9f9   : > { %6484 = vmatmul.bf16.gmra.mxu2 %v13572_v55  ;;  %v6272_v38 = vpop.f32.mrf.mxu0 }
 0x9fa   : > { %6573 = vmatmul.bf16.gmra.mxu3 %v13572_v55  ;;  %v6787_v54 = vmax.f32 %v6734_v53, %v6735_v52  ;;  %v6361_v3 = vpop.f32.mrf.mxu1  ;;  %v6640_v40 = vmax.f32 %v13586_v50, %v6272_v38 }
 0x9fb   : > { %v6641_v8 = vmax.f32 %v13587_v9, %v6361_v3 }
 0x9fc   : > { %7249 = vmax.xlane.f32.xlu1 %v6787_v54  ;;  %v6445_v47 = vpop.f32.mrf.mxu2  ;;  %6311 = vmatmul.bf16.gmra.mxu0 %v13581_v39 }
 0x9fd   : > { %v6534_v42 = vpop.f32.mrf.mxu3  ;;  %v6634_v11 = vmax.f32 %v13579_v23, %v6445_v47  ;;  %6400 = vmatmul.bf16.gmra.mxu1 %v13581_v39  ;;  %v13595_v47 = vld [vmem:[#allocation152_spill] sm:$0xff] }
 0x9fe   : > { %v6635_v37 = vmax.f32 %v13580_v26, %v6534_v42  ;;  %v13597_v23 = vld [vmem:[#allocation8_spill] sm:$0xff] }
 0x9ff   : > { %v6736_v33 = vmax.f32 %v6632_v19, %v6634_v11 }
 0xa00   : > { %v6737_v12 = vmax.f32 %v6633_v1, %v6635_v37 }
 0xa01   : > { %v6274_v28 = vpop.f32.mrf.mxu0 }
 0xa02   : > { %v6788_v25 = vmax.f32 %v6736_v33, %v6737_v12  ;;  %v6363_v51 = vpop.f32.mrf.mxu1  ;;  %v6644_v44 = vmax.f32 %v13590_v2, %v6274_v28  ;;  %v13606_v2 = vld [vmem:[#allocation74_spill] sm:$0xff] }
 0xa03   : > { %v6645_v45 = vmax.f32 %v13591_v10, %v6363_v51  ;;  %v13607_v10 = vld [vmem:[#allocation4_spill] sm:$0xff] }
 0xa04   : > { %7251 = vmax.xlane.f32.xlu2 %v6788_v25  ;;  %v6447_v34 = vpop.f32.mrf.mxu2 }
 0xa05   : > { %v6536_v14 = vpop.f32.mrf.mxu3  ;;  %v6638_v4 = vmax.f32 %v13584_v59, %v6447_v34  ;;  %v13598_v34 = vld [vmem:[#allocation141_spill] sm:$0xff] }
 0xa06   : > { %v6639_v63 = vmax.f32 %v13585_v13, %v6536_v14  ;;  %v13601_v59 = vld [vmem:[#allocation5_spill] sm:$0xff] }
 0xa07   : > { %v6738_v0 = vmax.f32 %v6636_v61, %v6638_v4 }
 0xa08   : > { %v6739_v49 = vmax.f32 %v6637_v32, %v6639_v63 }
 0xa09   : > { %6489 = vmatmul.bf16.gmra.mxu2 %v13581_v39  ;;  %v6277_v57 = vpop.f32.mrf.mxu0 }
 0xa0a   : > { %6578 = vmatmul.bf16.gmra.mxu3 %v13581_v39  ;;  %v6789_v35 = vmax.f32 %v6738_v0, %v6739_v49  ;;  %v6366_v46 = vpop.f32.mrf.mxu1  ;;  %v6648_v19 = vmax.f32 %v13594_v62, %v6277_v57  ;;  %v13610_v62 = vld [vmem:[#allocation83_spill] sm:$0xff] }
 0xa0b   : > { %v6649_v42 = vmax.f32 %v13595_v47, %v6366_v46  ;;  %v13611_v47 = vld [vmem:[#allocation81_spill] sm:$0xff] }
 0xa0c   : > { %7253 = vmax.xlane.f32.xlu0 %v6789_v35  ;;  %v6450_v22 = vpop.f32.mrf.mxu2 }
 0xa0d   : > { %v6539_v24 = vpop.f32.mrf.mxu3  ;;  %v6642_v20 = vmax.f32 %v13588_v31, %v6450_v22 }
 0xa0e   : > { %v6643_v17 = vmax.f32 %v13589_v48, %v6539_v24  ;;  %v13602_v24 = vld [vmem:[#allocation145_spill] sm:$0xff] }
 0xa0f   : > { %v6740_v41 = vmax.f32 %v6640_v40, %v6642_v20  ;;  %v13603_v40 = vld [vmem:[#allocation154_spill] sm:$0xff]  ;;  %v13605_v20 = vld [vmem:[#allocation11_spill] sm:$0xff] }
 0xa10   : > { %v6741_v7 = vmax.f32 %v6641_v8, %v6643_v17  ;;  %v13604_v8 = vld [vmem:[#allocation82_spill] sm:$0xff] }
 0xa11   : > { %v6279_v18 = vpop.f32.mrf.mxu0 }
 0xa12   : > { %v6790_v55 = vmax.f32 %v6740_v41, %v6741_v7  ;;  %v6368_v16 = vpop.f32.mrf.mxu1  ;;  %v6652_v14 = vmax.f32 %v13598_v34, %v6279_v18  ;;  %v13614_v34 = vld [vmem:[#allocation12_spill] sm:$0xff] }
 0xa13   : > { %v6653_v61 = vmax.f32 %v13599_v6, %v6368_v16  ;;  %v13615_v6 = vld [vmem:[#allocation10_spill] sm:$0xff] }
 0xa14   : > { %7255 = vmax.xlane.f32.xlu1 %v6790_v55  ;;  %v6452_v60 = vpop.f32.mrf.mxu2 }
 0xa15   : > { %v6541_v36 = vpop.f32.mrf.mxu3  ;;  %v6646_v56 = vmax.f32 %v13592_v43, %v6452_v60  ;;  %v13608_v43 = vld [vmem:[#allocation3_spill] sm:$0xff] }
 0xa16   : > { %v6647_v5 = vmax.f32 %v13593_v15, %v6541_v36  ;;  %v13609_v15 = vld [vmem:[#allocation79_spill] sm:$0xff] }
 0xa17   : > { %v7228_v21 = vpop.xlane.xlu2 %7227  ;;  %v6742_v58 = vmax.f32 %v6644_v44, %v6646_v56 }
 0xa18   : > { %v6743_v27 = vmax.f32 %v6645_v45, %v6647_v5  ;;  %7388 = vst.msk [vmem:[%s10150_s17 + $0x300] sm:$0xff] %vm7291_vm4, %v7228_v21 }
 0xa19   : > { %v6282_v52 = vpop.f32.mrf.mxu0 }
 0xa1a   : > { %v6791_v53 = vmax.f32 %v6742_v58, %v6743_v27  ;;  %v6371_v54 = vpop.f32.mrf.mxu1  ;;  %v6656_v50 = vmax.f32 %v13602_v24, %v6282_v52  ;;  %v13618_v24 = vld [vmem:[#allocation80_spill] sm:$0xff] }
 0xa1b   : > { %v6657_v9 = vmax.f32 %v13603_v40, %v6371_v54  ;;  %v13619_v40 = vld [vmem:[#allocation7_spill] sm:$0xff] }
 0xa1c   : > { %7257 = vmax.xlane.f32.xlu2 %v6791_v53  ;;  %v6455_v38 = vpop.f32.mrf.mxu2 }
 0xa1d   : > { %v6544_v3 = vpop.f32.mrf.mxu3  ;;  %v6650_v1 = vmax.f32 %v13596_v30, %v6455_v38  ;;  %v13612_v30 = vld [vmem:[#allocation77_spill] sm:$0xff] }
 0xa1e   : > { %v6651_v11 = vmax.f32 %v13597_v23, %v6544_v3  ;;  %v13613_v23 = vld [vmem:[#allocation78_spill] sm:$0xff] }
 0xa1f   : > { %v7230_v26 = vpop.xlane.xlu0 %7229  ;;  %v6744_v37 = vmax.f32 %v6648_v19, %v6650_v1 }
 0xa20   : > { %v6745_v39 = vmax.f32 %v6649_v42, %v6651_v11  ;;  %7389 = vst.msk [vmem:[%s10150_s17 + $0x308] sm:$0xff] %vm7291_vm4, %v7230_v26 }
 0xa21   : > { %v6284_v12 = vpop.f32.mrf.mxu0 }
 0xa22   : > { %v6792_v33 = vmax.f32 %v6744_v37, %v6745_v39  ;;  %v6373_v25 = vpop.f32.mrf.mxu1  ;;  %v6660_v44 = vmax.f32 %v13606_v2, %v6284_v12  ;;  %v13623_v2 = vld [vmem:[#allocation15_spill] sm:$0xff] }
 0xa23   : > { %v6661_v45 = vmax.f32 %v13607_v10, %v6373_v25 }
 0xa24   : > { %7259 = vmax.xlane.f32.xlu0 %v6792_v33  ;;  %v6457_v28 = vpop.f32.mrf.mxu2 }
 0xa25   : > { %v6546_v51 = vpop.f32.mrf.mxu3  ;;  %v6654_v32 = vmax.f32 %v13600_v29, %v6457_v28  ;;  %v13616_v29 = vld [vmem:[#allocation75_spill] sm:$0xff] }
 0xa26   : > { %v6655_v4 = vmax.f32 %v13601_v59, %v6546_v51  ;;  %v13617_v59 = vld [vmem:[#allocation76_spill] sm:$0xff] }
 0xa27   : > { %v7232_v13 = vpop.xlane.xlu1 %7231  ;;  %v6746_v63 = vmax.f32 %v6652_v14, %v6654_v32 }
 0xa28   : > { %v6747_v0 = vmax.f32 %v6653_v61, %v6655_v4  ;;  %7390 = vst.msk [vmem:[%s10150_s17 + $0x310] sm:$0xff] %vm7291_vm4, %v7232_v13 }
 0xa29   : > { %v6287_v35 = vpop.f32.mrf.mxu0 }
 0xa2a   : > { %v6793_v49 = vmax.f32 %v6746_v63, %v6747_v0  ;;  %v6376_v57 = vpop.f32.mrf.mxu1  ;;  %v6664_v19 = vmax.f32 %v13610_v62, %v6287_v35  ;;  %v13627_v62 = vld [vmem:[#allocation9_spill] sm:$0xff] }
 0xa2b   : > { %v6665_v42 = vmax.f32 %v13611_v47, %v6376_v57  ;;  %v13628_v47 = vld [vmem:[#allocation63_spill] sm:$0xff] }
 0xa2c   : > { %7261 = vmax.xlane.f32.xlu1 %v6793_v49  ;;  %v6460_v46 = vpop.f32.mrf.mxu2 }
 0xa2d   : > { %v6549_v22 = vpop.f32.mrf.mxu3  ;;  %v6658_v31 = vmax.f32 %v13604_v8, %v6460_v46  ;;  %v13620_v8 = vld [vmem:[#allocation69_spill] sm:$0xff] }
 0xa2e   : > { %v6659_v48 = vmax.f32 %v13605_v20, %v6549_v22  ;;  %v13621_v20 = vld [vmem:[#allocation70_spill] sm:$0xff] }
 0xa2f   : > { %v7234_v17 = vpop.xlane.xlu2 %7233  ;;  %v6748_v41 = vmax.f32 %v6656_v50, %v6658_v31 }
 0xa30   : > { %v6749_v7 = vmax.f32 %v6657_v9, %v6659_v48  ;;  %7391 = vst.msk [vmem:[%s10150_s17 + $0x318] sm:$0xff] %vm7291_vm4, %v7234_v17 }
 0xa31   : > { %v6289_v18 = vpop.f32.mrf.mxu0 }
 0xa32   : > { %v6794_v55 = vmax.f32 %v6748_v41, %v6749_v7  ;;  %v6378_v16 = vpop.f32.mrf.mxu1  ;;  %v6668_v14 = vmax.f32 %v13614_v34, %v6289_v18  ;;  %v13631_v34 = vld [vmem:[#allocation68_spill] sm:$0xff] }
 0xa33   : > { %v6669_v61 = vmax.f32 %v13615_v6, %v6378_v16  ;;  %v13632_v6 = vld [vmem:[#allocation87_spill] sm:$0xff] }
 0xa34   : > { %7263 = vmax.xlane.f32.xlu2 %v6794_v55  ;;  %v6462_v60 = vpop.f32.mrf.mxu2 }
 0xa35   : > { %v6551_v36 = vpop.f32.mrf.mxu3  ;;  %v6662_v56 = vmax.f32 %v13608_v43, %v6462_v60  ;;  %v13622_v60 = vld [vmem:[#allocation72_spill] sm:$0xff] }
 0xa36   : > { %v6663_v5 = vmax.f32 %v13609_v15, %v6551_v36  ;;  %v13624_v43 = vld [vmem:[#allocation64_spill] sm:$0xff]  ;;  %v13625_v15 = vld [vmem:[#allocation65_spill] sm:$0xff] }
 0xa37   : > { %v7236_v21 = vpop.xlane.xlu0 %7235  ;;  %v6750_v58 = vmax.f32 %v6660_v44, %v6662_v56 }
 0xa38   : > { %v6751_v27 = vmax.f32 %v6661_v45, %v6663_v5  ;;  %7392 = vst.msk [vmem:[%s10150_s17 + $0x320] sm:$0xff] %vm7291_vm4, %v7236_v21 }
 0xa39   : > { %v6292_v52 = vpop.f32.mrf.mxu0 }
 0xa3a   : > { %v6795_v53 = vmax.f32 %v6750_v58, %v6751_v27  ;;  %v6381_v54 = vpop.f32.mrf.mxu1  ;;  %v6672_v50 = vmax.f32 %v13618_v24, %v6292_v52  ;;  %v13635_v24 = vld [vmem:[#allocation16_spill] sm:$0xff] }
 0xa3b   : > { %v6673_v9 = vmax.f32 %v13619_v40, %v6381_v54  ;;  %v13636_v40 = vld [vmem:[#allocation90_spill] sm:$0xff] }
 0xa3c   : > { %7265 = vmax.xlane.f32.xlu0 %v6795_v53  ;;  %v6465_v38 = vpop.f32.mrf.mxu2 }
 0xa3d   : > { %v6554_v3 = vpop.f32.mrf.mxu3  ;;  %v6666_v1 = vmax.f32 %v13612_v30, %v6465_v38  ;;  %v13626_v38 = vld [vmem:[#allocation73_spill] sm:$0xff]  ;;  %v13629_v30 = vld [vmem:[#allocation59_spill] sm:$0xff] }
 0xa3e   : > { %v6667_v11 = vmax.f32 %v13613_v23, %v6554_v3 }
 0xa3f   : > { %v7238_v26 = vpop.xlane.xlu1 %7237  ;;  %v6752_v37 = vmax.f32 %v6664_v19, %v6666_v1 }
 0xa40   : > { %v6753_v39 = vmax.f32 %v6665_v42, %v6667_v11  ;;  %7393 = vst.msk [vmem:[%s10150_s17 + $0x328] sm:$0xff] %vm7291_vm4, %v7238_v26 }
 0xa41   : > { %v6294_v12 = vpop.f32.mrf.mxu0 }
 0xa42   : > { %v6796_v33 = vmax.f32 %v6752_v37, %v6753_v39  ;;  %v6383_v25 = vpop.f32.mrf.mxu1  ;;  %v6676_v36 = vmax.f32 %v13622_v60, %v6294_v12  ;;  %v13638_v60 = vld [vmem:[#allocation14_spill] sm:$0xff] }
 0xa43   : > { %v6677_v44 = vmax.f32 %v13623_v2, %v6383_v25  ;;  %v13639_v2 = vld [vmem:[#allocation86_spill] sm:$0xff] }
 0xa44   : > { %7267 = vmax.xlane.f32.xlu1 %v6796_v33  ;;  %v6467_v28 = vpop.f32.mrf.mxu2 }
 0xa45   : > { %v6556_v51 = vpop.f32.mrf.mxu3  ;;  %v6670_v32 = vmax.f32 %v13616_v29, %v6467_v28  ;;  %v13630_v28 = vld [vmem:[#allocation67_spill] sm:$0xff]  ;;  %v13633_v29 = vld [vmem:[#allocation56_spill] sm:$0xff] }
 0xa46   : > { %v6671_v4 = vmax.f32 %v13617_v59, %v6556_v51 }
 0xa47   : > { %v7240_v13 = vpop.xlane.xlu2 %7239  ;;  %v6754_v63 = vmax.f32 %v6668_v14, %v6670_v32 }
 0xa48   : > { %v6755_v0 = vmax.f32 %v6669_v61, %v6671_v4  ;;  %7394 = vst.msk [vmem:[%s10150_s17 + $0x330] sm:$0xff] %vm7291_vm4, %v7240_v13 }
 0xa49   : > { %v6297_v35 = vpop.f32.mrf.mxu0 }
 0xa4a   : > { %v6797_v49 = vmax.f32 %v6754_v63, %v6755_v0  ;;  %v6386_v57 = vpop.f32.mrf.mxu1  ;;  %v6680_v3 = vmax.f32 %v13626_v38, %v6297_v35  ;;  %v13643_v38 = vld [vmem:[#allocation22_spill] sm:$0xff] }
 0xa4b   : > { %v6681_v19 = vmax.f32 %v13627_v62, %v6386_v57 }
 0xa4c   : > { %7269 = vmax.xlane.f32.xlu2 %v6797_v49  ;;  %v6470_v46 = vpop.f32.mrf.mxu2 }
 0xa4d   : > { %v6559_v22 = vpop.f32.mrf.mxu3  ;;  %v6674_v31 = vmax.f32 %v13620_v8, %v6470_v46  ;;  %v13634_v46 = vld [vmem:[#allocation62_spill] sm:$0xff]  ;;  %v13637_v8 = vld [vmem:[#allocation91_spill] sm:$0xff] }
 0xa4e   : > { %v6675_v48 = vmax.f32 %v13621_v20, %v6559_v22 }
 0xa4f   : > { %v7242_v17 = vpop.xlane.xlu0 %7241  ;;  %v6756_v41 = vmax.f32 %v6672_v50, %v6674_v31 }
 0xa50   : > { %v6757_v7 = vmax.f32 %v6673_v9, %v6675_v48  ;;  %7395 = vst.msk [vmem:[%s10150_s17 + $0x338] sm:$0xff] %vm7291_vm4, %v7242_v17 }
 0xa51   : > { %v6299_v10 = vpop.f32.mrf.mxu0 }
 0xa52   : > { %v6798_v55 = vmax.f32 %v6756_v41, %v6757_v7  ;;  %v6388_v45 = vpop.f32.mrf.mxu1  ;;  %v6684_v51 = vmax.f32 %v13630_v28, %v6299_v10  ;;  %v13640_v10 = vld [vmem:[#allocation95_spill] sm:$0xff]  ;;  %v13647_v28 = vld [vmem:[#allocation49_spill] sm:$0xff] }
 0xa53   : > { %v6685_v14 = vmax.f32 %v13631_v34, %v6388_v45  ;;  %v13648_v34 = vld [vmem:[#allocation21_spill] sm:$0xff] }
 0xa54   : > { %7271 = vmax.xlane.f32.xlu0 %v6798_v55  ;;  %v6472_v18 = vpop.f32.mrf.mxu2 }
 0xa55   : > { %v6561_v16 = vpop.f32.mrf.mxu3  ;;  %v6678_v56 = vmax.f32 %v13624_v43, %v6472_v18  ;;  %v13641_v43 = vld [vmem:[#allocation96_spill] sm:$0xff] }
 0xa56   : > { %v6679_v5 = vmax.f32 %v13625_v15, %v6561_v16 }
 0xa57   : > { %v7244_v21 = vpop.xlane.xlu1 %7243  ;;  %v6758_v58 = vmax.f32 %v6676_v36, %v6678_v56 }
 0xa58   : > { %v6759_v27 = vmax.f32 %v6677_v44, %v6679_v5  ;;  %7396 = vst.msk [vmem:[%s10150_s17 + $0x340] sm:$0xff] %vm7291_vm4, %v7244_v21 }
 0xa59   : > { %v6302_v11 = vpop.f32.mrf.mxu0 }
 0xa5a   : > { %v6799_v53 = vmax.f32 %v6758_v58, %v6759_v27  ;;  %v6391_v26 = vpop.f32.mrf.mxu1  ;;  %v6688_v22 = vmax.f32 %v13634_v46, %v6302_v11  ;;  %v13651_v46 = vld [vmem:[#allocation60_spill] sm:$0xff] }
 0xa5b   : > { %v6689_v50 = vmax.f32 %v13635_v24, %v6391_v26  ;;  %v13652_v24 = vld [vmem:[#allocation42_spill] sm:$0xff] }
 0xa5c   : > { %7273 = vmax.xlane.f32.xlu1 %v6799_v53  ;;  %v6475_v52 = vpop.f32.mrf.mxu2 }
 0xa5d   : > { %v6564_v54 = vpop.f32.mrf.mxu3  ;;  %v6682_v42 = vmax.f32 %v13628_v47, %v6475_v52  ;;  %v13642_v52 = vld [vmem:[#allocation18_spill] sm:$0xff] }
 0xa5e   : > { %v6683_v1 = vmax.f32 %v13629_v30, %v6564_v54 }
 0xa5f   : > { %v7246_v23 = vpop.xlane.xlu2 %7245  ;;  %v6760_v37 = vmax.f32 %v6680_v3, %v6682_v42  ;;  %v13645_v42 = vld [vmem:[#allocation89_spill] sm:$0xff] }
 0xa60   : > { %v6761_v39 = vmax.f32 %v6681_v19, %v6683_v1  ;;  %7397 = vst.msk [vmem:[%s10150_s17 + $0x348] sm:$0xff] %vm7291_vm4, %v7246_v23  ;;  %v13644_v19 = vld [vmem:[#allocation13_spill] sm:$0xff] }
 0xa61   : > { %v6304_v63 = vpop.f32.mrf.mxu0 }
 0xa62   : > { %v6800_v33 = vmax.f32 %v6760_v37, %v6761_v39  ;;  %v6393_v0 = vpop.f32.mrf.mxu1  ;;  %v6692_v36 = vmax.f32 %v13638_v60, %v6304_v63  ;;  %v13655_v60 = vld [vmem:[#allocation55_spill] sm:$0xff] }
 0xa63   : > { %v6693_v44 = vmax.f32 %v13639_v2, %v6393_v0  ;;  %v13656_v2 = vld [vmem:[#allocation50_spill] sm:$0xff] }
 0xa64   : > { %7275 = vmax.xlane.f32.xlu2 %v6800_v33  ;;  %v6477_v12 = vpop.f32.mrf.mxu2 }
 0xa65   : > { %v6566_v25 = vpop.f32.mrf.mxu3  ;;  %v6686_v61 = vmax.f32 %v13632_v6, %v6477_v12  ;;  %v13646_v12 = vld [vmem:[#allocation17_spill] sm:$0xff] }
 0xa66   : > { %v6687_v32 = vmax.f32 %v13633_v29, %v6566_v25  ;;  %v13649_v6 = vld [vmem:[#allocation41_spill] sm:$0xff] }
 0xa67   : > { %v7248_v59 = vpop.xlane.xlu0 %7247  ;;  %v6762_v4 = vmax.f32 %v6684_v51, %v6686_v61 }
 0xa68   : > { %v6763_v13 = vmax.f32 %v6685_v14, %v6687_v32  ;;  %7398 = vst.msk [vmem:[%s10150_s17 + $0x350] sm:$0xff] %vm7291_vm4, %v7248_v59 }
 0xa69   : > { %v6307_v7 = vpop.f32.mrf.mxu0 }
 0xa6a   : > { %v6801_v49 = vmax.f32 %v6762_v4, %v6763_v13  ;;  %v6396_v55 = vpop.f32.mrf.mxu1  ;;  %v6696_v54 = vmax.f32 %v13642_v52, %v6307_v7 }
 0xa6b   : > { %v6697_v3 = vmax.f32 %v13643_v38, %v6396_v55 }
 0xa6c   : > { %7277 = vmax.xlane.f32.xlu0 %v6801_v49  ;;  %v6480_v35 = vpop.f32.mrf.mxu2 }
 0xa6d   : > { %v6569_v57 = vpop.f32.mrf.mxu3  ;;  %v6690_v9 = vmax.f32 %v13636_v40, %v6480_v35  ;;  %v13650_v35 = vld [vmem:[#allocation85_spill] sm:$0xff]  ;;  %v13653_v40 = vld [vmem:[#allocation19_spill] sm:$0xff] }
 0xa6e   : > { %v6691_v31 = vmax.f32 %v13637_v8, %v6569_v57 }
 0xa6f   : > { %v7250_v20 = vpop.xlane.xlu1 %7249  ;;  %v6764_v48 = vmax.f32 %v6688_v22, %v6690_v9 }
 0xa70   : > { %v6765_v17 = vmax.f32 %v6689_v50, %v6691_v31  ;;  %7399 = vst.msk [vmem:[%s10150_s17 + $0x358] sm:$0xff] %vm7291_vm4, %v7250_v20 }
 0xa71   : > { %v6309_v62 = vpop.f32.mrf.mxu0 }
 0xa72   : > { %v6802_v41 = vmax.f32 %v6764_v48, %v6765_v17  ;;  %v6398_v1 = vpop.f32.mrf.mxu1  ;;  %v6700_v25 = vmax.f32 %v13646_v12, %v6309_v62 }
 0xa73   : > { %v6701_v51 = vmax.f32 %v13647_v28, %v6398_v1 }
 0xa74   : > { %7279 = vmax.xlane.f32.xlu1 %v6802_v41  ;;  %v6482_v18 = vpop.f32.mrf.mxu2 }
 0xa75   : > { %v6571_v16 = vpop.f32.mrf.mxu3  ;;  %v6694_v45 = vmax.f32 %v13640_v10, %v6482_v18  ;;  %v13654_v18 = vld [vmem:[#allocation99_spill] sm:$0xff]  ;;  %v13657_v10 = vld [vmem:[#allocation93_spill] sm:$0xff] }
 0xa76   : > { %v6695_v56 = vmax.f32 %v13641_v43, %v6571_v16 }
 0xa77   : > { %v7252_v15 = vpop.xlane.xlu2 %7251  ;;  %v6766_v5 = vmax.f32 %v6692_v36, %v6694_v45 }
 0xa78   : > { %v6767_v21 = vmax.f32 %v6693_v44, %v6695_v56  ;;  %7400 = vst.msk [vmem:[%s10150_s17 + $0x360] sm:$0xff] %vm7291_vm4, %v7252_v15 }
 0xa79   : > { %v6312_v4 = vpop.f32.mrf.mxu0 }
 0xa7a   : > { %v6803_v58 = vmax.f32 %v6766_v5, %v6767_v21  ;;  %v6401_v13 = vpop.f32.mrf.mxu1  ;;  %v6704_v57 = vmax.f32 %v13650_v35, %v6312_v4 }
 0xa7b   : > { %v6705_v22 = vmax.f32 %v13651_v46, %v6401_v13 }
 0xa7c   : > { %7281 = vmax.xlane.f32.xlu2 %v6803_v58  ;;  %v6485_v27 = vpop.f32.mrf.mxu2 }
 0xa7d   : > { %v6574_v53 = vpop.f32.mrf.mxu3  ;;  %v6698_v47 = vmax.f32 %v13644_v19, %v6485_v27 }
 0xa7e   : > { %v6699_v30 = vmax.f32 %v13645_v42, %v6574_v53 }
 0xa7f   : > { %v7254_v23 = vpop.xlane.xlu0 %7253  ;;  %v6768_v11 = vmax.f32 %v6696_v54, %v6698_v47 }
 0xa80   : > { %v6769_v26 = vmax.f32 %v6697_v3, %v6699_v30  ;;  %7401 = vst.msk [vmem:[%s10150_s17 + $0x368] sm:$0xff] %vm7291_vm4, %v7254_v23 }
 0xa81   : > { %v6314_v17 = vpop.f32.mrf.mxu0 }
 0xa82   : > { %v6804_v37 = vmax.f32 %v6768_v11, %v6769_v26  ;;  %v6403_v41 = vpop.f32.mrf.mxu1  ;;  %v6708_v16 = vmax.f32 %v13654_v18, %v6314_v17 }
 0xa83   : > { %v6709_v36 = vmax.f32 %v13655_v60, %v6403_v41 }
 0xa84   : > { %7283 = vmax.xlane.f32.xlu0 %v6804_v37  ;;  %v6487_v39 = vpop.f32.mrf.mxu2 }
 0xa85   : > { %v6576_v33 = vpop.f32.mrf.mxu3  ;;  %v6702_v14 = vmax.f32 %v13648_v34, %v6487_v39 }
 0xa86   : > { %v6703_v61 = vmax.f32 %v13649_v6, %v6576_v33 }
 0xa87   : > { %v7256_v29 = vpop.xlane.xlu1 %7255  ;;  %v6770_v32 = vmax.f32 %v6700_v25, %v6702_v14 }
 0xa88   : > { %v6771_v59 = vmax.f32 %v6701_v51, %v6703_v61  ;;  %7402 = vst.msk [vmem:[%s10150_s17 + $0x370] sm:$0xff] %vm7291_vm4, %v7256_v29 }
 0xa8a   : > { %v6805_v63 = vmax.f32 %v6770_v32, %v6771_v59 }
 0xa8c   : > { %7285 = vmax.xlane.f32.xlu1 %v6805_v63  ;;  %v6490_v0 = vpop.f32.mrf.mxu2 }
 0xa8d   : > { %v6579_v49 = vpop.f32.mrf.mxu3  ;;  %v6706_v50 = vmax.f32 %v13652_v24, %v6490_v0 }
 0xa8e   : > { %v6707_v9 = vmax.f32 %v13653_v40, %v6579_v49 }
 0xa8f   : > { %v7258_v8 = vpop.xlane.xlu2 %7257  ;;  %v6772_v31 = vmax.f32 %v6704_v57, %v6706_v50 }
 0xa90   : > { %v6773_v20 = vmax.f32 %v6705_v22, %v6707_v9  ;;  %7403 = vst.msk [vmem:[%s10150_s17 + $0x378] sm:$0xff] %vm7291_vm4, %v7258_v8 }
 0xa92   : > { %v6806_v48 = vmax.f32 %v6772_v31, %v6773_v20 }
 0xa94   : > { %7287 = vmax.xlane.f32.xlu2 %v6806_v48  ;;  %v6492_v7 = vpop.f32.mrf.mxu2 }
 0xa95   : > { %v6581_v55 = vpop.f32.mrf.mxu3  ;;  %v6710_v44 = vmax.f32 %v13656_v2, %v6492_v7 }
 0xa96   : > { %v6711_v45 = vmax.f32 %v13657_v10, %v6581_v55 }
 0xa97   : > { %v7260_v43 = vpop.xlane.xlu0 %7259  ;;  %v6774_v56 = vmax.f32 %v6708_v16, %v6710_v44 }
 0xa98   : > { %v6775_v15 = vmax.f32 %v6709_v36, %v6711_v45  ;;  %7404 = vst.msk [vmem:[%s10150_s17 + $0x380] sm:$0xff] %vm7291_vm4, %v7260_v43 }
 0xa9a   : > { %v6807_v5 = vmax.f32 %v6774_v56, %v6775_v15 }
 0xa9c   : > { %7289 = vmax.xlane.f32.xlu0 %v6807_v5 }
 0xa9f   : > { %v7262_v21 = vpop.xlane.xlu1 %7261 }
 0xaa0   : > { %7405 = vst.msk [vmem:[%s10150_s17 + $0x388] sm:$0xff] %vm7291_vm4, %v7262_v21 }
 0xaa7   : > { %v7264_v58 = vpop.xlane.xlu2 %7263 }
 0xaa8   : > { %7406 = vst.msk [vmem:[%s10150_s17 + $0x390] sm:$0xff] %vm7291_vm4, %v7264_v58 }
 0xaaf   : > { %v7266_v27 = vpop.xlane.xlu0 %7265 }
 0xab0   : > { %7407 = vst.msk [vmem:[%s10150_s17 + $0x398] sm:$0xff] %vm7291_vm4, %v7266_v27 }
 0xab7   : > { %v7268_v53 = vpop.xlane.xlu1 %7267 }
 0xab8   : > { %7408 = vst.msk [vmem:[%s10150_s17 + $0x3a0] sm:$0xff] %vm7291_vm4, %v7268_v53 }
 0xabf   : > { %v7270_v52 = vpop.xlane.xlu2 %7269 }
 0xac0   : > { %7409 = vst.msk [vmem:[%s10150_s17 + $0x3a8] sm:$0xff] %vm7291_vm4, %v7270_v52 }
 0xac7   : > { %v7272_v54 = vpop.xlane.xlu0 %7271 }
 0xac8   : > { %7410 = vst.msk [vmem:[%s10150_s17 + $0x3b0] sm:$0xff] %vm7291_vm4, %v7272_v54 }
 0xacf   : > { %v7274_v38 = vpop.xlane.xlu1 %7273 }
 0xad0   : > { %7411 = vst.msk [vmem:[%s10150_s17 + $0x3b8] sm:$0xff] %vm7291_vm4, %v7274_v38 }
 0xad7   : > { %v7276_v3 = vpop.xlane.xlu2 %7275 }
 0xad8   : > { %7412 = vst.msk [vmem:[%s10150_s17 + $0x3c0] sm:$0xff] %vm7291_vm4, %v7276_v3 }
 0xadf   : > { %v7278_v62 = vpop.xlane.xlu0 %7277 }
 0xae0   : > { %7413 = vst.msk [vmem:[%s10150_s17 + $0x3c8] sm:$0xff] %vm7291_vm4, %v7278_v62 }
 0xae7   : > { %v7280_v19 = vpop.xlane.xlu1 %7279 }
 0xae8   : > { %7414 = vst.msk [vmem:[%s10150_s17 + $0x3d0] sm:$0xff] %vm7291_vm4, %v7280_v19 }
 0xaef   : > { %v7282_v47 = vpop.xlane.xlu2 %7281 }
 0xaf0   : > { %7415 = vst.msk [vmem:[%s10150_s17 + $0x3d8] sm:$0xff] %vm7291_vm4, %v7282_v47 }
 0xaf7   : > { %v7284_v42 = vpop.xlane.xlu0 %7283 }
 0xaf8   : > { %7416 = vst.msk [vmem:[%s10150_s17 + $0x3e0] sm:$0xff] %vm7291_vm4, %v7284_v42 }
 0xaff   : > { %v7286_v30 = vpop.xlane.xlu1 %7285 }
 0xb00   : > { %7417 = vst.msk [vmem:[%s10150_s17 + $0x3e8] sm:$0xff] %vm7291_vm4, %v7286_v30 }
 0xb07   : > { %v7288_v1 = vpop.xlane.xlu2 %7287 }
 0xb08   : > { %7418 = vst.msk [vmem:[%s10150_s17 + $0x3f0] sm:$0xff] %vm7291_vm4, %v7288_v1 }
 0xb0f   : > { %v7290_v23 = vpop.xlane.xlu0 %7289 }
 0xb10   : > { %7419 = vst.msk [vmem:[%s10150_s17 + $0x3f8] sm:$0xff] %vm7291_vm4, %v7290_v23 }
 0xb11 PF: > { %s18_s29 = sadd.s32 1, %s8056_s29   ;;  %s13658_s27 = smov %s8052_s28 }
 0xb12   : > { %p15_p5 = scmp.ge.s32.totalorder %s18_s29, 4   ;;  %s13659_s28 = smov %s13661_s30 }
 0xb14   :  { %17 = sbr.rel (!%p15_p5) target bundleno = 2 (0x2), region = 93 }

</bundles_post_ra>
